<compile_context>
chip_gen: v6e
topology: v6e:2x2x1
jax: 0.10.0
libtpu: 0.0.40
codegen_flags: <defaults>
</compile_context>

<pallas_src>
import numpy as np
import jax
import jax.numpy as jnp
from jax import lax
from jax.experimental import pallas as pl
from jax.experimental.pallas import tpu as pltpu

# Small, TPU-friendly shapes consistent with the module's structure.
VOCAB, EMBED, HIDDEN, LAYERS = 512, 128, 128, 2
BATCH, SEQ = 2, 8
BP = 8  # batch padded to the f32 sublane count


# --------------------------- Fused forward kernel ----------------------------
def fused_llm_kernel(ids_ref,                     # (B*T,) int32, SMEM (batch-major)
                     emb_ref,                     # (V, E) f32 embedding table
                     wih0_ref, whh0_ref, b0_ref,  # (E,4H) (H,4H) (1,4H)
                     w1_ref, b1_ref,              # (2H,4H)=[W_ih1^T;W_hh1^T] (1,4H)
                     hinit_ref, cinit_ref,        # (L, BP, H) each, zero-padded
                     wout_ref, bout_ref,          # (H, V) (1, V)
                     logits_ref,                  # (T*BP, V)
                     hn_ref, cn_ref,              # (L, BP, H) each
                     xpad_ref):                   # (T*BP, E) VMEM scratch
    Bp = hn_ref.shape[1]
    H = hn_ref.shape[2]
    T = xpad_ref.shape[0] // Bp
    B = ids_ref.shape[0] // T

    # ---- In-kernel embedding gather into zero-padded, time-major layout ----
    xpad_ref[...] = jnp.zeros_like(xpad_ref)
    for t in range(T):
        for b in range(B):
            tok = ids_ref[b * T + t]                           # SMEM scalar
            xpad_ref[pl.ds(t * Bp + b, 1), :] = emb_ref[pl.ds(tok, 1), :]

    # ---- Layer-0 input projection hoisted over all timesteps (one matmul) ---
    gx0 = (jnp.dot(xpad_ref[...], wih0_ref[...],
                   preferred_element_type=jnp.float32)
           + b0_ref[...])                                      # (T*BP, 4H)

    def lstm_cell(gates, c):
        # Fused i|f sigmoid over a contiguous 2H slice -> fewer EUP pushes.
        sif = jax.nn.sigmoid(gates[:, 0:2 * H])
        i_g = sif[:, 0:H]
        f_g = sif[:, H:2 * H]
        g_g = jnp.tanh(gates[:, 2 * H:3 * H])
        o_g = jax.nn.sigmoid(gates[:, 3 * H:4 * H])
        c_new = f_g * c + i_g * g_g
        h_new = o_g * jnp.tanh(c_new)
        return h_new, c_new

    h0 = hinit_ref[0]
    c0 = cinit_ref[0]
    h1 = hinit_ref[1]
    c1 = cinit_ref[1]

    ys1 = []
    # Wavefront: outer step s computes layer-0 step s and layer-1 step s-1.
    # The two are independent, so their matmul+gate chains can overlap; the
    # dependent chain length drops from 2*T to T+1.
    for s in range(T + 1):
        h0_prev = h0                      # layer-0 output at step s-1
        if s < T:
            gates0 = gx0[s * Bp:(s + 1) * Bp, :] + jnp.dot(
                h0, whh0_ref[...], preferred_element_type=jnp.float32)
            h0, c0 = lstm_cell(gates0, c0)
        if s >= 1:
            inp1 = jnp.concatenate([h0_prev, h1], axis=1)      # (BP, 2H)
            gates1 = (jnp.dot(inp1, w1_ref[...],
                              preferred_element_type=jnp.float32)
                      + b1_ref[...])
            h1, c1 = lstm_cell(gates1, c1)
            ys1.append(h1)

    hn_ref[0] = h0
    hn_ref[1] = h1
    cn_ref[0] = c0
    cn_ref[1] = c1

    # ---- Output projection: one lane-dense (T*BP, V) matmul, 512-wide stores --
    y1 = jnp.concatenate(ys1, axis=0)                          # (T*BP, H)
    logits_ref[...] = (jnp.dot(y1, wout_ref[...],
                               preferred_element_type=jnp.float32)
                       + bout_ref[...])


# --------------------------- Param preparation (once) ------------------------
def prepare_params(params):
    """Pre-transpose / fuse weights once, off the per-call hot path."""
    (w_ih0, w_hh0, b_ih0, b_hh0) = params["lstm"][0]
    (w_ih1, w_hh1, b_ih1, b_hh1) = params["lstm"][1]
    return {
        "emb": params["embedding"],                               # (V, E)
        "wih0_t": jnp.transpose(w_ih0),                           # (E, 4H)
        "whh0_t": jnp.transpose(w_hh0),                           # (H, 4H)
        "b0": (b_ih0 + b_hh0).reshape(1, 4 * HIDDEN),
        "w1_t": jnp.concatenate([jnp.transpose(w_ih1),
                                 jnp.transpose(w_hh1)], axis=0),  # (2H, 4H)
        "b1": (b_ih1 + b_hh1).reshape(1, 4 * HIDDEN),
        "wout_t": jnp.transpose(params["w_out"]),                 # (H, V)
        "bout": params["b_out"].reshape(1, VOCAB),
    }


# ------------------------------- Full forward --------------------------------
@jax.jit
def my_llm_forward(prep, x_ids, hidden):
    h0_all, c0_all = hidden                                  # (L, B, H) each
    B, T = x_ids.shape

    ids_flat = x_ids.reshape(B * T).astype(jnp.int32)        # batch-major flatten
    pad = ((0, 0), (0, BP - B), (0, 0))
    h0_p = jnp.pad(h0_all, pad)                              # (L, BP, H)
    c0_p = jnp.pad(c0_all, pad)

    # Advisory cost estimate (helps XLA schedule the call among neighbors).
    flops = (2 * (T * BP) * EMBED * 4 * HIDDEN               # L0 input proj
             + T * 2 * BP * HIDDEN * 4 * HIDDEN              # L0 recurrence
             + T * 2 * BP * (2 * HIDDEN) * 4 * HIDDEN        # L1 fused proj
             + 2 * (T * BP) * HIDDEN * VOCAB)                # output proj
    transcendentals = LAYERS * T * BP * 5 * HIDDEN
    bytes_accessed = 4 * (VOCAB * EMBED + EMBED * 4 * HIDDEN
                          + HIDDEN * 4 * HIDDEN + 2 * HIDDEN * 4 * HIDDEN
                          + HIDDEN * VOCAB + 2 * 4 * HIDDEN + VOCAB
                          + 4 * LAYERS * BP * HIDDEN + T * BP * VOCAB)

    smem = pl.BlockSpec(memory_space=pltpu.MemorySpace.SMEM)
    vmem = pl.BlockSpec(memory_space=pltpu.MemorySpace.VMEM)
    logits_p, hn_p, cn_p = pl.pallas_call(
        fused_llm_kernel,
        out_shape=(jax.ShapeDtypeStruct((T * BP, VOCAB), jnp.float32),
                   jax.ShapeDtypeStruct((LAYERS, BP, HIDDEN), jnp.float32),
                   jax.ShapeDtypeStruct((LAYERS, BP, HIDDEN), jnp.float32)),
        in_specs=[smem] + [vmem] * 10,
        out_specs=(vmem, vmem, vmem),
        scratch_shapes=[pltpu.VMEM((T * BP, EMBED), jnp.float32)],
        cost_estimate=pl.CostEstimate(flops=flops,
                                      transcendentals=transcendentals,
                                      bytes_accessed=bytes_accessed),
    )(ids_flat, prep["emb"], prep["wih0_t"], prep["whh0_t"], prep["b0"],
      prep["w1_t"], prep["b1"], h0_p, c0_p, prep["wout_t"], prep["bout"])

    logits = jnp.transpose(logits_p.reshape(T, BP, VOCAB)[:, :B, :], (1, 0, 2))
    return logits, (hn_p[:, :B, :], cn_p[:, :B, :])


# ------------------------------ Pure-JAX reference ---------------------------
def lstm_layer_ref(x_tbd, w_ih, w_hh, b_ih, b_hh, h0, c0):
    def step(carry, x_t):
        h, c = carry
        gates = x_t @ w_ih.T + b_ih + h @ w_hh.T + b_hh
        i, f, g, o = jnp.split(gates, 4, axis=-1)
        c = jax.nn.sigmoid(f) * c + jax.nn.sigmoid(i) * jnp.tanh(g)
        h = jax.nn.sigmoid(o) * jnp.tanh(c)
        return (h, c), h
    (hn, cn), ys = lax.scan(step, (h0, c0), x_tbd)
    return ys, hn, cn


def my_llm_forward_ref(params, x_ids, hidden):
    h0_all, c0_all = hidden
    emb = jnp.take(params["embedding"], x_ids, axis=0)
    x = jnp.transpose(emb, (1, 0, 2))
    hns, cns = [], []
    for l in range(LAYERS):
        w_ih, w_hh, b_ih, b_hh = params["lstm"][l]
        x, hn, cn = lstm_layer_ref(x, w_ih, w_hh, b_ih, b_hh,
                                   h0_all[l], c0_all[l])
        hns.append(hn)
        cns.append(cn)
    y = jnp.transpose(x, (1, 0, 2))
    logits = y @ params["w_out"].T + params["b_out"]
    return logits, (jnp.stack(hns), jnp.stack(cns))


# ----------------------------------- Main -------------------------------------
if __name__ == "__main__":
    key = jax.random.PRNGKey(0)
    keys = jax.random.split(key, 16)
    k = 1.0 / float(np.sqrt(HIDDEN))

    def uni(kk, shape):
        return jax.random.uniform(kk, shape, jnp.float32, minval=-k, maxval=k)

    params = {
        "embedding": jax.random.normal(keys[0], (VOCAB, EMBED), jnp.float32),
        "lstm": [
            (uni(keys[1], (4 * HIDDEN, EMBED)),
             uni(keys[2], (4 * HIDDEN, HIDDEN)),
             uni(keys[3], (4 * HIDDEN,)),
             uni(keys[4], (4 * HIDDEN,))),
            (uni(keys[5], (4 * HIDDEN, HIDDEN)),
             uni(keys[6], (4 * HIDDEN, HIDDEN)),
             uni(keys[7], (4 * HIDDEN,)),
             uni(keys[8], (4 * HIDDEN,))),
        ],
        "w_out": uni(keys[9], (VOCAB, HIDDEN)),
        "b_out": uni(keys[10], (VOCAB,)),
    }

    x_ids = jax.random.randint(keys[11], (BATCH, SEQ), 0, VOCAB, dtype=jnp.int32)
    h0 = 0.1 * jax.random.normal(keys[12], (LAYERS, BATCH, HIDDEN), jnp.float32)
    c0 = 0.1 * jax.random.normal(keys[13], (LAYERS, BATCH, HIDDEN), jnp.float32)

    prep = prepare_params(params)
    logits, (hn, cn) = my_llm_forward(prep, x_ids, (h0, c0))
    jax.block_until_ready((logits, hn, cn))

    logits_ref, (hn_ref, cn_ref) = my_llm_forward_ref(params, x_ids, (h0, c0))
    np.testing.assert_allclose(np.asarray(logits), np.asarray(logits_ref),
                               rtol=2e-4, atol=2e-4)
    np.testing.assert_allclose(np.asarray(hn), np.asarray(hn_ref),
                               rtol=2e-4, atol=2e-4)
    np.testing.assert_allclose(np.asarray(cn), np.asarray(cn_ref),
                               rtol=2e-4, atol=2e-4)
    print("KERNEL_OK")
</pallas_src>

<mosaic_0001>
module attributes {stable_mosaic.version = 11 : i64} {
  func.func @fused_llm_kernel(%arg0: memref<16xi32, #tpu.memory_space<smem>>, %arg1: memref<512x128xf32, #tpu.memory_space<vmem>>, %arg2: memref<128x512xf32, #tpu.memory_space<vmem>>, %arg3: memref<128x512xf32, #tpu.memory_space<vmem>>, %arg4: memref<1x512xf32, #tpu.memory_space<vmem>>, %arg5: memref<256x512xf32, #tpu.memory_space<vmem>>, %arg6: memref<1x512xf32, #tpu.memory_space<vmem>>, %arg7: memref<2x8x128xf32, #tpu.memory_space<vmem>>, %arg8: memref<2x8x128xf32, #tpu.memory_space<vmem>>, %arg9: memref<128x512xf32, #tpu.memory_space<vmem>>, %arg10: memref<1x512xf32, #tpu.memory_space<vmem>>, %arg11: memref<64x512xf32, #tpu.memory_space<vmem>>, %arg12: memref<2x8x128xf32, #tpu.memory_space<vmem>>, %arg13: memref<2x8x128xf32, #tpu.memory_space<vmem>>, %arg14: memref<64x128xf32, #tpu.memory_space<vmem>>) attributes {dimension_semantics = [], scalar_prefetch = 0 : i64, scratch_operands = 1 : i64, tpu.core_type = #tpu.core_type<tc>} {
    %cst = arith.constant 0.000000e+00 : f32
    %0 = vector.broadcast %cst : f32 to vector<64x128xf32>
    %c0 = arith.constant 0 : index
    %c0_0 = arith.constant 0 : index
    %1 = vector.load %arg14[%c0, %c0_0] : memref<64x128xf32, #tpu.memory_space<vmem>>, vector<64x128xf32>
    tpu.vector_store %arg14[%c0, %c0_0], %0 {strides = array<i32>} : memref<64x128xf32, #tpu.memory_space<vmem>>, vector<64x128xf32>,
    %c0_1 = arith.constant 0 : index
    %2 = memref.load %arg0[%c0_1] : memref<16xi32, #tpu.memory_space<smem>>
    %3 = arith.index_cast %2 : i32 to index
    %c0_2 = arith.constant 0 : index
    %4 = vector.load %arg1[%3, %c0_2] : memref<512x128xf32, #tpu.memory_space<vmem>>, vector<1x128xf32>
    %c0_3 = arith.constant 0 : index
    %c0_4 = arith.constant 0 : index
    %5 = vector.load %arg14[%c0_3, %c0_4] : memref<64x128xf32, #tpu.memory_space<vmem>>, vector<1x128xf32>
    tpu.vector_store %arg14[%c0_3, %c0_4], %4 {strides = array<i32>} : memref<64x128xf32, #tpu.memory_space<vmem>>, vector<1x128xf32>,
    %c8 = arith.constant 8 : index
    %6 = memref.load %arg0[%c8] : memref<16xi32, #tpu.memory_space<smem>>
    %7 = arith.index_cast %6 : i32 to index
    %c0_5 = arith.constant 0 : index
    %8 = vector.load %arg1[%7, %c0_5] : memref<512x128xf32, #tpu.memory_space<vmem>>, vector<1x128xf32>
    %c1 = arith.constant 1 : index
    %c0_6 = arith.constant 0 : index
    %9 = vector.load %arg14[%c1, %c0_6] : memref<64x128xf32, #tpu.memory_space<vmem>>, vector<1x128xf32>
    tpu.vector_store %arg14[%c1, %c0_6], %8 {strides = array<i32>} : memref<64x128xf32, #tpu.memory_space<vmem>>, vector<1x128xf32>,
    %c1_7 = arith.constant 1 : index
    %10 = memref.load %arg0[%c1_7] : memref<16xi32, #tpu.memory_space<smem>>
    %11 = arith.index_cast %10 : i32 to index
    %c0_8 = arith.constant 0 : index
    %12 = vector.load %arg1[%11, %c0_8] : memref<512x128xf32, #tpu.memory_space<vmem>>, vector<1x128xf32>
    %c8_9 = arith.constant 8 : index
    %c0_10 = arith.constant 0 : index
    %13 = vector.load %arg14[%c8_9, %c0_10] : memref<64x128xf32, #tpu.memory_space<vmem>>, vector<1x128xf32>
    tpu.vector_store %arg14[%c8_9, %c0_10], %12 {strides = array<i32>} : memref<64x128xf32, #tpu.memory_space<vmem>>, vector<1x128xf32>,
    %c9 = arith.constant 9 : index
    %14 = memref.load %arg0[%c9] : memref<16xi32, #tpu.memory_space<smem>>
    %15 = arith.index_cast %14 : i32 to index
    %c0_11 = arith.constant 0 : index
    %16 = vector.load %arg1[%15, %c0_11] : memref<512x128xf32, #tpu.memory_space<vmem>>, vector<1x128xf32>
    %c9_12 = arith.constant 9 : index
    %c0_13 = arith.constant 0 : index
    %17 = vector.load %arg14[%c9_12, %c0_13] : memref<64x128xf32, #tpu.memory_space<vmem>>, vector<1x128xf32>
    tpu.vector_store %arg14[%c9_12, %c0_13], %16 {strides = array<i32>} : memref<64x128xf32, #tpu.memory_space<vmem>>, vector<1x128xf32>,
    %c2 = arith.constant 2 : index
    %18 = memref.load %arg0[%c2] : memref<16xi32, #tpu.memory_space<smem>>
    %19 = arith.index_cast %18 : i32 to index
    %c0_14 = arith.constant 0 : index
    %20 = vector.load %arg1[%19, %c0_14] : memref<512x128xf32, #tpu.memory_space<vmem>>, vector<1x128xf32>
    %c16 = arith.constant 16 : index
    %c0_15 = arith.constant 0 : index
    %21 = vector.load %arg14[%c16, %c0_15] : memref<64x128xf32, #tpu.memory_space<vmem>>, vector<1x128xf32>
    tpu.vector_store %arg14[%c16, %c0_15], %20 {strides = array<i32>} : memref<64x128xf32, #tpu.memory_space<vmem>>, vector<1x128xf32>,
    %c10 = arith.constant 10 : index
    %22 = memref.load %arg0[%c10] : memref<16xi32, #tpu.memory_space<smem>>
    %23 = arith.index_cast %22 : i32 to index
    %c0_16 = arith.constant 0 : index
    %24 = vector.load %arg1[%23, %c0_16] : memref<512x128xf32, #tpu.memory_space<vmem>>, vector<1x128xf32>
    %c17 = arith.constant 17 : index
    %c0_17 = arith.constant 0 : index
    %25 = vector.load %arg14[%c17, %c0_17] : memref<64x128xf32, #tpu.memory_space<vmem>>, vector<1x128xf32>
    tpu.vector_store %arg14[%c17, %c0_17], %24 {strides = array<i32>} : memref<64x128xf32, #tpu.memory_space<vmem>>, vector<1x128xf32>,
    %c3 = arith.constant 3 : index
    %26 = memref.load %arg0[%c3] : memref<16xi32, #tpu.memory_space<smem>>
    %27 = arith.index_cast %26 : i32 to index
    %c0_18 = arith.constant 0 : index
    %28 = vector.load %arg1[%27, %c0_18] : memref<512x128xf32, #tpu.memory_space<vmem>>, vector<1x128xf32>
    %c24 = arith.constant 24 : index
    %c0_19 = arith.constant 0 : index
    %29 = vector.load %arg14[%c24, %c0_19] : memref<64x128xf32, #tpu.memory_space<vmem>>, vector<1x128xf32>
    tpu.vector_store %arg14[%c24, %c0_19], %28 {strides = array<i32>} : memref<64x128xf32, #tpu.memory_space<vmem>>, vector<1x128xf32>,
    %c11 = arith.constant 11 : index
    %30 = memref.load %arg0[%c11] : memref<16xi32, #tpu.memory_space<smem>>
    %31 = arith.index_cast %30 : i32 to index
    %c0_20 = arith.constant 0 : index
    %32 = vector.load %arg1[%31, %c0_20] : memref<512x128xf32, #tpu.memory_space<vmem>>, vector<1x128xf32>
    %c25 = arith.constant 25 : index
    %c0_21 = arith.constant 0 : index
    %33 = vector.load %arg14[%c25, %c0_21] : memref<64x128xf32, #tpu.memory_space<vmem>>, vector<1x128xf32>
    tpu.vector_store %arg14[%c25, %c0_21], %32 {strides = array<i32>} : memref<64x128xf32, #tpu.memory_space<vmem>>, vector<1x128xf32>,
    %c4 = arith.constant 4 : index
    %34 = memref.load %arg0[%c4] : memref<16xi32, #tpu.memory_space<smem>>
    %35 = arith.index_cast %34 : i32 to index
    %c0_22 = arith.constant 0 : index
    %36 = vector.load %arg1[%35, %c0_22] : memref<512x128xf32, #tpu.memory_space<vmem>>, vector<1x128xf32>
    %c32 = arith.constant 32 : index
    %c0_23 = arith.constant 0 : index
    %37 = vector.load %arg14[%c32, %c0_23] : memref<64x128xf32, #tpu.memory_space<vmem>>, vector<1x128xf32>
    tpu.vector_store %arg14[%c32, %c0_23], %36 {strides = array<i32>} : memref<64x128xf32, #tpu.memory_space<vmem>>, vector<1x128xf32>,
    %c12 = arith.constant 12 : index
    %38 = memref.load %arg0[%c12] : memref<16xi32, #tpu.memory_space<smem>>
    %39 = arith.index_cast %38 : i32 to index
    %c0_24 = arith.constant 0 : index
    %40 = vector.load %arg1[%39, %c0_24] : memref<512x128xf32, #tpu.memory_space<vmem>>, vector<1x128xf32>
    %c33 = arith.constant 33 : index
    %c0_25 = arith.constant 0 : index
    %41 = vector.load %arg14[%c33, %c0_25] : memref<64x128xf32, #tpu.memory_space<vmem>>, vector<1x128xf32>
    tpu.vector_store %arg14[%c33, %c0_25], %40 {strides = array<i32>} : memref<64x128xf32, #tpu.memory_space<vmem>>, vector<1x128xf32>,
    %c5 = arith.constant 5 : index
    %42 = memref.load %arg0[%c5] : memref<16xi32, #tpu.memory_space<smem>>
    %43 = arith.index_cast %42 : i32 to index
    %c0_26 = arith.constant 0 : index
    %44 = vector.load %arg1[%43, %c0_26] : memref<512x128xf32, #tpu.memory_space<vmem>>, vector<1x128xf32>
    %c40 = arith.constant 40 : index
    %c0_27 = arith.constant 0 : index
    %45 = vector.load %arg14[%c40, %c0_27] : memref<64x128xf32, #tpu.memory_space<vmem>>, vector<1x128xf32>
    tpu.vector_store %arg14[%c40, %c0_27], %44 {strides = array<i32>} : memref<64x128xf32, #tpu.memory_space<vmem>>, vector<1x128xf32>,
    %c13 = arith.constant 13 : index
    %46 = memref.load %arg0[%c13] : memref<16xi32, #tpu.memory_space<smem>>
    %47 = arith.index_cast %46 : i32 to index
    %c0_28 = arith.constant 0 : index
    %48 = vector.load %arg1[%47, %c0_28] : memref<512x128xf32, #tpu.memory_space<vmem>>, vector<1x128xf32>
    %c41 = arith.constant 41 : index
    %c0_29 = arith.constant 0 : index
    %49 = vector.load %arg14[%c41, %c0_29] : memref<64x128xf32, #tpu.memory_space<vmem>>, vector<1x128xf32>
    tpu.vector_store %arg14[%c41, %c0_29], %48 {strides = array<i32>} : memref<64x128xf32, #tpu.memory_space<vmem>>, vector<1x128xf32>,
    %c6 = arith.constant 6 : index
    %50 = memref.load %arg0[%c6] : memref<16xi32, #tpu.memory_space<smem>>
    %51 = arith.index_cast %50 : i32 to index
    %c0_30 = arith.constant 0 : index
    %52 = vector.load %arg1[%51, %c0_30] : memref<512x128xf32, #tpu.memory_space<vmem>>, vector<1x128xf32>
    %c48 = arith.constant 48 : index
    %c0_31 = arith.constant 0 : index
    %53 = vector.load %arg14[%c48, %c0_31] : memref<64x128xf32, #tpu.memory_space<vmem>>, vector<1x128xf32>
    tpu.vector_store %arg14[%c48, %c0_31], %52 {strides = array<i32>} : memref<64x128xf32, #tpu.memory_space<vmem>>, vector<1x128xf32>,
    %c14 = arith.constant 14 : index
    %54 = memref.load %arg0[%c14] : memref<16xi32, #tpu.memory_space<smem>>
    %55 = arith.index_cast %54 : i32 to index
    %c0_32 = arith.constant 0 : index
    %56 = vector.load %arg1[%55, %c0_32] : memref<512x128xf32, #tpu.memory_space<vmem>>, vector<1x128xf32>
    %c49 = arith.constant 49 : index
    %c0_33 = arith.constant 0 : index
    %57 = vector.load %arg14[%c49, %c0_33] : memref<64x128xf32, #tpu.memory_space<vmem>>, vector<1x128xf32>
    tpu.vector_store %arg14[%c49, %c0_33], %56 {strides = array<i32>} : memref<64x128xf32, #tpu.memory_space<vmem>>, vector<1x128xf32>,
    %c7 = arith.constant 7 : index
    %58 = memref.load %arg0[%c7] : memref<16xi32, #tpu.memory_space<smem>>
    %59 = arith.index_cast %58 : i32 to index
    %c0_34 = arith.constant 0 : index
    %60 = vector.load %arg1[%59, %c0_34] : memref<512x128xf32, #tpu.memory_space<vmem>>, vector<1x128xf32>
    %c56 = arith.constant 56 : index
    %c0_35 = arith.constant 0 : index
    %61 = vector.load %arg14[%c56, %c0_35] : memref<64x128xf32, #tpu.memory_space<vmem>>, vector<1x128xf32>
    tpu.vector_store %arg14[%c56, %c0_35], %60 {strides = array<i32>} : memref<64x128xf32, #tpu.memory_space<vmem>>, vector<1x128xf32>,
    %c15 = arith.constant 15 : index
    %62 = memref.load %arg0[%c15] : memref<16xi32, #tpu.memory_space<smem>>
    %63 = arith.index_cast %62 : i32 to index
    %c0_36 = arith.constant 0 : index
    %64 = vector.load %arg1[%63, %c0_36] : memref<512x128xf32, #tpu.memory_space<vmem>>, vector<1x128xf32>
    %c57 = arith.constant 57 : index
    %c0_37 = arith.constant 0 : index
    %65 = vector.load %arg14[%c57, %c0_37] : memref<64x128xf32, #tpu.memory_space<vmem>>, vector<1x128xf32>
    tpu.vector_store %arg14[%c57, %c0_37], %64 {strides = array<i32>} : memref<64x128xf32, #tpu.memory_space<vmem>>, vector<1x128xf32>,
    %c0_38 = arith.constant 0 : index
    %c0_39 = arith.constant 0 : index
    %66 = vector.load %arg14[%c0_38, %c0_39] : memref<64x128xf32, #tpu.memory_space<vmem>>, vector<64x128xf32>
    %c0_40 = arith.constant 0 : index
    %c0_41 = arith.constant 0 : index
    %67 = vector.load %arg2[%c0_40, %c0_41] : memref<128x512xf32, #tpu.memory_space<vmem>>, vector<128x512xf32>
    %cst_42 = arith.constant dense<0.000000e+00> : vector<64x512xf32>
    %68 = tpu.matmul %66, %67, %cst_42 {dimension_numbers = #tpu.dot_dimension_numbers<[1], [0], [0], [1], [0, 0, 1, 1], [], []>} : vector<64x128xf32>, vector<128x512xf32>, vector<64x512xf32> -> vector<64x512xf32>
    %c0_43 = arith.constant 0 : index
    %c0_44 = arith.constant 0 : index
    %69 = vector.load %arg4[%c0_43, %c0_44] : memref<1x512xf32, #tpu.memory_space<vmem>>, vector<1x512xf32>
    %70 = vector.broadcast %69 : vector<1x512xf32> to vector<64x512xf32>
    %71 = arith.addf %68, %70 : vector<64x512xf32>
    %c0_45 = arith.constant 0 : index
    %c0_46 = arith.constant 0 : index
    %c0_47 = arith.constant 0 : index
    %72 = vector.load %arg7[%c0_45, %c0_46, %c0_47] : memref<2x8x128xf32, #tpu.memory_space<vmem>>, vector<1x8x128xf32>
    %73 = vector.shape_cast %72 : vector<1x8x128xf32> to vector<8x128xf32>
    %c0_48 = arith.constant 0 : index
    %c0_49 = arith.constant 0 : index
    %c0_50 = arith.constant 0 : index
    %74 = vector.load %arg8[%c0_48, %c0_49, %c0_50] : memref<2x8x128xf32, #tpu.memory_space<vmem>>, vector<1x8x128xf32>
    %75 = vector.shape_cast %74 : vector<1x8x128xf32> to vector<8x128xf32>
    %c1_51 = arith.constant 1 : index
    %c0_52 = arith.constant 0 : index
    %c0_53 = arith.constant 0 : index
    %76 = vector.load %arg7[%c1_51, %c0_52, %c0_53] : memref<2x8x128xf32, #tpu.memory_space<vmem>>, vector<1x8x128xf32>
    %77 = vector.shape_cast %76 : vector<1x8x128xf32> to vector<8x128xf32>
    %c1_54 = arith.constant 1 : index
    %c0_55 = arith.constant 0 : index
    %c0_56 = arith.constant 0 : index
    %78 = vector.load %arg8[%c1_54, %c0_55, %c0_56] : memref<2x8x128xf32, #tpu.memory_space<vmem>>, vector<1x8x128xf32>
    %79 = vector.shape_cast %78 : vector<1x8x128xf32> to vector<8x128xf32>
    %80 = vector.extract_strided_slice %71 {offsets = [0, 0], sizes = [8, 512], strides = [1, 1]} : vector<64x512xf32> to vector<8x512xf32>
    %c0_57 = arith.constant 0 : index
    %c0_58 = arith.constant 0 : index
    %81 = vector.load %arg3[%c0_57, %c0_58] : memref<128x512xf32, #tpu.memory_space<vmem>>, vector<128x512xf32>
    %cst_59 = arith.constant dense<0.000000e+00> : vector<8x512xf32>
    %82 = tpu.matmul %73, %81, %cst_59 {dimension_numbers = #tpu.dot_dimension_numbers<[1], [0], [0], [1], [0, 0, 1, 1], [], []>} : vector<8x128xf32>, vector<128x512xf32>, vector<8x512xf32> -> vector<8x512xf32>
    %83 = arith.addf %80, %82 : vector<8x512xf32>
    %84 = vector.extract_strided_slice %83 {offsets = [0, 0], sizes = [8, 256], strides = [1, 1]} : vector<8x512xf32> to vector<8x256xf32>
    %85 = arith.negf %84 : vector<8x256xf32>
    %86 = math.exp %85 : vector<8x256xf32>
    %cst_60 = arith.constant 1.000000e+00 : f32
    %87 = vector.broadcast %cst_60 : f32 to vector<8x256xf32>
    %88 = arith.addf %87, %86 : vector<8x256xf32>
    %89 = arith.divf %87, %88 : vector<8x256xf32>
    %90 = vector.extract_strided_slice %89 {offsets = [0, 0], sizes = [8, 128], strides = [1, 1]} : vector<8x256xf32> to vector<8x128xf32>
    %91 = vector.extract_strided_slice %89 {offsets = [0, 128], sizes = [8, 128], strides = [1, 1]} : vector<8x256xf32> to vector<8x128xf32>
    %92 = vector.extract_strided_slice %83 {offsets = [0, 256], sizes = [8, 128], strides = [1, 1]} : vector<8x512xf32> to vector<8x128xf32>
    %93 = math.tanh %92 : vector<8x128xf32>
    %94 = vector.extract_strided_slice %83 {offsets = [0, 384], sizes = [8, 128], strides = [1, 1]} : vector<8x512xf32> to vector<8x128xf32>
    %95 = arith.negf %94 : vector<8x128xf32>
    %96 = math.exp %95 : vector<8x128xf32>
    %cst_61 = arith.constant 1.000000e+00 : f32
    %97 = vector.broadcast %cst_61 : f32 to vector<8x128xf32>
    %98 = arith.addf %97, %96 : vector<8x128xf32>
    %99 = arith.divf %97, %98 : vector<8x128xf32>
    %100 = arith.mulf %91, %75 : vector<8x128xf32>
    %101 = arith.mulf %90, %93 : vector<8x128xf32>
    %102 = arith.addf %100, %101 : vector<8x128xf32>
    %103 = math.tanh %102 : vector<8x128xf32>
    %104 = arith.mulf %99, %103 : vector<8x128xf32>
    %105 = vector.extract_strided_slice %71 {offsets = [8, 0], sizes = [8, 512], strides = [1, 1]} : vector<64x512xf32> to vector<8x512xf32>
    %c0_62 = arith.constant 0 : index
    %c0_63 = arith.constant 0 : index
    %106 = vector.load %arg3[%c0_62, %c0_63] : memref<128x512xf32, #tpu.memory_space<vmem>>, vector<128x512xf32>
    %cst_64 = arith.constant dense<0.000000e+00> : vector<8x512xf32>
    %107 = tpu.matmul %104, %106, %cst_64 {dimension_numbers = #tpu.dot_dimension_numbers<[1], [0], [0], [1], [0, 0, 1, 1], [], []>} : vector<8x128xf32>, vector<128x512xf32>, vector<8x512xf32> -> vector<8x512xf32>
    %108 = arith.addf %105, %107 : vector<8x512xf32>
    %109 = vector.extract_strided_slice %108 {offsets = [0, 0], sizes = [8, 256], strides = [1, 1]} : vector<8x512xf32> to vector<8x256xf32>
    %110 = arith.negf %109 : vector<8x256xf32>
    %111 = math.exp %110 : vector<8x256xf32>
    %cst_65 = arith.constant 1.000000e+00 : f32
    %112 = vector.broadcast %cst_65 : f32 to vector<8x256xf32>
    %113 = arith.addf %112, %111 : vector<8x256xf32>
    %114 = arith.divf %112, %113 : vector<8x256xf32>
    %115 = vector.extract_strided_slice %114 {offsets = [0, 0], sizes = [8, 128], strides = [1, 1]} : vector<8x256xf32> to vector<8x128xf32>
    %116 = vector.extract_strided_slice %114 {offsets = [0, 128], sizes = [8, 128], strides = [1, 1]} : vector<8x256xf32> to vector<8x128xf32>
    %117 = vector.extract_strided_slice %108 {offsets = [0, 256], sizes = [8, 128], strides = [1, 1]} : vector<8x512xf32> to vector<8x128xf32>
    %118 = math.tanh %117 : vector<8x128xf32>
    %119 = vector.extract_strided_slice %108 {offsets = [0, 384], sizes = [8, 128], strides = [1, 1]} : vector<8x512xf32> to vector<8x128xf32>
    %120 = arith.negf %119 : vector<8x128xf32>
    %121 = math.exp %120 : vector<8x128xf32>
    %cst_66 = arith.constant 1.000000e+00 : f32
    %122 = vector.broadcast %cst_66 : f32 to vector<8x128xf32>
    %123 = arith.addf %122, %121 : vector<8x128xf32>
    %124 = arith.divf %122, %123 : vector<8x128xf32>
    %125 = arith.mulf %116, %102 : vector<8x128xf32>
    %126 = arith.mulf %115, %118 : vector<8x128xf32>
    %127 = arith.addf %125, %126 : vector<8x128xf32>
    %128 = math.tanh %127 : vector<8x128xf32>
    %129 = arith.mulf %124, %128 : vector<8x128xf32>
    %130 = tpu.concatenate %104, %77 in 1 : vector<8x128xf32>, vector<8x128xf32> -> vector<8x256xf32>
    %c0_67 = arith.constant 0 : index
    %c0_68 = arith.constant 0 : index
    %131 = vector.load %arg5[%c0_67, %c0_68] : memref<256x512xf32, #tpu.memory_space<vmem>>, vector<256x512xf32>
    %cst_69 = arith.constant dense<0.000000e+00> : vector<8x512xf32>
    %132 = tpu.matmul %130, %131, %cst_69 {dimension_numbers = #tpu.dot_dimension_numbers<[1], [0], [0], [1], [0, 0, 1, 1], [], []>} : vector<8x256xf32>, vector<256x512xf32>, vector<8x512xf32> -> vector<8x512xf32>
    %c0_70 = arith.constant 0 : index
    %c0_71 = arith.constant 0 : index
    %133 = vector.load %arg6[%c0_70, %c0_71] : memref<1x512xf32, #tpu.memory_space<vmem>>, vector<1x512xf32>
    %134 = vector.broadcast %133 : vector<1x512xf32> to vector<8x512xf32>
    %135 = arith.addf %132, %134 : vector<8x512xf32>
    %136 = vector.extract_strided_slice %135 {offsets = [0, 0], sizes = [8, 256], strides = [1, 1]} : vector<8x512xf32> to vector<8x256xf32>
    %137 = arith.negf %136 : vector<8x256xf32>
    %138 = math.exp %137 : vector<8x256xf32>
    %cst_72 = arith.constant 1.000000e+00 : f32
    %139 = vector.broadcast %cst_72 : f32 to vector<8x256xf32>
    %140 = arith.addf %139, %138 : vector<8x256xf32>
    %141 = arith.divf %139, %140 : vector<8x256xf32>
    %142 = vector.extract_strided_slice %141 {offsets = [0, 0], sizes = [8, 128], strides = [1, 1]} : vector<8x256xf32> to vector<8x128xf32>
    %143 = vector.extract_strided_slice %141 {offsets = [0, 128], sizes = [8, 128], strides = [1, 1]} : vector<8x256xf32> to vector<8x128xf32>
    %144 = vector.extract_strided_slice %135 {offsets = [0, 256], sizes = [8, 128], strides = [1, 1]} : vector<8x512xf32> to vector<8x128xf32>
    %145 = math.tanh %144 : vector<8x128xf32>
    %146 = vector.extract_strided_slice %135 {offsets = [0, 384], sizes = [8, 128], strides = [1, 1]} : vector<8x512xf32> to vector<8x128xf32>
    %147 = arith.negf %146 : vector<8x128xf32>
    %148 = math.exp %147 : vector<8x128xf32>
    %cst_73 = arith.constant 1.000000e+00 : f32
    %149 = vector.broadcast %cst_73 : f32 to vector<8x128xf32>
    %150 = arith.addf %149, %148 : vector<8x128xf32>
    %151 = arith.divf %149, %150 : vector<8x128xf32>
    %152 = arith.mulf %143, %79 : vector<8x128xf32>
    %153 = arith.mulf %142, %145 : vector<8x128xf32>
    %154 = arith.addf %152, %153 : vector<8x128xf32>
    %155 = math.tanh %154 : vector<8x128xf32>
    %156 = arith.mulf %151, %155 : vector<8x128xf32>
    %157 = vector.extract_strided_slice %71 {offsets = [16, 0], sizes = [8, 512], strides = [1, 1]} : vector<64x512xf32> to vector<8x512xf32>
    %c0_74 = arith.constant 0 : index
    %c0_75 = arith.constant 0 : index
    %158 = vector.load %arg3[%c0_74, %c0_75] : memref<128x512xf32, #tpu.memory_space<vmem>>, vector<128x512xf32>
    %cst_76 = arith.constant dense<0.000000e+00> : vector<8x512xf32>
    %159 = tpu.matmul %129, %158, %cst_76 {dimension_numbers = #tpu.dot_dimension_numbers<[1], [0], [0], [1], [0, 0, 1, 1], [], []>} : vector<8x128xf32>, vector<128x512xf32>, vector<8x512xf32> -> vector<8x512xf32>
    %160 = arith.addf %157, %159 : vector<8x512xf32>
    %161 = vector.extract_strided_slice %160 {offsets = [0, 0], sizes = [8, 256], strides = [1, 1]} : vector<8x512xf32> to vector<8x256xf32>
    %162 = arith.negf %161 : vector<8x256xf32>
    %163 = math.exp %162 : vector<8x256xf32>
    %cst_77 = arith.constant 1.000000e+00 : f32
    %164 = vector.broadcast %cst_77 : f32 to vector<8x256xf32>
    %165 = arith.addf %164, %163 : vector<8x256xf32>
    %166 = arith.divf %164, %165 : vector<8x256xf32>
    %167 = vector.extract_strided_slice %166 {offsets = [0, 0], sizes = [8, 128], strides = [1, 1]} : vector<8x256xf32> to vector<8x128xf32>
    %168 = vector.extract_strided_slice %166 {offsets = [0, 128], sizes = [8, 128], strides = [1, 1]} : vector<8x256xf32> to vector<8x128xf32>
    %169 = vector.extract_strided_slice %160 {offsets = [0, 256], sizes = [8, 128], strides = [1, 1]} : vector<8x512xf32> to vector<8x128xf32>
    %170 = math.tanh %169 : vector<8x128xf32>
    %171 = vector.extract_strided_slice %160 {offsets = [0, 384], sizes = [8, 128], strides = [1, 1]} : vector<8x512xf32> to vector<8x128xf32>
    %172 = arith.negf %171 : vector<8x128xf32>
    %173 = math.exp %172 : vector<8x128xf32>
    %cst_78 = arith.constant 1.000000e+00 : f32
    %174 = vector.broadcast %cst_78 : f32 to vector<8x128xf32>
    %175 = arith.addf %174, %173 : vector<8x128xf32>
    %176 = arith.divf %174, %175 : vector<8x128xf32>
    %177 = arith.mulf %168, %127 : vector<8x128xf32>
    %178 = arith.mulf %167, %170 : vector<8x128xf32>
    %179 = arith.addf %177, %178 : vector<8x128xf32>
    %180 = math.tanh %179 : vector<8x128xf32>
    %181 = arith.mulf %176, %180 : vector<8x128xf32>
    %182 = tpu.concatenate %129, %156 in 1 : vector<8x128xf32>, vector<8x128xf32> -> vector<8x256xf32>
    %c0_79 = arith.constant 0 : index
    %c0_80 = arith.constant 0 : index
    %183 = vector.load %arg5[%c0_79, %c0_80] : memref<256x512xf32, #tpu.memory_space<vmem>>, vector<256x512xf32>
    %cst_81 = arith.constant dense<0.000000e+00> : vector<8x512xf32>
    %184 = tpu.matmul %182, %183, %cst_81 {dimension_numbers = #tpu.dot_dimension_numbers<[1], [0], [0], [1], [0, 0, 1, 1], [], []>} : vector<8x256xf32>, vector<256x512xf32>, vector<8x512xf32> -> vector<8x512xf32>
    %c0_82 = arith.constant 0 : index
    %c0_83 = arith.constant 0 : index
    %185 = vector.load %arg6[%c0_82, %c0_83] : memref<1x512xf32, #tpu.memory_space<vmem>>, vector<1x512xf32>
    %186 = vector.broadcast %185 : vector<1x512xf32> to vector<8x512xf32>
    %187 = arith.addf %184, %186 : vector<8x512xf32>
    %188 = vector.extract_strided_slice %187 {offsets = [0, 0], sizes = [8, 256], strides = [1, 1]} : vector<8x512xf32> to vector<8x256xf32>
    %189 = arith.negf %188 : vector<8x256xf32>
    %190 = math.exp %189 : vector<8x256xf32>
    %cst_84 = arith.constant 1.000000e+00 : f32
    %191 = vector.broadcast %cst_84 : f32 to vector<8x256xf32>
    %192 = arith.addf %191, %190 : vector<8x256xf32>
    %193 = arith.divf %191, %192 : vector<8x256xf32>
    %194 = vector.extract_strided_slice %193 {offsets = [0, 0], sizes = [8, 128], strides = [1, 1]} : vector<8x256xf32> to vector<8x128xf32>
    %195 = vector.extract_strided_slice %193 {offsets = [0, 128], sizes = [8, 128], strides = [1, 1]} : vector<8x256xf32> to vector<8x128xf32>
    %196 = vector.extract_strided_slice %187 {offsets = [0, 256], sizes = [8, 128], strides = [1, 1]} : vector<8x512xf32> to vector<8x128xf32>
    %197 = math.tanh %196 : vector<8x128xf32>
    %198 = vector.extract_strided_slice %187 {offsets = [0, 384], sizes = [8, 128], strides = [1, 1]} : vector<8x512xf32> to vector<8x128xf32>
    %199 = arith.negf %198 : vector<8x128xf32>
    %200 = math.exp %199 : vector<8x128xf32>
    %cst_85 = arith.constant 1.000000e+00 : f32
    %201 = vector.broadcast %cst_85 : f32 to vector<8x128xf32>
    %202 = arith.addf %201, %200 : vector<8x128xf32>
    %203 = arith.divf %201, %202 : vector<8x128xf32>
    %204 = arith.mulf %195, %154 : vector<8x128xf32>
    %205 = arith.mulf %194, %197 : vector<8x128xf32>
    %206 = arith.addf %204, %205 : vector<8x128xf32>
    %207 = math.tanh %206 : vector<8x128xf32>
    %208 = arith.mulf %203, %207 : vector<8x128xf32>
    %209 = vector.extract_strided_slice %71 {offsets = [24, 0], sizes = [8, 512], strides = [1, 1]} : vector<64x512xf32> to vector<8x512xf32>
    %c0_86 = arith.constant 0 : index
    %c0_87 = arith.constant 0 : index
    %210 = vector.load %arg3[%c0_86, %c0_87] : memref<128x512xf32, #tpu.memory_space<vmem>>, vector<128x512xf32>
    %cst_88 = arith.constant dense<0.000000e+00> : vector<8x512xf32>
    %211 = tpu.matmul %181, %210, %cst_88 {dimension_numbers = #tpu.dot_dimension_numbers<[1], [0], [0], [1], [0, 0, 1, 1], [], []>} : vector<8x128xf32>, vector<128x512xf32>, vector<8x512xf32> -> vector<8x512xf32>
    %212 = arith.addf %209, %211 : vector<8x512xf32>
    %213 = vector.extract_strided_slice %212 {offsets = [0, 0], sizes = [8, 256], strides = [1, 1]} : vector<8x512xf32> to vector<8x256xf32>
    %214 = arith.negf %213 : vector<8x256xf32>
    %215 = math.exp %214 : vector<8x256xf32>
    %cst_89 = arith.constant 1.000000e+00 : f32
    %216 = vector.broadcast %cst_89 : f32 to vector<8x256xf32>
    %217 = arith.addf %216, %215 : vector<8x256xf32>
    %218 = arith.divf %216, %217 : vector<8x256xf32>
    %219 = vector.extract_strided_slice %218 {offsets = [0, 0], sizes = [8, 128], strides = [1, 1]} : vector<8x256xf32> to vector<8x128xf32>
    %220 = vector.extract_strided_slice %218 {offsets = [0, 128], sizes = [8, 128], strides = [1, 1]} : vector<8x256xf32> to vector<8x128xf32>
    %221 = vector.extract_strided_slice %212 {offsets = [0, 256], sizes = [8, 128], strides = [1, 1]} : vector<8x512xf32> to vector<8x128xf32>
    %222 = math.tanh %221 : vector<8x128xf32>
    %223 = vector.extract_strided_slice %212 {offsets = [0, 384], sizes = [8, 128], strides = [1, 1]} : vector<8x512xf32> to vector<8x128xf32>
    %224 = arith.negf %223 : vector<8x128xf32>
    %225 = math.exp %224 : vector<8x128xf32>
    %cst_90 = arith.constant 1.000000e+00 : f32
    %226 = vector.broadcast %cst_90 : f32 to vector<8x128xf32>
    %227 = arith.addf %226, %225 : vector<8x128xf32>
    %228 = arith.divf %226, %227 : vector<8x128xf32>
    %229 = arith.mulf %220, %179 : vector<8x128xf32>
    %230 = arith.mulf %219, %222 : vector<8x128xf32>
    %231 = arith.addf %229, %230 : vector<8x128xf32>
    %232 = math.tanh %231 : vector<8x128xf32>
    %233 = arith.mulf %228, %232 : vector<8x128xf32>
    %234 = tpu.concatenate %181, %208 in 1 : vector<8x128xf32>, vector<8x128xf32> -> vector<8x256xf32>
    %c0_91 = arith.constant 0 : index
    %c0_92 = arith.constant 0 : index
    %235 = vector.load %arg5[%c0_91, %c0_92] : memref<256x512xf32, #tpu.memory_space<vmem>>, vector<256x512xf32>
    %cst_93 = arith.constant dense<0.000000e+00> : vector<8x512xf32>
    %236 = tpu.matmul %234, %235, %cst_93 {dimension_numbers = #tpu.dot_dimension_numbers<[1], [0], [0], [1], [0, 0, 1, 1], [], []>} : vector<8x256xf32>, vector<256x512xf32>, vector<8x512xf32> -> vector<8x512xf32>
    %c0_94 = arith.constant 0 : index
    %c0_95 = arith.constant 0 : index
    %237 = vector.load %arg6[%c0_94, %c0_95] : memref<1x512xf32, #tpu.memory_space<vmem>>, vector<1x512xf32>
    %238 = vector.broadcast %237 : vector<1x512xf32> to vector<8x512xf32>
    %239 = arith.addf %236, %238 : vector<8x512xf32>
    %240 = vector.extract_strided_slice %239 {offsets = [0, 0], sizes = [8, 256], strides = [1, 1]} : vector<8x512xf32> to vector<8x256xf32>
    %241 = arith.negf %240 : vector<8x256xf32>
    %242 = math.exp %241 : vector<8x256xf32>
    %cst_96 = arith.constant 1.000000e+00 : f32
    %243 = vector.broadcast %cst_96 : f32 to vector<8x256xf32>
    %244 = arith.addf %243, %242 : vector<8x256xf32>
    %245 = arith.divf %243, %244 : vector<8x256xf32>
    %246 = vector.extract_strided_slice %245 {offsets = [0, 0], sizes = [8, 128], strides = [1, 1]} : vector<8x256xf32> to vector<8x128xf32>
    %247 = vector.extract_strided_slice %245 {offsets = [0, 128], sizes = [8, 128], strides = [1, 1]} : vector<8x256xf32> to vector<8x128xf32>
    %248 = vector.extract_strided_slice %239 {offsets = [0, 256], sizes = [8, 128], strides = [1, 1]} : vector<8x512xf32> to vector<8x128xf32>
    %249 = math.tanh %248 : vector<8x128xf32>
    %250 = vector.extract_strided_slice %239 {offsets = [0, 384], sizes = [8, 128], strides = [1, 1]} : vector<8x512xf32> to vector<8x128xf32>
    %251 = arith.negf %250 : vector<8x128xf32>
    %252 = math.exp %251 : vector<8x128xf32>
    %cst_97 = arith.constant 1.000000e+00 : f32
    %253 = vector.broadcast %cst_97 : f32 to vector<8x128xf32>
    %254 = arith.addf %253, %252 : vector<8x128xf32>
    %255 = arith.divf %253, %254 : vector<8x128xf32>
    %256 = arith.mulf %247, %206 : vector<8x128xf32>
    %257 = arith.mulf %246, %249 : vector<8x128xf32>
    %258 = arith.addf %256, %257 : vector<8x128xf32>
    %259 = math.tanh %258 : vector<8x128xf32>
    %260 = arith.mulf %255, %259 : vector<8x128xf32>
    %261 = vector.extract_strided_slice %71 {offsets = [32, 0], sizes = [8, 512], strides = [1, 1]} : vector<64x512xf32> to vector<8x512xf32>
    %c0_98 = arith.constant 0 : index
    %c0_99 = arith.constant 0 : index
    %262 = vector.load %arg3[%c0_98, %c0_99] : memref<128x512xf32, #tpu.memory_space<vmem>>, vector<128x512xf32>
    %cst_100 = arith.constant dense<0.000000e+00> : vector<8x512xf32>
    %263 = tpu.matmul %233, %262, %cst_100 {dimension_numbers = #tpu.dot_dimension_numbers<[1], [0], [0], [1], [0, 0, 1, 1], [], []>} : vector<8x128xf32>, vector<128x512xf32>, vector<8x512xf32> -> vector<8x512xf32>
    %264 = arith.addf %261, %263 : vector<8x512xf32>
    %265 = vector.extract_strided_slice %264 {offsets = [0, 0], sizes = [8, 256], strides = [1, 1]} : vector<8x512xf32> to vector<8x256xf32>
    %266 = arith.negf %265 : vector<8x256xf32>
    %267 = math.exp %266 : vector<8x256xf32>
    %cst_101 = arith.constant 1.000000e+00 : f32
    %268 = vector.broadcast %cst_101 : f32 to vector<8x256xf32>
    %269 = arith.addf %268, %267 : vector<8x256xf32>
    %270 = arith.divf %268, %269 : vector<8x256xf32>
    %271 = vector.extract_strided_slice %270 {offsets = [0, 0], sizes = [8, 128], strides = [1, 1]} : vector<8x256xf32> to vector<8x128xf32>
    %272 = vector.extract_strided_slice %270 {offsets = [0, 128], sizes = [8, 128], strides = [1, 1]} : vector<8x256xf32> to vector<8x128xf32>
    %273 = vector.extract_strided_slice %264 {offsets = [0, 256], sizes = [8, 128], strides = [1, 1]} : vector<8x512xf32> to vector<8x128xf32>
    %274 = math.tanh %273 : vector<8x128xf32>
    %275 = vector.extract_strided_slice %264 {offsets = [0, 384], sizes = [8, 128], strides = [1, 1]} : vector<8x512xf32> to vector<8x128xf32>
    %276 = arith.negf %275 : vector<8x128xf32>
    %277 = math.exp %276 : vector<8x128xf32>
    %cst_102 = arith.constant 1.000000e+00 : f32
    %278 = vector.broadcast %cst_102 : f32 to vector<8x128xf32>
    %279 = arith.addf %278, %277 : vector<8x128xf32>
    %280 = arith.divf %278, %279 : vector<8x128xf32>
    %281 = arith.mulf %272, %231 : vector<8x128xf32>
    %282 = arith.mulf %271, %274 : vector<8x128xf32>
    %283 = arith.addf %281, %282 : vector<8x128xf32>
    %284 = math.tanh %283 : vector<8x128xf32>
    %285 = arith.mulf %280, %284 : vector<8x128xf32>
    %286 = tpu.concatenate %233, %260 in 1 : vector<8x128xf32>, vector<8x128xf32> -> vector<8x256xf32>
    %c0_103 = arith.constant 0 : index
    %c0_104 = arith.constant 0 : index
    %287 = vector.load %arg5[%c0_103, %c0_104] : memref<256x512xf32, #tpu.memory_space<vmem>>, vector<256x512xf32>
    %cst_105 = arith.constant dense<0.000000e+00> : vector<8x512xf32>
    %288 = tpu.matmul %286, %287, %cst_105 {dimension_numbers = #tpu.dot_dimension_numbers<[1], [0], [0], [1], [0, 0, 1, 1], [], []>} : vector<8x256xf32>, vector<256x512xf32>, vector<8x512xf32> -> vector<8x512xf32>
    %c0_106 = arith.constant 0 : index
    %c0_107 = arith.constant 0 : index
    %289 = vector.load %arg6[%c0_106, %c0_107] : memref<1x512xf32, #tpu.memory_space<vmem>>, vector<1x512xf32>
    %290 = vector.broadcast %289 : vector<1x512xf32> to vector<8x512xf32>
    %291 = arith.addf %288, %290 : vector<8x512xf32>
    %292 = vector.extract_strided_slice %291 {offsets = [0, 0], sizes = [8, 256], strides = [1, 1]} : vector<8x512xf32> to vector<8x256xf32>
    %293 = arith.negf %292 : vector<8x256xf32>
    %294 = math.exp %293 : vector<8x256xf32>
    %cst_108 = arith.constant 1.000000e+00 : f32
    %295 = vector.broadcast %cst_108 : f32 to vector<8x256xf32>
    %296 = arith.addf %295, %294 : vector<8x256xf32>
    %297 = arith.divf %295, %296 : vector<8x256xf32>
    %298 = vector.extract_strided_slice %297 {offsets = [0, 0], sizes = [8, 128], strides = [1, 1]} : vector<8x256xf32> to vector<8x128xf32>
    %299 = vector.extract_strided_slice %297 {offsets = [0, 128], sizes = [8, 128], strides = [1, 1]} : vector<8x256xf32> to vector<8x128xf32>
    %300 = vector.extract_strided_slice %291 {offsets = [0, 256], sizes = [8, 128], strides = [1, 1]} : vector<8x512xf32> to vector<8x128xf32>
    %301 = math.tanh %300 : vector<8x128xf32>
    %302 = vector.extract_strided_slice %291 {offsets = [0, 384], sizes = [8, 128], strides = [1, 1]} : vector<8x512xf32> to vector<8x128xf32>
    %303 = arith.negf %302 : vector<8x128xf32>
    %304 = math.exp %303 : vector<8x128xf32>
    %cst_109 = arith.constant 1.000000e+00 : f32
    %305 = vector.broadcast %cst_109 : f32 to vector<8x128xf32>
    %306 = arith.addf %305, %304 : vector<8x128xf32>
    %307 = arith.divf %305, %306 : vector<8x128xf32>
    %308 = arith.mulf %299, %258 : vector<8x128xf32>
    %309 = arith.mulf %298, %301 : vector<8x128xf32>
    %310 = arith.addf %308, %309 : vector<8x128xf32>
    %311 = math.tanh %310 : vector<8x128xf32>
    %312 = arith.mulf %307, %311 : vector<8x128xf32>
    %313 = vector.extract_strided_slice %71 {offsets = [40, 0], sizes = [8, 512], strides = [1, 1]} : vector<64x512xf32> to vector<8x512xf32>
    %c0_110 = arith.constant 0 : index
    %c0_111 = arith.constant 0 : index
    %314 = vector.load %arg3[%c0_110, %c0_111] : memref<128x512xf32, #tpu.memory_space<vmem>>, vector<128x512xf32>
    %cst_112 = arith.constant dense<0.000000e+00> : vector<8x512xf32>
    %315 = tpu.matmul %285, %314, %cst_112 {dimension_numbers = #tpu.dot_dimension_numbers<[1], [0], [0], [1], [0, 0, 1, 1], [], []>} : vector<8x128xf32>, vector<128x512xf32>, vector<8x512xf32> -> vector<8x512xf32>
    %316 = arith.addf %313, %315 : vector<8x512xf32>
    %317 = vector.extract_strided_slice %316 {offsets = [0, 0], sizes = [8, 256], strides = [1, 1]} : vector<8x512xf32> to vector<8x256xf32>
    %318 = arith.negf %317 : vector<8x256xf32>
    %319 = math.exp %318 : vector<8x256xf32>
    %cst_113 = arith.constant 1.000000e+00 : f32
    %320 = vector.broadcast %cst_113 : f32 to vector<8x256xf32>
    %321 = arith.addf %320, %319 : vector<8x256xf32>
    %322 = arith.divf %320, %321 : vector<8x256xf32>
    %323 = vector.extract_strided_slice %322 {offsets = [0, 0], sizes = [8, 128], strides = [1, 1]} : vector<8x256xf32> to vector<8x128xf32>
    %324 = vector.extract_strided_slice %322 {offsets = [0, 128], sizes = [8, 128], strides = [1, 1]} : vector<8x256xf32> to vector<8x128xf32>
    %325 = vector.extract_strided_slice %316 {offsets = [0, 256], sizes = [8, 128], strides = [1, 1]} : vector<8x512xf32> to vector<8x128xf32>
    %326 = math.tanh %325 : vector<8x128xf32>
    %327 = vector.extract_strided_slice %316 {offsets = [0, 384], sizes = [8, 128], strides = [1, 1]} : vector<8x512xf32> to vector<8x128xf32>
    %328 = arith.negf %327 : vector<8x128xf32>
    %329 = math.exp %328 : vector<8x128xf32>
    %cst_114 = arith.constant 1.000000e+00 : f32
    %330 = vector.broadcast %cst_114 : f32 to vector<8x128xf32>
    %331 = arith.addf %330, %329 : vector<8x128xf32>
    %332 = arith.divf %330, %331 : vector<8x128xf32>
    %333 = arith.mulf %324, %283 : vector<8x128xf32>
    %334 = arith.mulf %323, %326 : vector<8x128xf32>
    %335 = arith.addf %333, %334 : vector<8x128xf32>
    %336 = math.tanh %335 : vector<8x128xf32>
    %337 = arith.mulf %332, %336 : vector<8x128xf32>
    %338 = tpu.concatenate %285, %312 in 1 : vector<8x128xf32>, vector<8x128xf32> -> vector<8x256xf32>
    %c0_115 = arith.constant 0 : index
    %c0_116 = arith.constant 0 : index
    %339 = vector.load %arg5[%c0_115, %c0_116] : memref<256x512xf32, #tpu.memory_space<vmem>>, vector<256x512xf32>
    %cst_117 = arith.constant dense<0.000000e+00> : vector<8x512xf32>
    %340 = tpu.matmul %338, %339, %cst_117 {dimension_numbers = #tpu.dot_dimension_numbers<[1], [0], [0], [1], [0, 0, 1, 1], [], []>} : vector<8x256xf32>, vector<256x512xf32>, vector<8x512xf32> -> vector<8x512xf32>
    %c0_118 = arith.constant 0 : index
    %c0_119 = arith.constant 0 : index
    %341 = vector.load %arg6[%c0_118, %c0_119] : memref<1x512xf32, #tpu.memory_space<vmem>>, vector<1x512xf32>
    %342 = vector.broadcast %341 : vector<1x512xf32> to vector<8x512xf32>
    %343 = arith.addf %340, %342 : vector<8x512xf32>
    %344 = vector.extract_strided_slice %343 {offsets = [0, 0], sizes = [8, 256], strides = [1, 1]} : vector<8x512xf32> to vector<8x256xf32>
    %345 = arith.negf %344 : vector<8x256xf32>
    %346 = math.exp %345 : vector<8x256xf32>
    %cst_120 = arith.constant 1.000000e+00 : f32
    %347 = vector.broadcast %cst_120 : f32 to vector<8x256xf32>
    %348 = arith.addf %347, %346 : vector<8x256xf32>
    %349 = arith.divf %347, %348 : vector<8x256xf32>
    %350 = vector.extract_strided_slice %349 {offsets = [0, 0], sizes = [8, 128], strides = [1, 1]} : vector<8x256xf32> to vector<8x128xf32>
    %351 = vector.extract_strided_slice %349 {offsets = [0, 128], sizes = [8, 128], strides = [1, 1]} : vector<8x256xf32> to vector<8x128xf32>
    %352 = vector.extract_strided_slice %343 {offsets = [0, 256], sizes = [8, 128], strides = [1, 1]} : vector<8x512xf32> to vector<8x128xf32>
    %353 = math.tanh %352 : vector<8x128xf32>
    %354 = vector.extract_strided_slice %343 {offsets = [0, 384], sizes = [8, 128], strides = [1, 1]} : vector<8x512xf32> to vector<8x128xf32>
    %355 = arith.negf %354 : vector<8x128xf32>
    %356 = math.exp %355 : vector<8x128xf32>
    %cst_121 = arith.constant 1.000000e+00 : f32
    %357 = vector.broadcast %cst_121 : f32 to vector<8x128xf32>
    %358 = arith.addf %357, %356 : vector<8x128xf32>
    %359 = arith.divf %357, %358 : vector<8x128xf32>
    %360 = arith.mulf %351, %310 : vector<8x128xf32>
    %361 = arith.mulf %350, %353 : vector<8x128xf32>
    %362 = arith.addf %360, %361 : vector<8x128xf32>
    %363 = math.tanh %362 : vector<8x128xf32>
    %364 = arith.mulf %359, %363 : vector<8x128xf32>
    %365 = vector.extract_strided_slice %71 {offsets = [48, 0], sizes = [8, 512], strides = [1, 1]} : vector<64x512xf32> to vector<8x512xf32>
    %c0_122 = arith.constant 0 : index
    %c0_123 = arith.constant 0 : index
    %366 = vector.load %arg3[%c0_122, %c0_123] : memref<128x512xf32, #tpu.memory_space<vmem>>, vector<128x512xf32>
    %cst_124 = arith.constant dense<0.000000e+00> : vector<8x512xf32>
    %367 = tpu.matmul %337, %366, %cst_124 {dimension_numbers = #tpu.dot_dimension_numbers<[1], [0], [0], [1], [0, 0, 1, 1], [], []>} : vector<8x128xf32>, vector<128x512xf32>, vector<8x512xf32> -> vector<8x512xf32>
    %368 = arith.addf %365, %367 : vector<8x512xf32>
    %369 = vector.extract_strided_slice %368 {offsets = [0, 0], sizes = [8, 256], strides = [1, 1]} : vector<8x512xf32> to vector<8x256xf32>
    %370 = arith.negf %369 : vector<8x256xf32>
    %371 = math.exp %370 : vector<8x256xf32>
    %cst_125 = arith.constant 1.000000e+00 : f32
    %372 = vector.broadcast %cst_125 : f32 to vector<8x256xf32>
    %373 = arith.addf %372, %371 : vector<8x256xf32>
    %374 = arith.divf %372, %373 : vector<8x256xf32>
    %375 = vector.extract_strided_slice %374 {offsets = [0, 0], sizes = [8, 128], strides = [1, 1]} : vector<8x256xf32> to vector<8x128xf32>
    %376 = vector.extract_strided_slice %374 {offsets = [0, 128], sizes = [8, 128], strides = [1, 1]} : vector<8x256xf32> to vector<8x128xf32>
    %377 = vector.extract_strided_slice %368 {offsets = [0, 256], sizes = [8, 128], strides = [1, 1]} : vector<8x512xf32> to vector<8x128xf32>
    %378 = math.tanh %377 : vector<8x128xf32>
    %379 = vector.extract_strided_slice %368 {offsets = [0, 384], sizes = [8, 128], strides = [1, 1]} : vector<8x512xf32> to vector<8x128xf32>
    %380 = arith.negf %379 : vector<8x128xf32>
    %381 = math.exp %380 : vector<8x128xf32>
    %cst_126 = arith.constant 1.000000e+00 : f32
    %382 = vector.broadcast %cst_126 : f32 to vector<8x128xf32>
    %383 = arith.addf %382, %381 : vector<8x128xf32>
    %384 = arith.divf %382, %383 : vector<8x128xf32>
    %385 = arith.mulf %376, %335 : vector<8x128xf32>
    %386 = arith.mulf %375, %378 : vector<8x128xf32>
    %387 = arith.addf %385, %386 : vector<8x128xf32>
    %388 = math.tanh %387 : vector<8x128xf32>
    %389 = arith.mulf %384, %388 : vector<8x128xf32>
    %390 = tpu.concatenate %337, %364 in 1 : vector<8x128xf32>, vector<8x128xf32> -> vector<8x256xf32>
    %c0_127 = arith.constant 0 : index
    %c0_128 = arith.constant 0 : index
    %391 = vector.load %arg5[%c0_127, %c0_128] : memref<256x512xf32, #tpu.memory_space<vmem>>, vector<256x512xf32>
    %cst_129 = arith.constant dense<0.000000e+00> : vector<8x512xf32>
    %392 = tpu.matmul %390, %391, %cst_129 {dimension_numbers = #tpu.dot_dimension_numbers<[1], [0], [0], [1], [0, 0, 1, 1], [], []>} : vector<8x256xf32>, vector<256x512xf32>, vector<8x512xf32> -> vector<8x512xf32>
    %c0_130 = arith.constant 0 : index
    %c0_131 = arith.constant 0 : index
    %393 = vector.load %arg6[%c0_130, %c0_131] : memref<1x512xf32, #tpu.memory_space<vmem>>, vector<1x512xf32>
    %394 = vector.broadcast %393 : vector<1x512xf32> to vector<8x512xf32>
    %395 = arith.addf %392, %394 : vector<8x512xf32>
    %396 = vector.extract_strided_slice %395 {offsets = [0, 0], sizes = [8, 256], strides = [1, 1]} : vector<8x512xf32> to vector<8x256xf32>
    %397 = arith.negf %396 : vector<8x256xf32>
    %398 = math.exp %397 : vector<8x256xf32>
    %cst_132 = arith.constant 1.000000e+00 : f32
    %399 = vector.broadcast %cst_132 : f32 to vector<8x256xf32>
    %400 = arith.addf %399, %398 : vector<8x256xf32>
    %401 = arith.divf %399, %400 : vector<8x256xf32>
    %402 = vector.extract_strided_slice %401 {offsets = [0, 0], sizes = [8, 128], strides = [1, 1]} : vector<8x256xf32> to vector<8x128xf32>
    %403 = vector.extract_strided_slice %401 {offsets = [0, 128], sizes = [8, 128], strides = [1, 1]} : vector<8x256xf32> to vector<8x128xf32>
    %404 = vector.extract_strided_slice %395 {offsets = [0, 256], sizes = [8, 128], strides = [1, 1]} : vector<8x512xf32> to vector<8x128xf32>
    %405 = math.tanh %404 : vector<8x128xf32>
    %406 = vector.extract_strided_slice %395 {offsets = [0, 384], sizes = [8, 128], strides = [1, 1]} : vector<8x512xf32> to vector<8x128xf32>
    %407 = arith.negf %406 : vector<8x128xf32>
    %408 = math.exp %407 : vector<8x128xf32>
    %cst_133 = arith.constant 1.000000e+00 : f32
    %409 = vector.broadcast %cst_133 : f32 to vector<8x128xf32>
    %410 = arith.addf %409, %408 : vector<8x128xf32>
    %411 = arith.divf %409, %410 : vector<8x128xf32>
    %412 = arith.mulf %403, %362 : vector<8x128xf32>
    %413 = arith.mulf %402, %405 : vector<8x128xf32>
    %414 = arith.addf %412, %413 : vector<8x128xf32>
    %415 = math.tanh %414 : vector<8x128xf32>
    %416 = arith.mulf %411, %415 : vector<8x128xf32>
    %417 = vector.extract_strided_slice %71 {offsets = [56, 0], sizes = [8, 512], strides = [1, 1]} : vector<64x512xf32> to vector<8x512xf32>
    %c0_134 = arith.constant 0 : index
    %c0_135 = arith.constant 0 : index
    %418 = vector.load %arg3[%c0_134, %c0_135] : memref<128x512xf32, #tpu.memory_space<vmem>>, vector<128x512xf32>
    %cst_136 = arith.constant dense<0.000000e+00> : vector<8x512xf32>
    %419 = tpu.matmul %389, %418, %cst_136 {dimension_numbers = #tpu.dot_dimension_numbers<[1], [0], [0], [1], [0, 0, 1, 1], [], []>} : vector<8x128xf32>, vector<128x512xf32>, vector<8x512xf32> -> vector<8x512xf32>
    %420 = arith.addf %417, %419 : vector<8x512xf32>
    %421 = vector.extract_strided_slice %420 {offsets = [0, 0], sizes = [8, 256], strides = [1, 1]} : vector<8x512xf32> to vector<8x256xf32>
    %422 = arith.negf %421 : vector<8x256xf32>
    %423 = math.exp %422 : vector<8x256xf32>
    %cst_137 = arith.constant 1.000000e+00 : f32
    %424 = vector.broadcast %cst_137 : f32 to vector<8x256xf32>
    %425 = arith.addf %424, %423 : vector<8x256xf32>
    %426 = arith.divf %424, %425 : vector<8x256xf32>
    %427 = vector.extract_strided_slice %426 {offsets = [0, 0], sizes = [8, 128], strides = [1, 1]} : vector<8x256xf32> to vector<8x128xf32>
    %428 = vector.extract_strided_slice %426 {offsets = [0, 128], sizes = [8, 128], strides = [1, 1]} : vector<8x256xf32> to vector<8x128xf32>
    %429 = vector.extract_strided_slice %420 {offsets = [0, 256], sizes = [8, 128], strides = [1, 1]} : vector<8x512xf32> to vector<8x128xf32>
    %430 = math.tanh %429 : vector<8x128xf32>
    %431 = vector.extract_strided_slice %420 {offsets = [0, 384], sizes = [8, 128], strides = [1, 1]} : vector<8x512xf32> to vector<8x128xf32>
    %432 = arith.negf %431 : vector<8x128xf32>
    %433 = math.exp %432 : vector<8x128xf32>
    %cst_138 = arith.constant 1.000000e+00 : f32
    %434 = vector.broadcast %cst_138 : f32 to vector<8x128xf32>
    %435 = arith.addf %434, %433 : vector<8x128xf32>
    %436 = arith.divf %434, %435 : vector<8x128xf32>
    %437 = arith.mulf %428, %387 : vector<8x128xf32>
    %438 = arith.mulf %427, %430 : vector<8x128xf32>
    %439 = arith.addf %437, %438 : vector<8x128xf32>
    %440 = math.tanh %439 : vector<8x128xf32>
    %441 = arith.mulf %436, %440 : vector<8x128xf32>
    %442 = tpu.concatenate %389, %416 in 1 : vector<8x128xf32>, vector<8x128xf32> -> vector<8x256xf32>
    %c0_139 = arith.constant 0 : index
    %c0_140 = arith.constant 0 : index
    %443 = vector.load %arg5[%c0_139, %c0_140] : memref<256x512xf32, #tpu.memory_space<vmem>>, vector<256x512xf32>
    %cst_141 = arith.constant dense<0.000000e+00> : vector<8x512xf32>
    %444 = tpu.matmul %442, %443, %cst_141 {dimension_numbers = #tpu.dot_dimension_numbers<[1], [0], [0], [1], [0, 0, 1, 1], [], []>} : vector<8x256xf32>, vector<256x512xf32>, vector<8x512xf32> -> vector<8x512xf32>
    %c0_142 = arith.constant 0 : index
    %c0_143 = arith.constant 0 : index
    %445 = vector.load %arg6[%c0_142, %c0_143] : memref<1x512xf32, #tpu.memory_space<vmem>>, vector<1x512xf32>
    %446 = vector.broadcast %445 : vector<1x512xf32> to vector<8x512xf32>
    %447 = arith.addf %444, %446 : vector<8x512xf32>
    %448 = vector.extract_strided_slice %447 {offsets = [0, 0], sizes = [8, 256], strides = [1, 1]} : vector<8x512xf32> to vector<8x256xf32>
    %449 = arith.negf %448 : vector<8x256xf32>
    %450 = math.exp %449 : vector<8x256xf32>
    %cst_144 = arith.constant 1.000000e+00 : f32
    %451 = vector.broadcast %cst_144 : f32 to vector<8x256xf32>
    %452 = arith.addf %451, %450 : vector<8x256xf32>
    %453 = arith.divf %451, %452 : vector<8x256xf32>
    %454 = vector.extract_strided_slice %453 {offsets = [0, 0], sizes = [8, 128], strides = [1, 1]} : vector<8x256xf32> to vector<8x128xf32>
    %455 = vector.extract_strided_slice %453 {offsets = [0, 128], sizes = [8, 128], strides = [1, 1]} : vector<8x256xf32> to vector<8x128xf32>
    %456 = vector.extract_strided_slice %447 {offsets = [0, 256], sizes = [8, 128], strides = [1, 1]} : vector<8x512xf32> to vector<8x128xf32>
    %457 = math.tanh %456 : vector<8x128xf32>
    %458 = vector.extract_strided_slice %447 {offsets = [0, 384], sizes = [8, 128], strides = [1, 1]} : vector<8x512xf32> to vector<8x128xf32>
    %459 = arith.negf %458 : vector<8x128xf32>
    %460 = math.exp %459 : vector<8x128xf32>
    %cst_145 = arith.constant 1.000000e+00 : f32
    %461 = vector.broadcast %cst_145 : f32 to vector<8x128xf32>
    %462 = arith.addf %461, %460 : vector<8x128xf32>
    %463 = arith.divf %461, %462 : vector<8x128xf32>
    %464 = arith.mulf %455, %414 : vector<8x128xf32>
    %465 = arith.mulf %454, %457 : vector<8x128xf32>
    %466 = arith.addf %464, %465 : vector<8x128xf32>
    %467 = math.tanh %466 : vector<8x128xf32>
    %468 = arith.mulf %463, %467 : vector<8x128xf32>
    %469 = tpu.concatenate %441, %468 in 1 : vector<8x128xf32>, vector<8x128xf32> -> vector<8x256xf32>
    %c0_146 = arith.constant 0 : index
    %c0_147 = arith.constant 0 : index
    %470 = vector.load %arg5[%c0_146, %c0_147] : memref<256x512xf32, #tpu.memory_space<vmem>>, vector<256x512xf32>
    %cst_148 = arith.constant dense<0.000000e+00> : vector<8x512xf32>
    %471 = tpu.matmul %469, %470, %cst_148 {dimension_numbers = #tpu.dot_dimension_numbers<[1], [0], [0], [1], [0, 0, 1, 1], [], []>} : vector<8x256xf32>, vector<256x512xf32>, vector<8x512xf32> -> vector<8x512xf32>
    %c0_149 = arith.constant 0 : index
    %c0_150 = arith.constant 0 : index
    %472 = vector.load %arg6[%c0_149, %c0_150] : memref<1x512xf32, #tpu.memory_space<vmem>>, vector<1x512xf32>
    %473 = vector.broadcast %472 : vector<1x512xf32> to vector<8x512xf32>
    %474 = arith.addf %471, %473 : vector<8x512xf32>
    %475 = vector.extract_strided_slice %474 {offsets = [0, 0], sizes = [8, 256], strides = [1, 1]} : vector<8x512xf32> to vector<8x256xf32>
    %476 = arith.negf %475 : vector<8x256xf32>
    %477 = math.exp %476 : vector<8x256xf32>
    %cst_151 = arith.constant 1.000000e+00 : f32
    %478 = vector.broadcast %cst_151 : f32 to vector<8x256xf32>
    %479 = arith.addf %478, %477 : vector<8x256xf32>
    %480 = arith.divf %478, %479 : vector<8x256xf32>
    %481 = vector.extract_strided_slice %480 {offsets = [0, 0], sizes = [8, 128], strides = [1, 1]} : vector<8x256xf32> to vector<8x128xf32>
    %482 = vector.extract_strided_slice %480 {offsets = [0, 128], sizes = [8, 128], strides = [1, 1]} : vector<8x256xf32> to vector<8x128xf32>
    %483 = vector.extract_strided_slice %474 {offsets = [0, 256], sizes = [8, 128], strides = [1, 1]} : vector<8x512xf32> to vector<8x128xf32>
    %484 = math.tanh %483 : vector<8x128xf32>
    %485 = vector.extract_strided_slice %474 {offsets = [0, 384], sizes = [8, 128], strides = [1, 1]} : vector<8x512xf32> to vector<8x128xf32>
    %486 = arith.negf %485 : vector<8x128xf32>
    %487 = math.exp %486 : vector<8x128xf32>
    %cst_152 = arith.constant 1.000000e+00 : f32
    %488 = vector.broadcast %cst_152 : f32 to vector<8x128xf32>
    %489 = arith.addf %488, %487 : vector<8x128xf32>
    %490 = arith.divf %488, %489 : vector<8x128xf32>
    %491 = arith.mulf %482, %466 : vector<8x128xf32>
    %492 = arith.mulf %481, %484 : vector<8x128xf32>
    %493 = arith.addf %491, %492 : vector<8x128xf32>
    %494 = math.tanh %493 : vector<8x128xf32>
    %495 = arith.mulf %490, %494 : vector<8x128xf32>
    %c0_153 = arith.constant 0 : index
    %c0_154 = arith.constant 0 : index
    %c0_155 = arith.constant 0 : index
    %496 = vector.load %arg12[%c0_153, %c0_154, %c0_155] : memref<2x8x128xf32, #tpu.memory_space<vmem>>, vector<1x8x128xf32>
    %497 = vector.shape_cast %496 : vector<1x8x128xf32> to vector<8x128xf32>
    %498 = vector.shape_cast %441 : vector<8x128xf32> to vector<1x8x128xf32>
    tpu.vector_store %arg12[%c0_153, %c0_154, %c0_155], %498 {strides = array<i32>} : memref<2x8x128xf32, #tpu.memory_space<vmem>>, vector<1x8x128xf32>,
    %c1_156 = arith.constant 1 : index
    %c0_157 = arith.constant 0 : index
    %c0_158 = arith.constant 0 : index
    %499 = vector.load %arg12[%c1_156, %c0_157, %c0_158] : memref<2x8x128xf32, #tpu.memory_space<vmem>>, vector<1x8x128xf32>
    %500 = vector.shape_cast %499 : vector<1x8x128xf32> to vector<8x128xf32>
    %501 = vector.shape_cast %495 : vector<8x128xf32> to vector<1x8x128xf32>
    tpu.vector_store %arg12[%c1_156, %c0_157, %c0_158], %501 {strides = array<i32>} : memref<2x8x128xf32, #tpu.memory_space<vmem>>, vector<1x8x128xf32>,
    %c0_159 = arith.constant 0 : index
    %c0_160 = arith.constant 0 : index
    %c0_161 = arith.constant 0 : index
    %502 = vector.load %arg13[%c0_159, %c0_160, %c0_161] : memref<2x8x128xf32, #tpu.memory_space<vmem>>, vector<1x8x128xf32>
    %503 = vector.shape_cast %502 : vector<1x8x128xf32> to vector<8x128xf32>
    %504 = vector.shape_cast %439 : vector<8x128xf32> to vector<1x8x128xf32>
    tpu.vector_store %arg13[%c0_159, %c0_160, %c0_161], %504 {strides = array<i32>} : memref<2x8x128xf32, #tpu.memory_space<vmem>>, vector<1x8x128xf32>,
    %c1_162 = arith.constant 1 : index
    %c0_163 = arith.constant 0 : index
    %c0_164 = arith.constant 0 : index
    %505 = vector.load %arg13[%c1_162, %c0_163, %c0_164] : memref<2x8x128xf32, #tpu.memory_space<vmem>>, vector<1x8x128xf32>
    %506 = vector.shape_cast %505 : vector<1x8x128xf32> to vector<8x128xf32>
    %507 = vector.shape_cast %493 : vector<8x128xf32> to vector<1x8x128xf32>
    tpu.vector_store %arg13[%c1_162, %c0_163, %c0_164], %507 {strides = array<i32>} : memref<2x8x128xf32, #tpu.memory_space<vmem>>, vector<1x8x128xf32>,
    %508 = tpu.concatenate %156, %208, %260, %312, %364, %416, %468, %495 in 0 : vector<8x128xf32>, vector<8x128xf32>, vector<8x128xf32>, vector<8x128xf32>, vector<8x128xf32>, vector<8x128xf32>, vector<8x128xf32>, vector<8x128xf32> -> vector<64x128xf32>
    %c0_165 = arith.constant 0 : index
    %c0_166 = arith.constant 0 : index
    %509 = vector.load %arg9[%c0_165, %c0_166] : memref<128x512xf32, #tpu.memory_space<vmem>>, vector<128x512xf32>
    %cst_167 = arith.constant dense<0.000000e+00> : vector<64x512xf32>
    %510 = tpu.matmul %508, %509, %cst_167 {dimension_numbers = #tpu.dot_dimension_numbers<[1], [0], [0], [1], [0, 0, 1, 1], [], []>} : vector<64x128xf32>, vector<128x512xf32>, vector<64x512xf32> -> vector<64x512xf32>
    %c0_168 = arith.constant 0 : index
    %c0_169 = arith.constant 0 : index
    %511 = vector.load %arg10[%c0_168, %c0_169] : memref<1x512xf32, #tpu.memory_space<vmem>>, vector<1x512xf32>
    %512 = vector.broadcast %511 : vector<1x512xf32> to vector<64x512xf32>
    %513 = arith.addf %510, %512 : vector<64x512xf32>
    %c0_170 = arith.constant 0 : index
    %c0_171 = arith.constant 0 : index
    %514 = vector.load %arg11[%c0_170, %c0_171] : memref<64x512xf32, #tpu.memory_space<vmem>>, vector<64x512xf32>
    tpu.vector_store %arg11[%c0_170, %c0_171], %513 {strides = array<i32>} : memref<64x512xf32, #tpu.memory_space<vmem>>, vector<64x512xf32>,
    return
  }
}

</mosaic_0001>

<bundles_post_ra>
// kernel: my_llm_forward.1
= control target key start
LH: loop header
LB: loop body
LE: loop exit
PB: predicated region body
PF: predicated region fallthrough
CT: control target
= control target key end

     0   :  { %19 = vsyncpa [#allocation5], 0  ;;  %s8606_s0 = inlined_call_operand.vmem [shape: s32[16], index: 0, kind: input, shape index: {}]   ;;  %s8607_s1 = inlined_call_operand.hbm [shape: f32[512,128], index: 1, kind: input, shape index: {}]   ;;  %s8608_s2 = inlined_call_operand.hbm [shape: f32[128,512], index: 2, kind: input, shape index: {}]   ;;  %s8609_s3 = inlined_call_operand.hbm [shape: f32[128,512], index: 3, kind: input, shape index: {}]   ;;  %s8610_s4 = inlined_call_operand.vmem [shape: f32[1,512], index: 4, kind: input, shape index: {}]   ;;  %s8611_s5 = inlined_call_operand.hbm [shape: f32[256,512], index: 5, kind: input, shape index: {}]   ;;  %s8612_s6 = inlined_call_operand.vmem [shape: f32[1,512], index: 6, kind: input, shape index: {}]   ;;  %s8613_s7 = inlined_call_operand.vmem [shape: f32[2,8,128], index: 7, kind: input, shape index: {}]   ;;  %s8614_s8 = inlined_call_operand.vmem [shape: f32[2,8,128], index: 8, kind: input, shape index: {}]   ;;  %s8615_s9 = inlined_call_operand.hbm [shape: f32[128,512], index: 9, kind: input, shape index: {}]   ;;  %s8616_s10 = inlined_call_operand.vmem [shape: f32[1,512], index: 10, kind: input, shape index: {}]   ;;  %s8617_s11 = inlined_call_operand.vmem [shape: f32[64,512], index: 11, kind: output, shape index: {0}]   ;;  %s8618_s12 = inlined_call_operand.vmem [shape: f32[2,8,128], index: 12, kind: output, shape index: {1}]   ;;  %s8619_s13 = inlined_call_operand.vmem [shape: f32[2,8,128], index: 13, kind: output, shape index: {2}]  }
   0x1   :  { %20 = vsyncpa [#allocation4], 0 }
   0x2   :  { %21 = vsyncpa [#allocation8], 0 }
   0x3   :  { %22 = vsyncpa [#allocation11], 0  ;;  %s4834_s25 = smov [#allocation7]  }
   0x4   :  { %s50_s26 = sshll.u32 %s4834_s25, 4  ;;  %s51_s26 = int_to_ptr.vmem [resolvable:$true] %s50_s26 }
   0x5   :  { %s4722_s27 = scalar_lea.vmem %s51_s26, 8192  ;;  %p4727_p1 = scmp.lt.s32.totalorder %s51_s26, %s51_s26 }
   0x6   :  { %p4723_p0 = scmp.ne.s32.totalorder %s51_s26, %s4722_s27  ;;  %p4728_p2 = scmp.lt.s32.totalorder %s4722_s27, %s4722_s27 }
   0x8   :  { %p4729_p3 = por %p4728_p2, %p4727_p1 }
   0xa   :  { %p4730_p4 = pnand %p4729_p3, %p4723_p0 }
   0xc   :  { %4733 = shalt.err (!%p4730_p4)
}
   0xd   :  { %s4835_s28 = smov 512   ;;  %s4836_s29 = smov 32  }
   0xe   :  { %56 = dma.hbm_to_vmem [thread:$0]  %s8608_s2, 8192, %s51_s26, [#allocation8], %s4835_s28, %s4835_s28, %s4836_s29  }
   0xf   :  { %s4837_s15 = smov [#allocation10]   ;;  %s29_s19 = sshll.u32 %s8606_s0, 4  ;;  %s30_s19 = int_to_ptr.vmem [resolvable:$true] %s29_s19 }
  0x10   :  { %s76_s16 = sshll.u32 %s4837_s15, 4  ;;  %s77_s16 = int_to_ptr.vmem [resolvable:$true] %s76_s16 }
  0x11   :  { %s4742_s20 = scalar_lea.vmem %s77_s16, 16384  ;;  %p4747_p6 = scmp.lt.s32.totalorder %s77_s16, %s77_s16 }
  0x12   :  { %p4743_p5 = scmp.ne.s32.totalorder %s77_s16, %s4742_s20  ;;  %p4748_p7 = scmp.lt.s32.totalorder %s4742_s20, %s4742_s20 }
  0x14   :  { %p4749_p8 = por %p4748_p7, %p4747_p6 }
  0x16   :  { %p4750_p9 = pnand %p4749_p8, %p4743_p5 }
  0x18   :  { %4753 = shalt.err (!%p4750_p9)
}
  0x19   :  { %82 = dma.hbm_to_vmem [thread:$0]  %s8611_s5, 16384, %s77_s16, [#allocation11], %s4835_s28, %s4835_s28, %s4836_s29  }
  0x1a   :  { %s4754_s22 = scalar_lea.vmem %s30_s19, 16  ;;  %p4759_p11 = scmp.lt.s32.totalorder %s30_s19, %s30_s19 }
  0x1b   :  { %p4755_p10 = scmp.ne.s32.totalorder %s30_s19, %s4754_s22  ;;  %p4760_p12 = scmp.lt.s32.totalorder %s4754_s22, %s4754_s22 }
  0x1d   :  { %p4761_p13 = por %p4760_p12, %p4759_p11 }
  0x1f   :  { %p4762_p0 = pnand %p4761_p13, %p4755_p10 }
  0x21   :  { %4765 = shalt.err (!%p4762_p0)
}
  0x22   :  { %s4838_s0 = smov [#allocation3]   ;;  %s4839_s23 = smov [#allocation6]  }
  0x23   :  { %32 = dma.vmem_to_smem %s30_s19, 16, %s4838_s0, [#allocation5]  }
  0x24   :  { %s38_s24 = sshll.u32 %s4839_s23, 4  ;;  %s39_s24 = int_to_ptr.vmem [resolvable:$true] %s38_s24 }
  0x25   :  { %s4774_s25 = scalar_lea.vmem %s39_s24, 8192  ;;  %p4779_p2 = scmp.lt.s32.totalorder %s39_s24, %s39_s24 }
  0x26   :  { %p4775_p1 = scmp.ne.s32.totalorder %s39_s24, %s4774_s25  ;;  %p4780_p3 = scmp.lt.s32.totalorder %s4774_s25, %s4774_s25 }
  0x28   :  { %p4781_p4 = por %p4780_p3, %p4779_p2 }
  0x2a   :  { %p4782_p5 = pnand %p4781_p4, %p4775_p1 }
  0x2c   :  { %4785 = shalt.err (!%p4782_p5)
}
  0x2d   :  { %s4840_s5 = smov 128   ;;  %s4841_s26 = smov 8  }
  0x2e   :  { %44 = dma.hbm_to_vmem [thread:$0]  %s8607_s1, 8192, %s39_s24, [#allocation4], %s4840_s5, %s4840_s5, %s4841_s26  }
  0x2f   :  { %s4842_s14 = smov [#allocation9]   ;;  %s4843_s16 = smov [#allocation12]  }
  0x30   :  { %s62_s15 = sshll.u32 %s4842_s14, 4  ;;  %s94_s17 = sshll.u32 %s4843_s16, 4  ;;  %s63_s15 = int_to_ptr.vmem [resolvable:$true] %s62_s15  ;;  %s95_s17 = int_to_ptr.vmem [resolvable:$true] %s94_s17 }
  0x31   :  { %s4794_s18 = scalar_lea.vmem %s63_s15, 8192  ;;  %p4799_p7 = scmp.lt.s32.totalorder %s63_s15, %s63_s15 }
  0x32   :  { %p4795_p6 = scmp.ne.s32.totalorder %s63_s15, %s4794_s18  ;;  %p4800_p8 = scmp.lt.s32.totalorder %s4794_s18, %s4794_s18 }
  0x34   :  { %p4801_p9 = por %p4800_p8, %p4799_p7 }
  0x36   :  { %p4802_p10 = pnand %p4801_p9, %p4795_p6 }
  0x38   :  { %4805 = shalt.err (!%p4802_p10)
}
  0x39   :  { %68 = dma.hbm_to_vmem [thread:$0]  %s8609_s3, 8192, %s63_s15, [#allocation8], %s4835_s28, %s4835_s28, %s4836_s29  }
  0x3a   :  { %s4814_s1 = scalar_lea.vmem %s95_s17, 8192  ;;  %p4819_p12 = scmp.lt.s32.totalorder %s95_s17, %s95_s17 }
  0x3b   :  { %p4815_p11 = scmp.ne.s32.totalorder %s95_s17, %s4814_s1  ;;  %p4820_p13 = scmp.lt.s32.totalorder %s4814_s1, %s4814_s1 }
  0x3d   :  { %p4821_p0 = por %p4820_p13, %p4819_p12 }
  0x3f   :  { %p4822_p1 = pnand %p4821_p0, %p4815_p11 }
  0x41   :  { %4825 = shalt.err (!%p4822_p1)
}
  0x42   :  { %100 = dma.hbm_to_vmem [thread:$0]  %s8615_s9, 8192, %s95_s17, [#allocation11], %s4835_s28, %s4835_s28, %s4836_s29  }
  0x43   :  { %4826 = dma.done.wait [#allocation5], 16  }
  0x44   :  { %4827 = vsyncadd [#allocation5], 4294967280 }
  0x45   :  { %4828 = dma.done.wait [#allocation4], 8192  }
  0x46   :  { %4829 = vsyncadd [#allocation4], 4294959104 }
  0x47   :  { %4830 = dma.done.wait [#allocation8], 16384  }
  0x48   :  { %4831 = vsyncadd [#allocation8], 4294950912 }
  0x49   :  { %4832 = dma.done.wait [#allocation11], 24576  }
  0x4a   :  { %4833 = vsyncadd [#allocation11], 4294942720 }
  0x4b   :  { %121 = sfence }
  0x4c   :  { %v263_v0 = vld [vmem:[#allocation7 + $0x1e8] sm:$0xff]  ;;  %v265_v1 = vld [vmem:[#allocation7 + $0x1f8] sm:$0xff]  ;;  %v262_v2 = vld [vmem:[#allocation7 + $0x1e0] sm:$0xff]  ;;  %v8620_v6 = vmov 0.0   ;;  %s4953_s3 = sld [smem:[#allocation3]] }
  0x4d   :  { %288 = vmatprep.subr.mxu0 %v263_v0  ;;  %401 = vmatprep.subr.mxu1 %v265_v1  ;;  %v264_v3 = vld [vmem:[#allocation7 + $0x1f0] sm:$0xff]  ;;  %v259_v4 = vld [vmem:[#allocation7 + $0x1c8] sm:$0xff]  ;;  %v261_v5 = vld [vmem:[#allocation7 + $0x1d8] sm:$0xff]  ;;  %122 = vst [vmem:[#allocation2] sm:$0xff] %v8620_v6  ;;  %s4955_s9 = sld [smem:[#allocation3 + $0x8]] }
  0x4e   :  { %123 = vst [vmem:[#allocation2 + $0x8] sm:$0xff] %v8620_v6  ;;  %124 = vst [vmem:[#allocation2 + $0x10] sm:$0xff] %v8620_v6  ;;  %289 = vmatpush1.msra.mxu0 %v262_v2  ;;  %402 = vmatpush1.msra.mxu1 %v264_v3  ;;  %v258_v7 = vld [vmem:[#allocation7 + $0x1c0] sm:$0xff]  ;;  %v260_v8 = vld [vmem:[#allocation7 + $0x1d0] sm:$0xff]  ;;  %s4957_s28 = sld [smem:[#allocation3 + $0x1]] }
  0x4f   :  { %125 = vst [vmem:[#allocation2 + $0x18] sm:$0xff] %v8620_v6  ;;  %126 = vst [vmem:[#allocation2 + $0x20] sm:$0xff] %v8620_v6  ;;  %v255_v9 = vld [vmem:[#allocation7 + $0x1a8] sm:$0xff]  ;;  %290 = vmatprep.subr.mxu0 %v259_v4  ;;  %403 = vmatprep.subr.mxu1 %v261_v5  ;;  %v257_v10 = vld [vmem:[#allocation7 + $0x1b8] sm:$0xff]  ;;  %s4959_s29 = sld [smem:[#allocation3 + $0x9]] }
  0x50   :  { %127 = vst [vmem:[#allocation2 + $0x28] sm:$0xff] %v8620_v6  ;;  %128 = vst [vmem:[#allocation2 + $0x30] sm:$0xff] %v8620_v6  ;;  %v254_v11 = vld [vmem:[#allocation7 + $0x1a0] sm:$0xff]  ;;  %v256_v12 = vld [vmem:[#allocation7 + $0x1b0] sm:$0xff]  ;;  %291 = vmatpush1.msra.mxu0 %v258_v7  ;;  %404 = vmatpush1.msra.mxu1 %v260_v8  ;;  %s4961_s22 = sld [smem:[#allocation3 + $0x2]] }
  0x51   :  { %129 = vst [vmem:[#allocation2 + $0x38] sm:$0xff] %v8620_v6  ;;  %v251_v13 = vld [vmem:[#allocation7 + $0x188] sm:$0xff]  ;;  %v253_v14 = vld [vmem:[#allocation7 + $0x198] sm:$0xff]  ;;  %292 = vmatprep.subr.mxu0 %v255_v9  ;;  %405 = vmatprep.subr.mxu1 %v257_v10  ;;  %v250_v15 = vld [vmem:[#allocation7 + $0x180] sm:$0xff]  ;;  %s4963_s0 = sld [smem:[#allocation3 + $0xa]] }
  0x52   :  { %v252_v16 = vld [vmem:[#allocation7 + $0x190] sm:$0xff]  ;;  %293 = vmatpush1.msra.mxu0 %v254_v11  ;;  %406 = vmatpush1.msra.mxu1 %v256_v12  ;;  %v247_v17 = vld [vmem:[#allocation7 + $0x168] sm:$0xff]  ;;  %v249_v18 = vld [vmem:[#allocation7 + $0x178] sm:$0xff]  ;;  %s4965_s23 = sld [smem:[#allocation3 + $0x3]]  ;;  %s131_s25 = scalar_lea.vmem [#allocation6], %s4953_s3 }
  0x53   :  { %294 = vmatprep.subr.mxu0 %v251_v13  ;;  %407 = vmatprep.subr.mxu1 %v253_v14  ;;  %v246_v19 = vld [vmem:[#allocation7 + $0x160] sm:$0xff]  ;;  %v248_v20 = vld [vmem:[#allocation7 + $0x170] sm:$0xff]  ;;  %v243_v21 = vld [vmem:[#allocation7 + $0x148] sm:$0xff]  ;;  %s4967_s24 = sld [smem:[#allocation3 + $0xb]]  ;;  %s135_s5 = scalar_lea.vmem [#allocation6], %s4955_s9 }
  0x54   :  { %295 = vmatpush1.msra.mxu0 %v250_v15  ;;  %408 = vmatpush1.msra.mxu1 %v252_v16  ;;  %v245_v22 = vld [vmem:[#allocation7 + $0x158] sm:$0xff]  ;;  %v242_v23 = vld [vmem:[#allocation7 + $0x140] sm:$0xff]  ;;  %v244_v24 = vld [vmem:[#allocation7 + $0x150] sm:$0xff]  ;;  %s4971_s26 = sld [smem:[#allocation3 + $0x4]]  ;;  %s139_s27 = scalar_lea.vmem [#allocation6], %s4957_s28 }
  0x55   :  { %296 = vmatprep.subr.mxu0 %v247_v17  ;;  %409 = vmatprep.subr.mxu1 %v249_v18  ;;  %v239_v25 = vld [vmem:[#allocation7 + $0x128] sm:$0xff]  ;;  %v241_v26 = vld [vmem:[#allocation7 + $0x138] sm:$0xff]  ;;  %v238_v27 = vld [vmem:[#allocation7 + $0x120] sm:$0xff]  ;;  %s4974_s30 = sld [smem:[#allocation3 + $0xc]]  ;;  %s143_s14 = scalar_lea.vmem [#allocation6], %s4959_s29 }
  0x56   :  { %297 = vmatpush1.msra.mxu0 %v246_v19  ;;  %410 = vmatpush1.msra.mxu1 %v248_v20  ;;  %v240_v28 = vld [vmem:[#allocation7 + $0x130] sm:$0xff]  ;;  %v235_v29 = vld [vmem:[#allocation7 + $0x108] sm:$0xff]  ;;  %v237_v30 = vld [vmem:[#allocation7 + $0x118] sm:$0xff]  ;;  %s4977_s15 = sld [smem:[#allocation3 + $0x5]]  ;;  %s147_s17 = scalar_lea.vmem [#allocation6], %s4961_s22 }
  0x57   :  { %298 = vmatprep.subr.mxu0 %v243_v21  ;;  %411 = vmatprep.subr.mxu1 %v245_v22  ;;  %v234_v31 = vld [vmem:[#allocation7 + $0x100] sm:$0xff]  ;;  %v236_v32 = vld [vmem:[#allocation7 + $0x110] sm:$0xff]  ;;  %v231_v33 = vld [vmem:[#allocation7 + $0xe8] sm:$0xff]  ;;  %s4979_s16 = sld [smem:[#allocation3 + $0xd]]  ;;  %s151_s18 = scalar_lea.vmem [#allocation6], %s4963_s0 }
  0x58   :  { %299 = vmatpush1.msra.mxu0 %v242_v23  ;;  %412 = vmatpush1.msra.mxu1 %v244_v24  ;;  %v233_v34 = vld [vmem:[#allocation7 + $0xf8] sm:$0xff]  ;;  %v230_v35 = vld [vmem:[#allocation7 + $0xe0] sm:$0xff]  ;;  %v232_v36 = vld [vmem:[#allocation7 + $0xf0] sm:$0xff]  ;;  %s4983_s19 = sld [smem:[#allocation3 + $0x6]]  ;;  %s155_s20 = scalar_lea.vmem [#allocation6], %s4965_s23 }
  0x59   :  { %300 = vmatprep.subr.mxu0 %v239_v25  ;;  %413 = vmatprep.subr.mxu1 %v241_v26  ;;  %v227_v37 = vld [vmem:[#allocation7 + $0xc8] sm:$0xff]  ;;  %v229_v38 = vld [vmem:[#allocation7 + $0xd8] sm:$0xff]  ;;  %v226_v39 = vld [vmem:[#allocation7 + $0xc0] sm:$0xff]  ;;  %s4986_s1 = sld [smem:[#allocation3 + $0xe]]  ;;  %s159_s21 = scalar_lea.vmem [#allocation6], %s4967_s24 }
  0x5a   :  { %301 = vmatpush1.msra.mxu0 %v238_v27  ;;  %414 = vmatpush1.msra.mxu1 %v240_v28  ;;  %v228_v40 = vld [vmem:[#allocation7 + $0xd0] sm:$0xff]  ;;  %v223_v41 = vld [vmem:[#allocation7 + $0xa8] sm:$0xff]  ;;  %v225_v42 = vld [vmem:[#allocation7 + $0xb8] sm:$0xff]  ;;  %s5003_s2 = sld [smem:[#allocation3 + $0x7]]  ;;  %s163_s3 = scalar_lea.vmem [#allocation6], %s4971_s26 }
  0x5b   :  { %302 = vmatprep.subr.mxu0 %v235_v29  ;;  %415 = vmatprep.subr.mxu1 %v237_v30  ;;  %v222_v43 = vld [vmem:[#allocation7 + $0xa0] sm:$0xff]  ;;  %v224_v44 = vld [vmem:[#allocation7 + $0xb0] sm:$0xff]  ;;  %v219_v45 = vld [vmem:[#allocation7 + $0x88] sm:$0xff]  ;;  %s167_s9 = scalar_lea.vmem [#allocation6], %s4974_s30  ;;  %s5009_s28 = sld [smem:[#allocation3 + $0xf]] }
  0x5c   :  { %303 = vmatpush1.msra.mxu0 %v234_v31  ;;  %416 = vmatpush1.msra.mxu1 %v236_v32  ;;  %v221_v46 = vld [vmem:[#allocation7 + $0x98] sm:$0xff]  ;;  %v218_v47 = vld [vmem:[#allocation7 + $0x80] sm:$0xff]  ;;  %v220_v48 = vld [vmem:[#allocation7 + $0x90] sm:$0xff]  ;;  %s171_s29 = scalar_lea.vmem [#allocation6], %s4977_s15 }
  0x5d   :  { %304 = vmatprep.subr.mxu0 %v231_v33  ;;  %417 = vmatprep.subr.mxu1 %v233_v34  ;;  %v132_v49 = vld [vmem:[%s131_s25] sm:$0x1]  ;;  %v215_v51 = vld [vmem:[#allocation7 + $0x68] sm:$0xff]  ;;  %v217_v52 = vld [vmem:[#allocation7 + $0x78] sm:$0xff]  ;;  %s175_s22 = scalar_lea.vmem [#allocation6], %s4979_s16 }
  0x5e   :  { %305 = vmatpush1.msra.mxu0 %v230_v35  ;;  %418 = vmatpush1.msra.mxu1 %v232_v36  ;;  %v136_v50 = vld [vmem:[%s135_s5] sm:$0x1]  ;;  %133 = vst [vmem:[#allocation2] sm:$0x1] %v132_v49  ;;  %v216_v54 = vld [vmem:[#allocation7 + $0x70] sm:$0xff]  ;;  %v211_v55 = vld [vmem:[#allocation7 + $0x48] sm:$0xff] }
  0x5f   :  { %306 = vmatprep.subr.mxu0 %v227_v37  ;;  %419 = vmatprep.subr.mxu1 %v229_v38  ;;  %137 = vst [vmem:[#allocation2 + $0x1] sm:$0x1] %v136_v50  ;;  %v214_v53 = vld [vmem:[#allocation7 + $0x60] sm:$0xff]  ;;  %v213_v56 = vld [vmem:[#allocation7 + $0x58] sm:$0xff]  ;;  %v212_v59 = vld [vmem:[#allocation7 + $0x50] sm:$0xff]  ;;  %s179_s0 = scalar_lea.vmem [#allocation6], %s4983_s19 }
  0x60   :  { %307 = vmatpush1.msra.mxu0 %v226_v39  ;;  %420 = vmatpush1.msra.mxu1 %v228_v40  ;;  %v140_v57 = vld [vmem:[%s139_s27] sm:$0x1]  ;;  %v207_v61 = vld [vmem:[#allocation7 + $0x28] sm:$0xff]  ;;  %v209_v62 = vld [vmem:[#allocation7 + $0x38] sm:$0xff]  ;;  %s183_s23 = scalar_lea.vmem [#allocation6], %s4986_s1  ;;  %s187_s24 = scalar_lea.vmem [#allocation6], %s5003_s2 }
  0x61   :  { %308 = vmatprep.subr.mxu0 %v223_v41  ;;  %421 = vmatprep.subr.mxu1 %v225_v42  ;;  %v210_v58 = vld [vmem:[#allocation7 + $0x40] sm:$0xff]  ;;  %141 = vst [vmem:[#allocation2 + $0x8] sm:$0x1] %v140_v57  ;;  %v208_v0 = vld [vmem:[#allocation7 + $0x30] sm:$0xff]  ;;  %v203_v1 = vld [vmem:[#allocation7 + $0x8] sm:$0xff]  ;;  %s191_s25 = scalar_lea.vmem [#allocation6], %s5009_s28 }
  0x62   :  { %309 = vmatpush1.msra.mxu0 %v222_v43  ;;  %422 = vmatpush1.msra.mxu1 %v224_v44  ;;  %v144_v60 = vld [vmem:[%s143_s14] sm:$0x1]  ;;  %v205_v2 = vld [vmem:[#allocation7 + $0x18] sm:$0xff]  ;;  %v204_v7 = vld [vmem:[#allocation7 + $0x10] sm:$0xff] }
  0x63   :  { %310 = vmatprep.subr.mxu0 %v219_v45  ;;  %423 = vmatprep.subr.mxu1 %v221_v46  ;;  %145 = vst [vmem:[#allocation2 + $0x9] sm:$0x1] %v144_v60  ;;  %v206_v63 = vld [vmem:[#allocation7 + $0x20] sm:$0xff]  ;;  %v4989_v10 = vld [vmem:[#allocation9 + $0x1e8] sm:$0xff]  ;;  %v4991_v11 = vld [vmem:[#allocation9 + $0x1f8] sm:$0xff] }
  0x64   :  { %311 = vmatpush1.msra.mxu0 %v218_v47  ;;  %424 = vmatpush1.msra.mxu1 %v220_v48  ;;  %v148_v3 = vld [vmem:[%s147_s17] sm:$0x1]  ;;  %v4997_v14 = vld [vmem:[#allocation9 + $0x1f0] sm:$0xff]  ;;  %v4999_v15 = vld [vmem:[#allocation9 + $0x1c8] sm:$0xff] }
  0x65   :  { %312 = vmatprep.subr.mxu0 %v215_v51  ;;  %425 = vmatprep.subr.mxu1 %v217_v52  ;;  %v152_v4 = vld [vmem:[%s151_s18] sm:$0x1]  ;;  %149 = vst [vmem:[#allocation2 + $0x10] sm:$0x1] %v148_v3  ;;  %v5001_v16 = vld [vmem:[#allocation9 + $0x1d8] sm:$0xff]  ;;  %v5015_v20 = vld [vmem:[#allocation9 + $0x1d0] sm:$0xff] }
  0x66   :  { %313 = vmatpush1.msra.mxu0 %v214_v53  ;;  %426 = vmatpush1.msra.mxu1 %v216_v54  ;;  %v202_v5 = vld [vmem:[#allocation7] sm:$0xff]  ;;  %153 = vst [vmem:[#allocation2 + $0x11] sm:$0x1] %v152_v4  ;;  %v5021_v22 = vld [vmem:[#allocation9 + $0x1a8] sm:$0xff]  ;;  %v5023_v23 = vld [vmem:[#allocation9 + $0x1b8] sm:$0xff] }
  0x67   :  { %314 = vmatprep.subr.mxu0 %v211_v55  ;;  %427 = vmatprep.subr.mxu1 %v213_v56  ;;  %v194_v8 = vld [vmem:[#allocation2] sm:$0xff]  ;;  %v5029_v25 = vld [vmem:[#allocation9 + $0x1b0] sm:$0xff]  ;;  %v5033_v28 = vld [vmem:[#allocation9 + $0x188] sm:$0xff] }
  0x68   :  { %315 = vmatpush1.msra.mxu0 %v210_v58  ;;  %428 = vmatpush1.msra.mxu1 %v212_v59  ;;  %v156_v9 = vld [vmem:[%s155_s20] sm:$0x1]  ;;  %v5035_v29 = vld [vmem:[#allocation9 + $0x198] sm:$0xff]  ;;  %v5043_v31 = vld [vmem:[#allocation9 + $0x190] sm:$0xff] }
  0x69   :  { %316 = vmatprep.subr.mxu0 %v207_v61  ;;  %429 = vmatprep.subr.mxu1 %v209_v62  ;;  %157 = vst [vmem:[#allocation2 + $0x18] sm:$0x1] %v156_v9  ;;  %v160_v12 = vld [vmem:[%s159_s21] sm:$0x1]  ;;  %v5051_v35 = vld [vmem:[#allocation9 + $0x168] sm:$0xff]  ;;  %v5053_v36 = vld [vmem:[#allocation9 + $0x178] sm:$0xff] }
  0x6a   :  { %317 = vmatpush1.msra.mxu0 %v206_v63  ;;  %430 = vmatpush1.msra.mxu1 %v208_v0  ;;  %v4995_v13 = vld [vmem:[#allocation9 + $0x1e0] sm:$0xff]  ;;  %161 = vst [vmem:[#allocation2 + $0x19] sm:$0x1] %v160_v12  ;;  %v195_v21 = vld [vmem:[#allocation2 + $0x8] sm:$0xff]  ;;  %v5059_v38 = vld [vmem:[#allocation9 + $0x170] sm:$0xff] }
  0x6b   :  { %318 = vmatprep.subr.mxu0 %v203_v1  ;;  %431 = vmatprep.subr.mxu1 %v205_v2  ;;  %v164_v17 = vld [vmem:[%s163_s3] sm:$0x1]  ;;  %v5061_v39 = vld [vmem:[#allocation9 + $0x148] sm:$0xff]  ;;  %v5063_v40 = vld [vmem:[#allocation9 + $0x158] sm:$0xff] }
  0x6c   :  { %319 = vmatpush1.msra.mxu0 %v202_v5  ;;  %352 = vmatprep.mubr.f32.mxu0 %v8620_v6  ;;  %v168_v18 = vld [vmem:[%s167_s9] sm:$0x1]  ;;  %165 = vst [vmem:[#allocation2 + $0x20] sm:$0x1] %v164_v17  ;;  %v5073_v44 = vld [vmem:[#allocation9 + $0x150] sm:$0xff]  ;;  %v5079_v46 = vld [vmem:[#allocation9 + $0x128] sm:$0xff] }
  0x6d   :  { %432 = vmatpush1.msra.mxu1 %v204_v7  ;;  %465 = vmatprep.mubr.f32.mxu1 %v8620_v6  ;;  %v5013_v19 = vld [vmem:[#allocation9 + $0x1c0] sm:$0xff]  ;;  %169 = vst [vmem:[#allocation2 + $0x21] sm:$0x1] %v168_v18  ;;  %v196_v33 = vld [vmem:[#allocation2 + $0x10] sm:$0xff]  ;;  %v5081_v47 = vld [vmem:[#allocation9 + $0x138] sm:$0xff] }
  0x6e   :  { %353 = vmatmul.mubr.f32.vlgmr.msra.gmra.mxu0 %v194_v8  ;;  %466 = vmatmul.mubr.f32.vlgmr.msra.gmra.mxu1 %v194_v8  ;;  %v5025_v24 = vld [vmem:[#allocation9 + $0x1a0] sm:$0xff]  ;;  %v5087_v49 = vld [vmem:[#allocation9 + $0x130] sm:$0xff]  ;;  %v5089_v50 = vld [vmem:[#allocation9 + $0x108] sm:$0xff] }
  0x6f   :  { %584 = vmatprep.subr.mxu0 %v4989_v10  ;;  %655 = vmatprep.subr.mxu1 %v4991_v11  ;;  %v172_v26 = vld [vmem:[%s171_s29] sm:$0x1]  ;;  %v5091_v51 = vld [vmem:[#allocation9 + $0x118] sm:$0xff]  ;;  %v5099_v53 = vld [vmem:[#allocation9 + $0x110] sm:$0xff] }
  0x70   :  { %585 = vmatpush1.msra.mxu0 %v4995_v13  ;;  %656 = vmatpush1.msra.mxu1 %v4997_v14  ;;  %v176_v27 = vld [vmem:[%s175_s22] sm:$0x1]  ;;  %173 = vst [vmem:[#allocation2 + $0x28] sm:$0x1] %v172_v26  ;;  %v5105_v55 = vld [vmem:[#allocation9 + $0xe8] sm:$0xff]  ;;  %v5107_v56 = vld [vmem:[#allocation9 + $0xf8] sm:$0xff] }
  0x71   :  { %586 = vmatprep.subr.mxu0 %v4999_v15  ;;  %657 = vmatprep.subr.mxu1 %v5001_v16  ;;  %177 = vst [vmem:[#allocation2 + $0x29] sm:$0x1] %v176_v27  ;;  %v5041_v30 = vld [vmem:[#allocation9 + $0x180] sm:$0xff]  ;;  %v197_v45 = vld [vmem:[#allocation2 + $0x18] sm:$0xff]  ;;  %v5113_v58 = vld [vmem:[#allocation9 + $0xf0] sm:$0xff] }
  0x72   :  { %358 = vmatprep.mubr.f32.mxu0 %v8620_v6  ;;  %471 = vmatprep.mubr.f32.mxu1 %v8620_v6  ;;  %v180_v32 = vld [vmem:[%s179_s0] sm:$0x1]  ;;  %v5115_v59 = vld [vmem:[#allocation9 + $0xc8] sm:$0xff]  ;;  %v5117_v60 = vld [vmem:[#allocation9 + $0xd8] sm:$0xff] }
  0x73   :  { %587 = vmatpush1.msra.mxu0 %v5013_v19  ;;  %658 = vmatpush1.msra.mxu1 %v5015_v20  ;;  %181 = vst [vmem:[#allocation2 + $0x30] sm:$0x1] %v180_v32  ;;  %v184_v34 = vld [vmem:[%s183_s23] sm:$0x1]  ;;  %v5125_v62 = vld [vmem:[#allocation9 + $0xd0] sm:$0xff]  ;;  %v5131_v0 = vld [vmem:[#allocation9 + $0xa8] sm:$0xff] }
  0x74   :  { %359 = vmatmul.mubr.f32.gmra.mxu0 %v195_v21  ;;  %472 = vmatmul.mubr.f32.gmra.mxu1 %v195_v21  ;;  %185 = vst [vmem:[#allocation2 + $0x31] sm:$0x1] %v184_v34  ;;  %v5057_v37 = vld [vmem:[#allocation9 + $0x160] sm:$0xff]  ;;  %v5133_v1 = vld [vmem:[#allocation9 + $0xb8] sm:$0xff]  ;;  %v5139_v3 = vld [vmem:[#allocation9 + $0xb0] sm:$0xff] }
  0x75   :  { %588 = vmatprep.subr.mxu0 %v5021_v22  ;;  %659 = vmatprep.subr.mxu1 %v5023_v23  ;;  %v188_v41 = vld [vmem:[%s187_s24] sm:$0x1]  ;;  %v5141_v4 = vld [vmem:[#allocation9 + $0x88] sm:$0xff]  ;;  %v5143_v5 = vld [vmem:[#allocation9 + $0x98] sm:$0xff] }
  0x76   :  { %589 = vmatpush1.msra.mxu0 %v5025_v24  ;;  %660 = vmatpush1.msra.mxu1 %v5029_v25  ;;  %v192_v42 = vld [vmem:[%s191_s25] sm:$0x1]  ;;  %189 = vst [vmem:[#allocation2 + $0x38] sm:$0x1] %v188_v41  ;;  %v5151_v8 = vld [vmem:[#allocation9 + $0x90] sm:$0xff]  ;;  %v5157_v12 = vld [vmem:[#allocation9 + $0x68] sm:$0xff] }
  0x77   :  { %590 = vmatprep.subr.mxu0 %v5033_v28  ;;  %661 = vmatprep.subr.mxu1 %v5035_v29  ;;  %193 = vst [vmem:[#allocation2 + $0x39] sm:$0x1] %v192_v42  ;;  %v5071_v43 = vld [vmem:[#allocation9 + $0x140] sm:$0xff]  ;;  %v5159_v17 = vld [vmem:[#allocation9 + $0x78] sm:$0xff]  ;;  %v5165_v21 = vld [vmem:[#allocation9 + $0x70] sm:$0xff] }
  0x78   :  { %364 = vmatprep.mubr.f32.mxu0 %v8620_v6  ;;  %477 = vmatprep.mubr.f32.mxu1 %v8620_v6  ;;  %v5085_v48 = vld [vmem:[#allocation9 + $0x120] sm:$0xff]  ;;  %v199_v63 = vld [vmem:[#allocation2 + $0x28] sm:$0xff]  ;;  %v5169_v27 = vld [vmem:[#allocation9 + $0x58] sm:$0xff] }
  0x79   :  { %591 = vmatpush1.msra.mxu0 %v5041_v30  ;;  %662 = vmatpush1.msra.mxu1 %v5043_v31  ;;  %v5097_v52 = vld [vmem:[#allocation9 + $0x100] sm:$0xff]  ;;  %v5167_v26 = vld [vmem:[#allocation9 + $0x48] sm:$0xff]  ;;  %v5185_v42 = vld [vmem:[#allocation9 + $0x38] sm:$0xff] }
  0x7a   :  { %365 = vmatmul.mubr.f32.gmra.mxu0 %v196_v33  ;;  %478 = vmatmul.mubr.f32.gmra.mxu1 %v196_v33  ;;  %v198_v54 = vld [vmem:[#allocation2 + $0x20] sm:$0xff]  ;;  %v5177_v33 = vld [vmem:[#allocation9 + $0x50] sm:$0xff]  ;;  %v5183_v41 = vld [vmem:[#allocation9 + $0x28] sm:$0xff] }
  0x7b   :  { %592 = vmatprep.subr.mxu0 %v5051_v35  ;;  %663 = vmatprep.subr.mxu1 %v5053_v36  ;;  %v5111_v57 = vld [vmem:[#allocation9 + $0xe0] sm:$0xff]  ;;  %v200_v9 = vld [vmem:[#allocation2 + $0x30] sm:$0xff]  ;;  %9169 = vst [vmem:[#allocation17_spill] sm:$0xff] %v5177_v33  ;;  %9170 = vst [vmem:[#allocation18_spill] sm:$0xff] %v5183_v41 }
  0x7c   :  { %593 = vmatpush1.msra.mxu0 %v5057_v37  ;;  %664 = vmatpush1.msra.mxu1 %v5059_v38  ;;  %v5123_v61 = vld [vmem:[#allocation9 + $0xc0] sm:$0xff] }
  0x7d   :  { %594 = vmatprep.subr.mxu0 %v5061_v39  ;;  %665 = vmatprep.subr.mxu1 %v5063_v40  ;;  %v5137_v2 = vld [vmem:[#allocation9 + $0xa0] sm:$0xff] }
  0x7e   :  { %370 = vmatprep.mubr.f32.mxu0 %v8620_v6  ;;  %483 = vmatprep.mubr.f32.mxu1 %v8620_v6  ;;  %v5149_v7 = vld [vmem:[#allocation9 + $0x80] sm:$0xff]  ;;  %v201_v34 = vld [vmem:[#allocation2 + $0x38] sm:$0xff] }
  0x7f   :  { %595 = vmatpush1.msra.mxu0 %v5071_v43  ;;  %666 = vmatpush1.msra.mxu1 %v5073_v44  ;;  %v5163_v18 = vld [vmem:[#allocation9 + $0x60] sm:$0xff] }
  0x80   :  { %371 = vmatmul.mubr.f32.gmra.mxu0 %v197_v45  ;;  %484 = vmatmul.mubr.f32.gmra.mxu1 %v197_v45  ;;  %v5175_v32 = vld [vmem:[#allocation9 + $0x40] sm:$0xff] }
  0x81   :  { %596 = vmatprep.subr.mxu0 %v5079_v46  ;;  %667 = vmatprep.subr.mxu1 %v5081_v47  ;;  %v5189_v45 = vld [vmem:[#allocation9 + $0x20] sm:$0xff] }
  0x82   :  { %597 = vmatpush1.msra.mxu0 %v5085_v48  ;;  %668 = vmatpush1.msra.mxu1 %v5087_v49 }
  0x83   :  { %598 = vmatprep.subr.mxu0 %v5089_v50  ;;  %669 = vmatprep.subr.mxu1 %v5091_v51 }
  0x84   :  { %376 = vmatprep.mubr.f32.mxu0 %v8620_v6  ;;  %489 = vmatprep.mubr.f32.mxu1 %v8620_v6 }
  0x85   :  { %599 = vmatpush1.msra.mxu0 %v5097_v52  ;;  %670 = vmatpush1.msra.mxu1 %v5099_v53 }
  0x86   :  { %377 = vmatmul.mubr.f32.gmra.mxu0 %v198_v54  ;;  %490 = vmatmul.mubr.f32.gmra.mxu1 %v198_v54  ;;  %v5191_v54 = vld [vmem:[#allocation9 + $0x30] sm:$0xff] }
  0x87   :  { %600 = vmatprep.subr.mxu0 %v5105_v55  ;;  %671 = vmatprep.subr.mxu1 %v5107_v56 }
  0x88   :  { %601 = vmatpush1.msra.mxu0 %v5111_v57  ;;  %672 = vmatpush1.msra.mxu1 %v5113_v58 }
  0x89   :  { %602 = vmatprep.subr.mxu0 %v5115_v59  ;;  %673 = vmatprep.subr.mxu1 %v5117_v60 }
  0x8a   :  { %382 = vmatprep.mubr.f32.mxu0 %v8620_v6  ;;  %495 = vmatprep.mubr.f32.mxu1 %v8620_v6 }
  0x8b   :  { %603 = vmatpush1.msra.mxu0 %v5123_v61  ;;  %674 = vmatpush1.msra.mxu1 %v5125_v62 }
  0x8c   :  { %383 = vmatmul.mubr.f32.gmra.mxu0 %v199_v63  ;;  %496 = vmatmul.mubr.f32.gmra.mxu1 %v199_v63  ;;  %v5193_v63 = vld [vmem:[#allocation9 + $0x8] sm:$0xff] }
  0x8d   :  { %604 = vmatprep.subr.mxu0 %v5131_v0  ;;  %675 = vmatprep.subr.mxu1 %v5133_v1 }
  0x8e   :  { %605 = vmatpush1.msra.mxu0 %v5137_v2  ;;  %676 = vmatpush1.msra.mxu1 %v5139_v3 }
  0x8f   :  { %606 = vmatprep.subr.mxu0 %v5141_v4  ;;  %677 = vmatprep.subr.mxu1 %v5143_v5 }
  0x90   :  { %388 = vmatprep.mubr.f32.mxu0 %v8620_v6  ;;  %501 = vmatprep.mubr.f32.mxu1 %v8620_v6 }
  0x91   :  { %607 = vmatpush1.msra.mxu0 %v5149_v7  ;;  %678 = vmatpush1.msra.mxu1 %v5151_v8 }
  0x92   :  { %389 = vmatmul.mubr.f32.gmra.mxu0 %v200_v9  ;;  %502 = vmatmul.mubr.f32.gmra.mxu1 %v200_v9  ;;  %v5195_v9 = vld [vmem:[#allocation9 + $0x18] sm:$0xff] }
  0x93   :  { %608 = vmatprep.subr.mxu0 %v5157_v12  ;;  %679 = vmatprep.subr.mxu1 %v5159_v17 }
  0x94   :  { %609 = vmatpush1.msra.mxu0 %v5163_v18  ;;  %680 = vmatpush1.msra.mxu1 %v5165_v21 }
  0x95   :  { %610 = vmatprep.subr.mxu0 %v5167_v26  ;;  %681 = vmatprep.subr.mxu1 %v5169_v27 }
  0x96   :  { %394 = vmatprep.mubr.f32.mxu0 %v8620_v6  ;;  %507 = vmatprep.mubr.f32.mxu1 %v8620_v6  ;;  %v5199_v6 = vld [vmem:[#allocation9] sm:$0xff] }
  0x97   :  { %611 = vmatpush1.msra.mxu0 %v5175_v32  ;;  %682 = vmatpush1.msra.mxu1 %v5177_v33  ;;  %v5203_v33 = vld [vmem:[#allocation9 + $0x10] sm:$0xff] }
  0x98   :  { %395 = vmatmul.mubr.f32.gmra.mxu0 %v201_v34  ;;  %508 = vmatmul.mubr.f32.gmra.mxu1 %v201_v34  ;;  %v514_v34 = vld [vmem:[%s8613_s7] sm:$0xff] }
  0x99   :  { %612 = vmatprep.subr.mxu0 %v5183_v41  ;;  %683 = vmatprep.subr.mxu1 %v5185_v42  ;;  %v9171_v41 = vmov 0.0  }
  0x9a   :  { %613 = vmatpush1.msra.mxu0 %v5189_v45  ;;  %684 = vmatpush1.msra.mxu1 %v5191_v54 }
  0x9b   :  { %614 = vmatprep.subr.mxu0 %v5193_v63  ;;  %685 = vmatprep.subr.mxu1 %v5195_v9 }
  0x9c   :  { %615 = vmatpush1.msra.mxu0 %v5199_v6  ;;  %648 = vmatprep.mubr.f32.mxu0 %v9171_v41 }
  0x9d   :  { %686 = vmatpush1.msra.mxu1 %v5203_v33  ;;  %719 = vmatprep.mubr.f32.mxu1 %v9171_v41 }
  0x9e   :  { %649 = vmatmul.mubr.f32.vlgmr.msra.gmra.mxu0 %v514_v34  ;;  %720 = vmatmul.mubr.f32.vlgmr.msra.gmra.mxu1 %v514_v34 }
  0x9f   :  { %754 = vmatprep.subr.mxu0 %v4989_v10  ;;  %825 = vmatprep.subr.mxu1 %v4991_v11  ;;  %v9172_v10 = vld [vmem:[#allocation17_spill] sm:$0xff]  ;;  %v9173_v11 = vld [vmem:[#allocation18_spill] sm:$0xff] }
  0xa0   :  { %755 = vmatpush1.msra.mxu0 %v4995_v13  ;;  %826 = vmatpush1.msra.mxu1 %v4997_v14  ;;  %v5280_v13 = vld [vmem:[#allocation10 + $0x1e8] sm:$0xff]  ;;  %v5282_v14 = vld [vmem:[#allocation10 + $0x1f8] sm:$0xff] }
  0xa1   :  { %756 = vmatprep.subr.mxu0 %v4999_v15  ;;  %827 = vmatprep.subr.mxu1 %v5001_v16  ;;  %v268_v15 = vlaneseq }
  0xa2   :  { %757 = vmatpush1.msra.mxu0 %v5013_v19  ;;  %828 = vmatpush1.msra.mxu1 %v5015_v20 }
  0xa3   :  { %758 = vmatprep.subr.mxu0 %v5021_v22  ;;  %829 = vmatprep.subr.mxu1 %v5023_v23  ;;  %v269_v16 = vshrl.u32 %v268_v15, 7  ;;  %v266_v23 = vld [vmem:[%s8610_s4] sm:$0xf] }
  0xa4   :  { %759 = vmatpush1.msra.mxu0 %v5025_v24  ;;  %830 = vmatpush1.msra.mxu1 %v5029_v25 }
  0xa5   :  { %760 = vmatprep.subr.mxu0 %v5033_v28  ;;  %831 = vmatprep.subr.mxu1 %v5035_v29  ;;  %v5292_v22 = vsub.s32 2, %v269_v16  ;;  %v5301_v28 = vsub.s32 1, %v269_v16  ;;  %v5303_v29 = vsub.s32 3, %v269_v16 }
  0xa6   :  { %761 = vmatpush1.msra.mxu0 %v5041_v30  ;;  %832 = vmatpush1.msra.mxu1 %v5043_v31 }
  0xa7   :  { %762 = vmatprep.subr.mxu0 %v5051_v35  ;;  %833 = vmatprep.subr.mxu1 %v5053_v36  ;;  %9175 = vst [vmem:[#allocation18_spill] sm:$0xff] %v5292_v22  ;;  %9176 = vst [vmem:[#allocation19_spill] sm:$0xff] %v5301_v28  ;;  %v5307_v31 = vrot.slane %v266_v23, %v5292_v22  ;;  %v5547_v22 = vld [vmem:[#allocation10 + $0x58] sm:$0xff] }
  0xa8   :  { %763 = vmatpush1.msra.mxu0 %v5057_v37  ;;  %834 = vmatpush1.msra.mxu1 %v5059_v38  ;;  %9177 = vst [vmem:[#allocation20_spill] sm:$0xff] %v5303_v29  ;;  %v275_v37 = vrot.slane %v266_v23, %v5301_v28  ;;  %v5311_v38 = vrot.slane %v266_v23, %v5303_v29  ;;  %9212 = vst [vmem:[#allocation55_spill] sm:$0xff] %v5547_v22 }
  0xa9   :  { %764 = vmatprep.subr.mxu0 %v5061_v39  ;;  %835 = vmatprep.subr.mxu1 %v5063_v40 }
  0xaa   :  { %765 = vmatpush1.msra.mxu0 %v5071_v43  ;;  %836 = vmatpush1.msra.mxu1 %v5073_v44 }
  0xab   :  { %766 = vmatprep.subr.mxu0 %v5079_v46  ;;  %837 = vmatprep.subr.mxu1 %v5081_v47 }
  0xac   :  { %767 = vmatpush1.msra.mxu0 %v5085_v48  ;;  %838 = vmatpush1.msra.mxu1 %v5087_v49 }
  0xad   :  { %768 = vmatprep.subr.mxu0 %v5089_v50  ;;  %839 = vmatprep.subr.mxu1 %v5091_v51 }
  0xae   :  { %769 = vmatpush1.msra.mxu0 %v5097_v52  ;;  %840 = vmatpush1.msra.mxu1 %v5099_v53 }
  0xaf   :  { %770 = vmatprep.subr.mxu0 %v5105_v55  ;;  %841 = vmatprep.subr.mxu1 %v5107_v56 }
  0xb0   :  { %771 = vmatpush1.msra.mxu0 %v5111_v57  ;;  %842 = vmatpush1.msra.mxu1 %v5113_v58 }
  0xb1   :  { %772 = vmatprep.subr.mxu0 %v5115_v59  ;;  %843 = vmatprep.subr.mxu1 %v5117_v60 }
  0xb2   :  { %773 = vmatpush1.msra.mxu0 %v5123_v61  ;;  %844 = vmatpush1.msra.mxu1 %v5125_v62 }
  0xb3   :  { %774 = vmatprep.subr.mxu0 %v5131_v0  ;;  %845 = vmatprep.subr.mxu1 %v5133_v1 }
  0xb4   :  { %775 = vmatpush1.msra.mxu0 %v5137_v2  ;;  %846 = vmatpush1.msra.mxu1 %v5139_v3 }
  0xb5   :  { %776 = vmatprep.subr.mxu0 %v5141_v4  ;;  %847 = vmatprep.subr.mxu1 %v5143_v5 }
  0xb6   :  { %777 = vmatpush1.msra.mxu0 %v5149_v7  ;;  %848 = vmatpush1.msra.mxu1 %v5151_v8 }
  0xb7   :  { %778 = vmatprep.subr.mxu0 %v5157_v12  ;;  %849 = vmatprep.subr.mxu1 %v5159_v17 }
  0xb8   :  { %779 = vmatpush1.msra.mxu0 %v5163_v18  ;;  %850 = vmatpush1.msra.mxu1 %v5165_v21 }
  0xb9   :  { %780 = vmatprep.subr.mxu0 %v5167_v26  ;;  %851 = vmatprep.subr.mxu1 %v5169_v27 }
  0xba   :  { %781 = vmatpush1.msra.mxu0 %v5175_v32  ;;  %852 = vmatpush1.msra.mxu1 %v9172_v10 }
  0xbb   :  { %782 = vmatprep.subr.mxu0 %v9173_v11  ;;  %853 = vmatprep.subr.mxu1 %v5185_v42 }
  0xbc   :  { %783 = vmatpush1.msra.mxu0 %v5189_v45  ;;  %854 = vmatpush1.msra.mxu1 %v5191_v54 }
  0xbd   :  { %784 = vmatprep.subr.mxu0 %v5193_v63  ;;  %855 = vmatprep.subr.mxu1 %v5195_v9 }
  0xbe   :  { %785 = vmatpush1.msra.mxu0 %v5199_v6  ;;  %856 = vmatpush1.msra.mxu1 %v5203_v33  ;;  %v5290_v6 = vsub.s32 0, %v269_v16 }
  0xbf   :  { %818 = vmatprep.mubr.f32.mxu0 %v9171_v41  ;;  %889 = vmatprep.mubr.f32.mxu1 %v9171_v41 }
  0xc0   :  { %1074 = vmatprep.subr.mxu0 %v5280_v13  ;;  %1145 = vmatprep.subr.mxu1 %v5282_v14  ;;  %9174 = vst [vmem:[#allocation17_spill] sm:$0xff] %v5290_v6  ;;  %v271_v30 = vrot.slane %v266_v23, %v5290_v6 }
 0x12e   :  { %v5286_v19 = vpop.f32.mrf.mxu0  ;;  %v5288_v20 = vpop.f32.mrf.mxu1 }
 0x130   :  { %v5297_v24 = vpop.f32.mrf.mxu0  ;;  %v5299_v25 = vpop.f32.mrf.mxu1 }
 0x134   :  { %v360_v35 = vpop.f32.mrf.mxu0  ;;  %v473_v36 = vpop.f32.mrf.mxu1 }
 0x135   :  { %v5313_v39 = vadd.f32 %v360_v35, %v271_v30  ;;  %v5316_v40 = vadd.f32 %v473_v36, %v5307_v31 }
 0x136   :  { %v362_v43 = vpop.f32.mrf.mxu0  ;;  %v475_v44 = vpop.f32.mrf.mxu1 }
 0x137   :  { %v5318_v46 = vadd.f32 %v362_v43, %v275_v37  ;;  %v5321_v47 = vadd.f32 %v475_v44, %v5311_v38 }
 0x13a   :  { %v366_v48 = vpop.f32.mrf.mxu0  ;;  %v479_v49 = vpop.f32.mrf.mxu1 }
 0x13b   :  { %v5323_v50 = vadd.f32 %v366_v48, %v271_v30  ;;  %v5326_v51 = vadd.f32 %v479_v49, %v5307_v31 }
 0x13c   :  { %v368_v52 = vpop.f32.mrf.mxu0  ;;  %v481_v53 = vpop.f32.mrf.mxu1 }
 0x13d   :  { %9178 = vst [vmem:[#allocation21_spill] sm:$0xff] %v5323_v50  ;;  %9179 = vst [vmem:[#allocation22_spill] sm:$0xff] %v5326_v51  ;;  %v5328_v55 = vadd.f32 %v368_v52, %v275_v37  ;;  %v5331_v56 = vadd.f32 %v481_v53, %v5311_v38  ;;  %v355_v53 = vadd.f32 %v5286_v19, %v271_v30  ;;  %v5535_v51 = vld [vmem:[#allocation10 + $0x78] sm:$0xff]  ;;  %v5545_v50 = vld [vmem:[#allocation10 + $0x48] sm:$0xff] }
 0x13e   :  { %9208 = vst [vmem:[#allocation51_spill] sm:$0xff] %v5535_v51  ;;  %9211 = vst [vmem:[#allocation54_spill] sm:$0xff] %v5545_v50 }
 0x13f   :  { %9180 = vst [vmem:[#allocation23_spill] sm:$0xff] %v5328_v55  ;;  %9181 = vst [vmem:[#allocation24_spill] sm:$0xff] %v5331_v56  ;;  %v5539_v56 = vld [vmem:[#allocation10 + $0x60] sm:$0xff]  ;;  %v5541_v55 = vld [vmem:[#allocation10 + $0x70] sm:$0xff] }
 0x140   :  { %v372_v57 = vpop.f32.mrf.mxu0  ;;  %v485_v58 = vpop.f32.mrf.mxu1  ;;  %9209 = vst [vmem:[#allocation52_spill] sm:$0xff] %v5539_v56  ;;  %9210 = vst [vmem:[#allocation53_spill] sm:$0xff] %v5541_v55 }
 0x141   :  { %v5333_v59 = vadd.f32 %v372_v57, %v271_v30  ;;  %v5336_v60 = vadd.f32 %v485_v58, %v5307_v31  ;;  %v357_v58 = vadd.f32 %v5297_v24, %v275_v37 }
 0x142   :  { %v374_v61 = vpop.f32.mrf.mxu0  ;;  %v487_v62 = vpop.f32.mrf.mxu1 }
 0x143   :  { %9182 = vst [vmem:[#allocation25_spill] sm:$0xff] %v5333_v59  ;;  %9183 = vst [vmem:[#allocation26_spill] sm:$0xff] %v5336_v60  ;;  %v5338_v0 = vadd.f32 %v374_v61, %v275_v37  ;;  %v5341_v1 = vadd.f32 %v487_v62, %v5311_v38  ;;  %v5523_v60 = vld [vmem:[#allocation10 + $0x98] sm:$0xff]  ;;  %v5533_v59 = vld [vmem:[#allocation10 + $0x68] sm:$0xff] }
 0x144   :  { %9204 = vst [vmem:[#allocation47_spill] sm:$0xff] %v5523_v60  ;;  %9207 = vst [vmem:[#allocation50_spill] sm:$0xff] %v5533_v59 }
 0x145   :  { %9184 = vst [vmem:[#allocation27_spill] sm:$0xff] %v5338_v0  ;;  %9185 = vst [vmem:[#allocation28_spill] sm:$0xff] %v5341_v1  ;;  %v5527_v1 = vld [vmem:[#allocation10 + $0x80] sm:$0xff]  ;;  %v5529_v0 = vld [vmem:[#allocation10 + $0x90] sm:$0xff] }
 0x146   :  { %v378_v2 = vpop.f32.mrf.mxu0  ;;  %v491_v3 = vpop.f32.mrf.mxu1  ;;  %9205 = vst [vmem:[#allocation48_spill] sm:$0xff] %v5527_v1  ;;  %9206 = vst [vmem:[#allocation49_spill] sm:$0xff] %v5529_v0 }
 0x147   :  { %v5343_v4 = vadd.f32 %v378_v2, %v271_v30  ;;  %v5346_v5 = vadd.f32 %v491_v3, %v5307_v31 }
 0x148   :  { %v380_v7 = vpop.f32.mrf.mxu0  ;;  %v493_v8 = vpop.f32.mrf.mxu1 }
 0x149   :  { %9186 = vst [vmem:[#allocation29_spill] sm:$0xff] %v5343_v4  ;;  %9187 = vst [vmem:[#allocation30_spill] sm:$0xff] %v5346_v5  ;;  %v5348_v12 = vadd.f32 %v380_v7, %v275_v37  ;;  %v5351_v17 = vadd.f32 %v493_v8, %v5311_v38  ;;  %v5511_v5 = vld [vmem:[#allocation10 + $0xb8] sm:$0xff]  ;;  %v5521_v4 = vld [vmem:[#allocation10 + $0x88] sm:$0xff] }
 0x14a   :  { %9203 = vst [vmem:[#allocation46_spill] sm:$0xff] %v5521_v4 }
 0x14b   :  { %9188 = vst [vmem:[#allocation31_spill] sm:$0xff] %v5348_v12  ;;  %9189 = vst [vmem:[#allocation32_spill] sm:$0xff] %v5351_v17  ;;  %v5515_v17 = vld [vmem:[#allocation10 + $0xa0] sm:$0xff]  ;;  %v5517_v12 = vld [vmem:[#allocation10 + $0xb0] sm:$0xff] }
 0x14c   :  { %v384_v18 = vpop.f32.mrf.mxu0  ;;  %v497_v21 = vpop.f32.mrf.mxu1  ;;  %9202 = vst [vmem:[#allocation45_spill] sm:$0xff] %v5517_v12 }
 0x14d   :  { %v5353_v26 = vadd.f32 %v384_v18, %v271_v30  ;;  %v5356_v27 = vadd.f32 %v497_v21, %v5307_v31  ;;  %v470_v21 = vadd.f32 %v5299_v25, %v5311_v38  ;;  %v515_v25 = vld [vmem:[%s8614_s8] sm:$0xff] }
 0x14e   :  { %v386_v32 = vpop.f32.mrf.mxu0  ;;  %v499_v33 = vpop.f32.mrf.mxu1 }
 0x14f   :  { %9190 = vst [vmem:[#allocation33_spill] sm:$0xff] %v5353_v26  ;;  %9191 = vst [vmem:[#allocation34_spill] sm:$0xff] %v5356_v27  ;;  %v5358_v42 = vadd.f32 %v386_v32, %v275_v37  ;;  %v5361_v45 = vadd.f32 %v499_v33, %v5311_v38  ;;  %v468_v33 = vadd.f32 %v5288_v20, %v5307_v31  ;;  %v5499_v27 = vld [vmem:[#allocation10 + $0xd8] sm:$0xff]  ;;  %v5509_v26 = vld [vmem:[#allocation10 + $0xa8] sm:$0xff] }
 0x151   :  { %9192 = vst [vmem:[#allocation35_spill] sm:$0xff] %v5358_v42  ;;  %9193 = vst [vmem:[#allocation36_spill] sm:$0xff] %v5361_v45  ;;  %v5503_v45 = vld [vmem:[#allocation10 + $0xc0] sm:$0xff]  ;;  %v5505_v42 = vld [vmem:[#allocation10 + $0xd0] sm:$0xff] }
 0x152   :  { %v390_v54 = vpop.f32.mrf.mxu0  ;;  %v503_v63 = vpop.f32.mrf.mxu1 }
 0x153   :  { %v5363_v9 = vadd.f32 %v390_v54, %v271_v30  ;;  %v5366_v34 = vadd.f32 %v503_v63, %v5307_v31 }
 0x154   :  { %v392_v10 = vpop.f32.mrf.mxu0  ;;  %v505_v11 = vpop.f32.mrf.mxu1 }
 0x155   :  { %9194 = vst [vmem:[#allocation37_spill] sm:$0xff] %v5363_v9  ;;  %9195 = vst [vmem:[#allocation38_spill] sm:$0xff] %v5366_v34  ;;  %v5368_v15 = vadd.f32 %v392_v10, %v275_v37  ;;  %v5371_v16 = vadd.f32 %v505_v11, %v5311_v38  ;;  %v5487_v34 = vld [vmem:[#allocation10 + $0xf8] sm:$0xff]  ;;  %v5497_v9 = vld [vmem:[#allocation10 + $0xc8] sm:$0xff] }
 0x157   :  { %9196 = vst [vmem:[#allocation39_spill] sm:$0xff] %v5368_v15  ;;  %9197 = vst [vmem:[#allocation40_spill] sm:$0xff] %v5371_v16  ;;  %v5491_v16 = vld [vmem:[#allocation10 + $0xe0] sm:$0xff]  ;;  %v5493_v15 = vld [vmem:[#allocation10 + $0xf0] sm:$0xff] }
 0x158   :  { %v396_v23 = vpop.f32.mrf.mxu0  ;;  %v509_v35 = vpop.f32.mrf.mxu1 }
 0x159   :  { %v5373_v36 = vadd.f32 %v396_v23, %v271_v30  ;;  %v5376_v43 = vadd.f32 %v509_v35, %v5307_v31 }
 0x15a   :  { %v398_v44 = vpop.f32.mrf.mxu0  ;;  %v511_v48 = vpop.f32.mrf.mxu1 }
 0x15b   :  { %9198 = vst [vmem:[#allocation41_spill] sm:$0xff] %v5373_v36  ;;  %9199 = vst [vmem:[#allocation42_spill] sm:$0xff] %v5376_v43  ;;  %v5378_v49 = vadd.f32 %v398_v44, %v275_v37  ;;  %v5381_v52 = vadd.f32 %v511_v48, %v5311_v38  ;;  %v5475_v43 = vld [vmem:[#allocation10 + $0x118] sm:$0xff]  ;;  %v5485_v36 = vld [vmem:[#allocation10 + $0xe8] sm:$0xff] }
 0x15d   :  { %9200 = vst [vmem:[#allocation43_spill] sm:$0xff] %v5378_v49  ;;  %9201 = vst [vmem:[#allocation44_spill] sm:$0xff] %v5381_v52  ;;  %v5479_v52 = vld [vmem:[#allocation10 + $0x100] sm:$0xff]  ;;  %v5481_v49 = vld [vmem:[#allocation10 + $0x110] sm:$0xff] }
 0x15e   :  { %v650_v57 = vpop.f32.mrf.mxu0  ;;  %v721_v7 = vpop.f32.mrf.mxu1 }
 0x15f   :  { %v726_v61 = vadd.f32 %v650_v57, %v355_v53  ;;  %v728_v54 = vadd.f32 %v721_v7, %v468_v33  ;;  %v5409_v7 = vld [vmem:[#allocation10 + $0x1d0] sm:$0xff]  ;;  %v5425_v33 = vld [vmem:[#allocation10 + $0x188] sm:$0xff] }
 0x160   :  { %v652_v62 = vpop.f32.mrf.mxu0  ;;  %v723_v18 = vpop.f32.mrf.mxu1 }
 0x161   :  { %v3821_v2 = vmul.f32 -1.442695, %v726_v61  ;;  %v727_v3 = vadd.f32 %v652_v62, %v357_v58  ;;  %v729_v32 = vadd.f32 %v723_v18, %v470_v21  ;;  %v5397_v58 = vld [vmem:[#allocation10 + $0x1e0] sm:$0xff]  ;;  %v5399_v61 = vld [vmem:[#allocation10 + $0x1f0] sm:$0xff]  ;;  %v5401_v62 = vld [vmem:[#allocation10 + $0x1c8] sm:$0xff] }
 0x162   :  { %v5415_v18 = vld [vmem:[#allocation10 + $0x1b8] sm:$0xff]  ;;  %v5419_v21 = vld [vmem:[#allocation10 + $0x1a0] sm:$0xff] }
 0x163   :  { %3882 = vpow2.f32 %v3821_v2  ;;  %v3822_v8 = vmul.f32 -1.442695, %v727_v3  ;;  %v3823_v19 = vmul.f32 -1.442695, %v729_v32  ;;  %v5403_v2 = vld [vmem:[#allocation10 + $0x1d8] sm:$0xff]  ;;  %v5407_v3 = vld [vmem:[#allocation10 + $0x1c0] sm:$0xff] }
 0x164   :  { %v5421_v32 = vld [vmem:[#allocation10 + $0x1b0] sm:$0xff] }
 0x165   :  { %3884 = vpow2.f32 %v3822_v8  ;;  %v5413_v8 = vld [vmem:[#allocation10 + $0x1a8] sm:$0xff] }
 0x166   :  { %3886 = vpow2.f32 %v3823_v19  ;;  %v5427_v19 = vld [vmem:[#allocation10 + $0x198] sm:$0xff] }
 0x170   :  { %v3883_v30 = vpop.eup %3882 }
 0x171   :  { %v736_v24 = vadd.f32 1.0, %v3883_v30  ;;  %v5431_v30 = vld [vmem:[#allocation10 + $0x180] sm:$0xff] }
 0x172   :  { %v3885_v37 = vpop.eup %3884 }
 0x173   :  { %3888 = vrcp.f32 %v736_v24  ;;  %v737_v63 = vadd.f32 1.0, %v3885_v37  ;;  %v3887_v10 = vpop.eup %3886  ;;  %v5437_v24 = vld [vmem:[#allocation10 + $0x168] sm:$0xff]  ;;  %v5439_v37 = vld [vmem:[#allocation10 + $0x178] sm:$0xff] }
 0x174   :  { %3890 = vtanh.f32 %v728_v54  ;;  %v746_v35 = vadd.f32 1.0, %v3887_v10  ;;  %v5433_v54 = vld [vmem:[#allocation10 + $0x190] sm:$0xff] }
 0x175   :  { %3892 = vrcp.f32 %v737_v63  ;;  %v5443_v63 = vld [vmem:[#allocation10 + $0x160] sm:$0xff]  ;;  %v5445_v10 = vld [vmem:[#allocation10 + $0x170] sm:$0xff] }
 0x176   :  { %3894 = vrcp.f32 %v746_v35  ;;  %v5461_v35 = vld [vmem:[#allocation10 + $0x128] sm:$0xff] }
 0x180   :  { %v3889_v11 = vpop.eup %3888 }
 0x181   :  { %v3891_v38 = vpop.eup %3890 }
 0x182   :  { %v3893_v23 = vpop.eup %3892  ;;  %v750_v20 = vmul.f32 %v3891_v38, %v3889_v11  ;;  %v5449_v11 = vld [vmem:[#allocation10 + $0x148] sm:$0xff]  ;;  %v5455_v38 = vld [vmem:[#allocation10 + $0x140] sm:$0xff] }
 0x183   :  { %v749_v31 = vmul.f32 %v3893_v23, %v515_v25  ;;  %v3895_v48 = vpop.eup %3894  ;;  %v5451_v25 = vld [vmem:[#allocation10 + $0x158] sm:$0xff]  ;;  %v5457_v23 = vld [vmem:[#allocation10 + $0x150] sm:$0xff] }
 0x185   :  { %v5392_v44 = vadd.f32 %v750_v20, %v749_v31  ;;  %v5463_v20 = vld [vmem:[#allocation10 + $0x138] sm:$0xff]  ;;  %v5467_v31 = vld [vmem:[#allocation10 + $0x120] sm:$0xff] }
 0x187   :  { %3896 = vtanh.f32 %v5392_v44 }
 0x194   :  { %v3897_v53 = vpop.eup %3896 }
 0x195   :  { %v5395_v57 = vmul.f32 %v3897_v53, %v3895_v48  ;;  %v5469_v48 = vld [vmem:[#allocation10 + $0x130] sm:$0xff]  ;;  %v5473_v53 = vld [vmem:[#allocation10 + $0x108] sm:$0xff] }
 0x197   :  { %819 = vmatmul.mubr.f32.vlgmr.msra.gmra.mxu0 %v5395_v57  ;;  %890 = vmatmul.mubr.f32.vlgmr.msra.gmra.mxu1 %v5395_v57 }
 0x198   :  { %1075 = vmatpush1.msra.mxu0 %v5397_v58  ;;  %1146 = vmatpush1.msra.mxu1 %v5399_v61 }
 0x199   :  { %1076 = vmatprep.subr.mxu0 %v5401_v62  ;;  %1147 = vmatprep.subr.mxu1 %v5403_v2 }
 0x19a   :  { %1077 = vmatpush1.msra.mxu0 %v5407_v3  ;;  %1148 = vmatpush1.msra.mxu1 %v5409_v7 }
 0x19b   :  { %1078 = vmatprep.subr.mxu0 %v5413_v8  ;;  %1149 = vmatprep.subr.mxu1 %v5415_v18 }
 0x19c   :  { %1079 = vmatpush1.msra.mxu0 %v5419_v21  ;;  %1150 = vmatpush1.msra.mxu1 %v5421_v32 }
 0x19d   :  { %1080 = vmatprep.subr.mxu0 %v5425_v33  ;;  %1151 = vmatprep.subr.mxu1 %v5427_v19 }
 0x19e   :  { %1081 = vmatpush1.msra.mxu0 %v5431_v30  ;;  %1152 = vmatpush1.msra.mxu1 %v5433_v54 }
 0x19f   :  { %1082 = vmatprep.subr.mxu0 %v5437_v24  ;;  %1153 = vmatprep.subr.mxu1 %v5439_v37 }
 0x1a0   :  { %1083 = vmatpush1.msra.mxu0 %v5443_v63  ;;  %1154 = vmatpush1.msra.mxu1 %v5445_v10 }
 0x1a1   :  { %1084 = vmatprep.subr.mxu0 %v5449_v11  ;;  %1155 = vmatprep.subr.mxu1 %v5451_v25 }
 0x1a2   :  { %1085 = vmatpush1.msra.mxu0 %v5455_v38  ;;  %1156 = vmatpush1.msra.mxu1 %v5457_v23 }
 0x1a3   :  { %1086 = vmatprep.subr.mxu0 %v5461_v35  ;;  %1157 = vmatprep.subr.mxu1 %v5463_v20 }
 0x1a4   :  { %1087 = vmatpush1.msra.mxu0 %v5467_v31  ;;  %1158 = vmatpush1.msra.mxu1 %v5469_v48 }
 0x1a5   :  { %1088 = vmatprep.subr.mxu0 %v5473_v53  ;;  %1159 = vmatprep.subr.mxu1 %v5475_v43 }
 0x1a6   :  { %1089 = vmatpush1.msra.mxu0 %v5479_v52  ;;  %1160 = vmatpush1.msra.mxu1 %v5481_v49 }
 0x1a7   :  { %1090 = vmatprep.subr.mxu0 %v5485_v36  ;;  %1161 = vmatprep.subr.mxu1 %v5487_v34 }
 0x1a8   :  { %1091 = vmatpush1.msra.mxu0 %v5491_v16  ;;  %1162 = vmatpush1.msra.mxu1 %v5493_v15 }
 0x1a9   :  { %1092 = vmatprep.subr.mxu0 %v5497_v9  ;;  %1163 = vmatprep.subr.mxu1 %v5499_v27 }
 0x1aa   :  { %1093 = vmatpush1.msra.mxu0 %v5503_v45  ;;  %1164 = vmatpush1.msra.mxu1 %v5505_v42 }
 0x1ab   :  { %1094 = vmatprep.subr.mxu0 %v5509_v26  ;;  %1165 = vmatprep.subr.mxu1 %v5511_v5 }
 0x1ac   :  { %1095 = vmatpush1.msra.mxu0 %v5515_v17  ;;  %1166 = vmatpush1.msra.mxu1 %v5517_v12  ;;  %v5551_v12 = vld [vmem:[#allocation10 + $0x40] sm:$0xff] }
 0x1ad   :  { %1096 = vmatprep.subr.mxu0 %v5521_v4  ;;  %1167 = vmatprep.subr.mxu1 %v5523_v60  ;;  %9213 = vst [vmem:[#allocation56_spill] sm:$0xff] %v5551_v12  ;;  %v5553_v4 = vld [vmem:[#allocation10 + $0x50] sm:$0xff]  ;;  %v5557_v60 = vld [vmem:[#allocation10 + $0x28] sm:$0xff] }
 0x1ae   :  { %1097 = vmatpush1.msra.mxu0 %v5527_v1  ;;  %1168 = vmatpush1.msra.mxu1 %v5529_v0  ;;  %9214 = vst [vmem:[#allocation57_spill] sm:$0xff] %v5553_v4  ;;  %9215 = vst [vmem:[#allocation58_spill] sm:$0xff] %v5557_v60  ;;  %v5559_v1 = vld [vmem:[#allocation10 + $0x38] sm:$0xff]  ;;  %v5563_v0 = vld [vmem:[#allocation10 + $0x20] sm:$0xff] }
 0x1af   :  { %1098 = vmatprep.subr.mxu0 %v5533_v59  ;;  %1169 = vmatprep.subr.mxu1 %v5535_v51  ;;  %9216 = vst [vmem:[#allocation59_spill] sm:$0xff] %v5559_v1  ;;  %9217 = vst [vmem:[#allocation60_spill] sm:$0xff] %v5563_v0  ;;  %v5565_v59 = vld [vmem:[#allocation10 + $0x30] sm:$0xff]  ;;  %v5569_v51 = vld [vmem:[#allocation10 + $0x8] sm:$0xff] }
 0x1b0   :  { %1099 = vmatpush1.msra.mxu0 %v5539_v56  ;;  %1170 = vmatpush1.msra.mxu1 %v5541_v55  ;;  %9218 = vst [vmem:[#allocation61_spill] sm:$0xff] %v5565_v59  ;;  %9219 = vst [vmem:[#allocation62_spill] sm:$0xff] %v5569_v51  ;;  %v5571_v56 = vld [vmem:[#allocation10 + $0x18] sm:$0xff]  ;;  %v5575_v55 = vld [vmem:[#allocation10] sm:$0xff] }
 0x1b1   :  { %1100 = vmatprep.subr.mxu0 %v5545_v50  ;;  %1171 = vmatprep.subr.mxu1 %v5547_v22  ;;  %9220 = vst [vmem:[#allocation63_spill] sm:$0xff] %v5571_v56  ;;  %9221 = vst [vmem:[#allocation64_spill] sm:$0xff] %v5575_v55  ;;  %v5577_v50 = vld [vmem:[#allocation10 + $0x10] sm:$0xff]  ;;  %v5581_v22 = vld [vmem:[#allocation10 + $0x3e8] sm:$0xff] }
 0x1b2   :  { %1101 = vmatpush1.msra.mxu0 %v5551_v12  ;;  %1172 = vmatpush1.msra.mxu1 %v5553_v4  ;;  %9222 = vst [vmem:[#allocation65_spill] sm:$0xff] %v5577_v50  ;;  %9223 = vst [vmem:[#allocation66_spill] sm:$0xff] %v5581_v22  ;;  %v5583_v12 = vld [vmem:[#allocation10 + $0x3f8] sm:$0xff]  ;;  %v5587_v4 = vld [vmem:[#allocation10 + $0x3e0] sm:$0xff] }
 0x1b3   :  { %1102 = vmatprep.subr.mxu0 %v5557_v60  ;;  %1173 = vmatprep.subr.mxu1 %v5559_v1  ;;  %9224 = vst [vmem:[#allocation67_spill] sm:$0xff] %v5583_v12  ;;  %9225 = vst [vmem:[#allocation68_spill] sm:$0xff] %v5587_v4  ;;  %v5589_v60 = vld [vmem:[#allocation10 + $0x3f0] sm:$0xff]  ;;  %v5593_v1 = vld [vmem:[#allocation10 + $0x3c8] sm:$0xff] }
 0x1b4   :  { %1103 = vmatpush1.msra.mxu0 %v5563_v0  ;;  %1174 = vmatpush1.msra.mxu1 %v5565_v59  ;;  %9226 = vst [vmem:[#allocation69_spill] sm:$0xff] %v5589_v60  ;;  %9227 = vst [vmem:[#allocation70_spill] sm:$0xff] %v5593_v1  ;;  %v5595_v0 = vld [vmem:[#allocation10 + $0x3d8] sm:$0xff]  ;;  %v5599_v59 = vld [vmem:[#allocation10 + $0x3c0] sm:$0xff] }
 0x1b5   :  { %1104 = vmatprep.subr.mxu0 %v5569_v51  ;;  %1175 = vmatprep.subr.mxu1 %v5571_v56  ;;  %9228 = vst [vmem:[#allocation71_spill] sm:$0xff] %v5595_v0  ;;  %9229 = vst [vmem:[#allocation72_spill] sm:$0xff] %v5599_v59  ;;  %v5601_v51 = vld [vmem:[#allocation10 + $0x3d0] sm:$0xff]  ;;  %v5605_v56 = vld [vmem:[#allocation10 + $0x3a8] sm:$0xff] }
 0x1b6   :  { %1105 = vmatpush1.msra.mxu0 %v5575_v55  ;;  %1176 = vmatpush1.msra.mxu1 %v5577_v50  ;;  %9230 = vst [vmem:[#allocation73_spill] sm:$0xff] %v5601_v51  ;;  %9231 = vst [vmem:[#allocation74_spill] sm:$0xff] %v5605_v56  ;;  %v5607_v55 = vld [vmem:[#allocation10 + $0x3b8] sm:$0xff]  ;;  %v5611_v50 = vld [vmem:[#allocation10 + $0x3a0] sm:$0xff] }
 0x1b7   :  { %1106 = vmatprep.subr.mxu0 %v5581_v22  ;;  %1177 = vmatprep.subr.mxu1 %v5583_v12  ;;  %9232 = vst [vmem:[#allocation75_spill] sm:$0xff] %v5607_v55  ;;  %9233 = vst [vmem:[#allocation76_spill] sm:$0xff] %v5611_v50  ;;  %v5613_v22 = vld [vmem:[#allocation10 + $0x3b0] sm:$0xff]  ;;  %v5617_v12 = vld [vmem:[#allocation10 + $0x388] sm:$0xff] }
 0x1b8   :  { %1107 = vmatpush2.msra.mxu0 %v5587_v4  ;;  %1178 = vmatpush2.msra.mxu1 %v5589_v60  ;;  %9234 = vst [vmem:[#allocation77_spill] sm:$0xff] %v5613_v22  ;;  %9235 = vst [vmem:[#allocation78_spill] sm:$0xff] %v5617_v12  ;;  %v5619_v4 = vld [vmem:[#allocation10 + $0x398] sm:$0xff]  ;;  %v5623_v60 = vld [vmem:[#allocation10 + $0x380] sm:$0xff] }
 0x1b9   :  { %1108 = vmatprep.subr.mxu0 %v5593_v1  ;;  %1179 = vmatprep.subr.mxu1 %v5595_v0  ;;  %9236 = vst [vmem:[#allocation79_spill] sm:$0xff] %v5619_v4  ;;  %9237 = vst [vmem:[#allocation80_spill] sm:$0xff] %v5623_v60  ;;  %v5625_v1 = vld [vmem:[#allocation10 + $0x390] sm:$0xff]  ;;  %v5629_v0 = vld [vmem:[#allocation10 + $0x368] sm:$0xff] }
 0x1ba   :  { %1109 = vmatpush2.msra.mxu0 %v5599_v59  ;;  %1180 = vmatpush2.msra.mxu1 %v5601_v51  ;;  %9238 = vst [vmem:[#allocation81_spill] sm:$0xff] %v5625_v1  ;;  %9239 = vst [vmem:[#allocation82_spill] sm:$0xff] %v5629_v0  ;;  %v5631_v59 = vld [vmem:[#allocation10 + $0x378] sm:$0xff]  ;;  %v5635_v51 = vld [vmem:[#allocation10 + $0x360] sm:$0xff] }
 0x1bb   :  { %1110 = vmatprep.subr.mxu0 %v5605_v56  ;;  %1181 = vmatprep.subr.mxu1 %v5607_v55  ;;  %9240 = vst [vmem:[#allocation83_spill] sm:$0xff] %v5631_v59  ;;  %9241 = vst [vmem:[#allocation84_spill] sm:$0xff] %v5635_v51  ;;  %v5637_v56 = vld [vmem:[#allocation10 + $0x370] sm:$0xff]  ;;  %v5641_v55 = vld [vmem:[#allocation10 + $0x348] sm:$0xff] }
 0x1bc   :  { %1111 = vmatpush2.msra.mxu0 %v5611_v50  ;;  %1182 = vmatpush2.msra.mxu1 %v5613_v22  ;;  %9242 = vst [vmem:[#allocation85_spill] sm:$0xff] %v5637_v56  ;;  %9243 = vst [vmem:[#allocation86_spill] sm:$0xff] %v5641_v55  ;;  %v5643_v50 = vld [vmem:[#allocation10 + $0x358] sm:$0xff]  ;;  %v5647_v22 = vld [vmem:[#allocation10 + $0x340] sm:$0xff] }
 0x1bd   :  { %1112 = vmatprep.subr.mxu0 %v5617_v12  ;;  %1183 = vmatprep.subr.mxu1 %v5619_v4  ;;  %9244 = vst [vmem:[#allocation87_spill] sm:$0xff] %v5643_v50  ;;  %9245 = vst [vmem:[#allocation88_spill] sm:$0xff] %v5647_v22  ;;  %v5649_v12 = vld [vmem:[#allocation10 + $0x350] sm:$0xff]  ;;  %v5653_v4 = vld [vmem:[#allocation10 + $0x328] sm:$0xff] }
 0x1be   :  { %1113 = vmatpush2.msra.mxu0 %v5623_v60  ;;  %1184 = vmatpush2.msra.mxu1 %v5625_v1  ;;  %9246 = vst [vmem:[#allocation89_spill] sm:$0xff] %v5649_v12  ;;  %9247 = vst [vmem:[#allocation90_spill] sm:$0xff] %v5653_v4  ;;  %v5655_v60 = vld [vmem:[#allocation10 + $0x338] sm:$0xff]  ;;  %v5659_v1 = vld [vmem:[#allocation10 + $0x320] sm:$0xff] }
 0x1bf   :  { %1114 = vmatprep.subr.mxu0 %v5629_v0  ;;  %1185 = vmatprep.subr.mxu1 %v5631_v59  ;;  %9248 = vst [vmem:[#allocation91_spill] sm:$0xff] %v5655_v60  ;;  %9249 = vst [vmem:[#allocation92_spill] sm:$0xff] %v5659_v1  ;;  %v5661_v0 = vld [vmem:[#allocation10 + $0x330] sm:$0xff]  ;;  %v5665_v59 = vld [vmem:[#allocation10 + $0x308] sm:$0xff] }
 0x1c0   :  { %1115 = vmatpush2.msra.mxu0 %v5635_v51  ;;  %1186 = vmatpush2.msra.mxu1 %v5637_v56  ;;  %9250 = vst [vmem:[#allocation93_spill] sm:$0xff] %v5661_v0  ;;  %9251 = vst [vmem:[#allocation94_spill] sm:$0xff] %v5665_v59  ;;  %v5667_v51 = vld [vmem:[#allocation10 + $0x318] sm:$0xff]  ;;  %v5671_v56 = vld [vmem:[#allocation10 + $0x300] sm:$0xff] }
 0x1c1   :  { %1116 = vmatprep.subr.mxu0 %v5641_v55  ;;  %1187 = vmatprep.subr.mxu1 %v5643_v50  ;;  %9252 = vst [vmem:[#allocation95_spill] sm:$0xff] %v5667_v51  ;;  %9253 = vst [vmem:[#allocation96_spill] sm:$0xff] %v5671_v56  ;;  %v5673_v55 = vld [vmem:[#allocation10 + $0x310] sm:$0xff]  ;;  %v5677_v50 = vld [vmem:[#allocation10 + $0x2e8] sm:$0xff] }
 0x1c2   :  { %1117 = vmatpush2.msra.mxu0 %v5647_v22  ;;  %1188 = vmatpush2.msra.mxu1 %v5649_v12  ;;  %9254 = vst [vmem:[#allocation97_spill] sm:$0xff] %v5673_v55  ;;  %9255 = vst [vmem:[#allocation98_spill] sm:$0xff] %v5677_v50  ;;  %v5679_v22 = vld [vmem:[#allocation10 + $0x2f8] sm:$0xff]  ;;  %v5683_v12 = vld [vmem:[#allocation10 + $0x2e0] sm:$0xff] }
 0x1c3   :  { %1118 = vmatprep.subr.mxu0 %v5653_v4  ;;  %1189 = vmatprep.subr.mxu1 %v5655_v60  ;;  %9256 = vst [vmem:[#allocation99_spill] sm:$0xff] %v5679_v22  ;;  %9257 = vst [vmem:[#allocation100_spill] sm:$0xff] %v5683_v12  ;;  %v5685_v4 = vld [vmem:[#allocation10 + $0x2f0] sm:$0xff]  ;;  %v5689_v60 = vld [vmem:[#allocation10 + $0x2c8] sm:$0xff] }
 0x1c4   :  { %1119 = vmatpush2.msra.mxu0 %v5659_v1  ;;  %1190 = vmatpush2.msra.mxu1 %v5661_v0  ;;  %9258 = vst [vmem:[#allocation101_spill] sm:$0xff] %v5685_v4  ;;  %9259 = vst [vmem:[#allocation102_spill] sm:$0xff] %v5689_v60  ;;  %v5691_v1 = vld [vmem:[#allocation10 + $0x2d8] sm:$0xff]  ;;  %v5695_v0 = vld [vmem:[#allocation10 + $0x2c0] sm:$0xff] }
 0x1c5   :  { %1120 = vmatprep.subr.mxu0 %v5665_v59  ;;  %1191 = vmatprep.subr.mxu1 %v5667_v51  ;;  %9260 = vst [vmem:[#allocation103_spill] sm:$0xff] %v5691_v1  ;;  %9261 = vst [vmem:[#allocation104_spill] sm:$0xff] %v5695_v0  ;;  %v5697_v59 = vld [vmem:[#allocation10 + $0x2d0] sm:$0xff]  ;;  %v5701_v51 = vld [vmem:[#allocation10 + $0x2a8] sm:$0xff] }
 0x1c6   :  { %1121 = vmatpush2.msra.mxu0 %v5671_v56  ;;  %1192 = vmatpush2.msra.mxu1 %v5673_v55  ;;  %9262 = vst [vmem:[#allocation105_spill] sm:$0xff] %v5697_v59  ;;  %9263 = vst [vmem:[#allocation106_spill] sm:$0xff] %v5701_v51  ;;  %v5703_v56 = vld [vmem:[#allocation10 + $0x2b8] sm:$0xff]  ;;  %v5707_v55 = vld [vmem:[#allocation10 + $0x2a0] sm:$0xff] }
 0x1c7   :  { %1122 = vmatprep.subr.mxu0 %v5677_v50  ;;  %1193 = vmatprep.subr.mxu1 %v5679_v22  ;;  %9264 = vst [vmem:[#allocation107_spill] sm:$0xff] %v5703_v56  ;;  %9265 = vst [vmem:[#allocation108_spill] sm:$0xff] %v5707_v55  ;;  %v5709_v50 = vld [vmem:[#allocation10 + $0x2b0] sm:$0xff]  ;;  %v5713_v22 = vld [vmem:[#allocation10 + $0x288] sm:$0xff] }
 0x1c8   :  { %1123 = vmatpush2.msra.mxu0 %v5683_v12  ;;  %1194 = vmatpush2.msra.mxu1 %v5685_v4  ;;  %9266 = vst [vmem:[#allocation109_spill] sm:$0xff] %v5709_v50  ;;  %9267 = vst [vmem:[#allocation110_spill] sm:$0xff] %v5713_v22  ;;  %v5715_v12 = vld [vmem:[#allocation10 + $0x298] sm:$0xff]  ;;  %v5719_v4 = vld [vmem:[#allocation10 + $0x280] sm:$0xff] }
 0x1c9   :  { %1124 = vmatprep.subr.mxu0 %v5689_v60  ;;  %1195 = vmatprep.subr.mxu1 %v5691_v1  ;;  %9268 = vst [vmem:[#allocation111_spill] sm:$0xff] %v5715_v12  ;;  %9269 = vst [vmem:[#allocation112_spill] sm:$0xff] %v5719_v4  ;;  %v5721_v60 = vld [vmem:[#allocation10 + $0x290] sm:$0xff]  ;;  %v5725_v1 = vld [vmem:[#allocation10 + $0x268] sm:$0xff] }
 0x1ca   :  { %1125 = vmatpush2.msra.mxu0 %v5695_v0  ;;  %1196 = vmatpush2.msra.mxu1 %v5697_v59  ;;  %9270 = vst [vmem:[#allocation113_spill] sm:$0xff] %v5721_v60  ;;  %9271 = vst [vmem:[#allocation114_spill] sm:$0xff] %v5725_v1  ;;  %v5727_v0 = vld [vmem:[#allocation10 + $0x278] sm:$0xff]  ;;  %v5731_v59 = vld [vmem:[#allocation10 + $0x260] sm:$0xff] }
 0x1cb   :  { %1126 = vmatprep.subr.mxu0 %v5701_v51  ;;  %1197 = vmatprep.subr.mxu1 %v5703_v56  ;;  %9272 = vst [vmem:[#allocation115_spill] sm:$0xff] %v5727_v0  ;;  %9273 = vst [vmem:[#allocation116_spill] sm:$0xff] %v5731_v59  ;;  %v5733_v51 = vld [vmem:[#allocation10 + $0x270] sm:$0xff]  ;;  %v5737_v56 = vld [vmem:[#allocation10 + $0x248] sm:$0xff] }
 0x1cc   :  { %1127 = vmatpush2.msra.mxu0 %v5707_v55  ;;  %1198 = vmatpush2.msra.mxu1 %v5709_v50  ;;  %9274 = vst [vmem:[#allocation117_spill] sm:$0xff] %v5733_v51  ;;  %v5739_v55 = vld [vmem:[#allocation10 + $0x258] sm:$0xff]  ;;  %v5743_v50 = vld [vmem:[#allocation10 + $0x240] sm:$0xff] }
 0x1cd   :  { %1128 = vmatprep.subr.mxu0 %v5713_v22  ;;  %1199 = vmatprep.subr.mxu1 %v5715_v12  ;;  %9275 = vst [vmem:[#allocation118_spill] sm:$0xff] %v5739_v55  ;;  %9276 = vst [vmem:[#allocation119_spill] sm:$0xff] %v5743_v50  ;;  %v5745_v22 = vld [vmem:[#allocation10 + $0x250] sm:$0xff]  ;;  %v5749_v12 = vld [vmem:[#allocation10 + $0x228] sm:$0xff] }
 0x1ce   :  { %1129 = vmatpush2.msra.mxu0 %v5719_v4  ;;  %1200 = vmatpush2.msra.mxu1 %v5721_v60  ;;  %9277 = vst [vmem:[#allocation120_spill] sm:$0xff] %v5745_v22  ;;  %9278 = vst [vmem:[#allocation121_spill] sm:$0xff] %v5749_v12  ;;  %v5751_v4 = vld [vmem:[#allocation10 + $0x238] sm:$0xff]  ;;  %v5755_v60 = vld [vmem:[#allocation10 + $0x220] sm:$0xff] }
 0x1cf   :  { %1130 = vmatprep.subr.mxu0 %v5725_v1  ;;  %1201 = vmatprep.subr.mxu1 %v5727_v0  ;;  %9279 = vst [vmem:[#allocation122_spill] sm:$0xff] %v5751_v4  ;;  %9280 = vst [vmem:[#allocation123_spill] sm:$0xff] %v5755_v60  ;;  %v5757_v1 = vld [vmem:[#allocation10 + $0x230] sm:$0xff]  ;;  %v5761_v0 = vld [vmem:[#allocation10 + $0x208] sm:$0xff] }
 0x1d0   :  { %1131 = vmatpush2.msra.mxu0 %v5731_v59  ;;  %1202 = vmatpush2.msra.mxu1 %v5733_v51  ;;  %9281 = vst [vmem:[#allocation124_spill] sm:$0xff] %v5757_v1  ;;  %9282 = vst [vmem:[#allocation125_spill] sm:$0xff] %v5761_v0  ;;  %v5763_v59 = vld [vmem:[#allocation10 + $0x218] sm:$0xff]  ;;  %v5767_v51 = vld [vmem:[#allocation10 + $0x200] sm:$0xff] }
 0x1d1   :  { %1132 = vmatprep.subr.mxu0 %v5737_v56  ;;  %1203 = vmatprep.subr.mxu1 %v5739_v55  ;;  %9283 = vst [vmem:[#allocation126_spill] sm:$0xff] %v5763_v59  ;;  %9284 = vst [vmem:[#allocation127_spill] sm:$0xff] %v5767_v51  ;;  %v3819_v55 = vld [vmem:[%s8613_s7 + $0x8] sm:$0xff] }
 0x1d2   :  { %1133 = vmatpush2.msra.mxu0 %v5743_v50  ;;  %1204 = vmatpush2.msra.mxu1 %v5745_v22  ;;  %v5774_v50 = vld [vmem:[#allocation10 + $0x210] sm:$0xff] }
 0x1d3   :  { %1134 = vmatprep.subr.mxu0 %v5749_v12  ;;  %1205 = vmatprep.subr.mxu1 %v5751_v4  ;;  %9285 = vst [vmem:[#allocation128_spill] sm:$0xff] %v5774_v50  ;;  %v5782_v4 = vld [vmem:[#allocation9 + $0x1e8] sm:$0xff] }
 0x1d4   :  { %1135 = vmatpush2.msra.mxu0 %v5755_v60  ;;  %1206 = vmatpush2.msra.mxu1 %v5757_v1  ;;  %9286 = vst [vmem:[#allocation129_spill] sm:$0xff] %v5782_v4  ;;  %v5785_v1 = vld [vmem:[#allocation9 + $0x1f8] sm:$0xff] }
 0x1d5   :  { %1136 = vmatprep.subr.mxu0 %v5761_v0  ;;  %1207 = vmatprep.subr.mxu1 %v5763_v59  ;;  %9287 = vst [vmem:[#allocation130_spill] sm:$0xff] %v5785_v1  ;;  %v5788_v0 = vld [vmem:[#allocation9 + $0x1e0] sm:$0xff] }
 0x1d6   :  { %1137 = vmatpush2.msra.mxu0 %v5767_v51  ;;  %1138 = vmatprep.mubr.f32.mxu0 %v3819_v55  ;;  %9288 = vst [vmem:[#allocation131_spill] sm:$0xff] %v5788_v0  ;;  %v5791_v51 = vld [vmem:[#allocation9 + $0x1f0] sm:$0xff] }
 0x1d7   :  { %1208 = vmatpush2.msra.mxu1 %v5774_v50  ;;  %1209 = vmatprep.mubr.f32.mxu1 %v3819_v55  ;;  %9289 = vst [vmem:[#allocation132_spill] sm:$0xff] %v5791_v51  ;;  %v5794_v55 = vld [vmem:[#allocation9 + $0x1c8] sm:$0xff] }
 0x1d8   :  { %1139 = vmatmul.mubr.f32.vlgmr.msra.gmra.mxu0 %v5395_v57  ;;  %1210 = vmatmul.mubr.f32.vlgmr.msra.gmra.mxu1 %v5395_v57  ;;  %9290 = vst [vmem:[#allocation133_spill] sm:$0xff] %v5794_v55  ;;  %v5797_v57 = vld [vmem:[#allocation9 + $0x1d8] sm:$0xff] }
 0x1d9   :  { %1240 = vmatprep.subr.mxu0 %v5782_v4  ;;  %1311 = vmatprep.subr.mxu1 %v5785_v1  ;;  %9291 = vst [vmem:[#allocation134_spill] sm:$0xff] %v5797_v57  ;;  %v5800_v4 = vld [vmem:[#allocation9 + $0x1c0] sm:$0xff]  ;;  %v5803_v1 = vld [vmem:[#allocation9 + $0x1d0] sm:$0xff] }
 0x1da   :  { %1241 = vmatpush1.msra.mxu0 %v5788_v0  ;;  %1312 = vmatpush1.msra.mxu1 %v5791_v51  ;;  %9292 = vst [vmem:[#allocation135_spill] sm:$0xff] %v5800_v4  ;;  %9293 = vst [vmem:[#allocation136_spill] sm:$0xff] %v5803_v1  ;;  %v5806_v0 = vld [vmem:[#allocation9 + $0x1a8] sm:$0xff]  ;;  %v5809_v51 = vld [vmem:[#allocation9 + $0x1b8] sm:$0xff] }
 0x1db   :  { %1242 = vmatprep.subr.mxu0 %v5794_v55  ;;  %1313 = vmatprep.subr.mxu1 %v5797_v57  ;;  %9294 = vst [vmem:[#allocation137_spill] sm:$0xff] %v5806_v0  ;;  %9295 = vst [vmem:[#allocation138_spill] sm:$0xff] %v5809_v51  ;;  %v5812_v55 = vld [vmem:[#allocation9 + $0x1a0] sm:$0xff]  ;;  %v5815_v57 = vld [vmem:[#allocation9 + $0x1b0] sm:$0xff] }
 0x1dc   :  { %1243 = vmatpush1.msra.mxu0 %v5800_v4  ;;  %1314 = vmatpush1.msra.mxu1 %v5803_v1  ;;  %9296 = vst [vmem:[#allocation139_spill] sm:$0xff] %v5812_v55  ;;  %9297 = vst [vmem:[#allocation140_spill] sm:$0xff] %v5815_v57  ;;  %v5818_v4 = vld [vmem:[#allocation9 + $0x188] sm:$0xff]  ;;  %v5821_v1 = vld [vmem:[#allocation9 + $0x198] sm:$0xff] }
 0x1dd   :  { %1244 = vmatprep.subr.mxu0 %v5806_v0  ;;  %1315 = vmatprep.subr.mxu1 %v5809_v51  ;;  %9298 = vst [vmem:[#allocation141_spill] sm:$0xff] %v5818_v4  ;;  %9299 = vst [vmem:[#allocation142_spill] sm:$0xff] %v5821_v1  ;;  %v5824_v0 = vld [vmem:[#allocation9 + $0x180] sm:$0xff]  ;;  %v5827_v51 = vld [vmem:[#allocation9 + $0x190] sm:$0xff] }
 0x1de   :  { %1245 = vmatpush1.msra.mxu0 %v5812_v55  ;;  %1316 = vmatpush1.msra.mxu1 %v5815_v57  ;;  %9300 = vst [vmem:[#allocation143_spill] sm:$0xff] %v5824_v0  ;;  %9301 = vst [vmem:[#allocation144_spill] sm:$0xff] %v5827_v51  ;;  %v5830_v55 = vld [vmem:[#allocation9 + $0x168] sm:$0xff]  ;;  %v5833_v57 = vld [vmem:[#allocation9 + $0x178] sm:$0xff] }
 0x1df   :  { %1246 = vmatprep.subr.mxu0 %v5818_v4  ;;  %1317 = vmatprep.subr.mxu1 %v5821_v1  ;;  %9302 = vst [vmem:[#allocation145_spill] sm:$0xff] %v5830_v55  ;;  %9303 = vst [vmem:[#allocation146_spill] sm:$0xff] %v5833_v57  ;;  %v5836_v4 = vld [vmem:[#allocation9 + $0x160] sm:$0xff]  ;;  %v5839_v1 = vld [vmem:[#allocation9 + $0x170] sm:$0xff] }
 0x1e0   :  { %1247 = vmatpush1.msra.mxu0 %v5824_v0  ;;  %1318 = vmatpush1.msra.mxu1 %v5827_v51  ;;  %9304 = vst [vmem:[#allocation147_spill] sm:$0xff] %v5836_v4  ;;  %9305 = vst [vmem:[#allocation148_spill] sm:$0xff] %v5839_v1  ;;  %v5842_v0 = vld [vmem:[#allocation9 + $0x148] sm:$0xff]  ;;  %v5845_v51 = vld [vmem:[#allocation9 + $0x158] sm:$0xff] }
 0x1e1   :  { %1248 = vmatprep.subr.mxu0 %v5830_v55  ;;  %1319 = vmatprep.subr.mxu1 %v5833_v57  ;;  %9306 = vst [vmem:[#allocation149_spill] sm:$0xff] %v5842_v0  ;;  %9307 = vst [vmem:[#allocation150_spill] sm:$0xff] %v5845_v51  ;;  %v5848_v55 = vld [vmem:[#allocation9 + $0x140] sm:$0xff]  ;;  %v5851_v57 = vld [vmem:[#allocation9 + $0x150] sm:$0xff] }
 0x1e2   :  { %1249 = vmatpush1.msra.mxu0 %v5836_v4  ;;  %1320 = vmatpush1.msra.mxu1 %v5839_v1  ;;  %9308 = vst [vmem:[#allocation151_spill] sm:$0xff] %v5848_v55  ;;  %9309 = vst [vmem:[#allocation152_spill] sm:$0xff] %v5851_v57  ;;  %v5854_v4 = vld [vmem:[#allocation9 + $0x128] sm:$0xff]  ;;  %v5857_v1 = vld [vmem:[#allocation9 + $0x138] sm:$0xff] }
 0x1e3   :  { %1250 = vmatprep.subr.mxu0 %v5842_v0  ;;  %1321 = vmatprep.subr.mxu1 %v5845_v51  ;;  %9310 = vst [vmem:[#allocation153_spill] sm:$0xff] %v5854_v4  ;;  %9311 = vst [vmem:[#allocation154_spill] sm:$0xff] %v5857_v1  ;;  %v5860_v0 = vld [vmem:[#allocation9 + $0x120] sm:$0xff]  ;;  %v5863_v51 = vld [vmem:[#allocation9 + $0x130] sm:$0xff] }
 0x1e4   :  { %1251 = vmatpush1.msra.mxu0 %v5848_v55  ;;  %1322 = vmatpush1.msra.mxu1 %v5851_v57  ;;  %9312 = vst [vmem:[#allocation155_spill] sm:$0xff] %v5860_v0  ;;  %9313 = vst [vmem:[#allocation156_spill] sm:$0xff] %v5863_v51  ;;  %v5866_v55 = vld [vmem:[#allocation9 + $0x108] sm:$0xff]  ;;  %v5869_v57 = vld [vmem:[#allocation9 + $0x118] sm:$0xff] }
 0x1e5   :  { %1252 = vmatprep.subr.mxu0 %v5854_v4  ;;  %1323 = vmatprep.subr.mxu1 %v5857_v1  ;;  %9314 = vst [vmem:[#allocation157_spill] sm:$0xff] %v5866_v55  ;;  %9315 = vst [vmem:[#allocation158_spill] sm:$0xff] %v5869_v57  ;;  %v5872_v4 = vld [vmem:[#allocation9 + $0x100] sm:$0xff]  ;;  %v5875_v1 = vld [vmem:[#allocation9 + $0x110] sm:$0xff] }
 0x1e6   :  { %1253 = vmatpush1.msra.mxu0 %v5860_v0  ;;  %1324 = vmatpush1.msra.mxu1 %v5863_v51  ;;  %9316 = vst [vmem:[#allocation159_spill] sm:$0xff] %v5872_v4  ;;  %9317 = vst [vmem:[#allocation160_spill] sm:$0xff] %v5875_v1  ;;  %v5878_v0 = vld [vmem:[#allocation9 + $0xe8] sm:$0xff]  ;;  %v5881_v51 = vld [vmem:[#allocation9 + $0xf8] sm:$0xff] }
 0x1e7   :  { %1254 = vmatprep.subr.mxu0 %v5866_v55  ;;  %1325 = vmatprep.subr.mxu1 %v5869_v57  ;;  %9318 = vst [vmem:[#allocation161_spill] sm:$0xff] %v5878_v0  ;;  %9319 = vst [vmem:[#allocation162_spill] sm:$0xff] %v5881_v51  ;;  %v5884_v55 = vld [vmem:[#allocation9 + $0xe0] sm:$0xff]  ;;  %v5887_v57 = vld [vmem:[#allocation9 + $0xf0] sm:$0xff] }
 0x1e8   :  { %1255 = vmatpush1.msra.mxu0 %v5872_v4  ;;  %1326 = vmatpush1.msra.mxu1 %v5875_v1  ;;  %9320 = vst [vmem:[#allocation163_spill] sm:$0xff] %v5884_v55  ;;  %9321 = vst [vmem:[#allocation164_spill] sm:$0xff] %v5887_v57  ;;  %v5890_v4 = vld [vmem:[#allocation9 + $0xc8] sm:$0xff]  ;;  %v5893_v1 = vld [vmem:[#allocation9 + $0xd8] sm:$0xff] }
 0x1e9   :  { %1256 = vmatprep.subr.mxu0 %v5878_v0  ;;  %1327 = vmatprep.subr.mxu1 %v5881_v51  ;;  %9322 = vst [vmem:[#allocation165_spill] sm:$0xff] %v5890_v4  ;;  %9323 = vst [vmem:[#allocation166_spill] sm:$0xff] %v5893_v1  ;;  %v5896_v0 = vld [vmem:[#allocation9 + $0xc0] sm:$0xff]  ;;  %v5899_v51 = vld [vmem:[#allocation9 + $0xd0] sm:$0xff] }
 0x1ea   :  { %1257 = vmatpush1.msra.mxu0 %v5884_v55  ;;  %1328 = vmatpush1.msra.mxu1 %v5887_v57  ;;  %9324 = vst [vmem:[#allocation167_spill] sm:$0xff] %v5896_v0  ;;  %9325 = vst [vmem:[#allocation168_spill] sm:$0xff] %v5899_v51  ;;  %v5902_v55 = vld [vmem:[#allocation9 + $0xa8] sm:$0xff]  ;;  %v5905_v57 = vld [vmem:[#allocation9 + $0xb8] sm:$0xff] }
 0x1eb   :  { %1258 = vmatprep.subr.mxu0 %v5890_v4  ;;  %1329 = vmatprep.subr.mxu1 %v5893_v1  ;;  %9326 = vst [vmem:[#allocation169_spill] sm:$0xff] %v5902_v55  ;;  %9327 = vst [vmem:[#allocation170_spill] sm:$0xff] %v5905_v57  ;;  %v5908_v4 = vld [vmem:[#allocation9 + $0xa0] sm:$0xff]  ;;  %v5911_v1 = vld [vmem:[#allocation9 + $0xb0] sm:$0xff] }
 0x1ec   :  { %1259 = vmatpush1.msra.mxu0 %v5896_v0  ;;  %1330 = vmatpush1.msra.mxu1 %v5899_v51  ;;  %9328 = vst [vmem:[#allocation171_spill] sm:$0xff] %v5908_v4  ;;  %9329 = vst [vmem:[#allocation172_spill] sm:$0xff] %v5911_v1  ;;  %v5914_v0 = vld [vmem:[#allocation9 + $0x88] sm:$0xff]  ;;  %v5917_v51 = vld [vmem:[#allocation9 + $0x98] sm:$0xff] }
 0x1ed   :  { %1260 = vmatprep.subr.mxu0 %v5902_v55  ;;  %1331 = vmatprep.subr.mxu1 %v5905_v57  ;;  %9330 = vst [vmem:[#allocation173_spill] sm:$0xff] %v5914_v0  ;;  %9331 = vst [vmem:[#allocation174_spill] sm:$0xff] %v5917_v51  ;;  %v5920_v55 = vld [vmem:[#allocation9 + $0x80] sm:$0xff]  ;;  %v5923_v57 = vld [vmem:[#allocation9 + $0x90] sm:$0xff] }
 0x1ee   :  { %1261 = vmatpush1.msra.mxu0 %v5908_v4  ;;  %1332 = vmatpush1.msra.mxu1 %v5911_v1  ;;  %9332 = vst [vmem:[#allocation175_spill] sm:$0xff] %v5920_v55  ;;  %9333 = vst [vmem:[#allocation176_spill] sm:$0xff] %v5923_v57  ;;  %v5926_v4 = vld [vmem:[#allocation9 + $0x68] sm:$0xff]  ;;  %v5929_v1 = vld [vmem:[#allocation9 + $0x78] sm:$0xff] }
 0x1ef   :  { %1262 = vmatprep.subr.mxu0 %v5914_v0  ;;  %1333 = vmatprep.subr.mxu1 %v5917_v51  ;;  %9334 = vst [vmem:[#allocation177_spill] sm:$0xff] %v5926_v4  ;;  %9335 = vst [vmem:[#allocation178_spill] sm:$0xff] %v5929_v1  ;;  %v5932_v0 = vld [vmem:[#allocation9 + $0x60] sm:$0xff]  ;;  %v5935_v51 = vld [vmem:[#allocation9 + $0x70] sm:$0xff] }
 0x1f0   :  { %1263 = vmatpush1.msra.mxu0 %v5920_v55  ;;  %1334 = vmatpush1.msra.mxu1 %v5923_v57  ;;  %9336 = vst [vmem:[#allocation179_spill] sm:$0xff] %v5932_v0  ;;  %9337 = vst [vmem:[#allocation180_spill] sm:$0xff] %v5935_v51  ;;  %v5938_v55 = vld [vmem:[#allocation9 + $0x48] sm:$0xff]  ;;  %v5941_v57 = vld [vmem:[#allocation9 + $0x58] sm:$0xff] }
 0x1f1   :  { %1264 = vmatprep.subr.mxu0 %v5926_v4  ;;  %1335 = vmatprep.subr.mxu1 %v5929_v1  ;;  %9338 = vst [vmem:[#allocation181_spill] sm:$0xff] %v5938_v55  ;;  %9339 = vst [vmem:[#allocation182_spill] sm:$0xff] %v5941_v57  ;;  %v5944_v4 = vld [vmem:[#allocation9 + $0x40] sm:$0xff]  ;;  %v5947_v1 = vld [vmem:[#allocation9 + $0x50] sm:$0xff] }
 0x1f2   :  { %1265 = vmatpush1.msra.mxu0 %v5932_v0  ;;  %1336 = vmatpush1.msra.mxu1 %v5935_v51  ;;  %9340 = vst [vmem:[#allocation183_spill] sm:$0xff] %v5944_v4  ;;  %9341 = vst [vmem:[#allocation184_spill] sm:$0xff] %v5947_v1  ;;  %v5950_v0 = vld [vmem:[#allocation9 + $0x28] sm:$0xff]  ;;  %v5953_v51 = vld [vmem:[#allocation9 + $0x38] sm:$0xff] }
 0x1f3   :  { %1266 = vmatprep.subr.mxu0 %v5938_v55  ;;  %1337 = vmatprep.subr.mxu1 %v5941_v57  ;;  %9342 = vst [vmem:[#allocation185_spill] sm:$0xff] %v5950_v0  ;;  %9343 = vst [vmem:[#allocation186_spill] sm:$0xff] %v5953_v51  ;;  %v5956_v55 = vld [vmem:[#allocation9 + $0x20] sm:$0xff]  ;;  %v5959_v57 = vld [vmem:[#allocation9 + $0x30] sm:$0xff] }
 0x1f4   :  { %1267 = vmatpush1.msra.mxu0 %v5944_v4  ;;  %1338 = vmatpush1.msra.mxu1 %v5947_v1  ;;  %9344 = vst [vmem:[#allocation187_spill] sm:$0xff] %v5956_v55  ;;  %9345 = vst [vmem:[#allocation188_spill] sm:$0xff] %v5959_v57  ;;  %v5962_v4 = vld [vmem:[#allocation9 + $0x8] sm:$0xff]  ;;  %v5965_v1 = vld [vmem:[#allocation9 + $0x18] sm:$0xff] }
 0x1f5   :  { %1268 = vmatprep.subr.mxu0 %v5950_v0  ;;  %1339 = vmatprep.subr.mxu1 %v5953_v51  ;;  %9346 = vst [vmem:[#allocation189_spill] sm:$0xff] %v5962_v4  ;;  %9347 = vst [vmem:[#allocation190_spill] sm:$0xff] %v5965_v1  ;;  %v5968_v0 = vld [vmem:[#allocation9] sm:$0xff]  ;;  %v5972_v51 = vld [vmem:[#allocation9 + $0x10] sm:$0xff] }
 0x1f6   :  { %1269 = vmatpush1.msra.mxu0 %v5956_v55  ;;  %1340 = vmatpush1.msra.mxu1 %v5959_v57  ;;  %9348 = vst [vmem:[#allocation191_spill] sm:$0xff] %v5968_v0  ;;  %9349 = vst [vmem:[#allocation192_spill] sm:$0xff] %v5972_v51 }
 0x1f7   :  { %1270 = vmatprep.subr.mxu0 %v5962_v4  ;;  %1341 = vmatprep.subr.mxu1 %v5965_v1 }
 0x1f8   :  { %1271 = vmatpush1.msra.mxu0 %v5968_v0  ;;  %1304 = vmatprep.mubr.f32.mxu0 %v9171_v41 }
 0x1f9   :  { %1342 = vmatpush1.msra.mxu1 %v5972_v51  ;;  %1375 = vmatprep.mubr.f32.mxu1 %v9171_v41 }
 0x1fa   :  { %1410 = vmatprep.subr.mxu0 %v5280_v13  ;;  %1481 = vmatprep.subr.mxu1 %v5282_v14 }
 0x257   :  { %v820_v4 = vpop.f32.mrf.mxu0  ;;  %v891_v0 = vpop.f32.mrf.mxu1 }
 0x258   :  { %v896_v57 = vadd.f32 %v820_v4, %v5313_v39  ;;  %v898_v41 = vadd.f32 %v891_v0, %v5316_v40 }
 0x259   :  { %v822_v1 = vpop.f32.mrf.mxu0  ;;  %v893_v60 = vpop.f32.mrf.mxu1 }
 0x25a   :  { %v3824_v55 = vmul.f32 -1.442695, %v896_v57  ;;  %v897_v50 = vadd.f32 %v822_v1, %v5318_v46  ;;  %v899_v51 = vadd.f32 %v893_v60, %v5321_v47 }
 0x25c   :  { %3898 = vpow2.f32 %v3824_v55  ;;  %v3825_v59 = vmul.f32 -1.442695, %v897_v50  ;;  %v3826_v12 = vmul.f32 -1.442695, %v899_v51 }
 0x25e   :  { %3900 = vpow2.f32 %v3825_v59 }
 0x25f   :  { %3902 = vtanh.f32 %v898_v41 }
 0x260   :  { %3904 = vpow2.f32 %v3826_v12 }
 0x269   :  { %v3899_v13 = vpop.eup %3898 }
 0x26a   :  { %v906_v22 = vadd.f32 1.0, %v3899_v13  ;;  %v9380_v13 = vld [vmem:[#allocation70_spill] sm:$0xff] }
 0x26b   :  { %v3901_v14 = vpop.eup %3900 }
 0x26c   :  { %3906 = vrcp.f32 %v906_v22  ;;  %v907_v39 = vadd.f32 1.0, %v3901_v14  ;;  %v3903_v4 = vpop.eup %3902  ;;  %v1052_v22 = vld [vmem:[%s8612_s6] sm:$0xf]  ;;  %v9381_v14 = vld [vmem:[#allocation71_spill] sm:$0xff] }
 0x26d   :  { %v3905_v46 = vpop.eup %3904  ;;  %v6004_v60 = vrot.slane %v1052_v22, %v5290_v6  ;;  %v6011_v0 = vrot.slane %v1052_v22, %v5301_v28  ;;  %v6381_v6 = vld [vmem:[#allocation10 + $0x70] sm:$0xff] }
 0x26e   :  { %3908 = vrcp.f32 %v907_v39  ;;  %v916_v59 = vadd.f32 1.0, %v3905_v46  ;;  %v9382_v39 = vld [vmem:[#allocation72_spill] sm:$0xff]  ;;  %v9384_v46 = vld [vmem:[#allocation74_spill] sm:$0xff] }
 0x26f   :  { %9350 = vst [vmem:[#allocation193_spill] sm:$0xff] %v6004_v60  ;;  %9351 = vst [vmem:[#allocation194_spill] sm:$0xff] %v6011_v0 }
 0x270   :  { %3910 = vrcp.f32 %v916_v59  ;;  %v9388_v59 = vld [vmem:[#allocation78_spill] sm:$0xff] }
 0x279   :  { %v3907_v1 = vpop.eup %3906 }
 0x27a   :  { %v920_v55 = vmul.f32 %v3907_v1, %v3903_v4  ;;  %v9383_v4 = vld [vmem:[#allocation73_spill] sm:$0xff]  ;;  %v9385_v1 = vld [vmem:[#allocation75_spill] sm:$0xff] }
 0x27b   :  { %v3909_v50 = vpop.eup %3908 }
 0x27c   :  { %v919_v57 = vmul.f32 %v3909_v50, %v5392_v44  ;;  %v9387_v50 = vld [vmem:[#allocation77_spill] sm:$0xff] }
 0x27d   :  { %v3911_v40 = vpop.eup %3910 }
 0x27e   :  { %v5983_v47 = vadd.f32 %v920_v55, %v919_v57  ;;  %v9386_v55 = vld [vmem:[#allocation76_spill] sm:$0xff]  ;;  %v9389_v57 = vld [vmem:[#allocation79_spill] sm:$0xff] }
 0x280   :  { %3912 = vtanh.f32 %v5983_v47 }
 0x28d   :  { %v3913_v41 = vpop.eup %3912 }
 0x28e   :  { %v5986_v51 = vmul.f32 %v3913_v41, %v3911_v40  ;;  %v9390_v40 = vld [vmem:[#allocation80_spill] sm:$0xff]  ;;  %v9391_v41 = vld [vmem:[#allocation81_spill] sm:$0xff] }
 0x290   :  { %1305 = vmatmul.mubr.f32.vlgmr.msra.gmra.mxu0 %v5986_v51  ;;  %1376 = vmatmul.mubr.f32.vlgmr.msra.gmra.mxu1 %v5986_v51 }
 0x291   :  { %1411 = vmatpush1.msra.mxu0 %v5397_v58  ;;  %1482 = vmatpush1.msra.mxu1 %v5399_v61 }
 0x292   :  { %1412 = vmatprep.subr.mxu0 %v5401_v62  ;;  %1483 = vmatprep.subr.mxu1 %v5403_v2 }
 0x293   :  { %1413 = vmatpush1.msra.mxu0 %v5407_v3  ;;  %1484 = vmatpush1.msra.mxu1 %v5409_v7  ;;  %v6032_v7 = vrot.slane %v1052_v22, %v5303_v29  ;;  %v6375_v29 = vld [vmem:[#allocation10 + $0x78] sm:$0xff] }
 0x294   :  { %1414 = vmatprep.subr.mxu0 %v5413_v8  ;;  %1485 = vmatprep.subr.mxu1 %v5415_v18 }
 0x295   :  { %1415 = vmatpush1.msra.mxu0 %v5419_v21  ;;  %1486 = vmatpush1.msra.mxu1 %v5421_v32  ;;  %9352 = vst [vmem:[#allocation195_spill] sm:$0xff] %v6032_v7  ;;  %v9364_v21 = vld [vmem:[#allocation54_spill] sm:$0xff]  ;;  %v9365_v32 = vld [vmem:[#allocation55_spill] sm:$0xff] }
 0x296   :  { %1416 = vmatprep.subr.mxu0 %v5425_v33  ;;  %1487 = vmatprep.subr.mxu1 %v5427_v19  ;;  %v9366_v19 = vld [vmem:[#allocation56_spill] sm:$0xff]  ;;  %9516 = vst [vmem:[#allocation54_spill] sm:$0xff] %v6381_v6 }
 0x297   :  { %1417 = vmatpush1.msra.mxu0 %v5431_v30  ;;  %1488 = vmatpush1.msra.mxu1 %v5433_v54  ;;  %v9367_v30 = vld [vmem:[#allocation57_spill] sm:$0xff] }
 0x298   :  { %v1140_v12 = vpop.f32.mrf.mxu0  ;;  %1418 = vmatprep.subr.mxu0 %v5437_v24  ;;  %1489 = vmatprep.subr.mxu1 %v5439_v37  ;;  %v1211_v2 = vpop.f32.mrf.mxu1  ;;  %v9368_v24 = vld [vmem:[#allocation58_spill] sm:$0xff]  ;;  %v9369_v37 = vld [vmem:[#allocation59_spill] sm:$0xff] }
 0x299   :  { %v1141_v44 = vadd.f32 %v1140_v12, %v6004_v60  ;;  %1419 = vmatpush1.msra.mxu0 %v5443_v63  ;;  %1490 = vmatpush1.msra.mxu1 %v5445_v10  ;;  %v9370_v10 = vld [vmem:[#allocation60_spill] sm:$0xff]  ;;  %v9393_v12 = vld [vmem:[#allocation83_spill] sm:$0xff] }
 0x29a   :  { %v1142_v58 = vpop.f32.mrf.mxu0  ;;  %1420 = vmatprep.subr.mxu0 %v5449_v11  ;;  %1491 = vmatprep.subr.mxu1 %v5451_v25  ;;  %v1213_v8 = vpop.f32.mrf.mxu1  ;;  %v9371_v11 = vld [vmem:[#allocation61_spill] sm:$0xff]  ;;  %v9372_v25 = vld [vmem:[#allocation62_spill] sm:$0xff] }
 0x29b   :  { %v3827_v61 = vmul.f32 -1.442695, %v1141_v44  ;;  %v1143_v62 = vadd.f32 %v1142_v58, %v6011_v0  ;;  %1421 = vmatpush1.msra.mxu0 %v5455_v38  ;;  %1492 = vmatpush1.msra.mxu1 %v5457_v23  ;;  %v9373_v38 = vld [vmem:[#allocation63_spill] sm:$0xff]  ;;  %v9374_v23 = vld [vmem:[#allocation64_spill] sm:$0xff] }
 0x29c   :  { %1422 = vmatprep.subr.mxu0 %v5461_v35  ;;  %1493 = vmatprep.subr.mxu1 %v5463_v20  ;;  %v9375_v35 = vld [vmem:[#allocation65_spill] sm:$0xff]  ;;  %v9376_v20 = vld [vmem:[#allocation66_spill] sm:$0xff]  ;;  %v9394_v58 = vld [vmem:[#allocation84_spill] sm:$0xff] }
 0x29d   :  { %3914 = vpow2.f32 %v3827_v61  ;;  %v3828_v3 = vmul.f32 -1.442695, %v1143_v62  ;;  %1423 = vmatpush1.msra.mxu0 %v5467_v31  ;;  %1494 = vmatpush1.msra.mxu1 %v5469_v48  ;;  %v9377_v31 = vld [vmem:[#allocation67_spill] sm:$0xff]  ;;  %v9378_v48 = vld [vmem:[#allocation68_spill] sm:$0xff]  ;;  %v9395_v61 = vld [vmem:[#allocation85_spill] sm:$0xff] }
 0x29e   :  { %1424 = vmatprep.subr.mxu0 %v5473_v53  ;;  %1495 = vmatprep.subr.mxu1 %v5475_v43  ;;  %v1214_v43 = vadd.f32 %v1213_v8, %v6032_v7  ;;  %v9379_v53 = vld [vmem:[#allocation69_spill] sm:$0xff]  ;;  %v9397_v8 = vld [vmem:[#allocation87_spill] sm:$0xff] }
 0x29f   :  { %3916 = vpow2.f32 %v3828_v3  ;;  %1425 = vmatpush1.msra.mxu0 %v5479_v52  ;;  %1496 = vmatpush1.msra.mxu1 %v5481_v49  ;;  %v9360_v49 = vld [vmem:[#allocation50_spill] sm:$0xff] }
 0x2a0   :  { %1426 = vmatprep.subr.mxu0 %v5485_v36  ;;  %1497 = vmatprep.subr.mxu1 %v5487_v34  ;;  %v9353_v34 = vld [vmem:[#allocation45_spill] sm:$0xff]  ;;  %v3829_v36 = vmul.f32 -1.442695, %v1214_v43  ;;  %v9396_v3 = vld [vmem:[#allocation86_spill] sm:$0xff] }
 0x2a1   :  { %1427 = vmatpush1.msra.mxu0 %v5491_v16  ;;  %1498 = vmatpush1.msra.mxu1 %v5493_v15  ;;  %v9354_v16 = vld [vmem:[#allocation18_spill] sm:$0xff] }
 0x2a2   :  { %1428 = vmatprep.subr.mxu0 %v5497_v9  ;;  %1499 = vmatprep.subr.mxu1 %v5499_v27  ;;  %v6048_v15 = vrot.slane %v1052_v22, %v9354_v16  ;;  %v9356_v9 = vld [vmem:[#allocation46_spill] sm:$0xff]  ;;  %v9357_v27 = vld [vmem:[#allocation47_spill] sm:$0xff]  ;;  %3918 = vpow2.f32 %v3829_v36  ;;  %v6378_v16 = vld [vmem:[#allocation10 + $0x60] sm:$0xff] }
 0x2a3   :  { %1429 = vmatpush1.msra.mxu0 %v5503_v45  ;;  %1500 = vmatpush1.msra.mxu1 %v5505_v42  ;;  %v9358_v45 = vld [vmem:[#allocation48_spill] sm:$0xff]  ;;  %v9359_v42 = vld [vmem:[#allocation49_spill] sm:$0xff]  ;;  %v9392_v22 = vld [vmem:[#allocation82_spill] sm:$0xff] }
 0x2a4   :  { %1430 = vmatprep.subr.mxu0 %v5509_v26  ;;  %1501 = vmatprep.subr.mxu1 %v5511_v5  ;;  %9355 = vst [vmem:[#allocation45_spill] sm:$0xff] %v6048_v15  ;;  %v9361_v26 = vld [vmem:[#allocation51_spill] sm:$0xff]  ;;  %v9362_v5 = vld [vmem:[#allocation52_spill] sm:$0xff]  ;;  %v1212_v18 = vadd.f32 %v1211_v2, %v6048_v15  ;;  %v3820_v2 = vld [vmem:[%s8614_s8 + $0x8] sm:$0xff] }
 0x2a5   :  { %1431 = vmatpush1.msra.mxu0 %v5515_v17  ;;  %1502 = vmatpush1.msra.mxu1 %v9353_v34  ;;  %v9363_v17 = vld [vmem:[#allocation53_spill] sm:$0xff]  ;;  %v9398_v34 = vld [vmem:[#allocation88_spill] sm:$0xff]  ;;  %v9401_v36 = vld [vmem:[#allocation91_spill] sm:$0xff]  ;;  %9514 = vst [vmem:[#allocation52_spill] sm:$0xff] %v6375_v29 }
 0x2a6   :  { %1432 = vmatprep.subr.mxu0 %v9356_v9  ;;  %1503 = vmatprep.subr.mxu1 %v9357_v27  ;;  %v9399_v9 = vld [vmem:[#allocation89_spill] sm:$0xff]  ;;  %9515 = vst [vmem:[#allocation53_spill] sm:$0xff] %v6378_v16 }
 0x2a7   :  { %1433 = vmatpush1.msra.mxu0 %v9358_v45  ;;  %1504 = vmatpush1.msra.mxu1 %v9359_v42  ;;  %v9400_v42 = vld [vmem:[#allocation90_spill] sm:$0xff] }
 0x2a8   :  { %1434 = vmatprep.subr.mxu0 %v9360_v49  ;;  %1505 = vmatprep.subr.mxu1 %v9361_v26 }
 0x2a9   :  { %1435 = vmatpush1.msra.mxu0 %v9362_v5  ;;  %1506 = vmatpush1.msra.mxu1 %v9363_v17  ;;  %v9402_v5 = vld [vmem:[#allocation92_spill] sm:$0xff]  ;;  %v9403_v17 = vld [vmem:[#allocation93_spill] sm:$0xff] }
 0x2aa   :  { %v3915_v52 = vpop.eup %3914  ;;  %1436 = vmatprep.subr.mxu0 %v9364_v21  ;;  %1507 = vmatprep.subr.mxu1 %v9365_v32  ;;  %v9406_v32 = vld [vmem:[#allocation96_spill] sm:$0xff] }
 0x2ab   :  { %v1222_v33 = vadd.f32 1.0, %v3915_v52  ;;  %1437 = vmatpush1.msra.mxu0 %v9366_v19  ;;  %1508 = vmatpush1.msra.mxu1 %v9367_v30  ;;  %v9404_v52 = vld [vmem:[#allocation94_spill] sm:$0xff]  ;;  %v9409_v30 = vld [vmem:[#allocation99_spill] sm:$0xff] }
 0x2ac   :  { %v3917_v54 = vpop.eup %3916  ;;  %1438 = vmatprep.subr.mxu0 %v9368_v24  ;;  %1509 = vmatprep.subr.mxu1 %v9369_v37  ;;  %v9408_v19 = vld [vmem:[#allocation98_spill] sm:$0xff]  ;;  %v9411_v24 = vld [vmem:[#allocation101_spill] sm:$0xff] }
 0x2ad   :  { %3920 = vrcp.f32 %v1222_v33  ;;  %v1223_v63 = vadd.f32 1.0, %v3917_v54  ;;  %1439 = vmatpush1.msra.mxu0 %v9370_v10  ;;  %1510 = vmatpush1.msra.mxu1 %v9371_v11  ;;  %v9407_v33 = vld [vmem:[#allocation97_spill] sm:$0xff]  ;;  %v9410_v54 = vld [vmem:[#allocation100_spill] sm:$0xff]  ;;  %v9412_v37 = vld [vmem:[#allocation102_spill] sm:$0xff] }
 0x2ae   :  { %3922 = vtanh.f32 %v1212_v18  ;;  %1440 = vmatprep.subr.mxu0 %v9372_v25  ;;  %1511 = vmatprep.subr.mxu1 %v9373_v38  ;;  %v9405_v18 = vld [vmem:[#allocation95_spill] sm:$0xff]  ;;  %v9414_v10 = vld [vmem:[#allocation104_spill] sm:$0xff]  ;;  %v9415_v11 = vld [vmem:[#allocation105_spill] sm:$0xff] }
 0x2af   :  { %3924 = vrcp.f32 %v1223_v63  ;;  %1441 = vmatpush1.msra.mxu0 %v9374_v23  ;;  %1512 = vmatpush1.msra.mxu1 %v9375_v35  ;;  %v3919_v44 = vpop.eup %3918  ;;  %v9413_v63 = vld [vmem:[#allocation103_spill] sm:$0xff]  ;;  %v9416_v25 = vld [vmem:[#allocation106_spill] sm:$0xff]  ;;  %v9418_v23 = vld [vmem:[#allocation108_spill] sm:$0xff] }
 0x2b0   :  { %1442 = vmatprep.subr.mxu0 %v9376_v20  ;;  %1513 = vmatprep.subr.mxu1 %v9377_v31  ;;  %v1232_v45 = vadd.f32 1.0, %v3919_v44  ;;  %v9417_v38 = vld [vmem:[#allocation107_spill] sm:$0xff]  ;;  %v9419_v35 = vld [vmem:[#allocation109_spill] sm:$0xff]  ;;  %v9420_v20 = vld [vmem:[#allocation110_spill] sm:$0xff] }
 0x2b1   :  { %1443 = vmatpush2.msra.mxu0 %v9378_v48  ;;  %1514 = vmatpush2.msra.mxu1 %v9379_v53  ;;  %v9421_v31 = vld [vmem:[#allocation111_spill] sm:$0xff]  ;;  %v9422_v48 = vld [vmem:[#allocation112_spill] sm:$0xff]  ;;  %v9423_v53 = vld [vmem:[#allocation113_spill] sm:$0xff] }
 0x2b2   :  { %1444 = vmatprep.subr.mxu0 %v9380_v13  ;;  %1515 = vmatprep.subr.mxu1 %v9381_v14  ;;  %3926 = vrcp.f32 %v1232_v45  ;;  %v9424_v13 = vld [vmem:[#allocation114_spill] sm:$0xff]  ;;  %v9425_v14 = vld [vmem:[#allocation115_spill] sm:$0xff]  ;;  %v9448_v45 = vld [vmem:[#allocation137_spill] sm:$0xff] }
 0x2b3   :  { %1445 = vmatpush2.msra.mxu0 %v9382_v39  ;;  %1516 = vmatpush2.msra.mxu1 %v9383_v4  ;;  %v9426_v39 = vld [vmem:[#allocation116_spill] sm:$0xff]  ;;  %v9427_v4 = vld [vmem:[#allocation117_spill] sm:$0xff]  ;;  %v9436_v44 = vld [vmem:[#allocation126_spill] sm:$0xff] }
 0x2b4   :  { %1446 = vmatprep.subr.mxu0 %v9384_v46  ;;  %1517 = vmatprep.subr.mxu1 %v9385_v1  ;;  %v9428_v46 = vld [vmem:[#allocation118_spill] sm:$0xff]  ;;  %v9429_v1 = vld [vmem:[#allocation119_spill] sm:$0xff] }
 0x2b5   :  { %1447 = vmatpush2.msra.mxu0 %v9386_v55  ;;  %1518 = vmatpush2.msra.mxu1 %v9387_v50  ;;  %v9430_v55 = vld [vmem:[#allocation120_spill] sm:$0xff]  ;;  %v9431_v50 = vld [vmem:[#allocation121_spill] sm:$0xff] }
 0x2b6   :  { %1448 = vmatprep.subr.mxu0 %v9388_v59  ;;  %1519 = vmatprep.subr.mxu1 %v9389_v57  ;;  %v9432_v59 = vld [vmem:[#allocation122_spill] sm:$0xff] }
 0x2b7   :  { %1449 = vmatpush2.msra.mxu0 %v9390_v40  ;;  %1520 = vmatpush2.msra.mxu1 %v9391_v41  ;;  %v9433_v40 = vld [vmem:[#allocation123_spill] sm:$0xff]  ;;  %v9434_v41 = vld [vmem:[#allocation124_spill] sm:$0xff] }
 0x2b8   :  { %1450 = vmatprep.subr.mxu0 %v9392_v22  ;;  %1521 = vmatprep.subr.mxu1 %v9393_v12  ;;  %v9435_v12 = vld [vmem:[#allocation125_spill] sm:$0xff] }
 0x2b9   :  { %1451 = vmatpush2.msra.mxu0 %v9394_v58  ;;  %1522 = vmatpush2.msra.mxu1 %v9395_v61  ;;  %v9439_v61 = vld [vmem:[#allocation128_spill] sm:$0xff] }
 0x2ba   :  { %v3921_v62 = vpop.eup %3920  ;;  %1452 = vmatprep.subr.mxu0 %v9396_v3  ;;  %1523 = vmatprep.subr.mxu1 %v9397_v8  ;;  %v9442_v3 = vld [vmem:[#allocation131_spill] sm:$0xff]  ;;  %v9443_v8 = vld [vmem:[#allocation132_spill] sm:$0xff] }
 0x2bb   :  { %v3923_v43 = vpop.eup %3922  ;;  %1453 = vmatpush2.msra.mxu0 %v9398_v34  ;;  %1524 = vmatpush2.msra.mxu1 %v9399_v9  ;;  %v9445_v34 = vld [vmem:[#allocation134_spill] sm:$0xff]  ;;  %v9446_v9 = vld [vmem:[#allocation135_spill] sm:$0xff] }
 0x2bc   :  { %v3925_v27 = vpop.eup %3924  ;;  %1454 = vmatprep.subr.mxu0 %v9400_v42  ;;  %1525 = vmatprep.subr.mxu1 %v9401_v36  ;;  %v1236_v49 = vmul.f32 %v3923_v43, %v3921_v62  ;;  %v9440_v62 = vld [vmem:[#allocation129_spill] sm:$0xff]  ;;  %v9449_v42 = vld [vmem:[#allocation138_spill] sm:$0xff]  ;;  %v9450_v36 = vld [vmem:[#allocation139_spill] sm:$0xff] }
 0x2bd   :  { %v1235_v26 = vmul.f32 %v3925_v27, %v3820_v2  ;;  %1455 = vmatpush2.msra.mxu0 %v9402_v5  ;;  %1526 = vmatpush2.msra.mxu1 %v9403_v17  ;;  %v9441_v2 = vld [vmem:[#allocation130_spill] sm:$0xff]  ;;  %v9444_v43 = vld [vmem:[#allocation133_spill] sm:$0xff]  ;;  %v9447_v27 = vld [vmem:[#allocation136_spill] sm:$0xff] }
 0x2be   :  { %1456 = vmatprep.subr.mxu0 %v9404_v52  ;;  %1527 = vmatprep.subr.mxu1 %v9405_v18  ;;  %v9454_v5 = vld [vmem:[#allocation143_spill] sm:$0xff]  ;;  %v9455_v17 = vld [vmem:[#allocation144_spill] sm:$0xff]  ;;  %v9456_v52 = vld [vmem:[#allocation145_spill] sm:$0xff] }
 0x2bf   :  { %v6104_v21 = vadd.f32 %v1236_v49, %v1235_v26  ;;  %1457 = vmatpush2.msra.mxu0 %v9406_v32  ;;  %1528 = vmatpush2.msra.mxu1 %v9407_v33  ;;  %v3927_v57 = vpop.eup %3926  ;;  %v9451_v49 = vld [vmem:[#allocation140_spill] sm:$0xff]  ;;  %v9453_v26 = vld [vmem:[#allocation142_spill] sm:$0xff]  ;;  %v9458_v32 = vld [vmem:[#allocation147_spill] sm:$0xff] }
 0x2c0   :  { %1458 = vmatprep.subr.mxu0 %v9408_v19  ;;  %1529 = vmatprep.subr.mxu1 %v9409_v30  ;;  %v9457_v18 = vld [vmem:[#allocation146_spill] sm:$0xff]  ;;  %v9459_v33 = vld [vmem:[#allocation148_spill] sm:$0xff]  ;;  %v9460_v19 = vld [vmem:[#allocation149_spill] sm:$0xff] }
 0x2c1   :  { %1459 = vmatpush2.msra.mxu0 %v9410_v54  ;;  %1530 = vmatpush2.msra.mxu1 %v9411_v24  ;;  %3928 = vtanh.f32 %v6104_v21  ;;  %v9461_v30 = vld [vmem:[#allocation150_spill] sm:$0xff]  ;;  %v9462_v54 = vld [vmem:[#allocation151_spill] sm:$0xff]  ;;  %v9463_v24 = vld [vmem:[#allocation152_spill] sm:$0xff] }
 0x2c2   :  { %1460 = vmatprep.subr.mxu0 %v9412_v37  ;;  %1531 = vmatprep.subr.mxu1 %v9413_v63  ;;  %v9464_v37 = vld [vmem:[#allocation153_spill] sm:$0xff]  ;;  %v9465_v63 = vld [vmem:[#allocation154_spill] sm:$0xff] }
 0x2c3   :  { %1461 = vmatpush2.msra.mxu0 %v9414_v10  ;;  %1532 = vmatpush2.msra.mxu1 %v9415_v11  ;;  %v9466_v10 = vld [vmem:[#allocation155_spill] sm:$0xff]  ;;  %v9467_v11 = vld [vmem:[#allocation156_spill] sm:$0xff] }
 0x2c4   :  { %1462 = vmatprep.subr.mxu0 %v9416_v25  ;;  %1533 = vmatprep.subr.mxu1 %v9417_v38  ;;  %v9468_v25 = vld [vmem:[#allocation157_spill] sm:$0xff]  ;;  %v9469_v38 = vld [vmem:[#allocation158_spill] sm:$0xff] }
 0x2c5   :  { %1463 = vmatpush2.msra.mxu0 %v9418_v23  ;;  %1534 = vmatpush2.msra.mxu1 %v9419_v35  ;;  %v9470_v23 = vld [vmem:[#allocation159_spill] sm:$0xff]  ;;  %v9471_v35 = vld [vmem:[#allocation160_spill] sm:$0xff] }
 0x2c6   :  { %1464 = vmatprep.subr.mxu0 %v9420_v20  ;;  %1535 = vmatprep.subr.mxu1 %v9421_v31  ;;  %v9472_v20 = vld [vmem:[#allocation161_spill] sm:$0xff]  ;;  %v9473_v31 = vld [vmem:[#allocation162_spill] sm:$0xff] }
 0x2c7   :  { %1465 = vmatpush2.msra.mxu0 %v9422_v48  ;;  %1536 = vmatpush2.msra.mxu1 %v9423_v53  ;;  %v9474_v48 = vld [vmem:[#allocation163_spill] sm:$0xff]  ;;  %v9475_v53 = vld [vmem:[#allocation164_spill] sm:$0xff] }
 0x2c8   :  { %1466 = vmatprep.subr.mxu0 %v9424_v13  ;;  %1537 = vmatprep.subr.mxu1 %v9425_v14  ;;  %v9476_v13 = vld [vmem:[#allocation165_spill] sm:$0xff]  ;;  %v9477_v14 = vld [vmem:[#allocation166_spill] sm:$0xff] }
 0x2c9   :  { %1467 = vmatpush2.msra.mxu0 %v9426_v39  ;;  %1538 = vmatpush2.msra.mxu1 %v9427_v4  ;;  %v9478_v39 = vld [vmem:[#allocation167_spill] sm:$0xff]  ;;  %v9479_v4 = vld [vmem:[#allocation168_spill] sm:$0xff] }
 0x2ca   :  { %1468 = vmatprep.subr.mxu0 %v5737_v56  ;;  %1539 = vmatprep.subr.mxu1 %v9428_v46  ;;  %v9437_v56 = vld [vmem:[#allocation127_spill] sm:$0xff]  ;;  %v9480_v46 = vld [vmem:[#allocation169_spill] sm:$0xff] }
 0x2cb   :  { %1469 = vmatpush2.msra.mxu0 %v9429_v1  ;;  %1540 = vmatpush2.msra.mxu1 %v9430_v55  ;;  %v9481_v1 = vld [vmem:[#allocation170_spill] sm:$0xff]  ;;  %v9482_v55 = vld [vmem:[#allocation171_spill] sm:$0xff] }
 0x2cc   :  { %1470 = vmatprep.subr.mxu0 %v9431_v50  ;;  %1541 = vmatprep.subr.mxu1 %v9432_v59  ;;  %v9483_v50 = vld [vmem:[#allocation172_spill] sm:$0xff]  ;;  %v9484_v59 = vld [vmem:[#allocation173_spill] sm:$0xff] }
 0x2cd   :  { %1471 = vmatpush2.msra.mxu0 %v9433_v40  ;;  %1542 = vmatpush2.msra.mxu1 %v9434_v41  ;;  %v9486_v40 = vld [vmem:[#allocation175_spill] sm:$0xff]  ;;  %v9487_v41 = vld [vmem:[#allocation176_spill] sm:$0xff] }
 0x2ce   :  { %v3929_v22 = vpop.eup %3928  ;;  %1472 = vmatprep.subr.mxu0 %v9435_v12  ;;  %1543 = vmatprep.subr.mxu1 %v9436_v44  ;;  %v9489_v12 = vld [vmem:[#allocation178_spill] sm:$0xff]  ;;  %v9490_v44 = vld [vmem:[#allocation179_spill] sm:$0xff] }
 0x2cf   :  { %1473 = vmatpush2.msra.mxu0 %v9437_v56  ;;  %v6140_v58 = vmul.f32 %v3929_v22, %v3927_v57  ;;  %1544 = vmatpush2.msra.mxu1 %v9439_v61  ;;  %v9485_v57 = vld [vmem:[#allocation174_spill] sm:$0xff]  ;;  %v9488_v22 = vld [vmem:[#allocation177_spill] sm:$0xff]  ;;  %v9491_v56 = vld [vmem:[#allocation180_spill] sm:$0xff] }
 0x2d0   :  { %1576 = vmatprep.subr.mxu0 %v9440_v62  ;;  %1647 = vmatprep.subr.mxu1 %v9441_v2  ;;  %v9492_v61 = vld [vmem:[#allocation181_spill] sm:$0xff]  ;;  %v9493_v62 = vld [vmem:[#allocation182_spill] sm:$0xff]  ;;  %v9494_v2 = vld [vmem:[#allocation183_spill] sm:$0xff] }
 0x2d1   :  { %9438 = vst [vmem:[#allocation46_spill] sm:$0xff] %v6140_v58  ;;  %1474 = vmatprep.mubr.f32.mxu0 %v6140_v58  ;;  %1545 = vmatprep.mubr.f32.mxu1 %v6140_v58  ;;  %v6384_v58 = vld [vmem:[#allocation10 + $0x48] sm:$0xff] }
 0x2d2   :  { %1475 = vmatmul.mubr.f32.vlgmr.msra.gmra.mxu0 %v5986_v51  ;;  %1546 = vmatmul.mubr.f32.vlgmr.msra.gmra.mxu1 %v5986_v51  ;;  %v9452_v51 = vld [vmem:[#allocation141_spill] sm:$0xff]  ;;  %9517 = vst [vmem:[#allocation55_spill] sm:$0xff] %v6384_v58 }
 0x2d3   :  { %1577 = vmatpush1.msra.mxu0 %v9442_v3  ;;  %1648 = vmatpush1.msra.mxu1 %v9443_v8  ;;  %v9495_v3 = vld [vmem:[#allocation184_spill] sm:$0xff]  ;;  %v9496_v8 = vld [vmem:[#allocation185_spill] sm:$0xff] }
 0x2d4   :  { %1578 = vmatprep.subr.mxu0 %v9444_v43  ;;  %1649 = vmatprep.subr.mxu1 %v9445_v34  ;;  %v9497_v43 = vld [vmem:[#allocation186_spill] sm:$0xff]  ;;  %v9498_v34 = vld [vmem:[#allocation187_spill] sm:$0xff] }
 0x2d5   :  { %1579 = vmatpush1.msra.mxu0 %v9446_v9  ;;  %1650 = vmatpush1.msra.mxu1 %v9447_v27  ;;  %v9499_v9 = vld [vmem:[#allocation188_spill] sm:$0xff]  ;;  %v9500_v27 = vld [vmem:[#allocation189_spill] sm:$0xff] }
 0x2d6   :  { %1580 = vmatprep.subr.mxu0 %v9448_v45  ;;  %1651 = vmatprep.subr.mxu1 %v9449_v42  ;;  %v9501_v45 = vld [vmem:[#allocation190_spill] sm:$0xff]  ;;  %v9502_v42 = vld [vmem:[#allocation191_spill] sm:$0xff] }
 0x2d7   :  { %1581 = vmatpush1.msra.mxu0 %v9450_v36  ;;  %1652 = vmatpush1.msra.mxu1 %v9451_v49  ;;  %v9503_v36 = vmov 0.0   ;;  %v9504_v49 = vld [vmem:[#allocation192_spill] sm:$0xff] }
 0x2d8   :  { %1582 = vmatprep.subr.mxu0 %v9452_v51  ;;  %1653 = vmatprep.subr.mxu1 %v9453_v26  ;;  %v6213_v51 = vld [vmem:[#allocation10 + $0x1e8] sm:$0xff]  ;;  %v6216_v26 = vld [vmem:[#allocation10 + $0x1f8] sm:$0xff] }
 0x2d9   :  { %1583 = vmatpush1.msra.mxu0 %v9454_v5  ;;  %1654 = vmatpush1.msra.mxu1 %v9455_v17  ;;  %v9505_v17 = vld [vmem:[#allocation21_spill] sm:$0xff] }
 0x2da   :  { %1584 = vmatprep.subr.mxu0 %v9456_v52  ;;  %1655 = vmatprep.subr.mxu1 %v9457_v18 }
 0x2db   :  { %1585 = vmatpush1.msra.mxu0 %v9458_v32  ;;  %1656 = vmatpush1.msra.mxu1 %v9459_v33  ;;  %v9506_v33 = vld [vmem:[#allocation23_spill] sm:$0xff] }
 0x2dc   :  { %1586 = vmatprep.subr.mxu0 %v9460_v19  ;;  %1657 = vmatprep.subr.mxu1 %v9461_v30 }
 0x2dd   :  { %1587 = vmatpush1.msra.mxu0 %v9462_v54  ;;  %1658 = vmatpush1.msra.mxu1 %v9463_v24 }
 0x2de   :  { %1588 = vmatprep.subr.mxu0 %v9464_v37  ;;  %1659 = vmatprep.subr.mxu1 %v9465_v63  ;;  %v9507_v37 = vld [vmem:[#allocation24_spill] sm:$0xff] }
 0x2df   :  { %1589 = vmatpush1.msra.mxu0 %v9466_v10  ;;  %1660 = vmatpush1.msra.mxu1 %v9467_v11  ;;  %v9508_v10 = vld [vmem:[#allocation22_spill] sm:$0xff] }
 0x2e0   :  { %1590 = vmatprep.subr.mxu0 %v9468_v25  ;;  %1661 = vmatprep.subr.mxu1 %v9469_v38 }
 0x2e1   :  { %1591 = vmatpush1.msra.mxu0 %v9470_v23  ;;  %1662 = vmatpush1.msra.mxu1 %v9471_v35 }
 0x2e2   :  { %1592 = vmatprep.subr.mxu0 %v9472_v20  ;;  %1663 = vmatprep.subr.mxu1 %v9473_v31 }
 0x2e3   :  { %1593 = vmatpush1.msra.mxu0 %v9474_v48  ;;  %1664 = vmatpush1.msra.mxu1 %v9475_v53 }
 0x2e4   :  { %1594 = vmatprep.subr.mxu0 %v9476_v13  ;;  %1665 = vmatprep.subr.mxu1 %v9477_v14 }
 0x2e5   :  { %1595 = vmatpush1.msra.mxu0 %v9478_v39  ;;  %1666 = vmatpush1.msra.mxu1 %v9479_v4 }
 0x2e6   :  { %1596 = vmatprep.subr.mxu0 %v9480_v46  ;;  %1667 = vmatprep.subr.mxu1 %v9481_v1 }
 0x2e7   :  { %1597 = vmatpush1.msra.mxu0 %v9482_v55  ;;  %1668 = vmatpush1.msra.mxu1 %v9483_v50 }
 0x2e8   :  { %1598 = vmatprep.subr.mxu0 %v9484_v59  ;;  %1669 = vmatprep.subr.mxu1 %v9485_v57  ;;  %v6231_v59 = vld [vmem:[#allocation10 + $0x1e0] sm:$0xff]  ;;  %v6234_v57 = vld [vmem:[#allocation10 + $0x1f0] sm:$0xff] }
 0x2e9   :  { %1599 = vmatpush1.msra.mxu0 %v9486_v40  ;;  %1670 = vmatpush1.msra.mxu1 %v9487_v41  ;;  %v6240_v40 = vld [vmem:[#allocation10 + $0x1d8] sm:$0xff]  ;;  %v6243_v41 = vld [vmem:[#allocation10 + $0x1c0] sm:$0xff] }
 0x2ea   :  { %1600 = vmatprep.subr.mxu0 %v9488_v22  ;;  %1671 = vmatprep.subr.mxu1 %v9489_v12  ;;  %v6246_v22 = vld [vmem:[#allocation10 + $0x1d0] sm:$0xff]  ;;  %v6249_v12 = vld [vmem:[#allocation10 + $0x1a8] sm:$0xff] }
 0x2eb   :  { %1601 = vmatpush1.msra.mxu0 %v9490_v44  ;;  %1672 = vmatpush1.msra.mxu1 %v9491_v56  ;;  %v6252_v44 = vld [vmem:[#allocation10 + $0x1b8] sm:$0xff]  ;;  %v6255_v56 = vld [vmem:[#allocation10 + $0x1a0] sm:$0xff] }
 0x2ec   :  { %1602 = vmatprep.subr.mxu0 %v9492_v61  ;;  %1673 = vmatprep.subr.mxu1 %v9493_v62  ;;  %v6258_v61 = vld [vmem:[#allocation10 + $0x1b0] sm:$0xff]  ;;  %v6261_v62 = vld [vmem:[#allocation10 + $0x188] sm:$0xff] }
 0x2ed   :  { %1603 = vmatpush1.msra.mxu0 %v9494_v2  ;;  %1674 = vmatpush1.msra.mxu1 %v9495_v3  ;;  %v6264_v2 = vld [vmem:[#allocation10 + $0x198] sm:$0xff]  ;;  %v6267_v3 = vld [vmem:[#allocation10 + $0x180] sm:$0xff] }
 0x2ee   :  { %1604 = vmatprep.subr.mxu0 %v9496_v8  ;;  %1675 = vmatprep.subr.mxu1 %v9497_v43  ;;  %v6270_v8 = vld [vmem:[#allocation10 + $0x190] sm:$0xff]  ;;  %v6273_v43 = vld [vmem:[#allocation10 + $0x168] sm:$0xff] }
 0x2ef   :  { %1605 = vmatpush1.msra.mxu0 %v9498_v34  ;;  %1676 = vmatpush1.msra.mxu1 %v9499_v9  ;;  %v6276_v34 = vld [vmem:[#allocation10 + $0x178] sm:$0xff] }
 0x2f0   :  { %1606 = vmatprep.subr.mxu0 %v9500_v27  ;;  %1677 = vmatprep.subr.mxu1 %v9501_v45  ;;  %v6279_v27 = vld [vmem:[#allocation10 + $0x160] sm:$0xff]  ;;  %v6282_v45 = vld [vmem:[#allocation10 + $0x170] sm:$0xff] }
 0x2f1   :  { %1607 = vmatpush1.msra.mxu0 %v9502_v42  ;;  %1640 = vmatprep.mubr.f32.mxu0 %v9503_v36 }
 0x2f2   :  { %1678 = vmatpush1.msra.mxu1 %v9504_v49  ;;  %1711 = vmatprep.mubr.f32.mxu1 %v9503_v36  ;;  %v6286_v49 = vld [vmem:[#allocation10 + $0x148] sm:$0xff] }
 0x2f3   :  { %1746 = vmatprep.subr.mxu0 %v6213_v51  ;;  %1817 = vmatprep.subr.mxu1 %v6216_v26 }
 0x350   :  { %v1306_v5 = vpop.f32.mrf.mxu0  ;;  %v1377_v30 = vpop.f32.mrf.mxu1 }
 0x351   :  { %v1382_v52 = vadd.f32 %v1306_v5, %v9505_v17  ;;  %v1384_v11 = vadd.f32 %v1377_v30, %v9508_v10  ;;  %v6289_v5 = vld [vmem:[#allocation10 + $0x158] sm:$0xff]  ;;  %v6311_v10 = vld [vmem:[#allocation10 + $0x108] sm:$0xff] }
 0x352   :  { %v1308_v18 = vpop.f32.mrf.mxu0  ;;  %v1379_v24 = vpop.f32.mrf.mxu1  ;;  %v6302_v30 = vld [vmem:[#allocation10 + $0x138] sm:$0xff] }
 0x353   :  { %v3830_v32 = vmul.f32 -1.442695, %v1382_v52  ;;  %v1383_v19 = vadd.f32 %v1308_v18, %v9506_v33  ;;  %v1385_v63 = vadd.f32 %v1379_v24, %v9507_v37  ;;  %v6292_v52 = vld [vmem:[#allocation10 + $0x140] sm:$0xff]  ;;  %v6295_v18 = vld [vmem:[#allocation10 + $0x150] sm:$0xff] }
 0x354   :  { %v6308_v24 = vld [vmem:[#allocation10 + $0x130] sm:$0xff] }
 0x355   :  { %3930 = vpow2.f32 %v3830_v32  ;;  %v3831_v54 = vmul.f32 -1.442695, %v1383_v19  ;;  %v3832_v25 = vmul.f32 -1.442695, %v1385_v63  ;;  %v6299_v19 = vld [vmem:[#allocation10 + $0x128] sm:$0xff] }
 0x357   :  { %3932 = vpow2.f32 %v3831_v54  ;;  %v6305_v54 = vld [vmem:[#allocation10 + $0x120] sm:$0xff] }
 0x358   :  { %3934 = vtanh.f32 %v1384_v11  ;;  %v6314_v11 = vld [vmem:[#allocation10 + $0x118] sm:$0xff] }
 0x359   :  { %3936 = vpow2.f32 %v3832_v25  ;;  %v6317_v25 = vld [vmem:[#allocation10 + $0x100] sm:$0xff] }
 0x362   :  { %v3931_v38 = vpop.eup %3930 }
 0x363   :  { %v1392_v23 = vadd.f32 1.0, %v3931_v38  ;;  %v6320_v38 = vld [vmem:[#allocation10 + $0x110] sm:$0xff] }
 0x364   :  { %v3933_v35 = vpop.eup %3932 }
 0x365   :  { %3938 = vrcp.f32 %v1392_v23  ;;  %v1393_v20 = vadd.f32 1.0, %v3933_v35  ;;  %v3935_v31 = vpop.eup %3934  ;;  %v6323_v23 = vld [vmem:[#allocation10 + $0xe8] sm:$0xff]  ;;  %v6326_v35 = vld [vmem:[#allocation10 + $0xf8] sm:$0xff] }
 0x366   :  { %v3937_v48 = vpop.eup %3936 }
 0x367   :  { %3940 = vrcp.f32 %v1393_v20  ;;  %v1402_v39 = vadd.f32 1.0, %v3937_v48  ;;  %v6329_v20 = vld [vmem:[#allocation10 + $0xe0] sm:$0xff] }
 0x369   :  { %3942 = vrcp.f32 %v1402_v39  ;;  %v6344_v39 = vld [vmem:[#allocation10 + $0xd0] sm:$0xff] }
 0x372   :  { %v3939_v53 = vpop.eup %3938 }
 0x373   :  { %v1406_v13 = vmul.f32 %v3939_v53, %v3935_v31  ;;  %v6332_v31 = vld [vmem:[#allocation10 + $0xf0] sm:$0xff]  ;;  %v6335_v53 = vld [vmem:[#allocation10 + $0xc8] sm:$0xff] }
 0x374   :  { %v3941_v14 = vpop.eup %3940 }
 0x375   :  { %v1405_v4 = vmul.f32 %v3941_v14, %v5983_v47  ;;  %v6237_v47 = vld [vmem:[#allocation10 + $0x1c8] sm:$0xff]  ;;  %v6341_v14 = vld [vmem:[#allocation10 + $0xc0] sm:$0xff] }
 0x376   :  { %v3943_v1 = vpop.eup %3942 }
 0x377   :  { %v6224_v46 = vadd.f32 %v1406_v13, %v1405_v4  ;;  %v6338_v13 = vld [vmem:[#allocation10 + $0xd8] sm:$0xff]  ;;  %v6347_v4 = vld [vmem:[#allocation10 + $0xa8] sm:$0xff] }
 0x379   :  { %3944 = vtanh.f32 %v6224_v46 }
 0x386   :  { %v3945_v55 = vpop.eup %3944 }
 0x387   :  { %v6227_v50 = vmul.f32 %v3945_v55, %v3943_v1  ;;  %v6350_v1 = vld [vmem:[#allocation10 + $0xb8] sm:$0xff] }
 0x389   :  { %1641 = vmatmul.mubr.f32.vlgmr.msra.gmra.mxu0 %v6227_v50  ;;  %1712 = vmatmul.mubr.f32.vlgmr.msra.gmra.mxu1 %v6227_v50 }
 0x38a   :  { %1747 = vmatpush1.msra.mxu0 %v6231_v59  ;;  %1818 = vmatpush1.msra.mxu1 %v6234_v57 }
 0x38b   :  { %1748 = vmatprep.subr.mxu0 %v6237_v47  ;;  %1819 = vmatprep.subr.mxu1 %v6240_v40 }
 0x38c   :  { %1749 = vmatpush1.msra.mxu0 %v6243_v41  ;;  %1820 = vmatpush1.msra.mxu1 %v6246_v22 }
 0x38d   :  { %1750 = vmatprep.subr.mxu0 %v6249_v12  ;;  %1821 = vmatprep.subr.mxu1 %v6252_v44 }
 0x38e   :  { %1751 = vmatpush1.msra.mxu0 %v6255_v56  ;;  %1822 = vmatpush1.msra.mxu1 %v6258_v61 }
 0x38f   :  { %1752 = vmatprep.subr.mxu0 %v6261_v62  ;;  %1823 = vmatprep.subr.mxu1 %v6264_v2 }
 0x390   :  { %1753 = vmatpush1.msra.mxu0 %v6267_v3  ;;  %1824 = vmatpush1.msra.mxu1 %v6270_v8 }
 0x391   :  { %1754 = vmatprep.subr.mxu0 %v6273_v43  ;;  %1825 = vmatprep.subr.mxu1 %v6276_v34 }
 0x392   :  { %v1476_v9 = vpop.f32.mrf.mxu0  ;;  %1755 = vmatpush1.msra.mxu0 %v6279_v27  ;;  %1826 = vmatpush1.msra.mxu1 %v6282_v45  ;;  %v1547_v37 = vpop.f32.mrf.mxu1 }
 0x393   :  { %v1477_v42 = vadd.f32 %v1476_v9, %v6004_v60  ;;  %1756 = vmatprep.subr.mxu0 %v6286_v49  ;;  %1827 = vmatprep.subr.mxu1 %v6289_v5  ;;  %v6354_v9 = vld [vmem:[#allocation10 + $0xa0] sm:$0xff] }
 0x394   :  { %v1478_v17 = vpop.f32.mrf.mxu0  ;;  %1757 = vmatpush1.msra.mxu0 %v6292_v52  ;;  %1828 = vmatpush1.msra.mxu1 %v6295_v18  ;;  %v1549_v48 = vpop.f32.mrf.mxu1 }
 0x395   :  { %v3833_v32 = vmul.f32 -1.442695, %v1477_v42  ;;  %v1479_v33 = vadd.f32 %v1478_v17, %v6011_v0  ;;  %1758 = vmatprep.subr.mxu0 %v6299_v19  ;;  %1829 = vmatprep.subr.mxu1 %v6302_v30  ;;  %v1550_v55 = vadd.f32 %v1549_v48, %v6032_v7  ;;  %v6357_v42 = vld [vmem:[#allocation10 + $0xb0] sm:$0xff]  ;;  %v6360_v17 = vld [vmem:[#allocation10 + $0x88] sm:$0xff] }
 0x396   :  { %1759 = vmatpush1.msra.mxu0 %v6305_v54  ;;  %1830 = vmatpush1.msra.mxu1 %v6308_v24  ;;  %9509 = vst [vmem:[#allocation47_spill] sm:$0xff] %v6360_v17  ;;  %v6372_v48 = vld [vmem:[#allocation10 + $0x68] sm:$0xff] }
 0x397   :  { %3946 = vpow2.f32 %v3833_v32  ;;  %v3834_v63 = vmul.f32 -1.442695, %v1479_v33  ;;  %1760 = vmatprep.subr.mxu0 %v6311_v10  ;;  %1831 = vmatprep.subr.mxu1 %v6314_v11  ;;  %v6363_v32 = vld [vmem:[#allocation10 + $0x98] sm:$0xff]  ;;  %v6366_v33 = vld [vmem:[#allocation10 + $0x80] sm:$0xff]  ;;  %9513 = vst [vmem:[#allocation51_spill] sm:$0xff] %v6372_v48 }
 0x398   :  { %1761 = vmatpush1.msra.mxu0 %v6317_v25  ;;  %1832 = vmatpush1.msra.mxu1 %v6320_v38  ;;  %9510 = vst [vmem:[#allocation48_spill] sm:$0xff] %v6363_v32  ;;  %9511 = vst [vmem:[#allocation49_spill] sm:$0xff] %v6366_v33  ;;  %v3835_v28 = vmul.f32 -1.442695, %v1550_v55  ;;  %v6391_v55 = vld [vmem:[#allocation10 + $0x40] sm:$0xff] }
 0x399   :  { %3948 = vpow2.f32 %v3834_v63  ;;  %1762 = vmatprep.subr.mxu0 %v6323_v23  ;;  %1833 = vmatprep.subr.mxu1 %v6326_v35  ;;  %v6369_v63 = vld [vmem:[#allocation10 + $0x90] sm:$0xff]  ;;  %9519 = vst [vmem:[#allocation57_spill] sm:$0xff] %v6391_v55 }
 0x39a   :  { %1763 = vmatpush1.msra.mxu0 %v6329_v20  ;;  %1834 = vmatpush1.msra.mxu1 %v6332_v31  ;;  %9512 = vst [vmem:[#allocation50_spill] sm:$0xff] %v6369_v63  ;;  %3950 = vpow2.f32 %v3835_v28  ;;  %v6415_v28 = vld [vmem:[#allocation10] sm:$0xff] }
 0x39b   :  { %1764 = vmatprep.subr.mxu0 %v6335_v53  ;;  %1835 = vmatprep.subr.mxu1 %v6338_v13  ;;  %9527 = vst [vmem:[#allocation65_spill] sm:$0xff] %v6415_v28 }
 0x39c   :  { %1765 = vmatpush1.msra.mxu0 %v6341_v14  ;;  %1836 = vmatpush1.msra.mxu1 %v6344_v39 }
 0x39d   :  { %1766 = vmatprep.subr.mxu0 %v6347_v4  ;;  %1837 = vmatprep.subr.mxu1 %v6350_v1 }
 0x39e   :  { %1767 = vmatpush1.msra.mxu0 %v6354_v9  ;;  %1838 = vmatpush1.msra.mxu1 %v6357_v42 }
 0x39f   :  { %1768 = vmatprep.subr.mxu0 %v6360_v17  ;;  %1839 = vmatprep.subr.mxu1 %v6363_v32  ;;  %v6506_v32 = vld [vmem:[#allocation10 + $0x308] sm:$0xff] }
 0x3a0   :  { %1769 = vmatpush1.msra.mxu0 %v6366_v33  ;;  %1840 = vmatpush1.msra.mxu1 %v6369_v63  ;;  %v6387_v63 = vld [vmem:[#allocation10 + $0x58] sm:$0xff]  ;;  %v6397_v33 = vld [vmem:[#allocation10 + $0x28] sm:$0xff]  ;;  %9557 = vst [vmem:[#allocation95_spill] sm:$0xff] %v6506_v32 }
 0x3a1   :  { %1770 = vmatprep.subr.mxu0 %v6372_v48  ;;  %1841 = vmatprep.subr.mxu1 %v6375_v29  ;;  %9518 = vst [vmem:[#allocation56_spill] sm:$0xff] %v6387_v63  ;;  %v1548_v29 = vadd.f32 %v1547_v37, %v6048_v15  ;;  %9521 = vst [vmem:[#allocation59_spill] sm:$0xff] %v6397_v33  ;;  %v6403_v37 = vld [vmem:[#allocation10 + $0x20] sm:$0xff]  ;;  %v6406_v15 = vld [vmem:[#allocation10 + $0x30] sm:$0xff] }
 0x3a2   :  { %1771 = vmatpush1.msra.mxu0 %v6378_v16  ;;  %1842 = vmatpush1.msra.mxu1 %v6381_v6  ;;  %v6394_v16 = vld [vmem:[#allocation10 + $0x50] sm:$0xff]  ;;  %9523 = vst [vmem:[#allocation61_spill] sm:$0xff] %v6403_v37  ;;  %9524 = vst [vmem:[#allocation62_spill] sm:$0xff] %v6406_v15 }
 0x3a3   :  { %1772 = vmatprep.subr.mxu0 %v6384_v58  ;;  %1843 = vmatprep.subr.mxu1 %v6387_v63  ;;  %9520 = vst [vmem:[#allocation58_spill] sm:$0xff] %v6394_v16  ;;  %v6400_v58 = vld [vmem:[#allocation10 + $0x38] sm:$0xff] }
 0x3a4   :  { %v3947_v48 = vpop.eup %3946  ;;  %1773 = vmatpush1.msra.mxu0 %v6391_v55  ;;  %1844 = vmatpush1.msra.mxu1 %v6394_v16  ;;  %9522 = vst [vmem:[#allocation60_spill] sm:$0xff] %v6400_v58  ;;  %v6409_v16 = vld [vmem:[#allocation10 + $0x8] sm:$0xff] }
 0x3a5   :  { %v1558_v6 = vadd.f32 1.0, %v3947_v48  ;;  %1774 = vmatprep.subr.mxu0 %v6397_v33  ;;  %1845 = vmatprep.subr.mxu1 %v6400_v58  ;;  %9525 = vst [vmem:[#allocation63_spill] sm:$0xff] %v6409_v16  ;;  %v6412_v33 = vld [vmem:[#allocation10 + $0x18] sm:$0xff]  ;;  %v6499_v58 = vld [vmem:[#allocation10 + $0x320] sm:$0xff] }
 0x3a6   :  { %v3949_v63 = vpop.eup %3948  ;;  %1775 = vmatpush1.msra.mxu0 %v6403_v37  ;;  %1846 = vmatpush1.msra.mxu1 %v6406_v15  ;;  %9526 = vst [vmem:[#allocation64_spill] sm:$0xff] %v6412_v33  ;;  %v6418_v37 = vld [vmem:[#allocation10 + $0x10] sm:$0xff]  ;;  %v6496_v15 = vld [vmem:[#allocation10 + $0x338] sm:$0xff]  ;;  %9555 = vst [vmem:[#allocation93_spill] sm:$0xff] %v6499_v58 }
 0x3a7   :  { %3952 = vrcp.f32 %v1558_v6  ;;  %v1559_v48 = vadd.f32 1.0, %v3949_v63  ;;  %1776 = vmatprep.subr.mxu0 %v6409_v16  ;;  %1847 = vmatprep.subr.mxu1 %v6412_v33  ;;  %9528 = vst [vmem:[#allocation66_spill] sm:$0xff] %v6418_v37  ;;  %v6421_v6 = vld [vmem:[#allocation10 + $0x3e8] sm:$0xff]  ;;  %v6424_v63 = vld [vmem:[#allocation10 + $0x3f8] sm:$0xff]  ;;  %v6427_v16 = vld [vmem:[#allocation10 + $0x3e0] sm:$0xff] }
 0x3a8   :  { %3954 = vtanh.f32 %v1548_v29  ;;  %1777 = vmatpush1.msra.mxu0 %v6415_v28  ;;  %1848 = vmatpush1.msra.mxu1 %v6418_v37  ;;  %9529 = vst [vmem:[#allocation67_spill] sm:$0xff] %v6421_v6  ;;  %9530 = vst [vmem:[#allocation68_spill] sm:$0xff] %v6424_v63  ;;  %v6430_v29 = vld [vmem:[#allocation10 + $0x3f0] sm:$0xff]  ;;  %v6433_v28 = vld [vmem:[#allocation10 + $0x3c8] sm:$0xff] }
 0x3a9   :  { %3956 = vrcp.f32 %v1559_v48  ;;  %1778 = vmatprep.subr.mxu0 %v6421_v6  ;;  %1849 = vmatprep.subr.mxu1 %v6424_v63  ;;  %9531 = vst [vmem:[#allocation69_spill] sm:$0xff] %v6427_v16  ;;  %9532 = vst [vmem:[#allocation70_spill] sm:$0xff] %v6430_v29  ;;  %v6436_v48 = vld [vmem:[#allocation10 + $0x3d8] sm:$0xff]  ;;  %v6439_v6 = vld [vmem:[#allocation10 + $0x3c0] sm:$0xff] }
 0x3aa   :  { %1779 = vmatpush2.msra.mxu0 %v6427_v16  ;;  %1850 = vmatpush2.msra.mxu1 %v6430_v29  ;;  %9533 = vst [vmem:[#allocation71_spill] sm:$0xff] %v6433_v28  ;;  %9534 = vst [vmem:[#allocation72_spill] sm:$0xff] %v6436_v48  ;;  %v6442_v63 = vld [vmem:[#allocation10 + $0x3d0] sm:$0xff]  ;;  %v6445_v16 = vld [vmem:[#allocation10 + $0x3a8] sm:$0xff] }
 0x3ab   :  { %1780 = vmatprep.subr.mxu0 %v6433_v28  ;;  %1851 = vmatprep.subr.mxu1 %v6436_v48  ;;  %9535 = vst [vmem:[#allocation73_spill] sm:$0xff] %v6439_v6  ;;  %9536 = vst [vmem:[#allocation74_spill] sm:$0xff] %v6442_v63  ;;  %v6448_v29 = vld [vmem:[#allocation10 + $0x3b8] sm:$0xff]  ;;  %v6451_v28 = vld [vmem:[#allocation10 + $0x3a0] sm:$0xff] }
 0x3ac   :  { %1781 = vmatpush2.msra.mxu0 %v6439_v6  ;;  %1852 = vmatpush2.msra.mxu1 %v6442_v63  ;;  %9537 = vst [vmem:[#allocation75_spill] sm:$0xff] %v6445_v16  ;;  %9538 = vst [vmem:[#allocation76_spill] sm:$0xff] %v6448_v29  ;;  %v6454_v48 = vld [vmem:[#allocation10 + $0x3b0] sm:$0xff]  ;;  %v6457_v6 = vld [vmem:[#allocation10 + $0x388] sm:$0xff] }
 0x3ad   :  { %1782 = vmatprep.subr.mxu0 %v6445_v16  ;;  %1853 = vmatprep.subr.mxu1 %v6448_v29  ;;  %9539 = vst [vmem:[#allocation77_spill] sm:$0xff] %v6451_v28  ;;  %9540 = vst [vmem:[#allocation78_spill] sm:$0xff] %v6454_v48  ;;  %v6460_v63 = vld [vmem:[#allocation10 + $0x398] sm:$0xff]  ;;  %v6463_v16 = vld [vmem:[#allocation10 + $0x380] sm:$0xff] }
 0x3ae   :  { %1783 = vmatpush2.msra.mxu0 %v6451_v28  ;;  %1854 = vmatpush2.msra.mxu1 %v6454_v48  ;;  %9541 = vst [vmem:[#allocation79_spill] sm:$0xff] %v6457_v6  ;;  %9542 = vst [vmem:[#allocation80_spill] sm:$0xff] %v6460_v63  ;;  %v6466_v29 = vld [vmem:[#allocation10 + $0x390] sm:$0xff]  ;;  %v6469_v28 = vld [vmem:[#allocation10 + $0x368] sm:$0xff] }
 0x3af   :  { %1784 = vmatprep.subr.mxu0 %v6457_v6  ;;  %1855 = vmatprep.subr.mxu1 %v6460_v63  ;;  %9543 = vst [vmem:[#allocation81_spill] sm:$0xff] %v6463_v16  ;;  %9544 = vst [vmem:[#allocation82_spill] sm:$0xff] %v6466_v29  ;;  %v6472_v48 = vld [vmem:[#allocation10 + $0x378] sm:$0xff]  ;;  %v6475_v6 = vld [vmem:[#allocation10 + $0x360] sm:$0xff] }
 0x3b0   :  { %1785 = vmatpush2.msra.mxu0 %v6463_v16  ;;  %1856 = vmatpush2.msra.mxu1 %v6466_v29  ;;  %9545 = vst [vmem:[#allocation83_spill] sm:$0xff] %v6469_v28  ;;  %9546 = vst [vmem:[#allocation84_spill] sm:$0xff] %v6472_v48  ;;  %v6478_v63 = vld [vmem:[#allocation10 + $0x370] sm:$0xff]  ;;  %v3951_v16 = vpop.eup %3950  ;;  %v6481_v37 = vld [vmem:[#allocation10 + $0x348] sm:$0xff] }
 0x3b1   :  { %1786 = vmatprep.subr.mxu0 %v6469_v28  ;;  %1857 = vmatprep.subr.mxu1 %v6472_v48  ;;  %9547 = vst [vmem:[#allocation85_spill] sm:$0xff] %v6475_v6  ;;  %9548 = vst [vmem:[#allocation86_spill] sm:$0xff] %v6478_v63  ;;  %v6484_v29 = vld [vmem:[#allocation10 + $0x358] sm:$0xff]  ;;  %v6487_v33 = vld [vmem:[#allocation10 + $0x340] sm:$0xff] }
 0x3b2   :  { %1787 = vmatpush2.msra.mxu0 %v6475_v6  ;;  %1858 = vmatpush2.msra.mxu1 %v6478_v63  ;;  %9549 = vst [vmem:[#allocation87_spill] sm:$0xff] %v6481_v37  ;;  %9550 = vst [vmem:[#allocation88_spill] sm:$0xff] %v6484_v29  ;;  %v6490_v48 = vld [vmem:[#allocation10 + $0x350] sm:$0xff]  ;;  %v6493_v63 = vld [vmem:[#allocation10 + $0x328] sm:$0xff] }
 0x3b3   :  { %1788 = vmatprep.subr.mxu0 %v6481_v37  ;;  %1859 = vmatprep.subr.mxu1 %v6484_v29  ;;  %9551 = vst [vmem:[#allocation89_spill] sm:$0xff] %v6487_v33  ;;  %9552 = vst [vmem:[#allocation90_spill] sm:$0xff] %v6490_v48  ;;  %v1568_v29 = vadd.f32 1.0, %v3951_v16  ;;  %v6512_v16 = vld [vmem:[#allocation10 + $0x300] sm:$0xff] }
 0x3b4   :  { %v3953_v28 = vpop.eup %3952  ;;  %1789 = vmatpush2.msra.mxu0 %v6487_v33  ;;  %1860 = vmatpush2.msra.mxu1 %v6490_v48  ;;  %9553 = vst [vmem:[#allocation91_spill] sm:$0xff] %v6493_v63  ;;  %9554 = vst [vmem:[#allocation92_spill] sm:$0xff] %v6496_v15  ;;  %v6502_v33 = vld [vmem:[#allocation10 + $0x330] sm:$0xff] }
 0x3b5   :  { %v3955_v6 = vpop.eup %3954  ;;  %1790 = vmatprep.subr.mxu0 %v6493_v63  ;;  %1861 = vmatprep.subr.mxu1 %v6496_v15  ;;  %9556 = vst [vmem:[#allocation94_spill] sm:$0xff] %v6502_v33  ;;  %v6509_v63 = vld [vmem:[#allocation10 + $0x318] sm:$0xff]  ;;  %9559 = vst [vmem:[#allocation97_spill] sm:$0xff] %v6512_v16  ;;  %3958 = vrcp.f32 %v1568_v29  ;;  %v6542_v29 = vld [vmem:[#allocation10 + $0x2d0] sm:$0xff] }
 0x3b6   :  { %v3957_v37 = vpop.eup %3956  ;;  %1791 = vmatpush2.msra.mxu0 %v6499_v58  ;;  %1862 = vmatpush2.msra.mxu1 %v6502_v33  ;;  %v1572_v48 = vmul.f32 %v3955_v6, %v3953_v28  ;;  %9558 = vst [vmem:[#allocation96_spill] sm:$0xff] %v6509_v63  ;;  %v6515_v58 = vld [vmem:[#allocation10 + $0x310] sm:$0xff]  ;;  %v6520_v28 = vld [vmem:[#allocation10 + $0x2e8] sm:$0xff]  ;;  %9569 = vst [vmem:[#allocation107_spill] sm:$0xff] %v6542_v29 }
 0x3b7   :  { %v1571_v55 = vmul.f32 %v3957_v37, %v6104_v21  ;;  %1792 = vmatprep.subr.mxu0 %v6506_v32  ;;  %1863 = vmatprep.subr.mxu1 %v6509_v63  ;;  %9560 = vst [vmem:[#allocation98_spill] sm:$0xff] %v6515_v58  ;;  %9562 = vst [vmem:[#allocation100_spill] sm:$0xff] %v6520_v28  ;;  %v6523_v21 = vld [vmem:[#allocation10 + $0x2f8] sm:$0xff]  ;;  %v6526_v37 = vld [vmem:[#allocation10 + $0x2e0] sm:$0xff] }
 0x3b8   :  { %1793 = vmatpush2.msra.mxu0 %v6512_v16  ;;  %1864 = vmatpush2.msra.mxu1 %v6515_v58  ;;  %9563 = vst [vmem:[#allocation101_spill] sm:$0xff] %v6523_v21  ;;  %9564 = vst [vmem:[#allocation102_spill] sm:$0xff] %v6526_v37  ;;  %v6529_v6 = vld [vmem:[#allocation10 + $0x2f0] sm:$0xff]  ;;  %v6532_v58 = vld [vmem:[#allocation10 + $0x2c8] sm:$0xff] }
 0x3b9   :  { %v6518_v33 = vadd.f32 %v1572_v48, %v1571_v55  ;;  %1794 = vmatprep.subr.mxu0 %v6520_v28  ;;  %1865 = vmatprep.subr.mxu1 %v6523_v21  ;;  %9565 = vst [vmem:[#allocation103_spill] sm:$0xff] %v6529_v6  ;;  %9566 = vst [vmem:[#allocation104_spill] sm:$0xff] %v6532_v58  ;;  %v6535_v55 = vld [vmem:[#allocation10 + $0x2d8] sm:$0xff]  ;;  %v6539_v48 = vld [vmem:[#allocation10 + $0x2c0] sm:$0xff] }
 0x3ba   :  { %1795 = vmatpush2.msra.mxu0 %v6526_v37  ;;  %1866 = vmatpush2.msra.mxu1 %v6529_v6  ;;  %9567 = vst [vmem:[#allocation105_spill] sm:$0xff] %v6535_v55  ;;  %9568 = vst [vmem:[#allocation106_spill] sm:$0xff] %v6539_v48  ;;  %v6545_v37 = vld [vmem:[#allocation10 + $0x2a8] sm:$0xff]  ;;  %v6548_v6 = vld [vmem:[#allocation10 + $0x2b8] sm:$0xff] }
 0x3bb   :  { %9561 = vst [vmem:[#allocation99_spill] sm:$0xff] %v6518_v33  ;;  %1796 = vmatprep.subr.mxu0 %v6532_v58  ;;  %1867 = vmatprep.subr.mxu1 %v6535_v55  ;;  %3960 = vtanh.f32 %v6518_v33  ;;  %9570 = vst [vmem:[#allocation108_spill] sm:$0xff] %v6545_v37  ;;  %v6551_v58 = vld [vmem:[#allocation10 + $0x2a0] sm:$0xff]  ;;  %v6554_v55 = vld [vmem:[#allocation10 + $0x2b0] sm:$0xff] }
 0x3bc   :  { %1797 = vmatpush2.msra.mxu0 %v6539_v48  ;;  %1868 = vmatpush2.msra.mxu1 %v6542_v29  ;;  %9571 = vst [vmem:[#allocation109_spill] sm:$0xff] %v6548_v6  ;;  %9572 = vst [vmem:[#allocation110_spill] sm:$0xff] %v6551_v58  ;;  %v6557_v48 = vld [vmem:[#allocation10 + $0x288] sm:$0xff]  ;;  %v6560_v29 = vld [vmem:[#allocation10 + $0x298] sm:$0xff] }
 0x3bd   :  { %1798 = vmatprep.subr.mxu0 %v6545_v37  ;;  %1869 = vmatprep.subr.mxu1 %v6548_v6  ;;  %9573 = vst [vmem:[#allocation111_spill] sm:$0xff] %v6554_v55  ;;  %9574 = vst [vmem:[#allocation112_spill] sm:$0xff] %v6557_v48  ;;  %v6563_v37 = vld [vmem:[#allocation10 + $0x280] sm:$0xff]  ;;  %v6566_v6 = vld [vmem:[#allocation10 + $0x290] sm:$0xff] }
 0x3be   :  { %1799 = vmatpush2.msra.mxu0 %v6551_v58  ;;  %1870 = vmatpush2.msra.mxu1 %v6554_v55  ;;  %9575 = vst [vmem:[#allocation113_spill] sm:$0xff] %v6560_v29  ;;  %9576 = vst [vmem:[#allocation114_spill] sm:$0xff] %v6563_v37  ;;  %v6569_v58 = vld [vmem:[#allocation10 + $0x268] sm:$0xff]  ;;  %v6572_v55 = vld [vmem:[#allocation10 + $0x278] sm:$0xff] }
 0x3bf   :  { %1800 = vmatprep.subr.mxu0 %v6557_v48  ;;  %1871 = vmatprep.subr.mxu1 %v6560_v29  ;;  %9577 = vst [vmem:[#allocation115_spill] sm:$0xff] %v6566_v6  ;;  %9578 = vst [vmem:[#allocation116_spill] sm:$0xff] %v6569_v58  ;;  %v6575_v48 = vld [vmem:[#allocation10 + $0x260] sm:$0xff]  ;;  %v6578_v29 = vld [vmem:[#allocation10 + $0x270] sm:$0xff] }
 0x3c0   :  { %1801 = vmatpush2.msra.mxu0 %v6563_v37  ;;  %1872 = vmatpush2.msra.mxu1 %v6566_v6  ;;  %9579 = vst [vmem:[#allocation117_spill] sm:$0xff] %v6572_v55  ;;  %9580 = vst [vmem:[#allocation118_spill] sm:$0xff] %v6575_v48  ;;  %v6581_v37 = vld [vmem:[#allocation10 + $0x248] sm:$0xff]  ;;  %v6584_v6 = vld [vmem:[#allocation10 + $0x258] sm:$0xff] }
 0x3c1   :  { %1802 = vmatprep.subr.mxu0 %v6569_v58  ;;  %1873 = vmatprep.subr.mxu1 %v6572_v55  ;;  %9581 = vst [vmem:[#allocation119_spill] sm:$0xff] %v6578_v29  ;;  %9582 = vst [vmem:[#allocation120_spill] sm:$0xff] %v6581_v37  ;;  %v6587_v58 = vld [vmem:[#allocation10 + $0x240] sm:$0xff]  ;;  %v6590_v55 = vld [vmem:[#allocation10 + $0x250] sm:$0xff] }
 0x3c2   :  { %1803 = vmatpush2.msra.mxu0 %v6575_v48  ;;  %1874 = vmatpush2.msra.mxu1 %v6578_v29  ;;  %9583 = vst [vmem:[#allocation121_spill] sm:$0xff] %v6584_v6  ;;  %9584 = vst [vmem:[#allocation122_spill] sm:$0xff] %v6587_v58  ;;  %v6593_v48 = vld [vmem:[#allocation10 + $0x228] sm:$0xff]  ;;  %v6596_v29 = vld [vmem:[#allocation10 + $0x238] sm:$0xff] }
 0x3c3   :  { %1804 = vmatprep.subr.mxu0 %v6581_v37  ;;  %1875 = vmatprep.subr.mxu1 %v6584_v6  ;;  %9585 = vst [vmem:[#allocation123_spill] sm:$0xff] %v6590_v55  ;;  %9586 = vst [vmem:[#allocation124_spill] sm:$0xff] %v6593_v48  ;;  %v6599_v37 = vld [vmem:[#allocation10 + $0x220] sm:$0xff]  ;;  %v6602_v6 = vld [vmem:[#allocation10 + $0x230] sm:$0xff] }
 0x3c4   :  { %1805 = vmatpush2.msra.mxu0 %v6587_v58  ;;  %1876 = vmatpush2.msra.mxu1 %v6590_v55  ;;  %9587 = vst [vmem:[#allocation125_spill] sm:$0xff] %v6596_v29  ;;  %9588 = vst [vmem:[#allocation126_spill] sm:$0xff] %v6599_v37  ;;  %v3959_v58 = vpop.eup %3958  ;;  %v6605_v21 = vld [vmem:[#allocation10 + $0x208] sm:$0xff]  ;;  %v6608_v55 = vld [vmem:[#allocation10 + $0x218] sm:$0xff] }
 0x3c5   :  { %1806 = vmatprep.subr.mxu0 %v6593_v48  ;;  %1877 = vmatprep.subr.mxu1 %v6596_v29  ;;  %9589 = vst [vmem:[#allocation127_spill] sm:$0xff] %v6602_v6  ;;  %9590 = vst [vmem:[#allocation128_spill] sm:$0xff] %v6605_v21  ;;  %v6611_v28 = vld [vmem:[#allocation10 + $0x200] sm:$0xff]  ;;  %v6614_v29 = vld [vmem:[#allocation10 + $0x210] sm:$0xff] }
 0x3c6   :  { %1807 = vmatpush2.msra.mxu0 %v6599_v37  ;;  %1878 = vmatpush2.msra.mxu1 %v6602_v6  ;;  %9591 = vst [vmem:[#allocation129_spill] sm:$0xff] %v6608_v55  ;;  %9592 = vst [vmem:[#allocation130_spill] sm:$0xff] %v6611_v28  ;;  %v6619_v6 = vld [vmem:[#allocation9 + $0x1e8] sm:$0xff]  ;;  %v9661_v63 = vld [vmem:[#allocation28_spill] sm:$0xff] }
 0x3c7   :  { %1808 = vmatprep.subr.mxu0 %v6605_v21  ;;  %1879 = vmatprep.subr.mxu1 %v6608_v55  ;;  %9593 = vst [vmem:[#allocation131_spill] sm:$0xff] %v6614_v29  ;;  %9595 = vst [vmem:[#allocation133_spill] sm:$0xff] %v6619_v6  ;;  %v6622_v21 = vld [vmem:[#allocation9 + $0x1f8] sm:$0xff]  ;;  %v9662_v32 = vld [vmem:[#allocation26_spill] sm:$0xff] }
 0x3c8   :  { %v3961_v48 = vpop.eup %3960  ;;  %1809 = vmatpush2.msra.mxu0 %v6611_v28  ;;  %1880 = vmatpush2.msra.mxu1 %v6614_v29  ;;  %9596 = vst [vmem:[#allocation134_spill] sm:$0xff] %v6622_v21  ;;  %v6629_v28 = vld [vmem:[#allocation9 + $0x1e0] sm:$0xff]  ;;  %v9660_v29 = vld [vmem:[#allocation27_spill] sm:$0xff] }
 0x3c9   :  { %v6617_v37 = vmul.f32 %v3961_v48, %v3959_v58  ;;  %1912 = vmatprep.subr.mxu0 %v6619_v6  ;;  %1983 = vmatprep.subr.mxu1 %v6622_v21  ;;  %9597 = vst [vmem:[#allocation135_spill] sm:$0xff] %v6629_v28  ;;  %v6632_v58 = vld [vmem:[#allocation9 + $0x1f0] sm:$0xff]  ;;  %v6635_v48 = vld [vmem:[#allocation9 + $0x1c8] sm:$0xff]  ;;  %v6638_v21 = vld [vmem:[#allocation9 + $0x1d8] sm:$0xff] }
 0x3ca   :  { %9598 = vst [vmem:[#allocation136_spill] sm:$0xff] %v6632_v58  ;;  %9599 = vst [vmem:[#allocation137_spill] sm:$0xff] %v6635_v48 }
 0x3cb   :  { %9594 = vst [vmem:[#allocation132_spill] sm:$0xff] %v6617_v37  ;;  %1810 = vmatprep.mubr.f32.mxu0 %v6617_v37  ;;  %1881 = vmatprep.mubr.f32.mxu1 %v6617_v37  ;;  %9600 = vst [vmem:[#allocation138_spill] sm:$0xff] %v6638_v21  ;;  %v6641_v37 = vld [vmem:[#allocation9 + $0x1c0] sm:$0xff] }
 0x3cc   :  { %1811 = vmatmul.mubr.f32.vlgmr.msra.gmra.mxu0 %v6227_v50  ;;  %1882 = vmatmul.mubr.f32.vlgmr.msra.gmra.mxu1 %v6227_v50  ;;  %9601 = vst [vmem:[#allocation139_spill] sm:$0xff] %v6641_v37  ;;  %v6644_v50 = vld [vmem:[#allocation9 + $0x1d0] sm:$0xff] }
 0x3cd   :  { %1913 = vmatpush1.msra.mxu0 %v6629_v28  ;;  %1984 = vmatpush1.msra.mxu1 %v6632_v58  ;;  %9602 = vst [vmem:[#allocation140_spill] sm:$0xff] %v6644_v50  ;;  %v6647_v28 = vld [vmem:[#allocation9 + $0x1a8] sm:$0xff]  ;;  %v6650_v58 = vld [vmem:[#allocation9 + $0x1b8] sm:$0xff] }
 0x3ce   :  { %1914 = vmatprep.subr.mxu0 %v6635_v48  ;;  %1985 = vmatprep.subr.mxu1 %v6638_v21  ;;  %9603 = vst [vmem:[#allocation141_spill] sm:$0xff] %v6647_v28  ;;  %9604 = vst [vmem:[#allocation142_spill] sm:$0xff] %v6650_v58  ;;  %v6653_v48 = vld [vmem:[#allocation9 + $0x1a0] sm:$0xff]  ;;  %v6656_v21 = vld [vmem:[#allocation9 + $0x1b0] sm:$0xff] }
 0x3cf   :  { %1915 = vmatpush1.msra.mxu0 %v6641_v37  ;;  %1986 = vmatpush1.msra.mxu1 %v6644_v50  ;;  %9605 = vst [vmem:[#allocation143_spill] sm:$0xff] %v6653_v48  ;;  %9606 = vst [vmem:[#allocation144_spill] sm:$0xff] %v6656_v21  ;;  %v6659_v37 = vld [vmem:[#allocation9 + $0x188] sm:$0xff]  ;;  %v6662_v50 = vld [vmem:[#allocation9 + $0x198] sm:$0xff] }
 0x3d0   :  { %1916 = vmatprep.subr.mxu0 %v6647_v28  ;;  %1987 = vmatprep.subr.mxu1 %v6650_v58  ;;  %9607 = vst [vmem:[#allocation145_spill] sm:$0xff] %v6659_v37  ;;  %9608 = vst [vmem:[#allocation146_spill] sm:$0xff] %v6662_v50  ;;  %v6665_v28 = vld [vmem:[#allocation9 + $0x180] sm:$0xff]  ;;  %v6668_v58 = vld [vmem:[#allocation9 + $0x190] sm:$0xff] }
 0x3d1   :  { %1917 = vmatpush1.msra.mxu0 %v6653_v48  ;;  %1988 = vmatpush1.msra.mxu1 %v6656_v21  ;;  %9609 = vst [vmem:[#allocation147_spill] sm:$0xff] %v6665_v28  ;;  %9610 = vst [vmem:[#allocation148_spill] sm:$0xff] %v6668_v58  ;;  %v6671_v48 = vld [vmem:[#allocation9 + $0x168] sm:$0xff]  ;;  %v6674_v21 = vld [vmem:[#allocation9 + $0x178] sm:$0xff] }
 0x3d2   :  { %1918 = vmatprep.subr.mxu0 %v6659_v37  ;;  %1989 = vmatprep.subr.mxu1 %v6662_v50  ;;  %9611 = vst [vmem:[#allocation149_spill] sm:$0xff] %v6671_v48  ;;  %9612 = vst [vmem:[#allocation150_spill] sm:$0xff] %v6674_v21  ;;  %v6677_v37 = vld [vmem:[#allocation9 + $0x160] sm:$0xff]  ;;  %v6680_v50 = vld [vmem:[#allocation9 + $0x170] sm:$0xff] }
 0x3d3   :  { %1919 = vmatpush1.msra.mxu0 %v6665_v28  ;;  %1990 = vmatpush1.msra.mxu1 %v6668_v58  ;;  %9613 = vst [vmem:[#allocation151_spill] sm:$0xff] %v6677_v37  ;;  %9614 = vst [vmem:[#allocation152_spill] sm:$0xff] %v6680_v50  ;;  %v6683_v28 = vld [vmem:[#allocation9 + $0x148] sm:$0xff]  ;;  %v6686_v58 = vld [vmem:[#allocation9 + $0x158] sm:$0xff] }
 0x3d4   :  { %1920 = vmatprep.subr.mxu0 %v6671_v48  ;;  %1991 = vmatprep.subr.mxu1 %v6674_v21  ;;  %9615 = vst [vmem:[#allocation153_spill] sm:$0xff] %v6683_v28  ;;  %9616 = vst [vmem:[#allocation154_spill] sm:$0xff] %v6686_v58  ;;  %v6689_v48 = vld [vmem:[#allocation9 + $0x140] sm:$0xff]  ;;  %v6692_v21 = vld [vmem:[#allocation9 + $0x150] sm:$0xff] }
 0x3d5   :  { %1921 = vmatpush1.msra.mxu0 %v6677_v37  ;;  %1992 = vmatpush1.msra.mxu1 %v6680_v50  ;;  %9617 = vst [vmem:[#allocation155_spill] sm:$0xff] %v6689_v48  ;;  %9618 = vst [vmem:[#allocation156_spill] sm:$0xff] %v6692_v21  ;;  %v6695_v37 = vld [vmem:[#allocation9 + $0x128] sm:$0xff]  ;;  %v6698_v50 = vld [vmem:[#allocation9 + $0x138] sm:$0xff] }
 0x3d6   :  { %1922 = vmatprep.subr.mxu0 %v6683_v28  ;;  %1993 = vmatprep.subr.mxu1 %v6686_v58  ;;  %9619 = vst [vmem:[#allocation157_spill] sm:$0xff] %v6695_v37  ;;  %9620 = vst [vmem:[#allocation158_spill] sm:$0xff] %v6698_v50  ;;  %v6701_v28 = vld [vmem:[#allocation9 + $0x120] sm:$0xff]  ;;  %v6704_v58 = vld [vmem:[#allocation9 + $0x130] sm:$0xff] }
 0x3d7   :  { %1923 = vmatpush1.msra.mxu0 %v6689_v48  ;;  %1994 = vmatpush1.msra.mxu1 %v6692_v21  ;;  %9621 = vst [vmem:[#allocation159_spill] sm:$0xff] %v6701_v28  ;;  %9622 = vst [vmem:[#allocation160_spill] sm:$0xff] %v6704_v58  ;;  %v6707_v48 = vld [vmem:[#allocation9 + $0x108] sm:$0xff]  ;;  %v6710_v21 = vld [vmem:[#allocation9 + $0x118] sm:$0xff] }
 0x3d8   :  { %1924 = vmatprep.subr.mxu0 %v6695_v37  ;;  %1995 = vmatprep.subr.mxu1 %v6698_v50  ;;  %9623 = vst [vmem:[#allocation161_spill] sm:$0xff] %v6707_v48  ;;  %9624 = vst [vmem:[#allocation162_spill] sm:$0xff] %v6710_v21  ;;  %v6713_v37 = vld [vmem:[#allocation9 + $0x100] sm:$0xff]  ;;  %v6716_v50 = vld [vmem:[#allocation9 + $0x110] sm:$0xff] }
 0x3d9   :  { %1925 = vmatpush1.msra.mxu0 %v6701_v28  ;;  %1996 = vmatpush1.msra.mxu1 %v6704_v58  ;;  %9625 = vst [vmem:[#allocation163_spill] sm:$0xff] %v6713_v37  ;;  %9626 = vst [vmem:[#allocation164_spill] sm:$0xff] %v6716_v50  ;;  %v6719_v28 = vld [vmem:[#allocation9 + $0xe8] sm:$0xff]  ;;  %v6722_v58 = vld [vmem:[#allocation9 + $0xf8] sm:$0xff] }
 0x3da   :  { %1926 = vmatprep.subr.mxu0 %v6707_v48  ;;  %1997 = vmatprep.subr.mxu1 %v6710_v21  ;;  %9627 = vst [vmem:[#allocation165_spill] sm:$0xff] %v6719_v28  ;;  %9628 = vst [vmem:[#allocation166_spill] sm:$0xff] %v6722_v58  ;;  %v6725_v48 = vld [vmem:[#allocation9 + $0xe0] sm:$0xff]  ;;  %v6728_v21 = vld [vmem:[#allocation9 + $0xf0] sm:$0xff] }
 0x3db   :  { %1927 = vmatpush1.msra.mxu0 %v6713_v37  ;;  %1998 = vmatpush1.msra.mxu1 %v6716_v50  ;;  %9629 = vst [vmem:[#allocation167_spill] sm:$0xff] %v6725_v48  ;;  %9630 = vst [vmem:[#allocation168_spill] sm:$0xff] %v6728_v21  ;;  %v6731_v37 = vld [vmem:[#allocation9 + $0xc8] sm:$0xff]  ;;  %v6734_v50 = vld [vmem:[#allocation9 + $0xd8] sm:$0xff] }
 0x3dc   :  { %1928 = vmatprep.subr.mxu0 %v6719_v28  ;;  %1999 = vmatprep.subr.mxu1 %v6722_v58  ;;  %9631 = vst [vmem:[#allocation169_spill] sm:$0xff] %v6731_v37  ;;  %9632 = vst [vmem:[#allocation170_spill] sm:$0xff] %v6734_v50  ;;  %v6737_v28 = vld [vmem:[#allocation9 + $0xc0] sm:$0xff]  ;;  %v6740_v58 = vld [vmem:[#allocation9 + $0xd0] sm:$0xff] }
 0x3dd   :  { %1929 = vmatpush1.msra.mxu0 %v6725_v48  ;;  %2000 = vmatpush1.msra.mxu1 %v6728_v21  ;;  %9633 = vst [vmem:[#allocation171_spill] sm:$0xff] %v6737_v28  ;;  %9634 = vst [vmem:[#allocation172_spill] sm:$0xff] %v6740_v58  ;;  %v6743_v48 = vld [vmem:[#allocation9 + $0xa8] sm:$0xff]  ;;  %v6746_v21 = vld [vmem:[#allocation9 + $0xb8] sm:$0xff] }
 0x3de   :  { %1930 = vmatprep.subr.mxu0 %v6731_v37  ;;  %2001 = vmatprep.subr.mxu1 %v6734_v50  ;;  %9635 = vst [vmem:[#allocation173_spill] sm:$0xff] %v6743_v48  ;;  %9636 = vst [vmem:[#allocation174_spill] sm:$0xff] %v6746_v21  ;;  %v6749_v37 = vld [vmem:[#allocation9 + $0xa0] sm:$0xff]  ;;  %v6752_v50 = vld [vmem:[#allocation9 + $0xb0] sm:$0xff] }
 0x3df   :  { %1931 = vmatpush1.msra.mxu0 %v6737_v28  ;;  %2002 = vmatpush1.msra.mxu1 %v6740_v58  ;;  %9637 = vst [vmem:[#allocation175_spill] sm:$0xff] %v6749_v37  ;;  %9638 = vst [vmem:[#allocation176_spill] sm:$0xff] %v6752_v50  ;;  %v6755_v28 = vld [vmem:[#allocation9 + $0x88] sm:$0xff]  ;;  %v6758_v58 = vld [vmem:[#allocation9 + $0x98] sm:$0xff] }
 0x3e0   :  { %1932 = vmatprep.subr.mxu0 %v6743_v48  ;;  %2003 = vmatprep.subr.mxu1 %v6746_v21  ;;  %9639 = vst [vmem:[#allocation177_spill] sm:$0xff] %v6755_v28  ;;  %9640 = vst [vmem:[#allocation178_spill] sm:$0xff] %v6758_v58  ;;  %v6761_v48 = vld [vmem:[#allocation9 + $0x80] sm:$0xff]  ;;  %v6764_v21 = vld [vmem:[#allocation9 + $0x90] sm:$0xff] }
 0x3e1   :  { %1933 = vmatpush1.msra.mxu0 %v6749_v37  ;;  %2004 = vmatpush1.msra.mxu1 %v6752_v50  ;;  %9641 = vst [vmem:[#allocation179_spill] sm:$0xff] %v6761_v48  ;;  %9642 = vst [vmem:[#allocation180_spill] sm:$0xff] %v6764_v21  ;;  %v6767_v37 = vld [vmem:[#allocation9 + $0x68] sm:$0xff]  ;;  %v6770_v50 = vld [vmem:[#allocation9 + $0x78] sm:$0xff] }
 0x3e2   :  { %1934 = vmatprep.subr.mxu0 %v6755_v28  ;;  %2005 = vmatprep.subr.mxu1 %v6758_v58  ;;  %9643 = vst [vmem:[#allocation181_spill] sm:$0xff] %v6767_v37  ;;  %9644 = vst [vmem:[#allocation182_spill] sm:$0xff] %v6770_v50  ;;  %v6773_v28 = vld [vmem:[#allocation9 + $0x60] sm:$0xff]  ;;  %v6776_v58 = vld [vmem:[#allocation9 + $0x70] sm:$0xff] }
 0x3e3   :  { %1935 = vmatpush1.msra.mxu0 %v6761_v48  ;;  %2006 = vmatpush1.msra.mxu1 %v6764_v21  ;;  %9645 = vst [vmem:[#allocation183_spill] sm:$0xff] %v6773_v28  ;;  %9646 = vst [vmem:[#allocation184_spill] sm:$0xff] %v6776_v58  ;;  %v6779_v48 = vld [vmem:[#allocation9 + $0x48] sm:$0xff]  ;;  %v6782_v21 = vld [vmem:[#allocation9 + $0x58] sm:$0xff] }
 0x3e4   :  { %1936 = vmatprep.subr.mxu0 %v6767_v37  ;;  %2007 = vmatprep.subr.mxu1 %v6770_v50  ;;  %9647 = vst [vmem:[#allocation185_spill] sm:$0xff] %v6779_v48  ;;  %9648 = vst [vmem:[#allocation186_spill] sm:$0xff] %v6782_v21  ;;  %v6785_v37 = vld [vmem:[#allocation9 + $0x40] sm:$0xff]  ;;  %v6788_v50 = vld [vmem:[#allocation9 + $0x50] sm:$0xff] }
 0x3e5   :  { %1937 = vmatpush1.msra.mxu0 %v6773_v28  ;;  %2008 = vmatpush1.msra.mxu1 %v6776_v58  ;;  %9649 = vst [vmem:[#allocation187_spill] sm:$0xff] %v6785_v37  ;;  %9650 = vst [vmem:[#allocation188_spill] sm:$0xff] %v6788_v50  ;;  %v6791_v28 = vld [vmem:[#allocation9 + $0x28] sm:$0xff]  ;;  %v6794_v58 = vld [vmem:[#allocation9 + $0x38] sm:$0xff] }
 0x3e6   :  { %1938 = vmatprep.subr.mxu0 %v6779_v48  ;;  %2009 = vmatprep.subr.mxu1 %v6782_v21  ;;  %9651 = vst [vmem:[#allocation189_spill] sm:$0xff] %v6791_v28  ;;  %9652 = vst [vmem:[#allocation190_spill] sm:$0xff] %v6794_v58  ;;  %v6797_v48 = vld [vmem:[#allocation9 + $0x20] sm:$0xff]  ;;  %v6800_v21 = vld [vmem:[#allocation9 + $0x30] sm:$0xff] }
 0x3e7   :  { %1939 = vmatpush1.msra.mxu0 %v6785_v37  ;;  %2010 = vmatpush1.msra.mxu1 %v6788_v50  ;;  %9653 = vst [vmem:[#allocation191_spill] sm:$0xff] %v6797_v48  ;;  %9654 = vst [vmem:[#allocation192_spill] sm:$0xff] %v6800_v21  ;;  %v6803_v37 = vld [vmem:[#allocation9 + $0x8] sm:$0xff]  ;;  %v6806_v50 = vld [vmem:[#allocation9 + $0x18] sm:$0xff] }
 0x3e8   :  { %1940 = vmatprep.subr.mxu0 %v6791_v28  ;;  %2011 = vmatprep.subr.mxu1 %v6794_v58  ;;  %9655 = vst [vmem:[#allocation21_spill] sm:$0xff] %v6803_v37  ;;  %9656 = vst [vmem:[#allocation23_spill] sm:$0xff] %v6806_v50  ;;  %v6809_v28 = vld [vmem:[#allocation9] sm:$0xff]  ;;  %v6813_v58 = vld [vmem:[#allocation9 + $0x10] sm:$0xff] }
 0x3e9   :  { %1941 = vmatpush1.msra.mxu0 %v6797_v48  ;;  %2012 = vmatpush1.msra.mxu1 %v6800_v21  ;;  %9657 = vst [vmem:[#allocation24_spill] sm:$0xff] %v6809_v28  ;;  %9658 = vst [vmem:[#allocation22_spill] sm:$0xff] %v6813_v58  ;;  %v9659_v21 = vld [vmem:[#allocation25_spill] sm:$0xff] }
 0x3ea   :  { %1942 = vmatprep.subr.mxu0 %v6803_v37  ;;  %2013 = vmatprep.subr.mxu1 %v6806_v50 }
 0x3eb   :  { %1943 = vmatpush1.msra.mxu0 %v6809_v28  ;;  %1976 = vmatprep.mubr.f32.mxu0 %v9503_v36 }
 0x3ec   :  { %2014 = vmatpush1.msra.mxu1 %v6813_v58  ;;  %2047 = vmatprep.mubr.f32.mxu1 %v9503_v36 }
 0x3ed   :  { %2082 = vmatprep.subr.mxu0 %v6213_v51  ;;  %2153 = vmatprep.subr.mxu1 %v6216_v26 }
 0x449   :  { %v1642_v37 = vpop.f32.mrf.mxu0  ;;  %v1713_v28 = vpop.f32.mrf.mxu1 }
 0x44a   :  { %v1718_v48 = vadd.f32 %v1642_v37, %v9659_v21  ;;  %v1720_v36 = vadd.f32 %v1713_v28, %v9662_v32  ;;  %v9693_v28 = vld [vmem:[#allocation76_spill] sm:$0xff] }
 0x44b   :  { %v1644_v50 = vpop.f32.mrf.mxu0  ;;  %v1715_v33 = vpop.f32.mrf.mxu1 }
 0x44c   :  { %v3836_v6 = vmul.f32 -1.442695, %v1718_v48  ;;  %v1719_v55 = vadd.f32 %v1644_v50, %v9660_v29  ;;  %v1721_v58 = vadd.f32 %v1715_v33, %v9661_v63 }
 0x44e   :  { %3962 = vpow2.f32 %v3836_v6  ;;  %v3837_v16 = vmul.f32 -1.442695, %v1719_v55  ;;  %v3838_v15 = vmul.f32 -1.442695, %v1721_v58  ;;  %v9694_v58 = vld [vmem:[#allocation77_spill] sm:$0xff] }
 0x450   :  { %3964 = vpow2.f32 %v3837_v16 }
 0x451   :  { %3966 = vtanh.f32 %v1720_v36 }
 0x452   :  { %3968 = vpow2.f32 %v3838_v15 }
 0x45b   :  { %v3963_v51 = vpop.eup %3962 }
 0x45c   :  { %v1728_v17 = vadd.f32 1.0, %v3963_v51  ;;  %v9695_v51 = vld [vmem:[#allocation78_spill] sm:$0xff] }
 0x45d   :  { %v3965_v26 = vpop.eup %3964 }
 0x45e   :  { %3970 = vrcp.f32 %v1728_v17  ;;  %v1729_v21 = vadd.f32 1.0, %v3965_v26  ;;  %v3967_v37 = vpop.eup %3966  ;;  %v9692_v17 = vld [vmem:[#allocation75_spill] sm:$0xff] }
 0x45f   :  { %v3969_v29 = vpop.eup %3968  ;;  %v9696_v26 = vld [vmem:[#allocation79_spill] sm:$0xff] }
 0x460   :  { %3972 = vrcp.f32 %v1729_v21  ;;  %v1738_v16 = vadd.f32 1.0, %v3969_v29  ;;  %v9697_v21 = vld [vmem:[#allocation80_spill] sm:$0xff]  ;;  %v9699_v29 = vld [vmem:[#allocation82_spill] sm:$0xff] }
 0x462   :  { %3974 = vrcp.f32 %v1738_v16  ;;  %v9703_v16 = vld [vmem:[#allocation86_spill] sm:$0xff] }
 0x46b   :  { %v3971_v6 = vpop.eup %3970 }
 0x46c   :  { %v1742_v48 = vmul.f32 %v3971_v6, %v3967_v37  ;;  %v9698_v37 = vld [vmem:[#allocation81_spill] sm:$0xff]  ;;  %v9700_v6 = vld [vmem:[#allocation83_spill] sm:$0xff] }
 0x46d   :  { %v3973_v55 = vpop.eup %3972 }
 0x46e   :  { %v1741_v50 = vmul.f32 %v3973_v55, %v6224_v46  ;;  %v9702_v55 = vld [vmem:[#allocation85_spill] sm:$0xff] }
 0x46f   :  { %v3975_v32 = vpop.eup %3974 }
 0x470   :  { %v6824_v33 = vadd.f32 %v1742_v48, %v1741_v50  ;;  %v9701_v48 = vld [vmem:[#allocation84_spill] sm:$0xff]  ;;  %v9704_v50 = vld [vmem:[#allocation87_spill] sm:$0xff] }
 0x472   :  { %3976 = vtanh.f32 %v6824_v33 }
 0x47f   :  { %v3977_v36 = vpop.eup %3976 }
 0x480   :  { %v6827_v63 = vmul.f32 %v3977_v36, %v3975_v32  ;;  %v9705_v32 = vld [vmem:[#allocation88_spill] sm:$0xff] }
 0x482   :  { %1977 = vmatmul.mubr.f32.vlgmr.msra.gmra.mxu0 %v6827_v63  ;;  %2048 = vmatmul.mubr.f32.vlgmr.msra.gmra.mxu1 %v6827_v63 }
 0x483   :  { %2083 = vmatpush1.msra.mxu0 %v6231_v59  ;;  %2154 = vmatpush1.msra.mxu1 %v6234_v57 }
 0x484   :  { %2084 = vmatprep.subr.mxu0 %v6237_v47  ;;  %2155 = vmatprep.subr.mxu1 %v6240_v40 }
 0x485   :  { %2085 = vmatpush1.msra.mxu0 %v6243_v41  ;;  %2156 = vmatpush1.msra.mxu1 %v6246_v22 }
 0x486   :  { %2086 = vmatprep.subr.mxu0 %v6249_v12  ;;  %2157 = vmatprep.subr.mxu1 %v6252_v44  ;;  %v9663_v44 = vld [vmem:[#allocation47_spill] sm:$0xff] }
 0x487   :  { %2087 = vmatpush1.msra.mxu0 %v6255_v56  ;;  %2158 = vmatpush1.msra.mxu1 %v6258_v61  ;;  %v9664_v56 = vld [vmem:[#allocation48_spill] sm:$0xff]  ;;  %v9665_v61 = vld [vmem:[#allocation49_spill] sm:$0xff] }
 0x488   :  { %2088 = vmatprep.subr.mxu0 %v6261_v62  ;;  %2159 = vmatprep.subr.mxu1 %v6264_v2  ;;  %v9666_v62 = vld [vmem:[#allocation50_spill] sm:$0xff]  ;;  %v9667_v2 = vld [vmem:[#allocation51_spill] sm:$0xff] }
 0x489   :  { %2089 = vmatpush1.msra.mxu0 %v6267_v3  ;;  %2160 = vmatpush1.msra.mxu1 %v6270_v8  ;;  %v9668_v3 = vld [vmem:[#allocation52_spill] sm:$0xff]  ;;  %v9669_v8 = vld [vmem:[#allocation53_spill] sm:$0xff] }
 0x48a   :  { %2090 = vmatprep.subr.mxu0 %v6273_v43  ;;  %2161 = vmatprep.subr.mxu1 %v6276_v34  ;;  %v9670_v43 = vld [vmem:[#allocation54_spill] sm:$0xff] }
 0x48b   :  { %2091 = vmatpush1.msra.mxu0 %v6279_v27  ;;  %2162 = vmatpush1.msra.mxu1 %v6282_v45  ;;  %v9671_v27 = vld [vmem:[#allocation55_spill] sm:$0xff]  ;;  %v9672_v45 = vld [vmem:[#allocation56_spill] sm:$0xff] }
 0x48c   :  { %v1812_v15 = vpop.f32.mrf.mxu0  ;;  %2092 = vmatprep.subr.mxu0 %v6286_v49  ;;  %2163 = vmatprep.subr.mxu1 %v6289_v5  ;;  %v1883_v40 = vpop.f32.mrf.mxu1  ;;  %v9673_v49 = vld [vmem:[#allocation57_spill] sm:$0xff]  ;;  %v9674_v5 = vld [vmem:[#allocation58_spill] sm:$0xff] }
 0x48d   :  { %v1813_v46 = vadd.f32 %v1812_v15, %v6004_v60  ;;  %2093 = vmatpush1.msra.mxu0 %v6292_v52  ;;  %2164 = vmatpush1.msra.mxu1 %v6295_v18  ;;  %v9675_v18 = vld [vmem:[#allocation45_spill] sm:$0xff] }
 0x48e   :  { %v1814_v59 = vpop.f32.mrf.mxu0  ;;  %2094 = vmatprep.subr.mxu0 %v6299_v19  ;;  %2165 = vmatprep.subr.mxu1 %v6302_v30  ;;  %v1885_v22 = vpop.f32.mrf.mxu1  ;;  %v1884_v19 = vadd.f32 %v1883_v40, %v9675_v18  ;;  %v9676_v30 = vld [vmem:[#allocation59_spill] sm:$0xff]  ;;  %v9706_v15 = vld [vmem:[#allocation89_spill] sm:$0xff] }
 0x48f   :  { %v3839_v57 = vmul.f32 -1.442695, %v1813_v46  ;;  %v1815_v47 = vadd.f32 %v1814_v59, %v6011_v0  ;;  %2095 = vmatpush1.msra.mxu0 %v6305_v54  ;;  %2166 = vmatpush1.msra.mxu1 %v6308_v24  ;;  %v1886_v12 = vadd.f32 %v1885_v22, %v6032_v7  ;;  %v9677_v54 = vld [vmem:[#allocation60_spill] sm:$0xff]  ;;  %v9707_v46 = vld [vmem:[#allocation90_spill] sm:$0xff] }
 0x490   :  { %2096 = vmatprep.subr.mxu0 %v6311_v10  ;;  %2167 = vmatprep.subr.mxu1 %v6314_v11  ;;  %v9678_v10 = vld [vmem:[#allocation61_spill] sm:$0xff]  ;;  %v9679_v11 = vld [vmem:[#allocation62_spill] sm:$0xff] }
 0x491   :  { %3978 = vpow2.f32 %v3839_v57  ;;  %v3840_v41 = vmul.f32 -1.442695, %v1815_v47  ;;  %2097 = vmatpush1.msra.mxu0 %v6317_v25  ;;  %2168 = vmatpush1.msra.mxu1 %v6320_v38  ;;  %v3841_v34 = vmul.f32 -1.442695, %v1886_v12  ;;  %v9680_v38 = vld [vmem:[#allocation63_spill] sm:$0xff]  ;;  %v9709_v47 = vld [vmem:[#allocation92_spill] sm:$0xff] }
 0x492   :  { %2098 = vmatprep.subr.mxu0 %v6323_v23  ;;  %2169 = vmatprep.subr.mxu1 %v6326_v35  ;;  %v9681_v23 = vld [vmem:[#allocation64_spill] sm:$0xff]  ;;  %v9708_v57 = vld [vmem:[#allocation91_spill] sm:$0xff]  ;;  %v9711_v22 = vld [vmem:[#allocation94_spill] sm:$0xff] }
 0x493   :  { %3980 = vpow2.f32 %v3840_v41  ;;  %2099 = vmatpush1.msra.mxu0 %v6329_v20  ;;  %2170 = vmatpush1.msra.mxu1 %v6332_v31  ;;  %v9682_v20 = vld [vmem:[#allocation65_spill] sm:$0xff]  ;;  %v9683_v31 = vld [vmem:[#allocation66_spill] sm:$0xff] }
 0x494   :  { %2100 = vmatprep.subr.mxu0 %v6335_v53  ;;  %2171 = vmatprep.subr.mxu1 %v6338_v13  ;;  %3982 = vpow2.f32 %v3841_v34  ;;  %v9684_v53 = vld [vmem:[#allocation67_spill] sm:$0xff]  ;;  %v9685_v13 = vld [vmem:[#allocation68_spill] sm:$0xff]  ;;  %v9710_v41 = vld [vmem:[#allocation93_spill] sm:$0xff] }
 0x495   :  { %2101 = vmatpush1.msra.mxu0 %v6341_v14  ;;  %2172 = vmatpush1.msra.mxu1 %v6344_v39  ;;  %v9686_v14 = vld [vmem:[#allocation69_spill] sm:$0xff]  ;;  %v9687_v39 = vld [vmem:[#allocation70_spill] sm:$0xff]  ;;  %v9717_v34 = vld [vmem:[#allocation100_spill] sm:$0xff] }
 0x496   :  { %2102 = vmatprep.subr.mxu0 %v6347_v4  ;;  %2173 = vmatprep.subr.mxu1 %v6350_v1  ;;  %v9688_v4 = vld [vmem:[#allocation71_spill] sm:$0xff]  ;;  %v9689_v1 = vld [vmem:[#allocation72_spill] sm:$0xff] }
 0x497   :  { %2103 = vmatpush1.msra.mxu0 %v6354_v9  ;;  %2174 = vmatpush1.msra.mxu1 %v6357_v42  ;;  %v9690_v9 = vld [vmem:[#allocation73_spill] sm:$0xff]  ;;  %v9691_v42 = vld [vmem:[#allocation74_spill] sm:$0xff] }
 0x498   :  { %2104 = vmatprep.subr.mxu0 %v9663_v44  ;;  %2175 = vmatprep.subr.mxu1 %v9664_v56  ;;  %v9712_v56 = vld [vmem:[#allocation95_spill] sm:$0xff] }
 0x499   :  { %2105 = vmatpush1.msra.mxu0 %v9665_v61  ;;  %2176 = vmatpush1.msra.mxu1 %v9666_v62  ;;  %v9713_v61 = vld [vmem:[#allocation96_spill] sm:$0xff] }
 0x49a   :  { %2106 = vmatprep.subr.mxu0 %v9667_v2  ;;  %2177 = vmatprep.subr.mxu1 %v9668_v3  ;;  %v9714_v2 = vld [vmem:[#allocation99_spill] sm:$0xff] }
 0x49b   :  { %2107 = vmatpush1.msra.mxu0 %v9669_v8  ;;  %2178 = vmatpush1.msra.mxu1 %v9670_v43  ;;  %v9715_v8 = vld [vmem:[#allocation97_spill] sm:$0xff]  ;;  %v9716_v43 = vld [vmem:[#allocation98_spill] sm:$0xff] }
 0x49c   :  { %2108 = vmatprep.subr.mxu0 %v9671_v27  ;;  %2179 = vmatprep.subr.mxu1 %v9672_v45  ;;  %v9718_v27 = vld [vmem:[#allocation101_spill] sm:$0xff] }
 0x49d   :  { %2109 = vmatpush1.msra.mxu0 %v9673_v49  ;;  %2180 = vmatpush1.msra.mxu1 %v9674_v5  ;;  %v9719_v49 = vld [vmem:[#allocation102_spill] sm:$0xff]  ;;  %v9720_v5 = vld [vmem:[#allocation103_spill] sm:$0xff] }
 0x49e   :  { %v3979_v52 = vpop.eup %3978  ;;  %2110 = vmatprep.subr.mxu0 %v9676_v30  ;;  %2181 = vmatprep.subr.mxu1 %v9677_v54  ;;  %v9723_v30 = vld [vmem:[#allocation106_spill] sm:$0xff]  ;;  %v9724_v54 = vld [vmem:[#allocation107_spill] sm:$0xff] }
 0x49f   :  { %v1894_v24 = vadd.f32 1.0, %v3979_v52  ;;  %2111 = vmatpush1.msra.mxu0 %v9678_v10  ;;  %2182 = vmatpush1.msra.mxu1 %v9679_v11  ;;  %v9721_v52 = vld [vmem:[#allocation104_spill] sm:$0xff]  ;;  %v9726_v10 = vld [vmem:[#allocation109_spill] sm:$0xff]  ;;  %v9727_v11 = vld [vmem:[#allocation110_spill] sm:$0xff] }
 0x4a0   :  { %v3981_v25 = vpop.eup %3980  ;;  %2112 = vmatprep.subr.mxu0 %v9680_v38  ;;  %2183 = vmatprep.subr.mxu1 %v9681_v23  ;;  %v9729_v38 = vld [vmem:[#allocation112_spill] sm:$0xff]  ;;  %v9730_v23 = vld [vmem:[#allocation113_spill] sm:$0xff] }
 0x4a1   :  { %3984 = vrcp.f32 %v1894_v24  ;;  %v1895_v35 = vadd.f32 1.0, %v3981_v25  ;;  %2113 = vmatpush1.msra.mxu0 %v9682_v20  ;;  %2184 = vmatpush1.msra.mxu1 %v9683_v31  ;;  %v3983_v36 = vpop.eup %3982  ;;  %v9725_v24 = vld [vmem:[#allocation108_spill] sm:$0xff]  ;;  %v9728_v25 = vld [vmem:[#allocation111_spill] sm:$0xff] }
 0x4a2   :  { %3986 = vtanh.f32 %v1884_v19  ;;  %2114 = vmatprep.subr.mxu0 %v9684_v53  ;;  %2185 = vmatprep.subr.mxu1 %v9685_v13  ;;  %v1904_v44 = vadd.f32 1.0, %v3983_v36  ;;  %v9722_v19 = vld [vmem:[#allocation105_spill] sm:$0xff]  ;;  %v9732_v20 = vld [vmem:[#allocation115_spill] sm:$0xff]  ;;  %v9733_v31 = vld [vmem:[#allocation116_spill] sm:$0xff] }
 0x4a3   :  { %3988 = vrcp.f32 %v1895_v35  ;;  %2115 = vmatpush2.msra.mxu0 %v9686_v14  ;;  %2186 = vmatpush2.msra.mxu1 %v9687_v39  ;;  %v9731_v35 = vld [vmem:[#allocation114_spill] sm:$0xff]  ;;  %v9734_v53 = vld [vmem:[#allocation117_spill] sm:$0xff]  ;;  %v9736_v14 = vld [vmem:[#allocation119_spill] sm:$0xff] }
 0x4a4   :  { %2116 = vmatprep.subr.mxu0 %v9688_v4  ;;  %2187 = vmatprep.subr.mxu1 %v9689_v1  ;;  %3990 = vrcp.f32 %v1904_v44  ;;  %v9735_v13 = vld [vmem:[#allocation118_spill] sm:$0xff]  ;;  %v9737_v39 = vld [vmem:[#allocation120_spill] sm:$0xff]  ;;  %v9738_v4 = vld [vmem:[#allocation121_spill] sm:$0xff] }
 0x4a5   :  { %2117 = vmatpush2.msra.mxu0 %v9690_v9  ;;  %2188 = vmatpush2.msra.mxu1 %v9691_v42  ;;  %v9739_v1 = vld [vmem:[#allocation122_spill] sm:$0xff]  ;;  %v9740_v9 = vld [vmem:[#allocation123_spill] sm:$0xff]  ;;  %v9741_v42 = vld [vmem:[#allocation124_spill] sm:$0xff] }
 0x4a6   :  { %2118 = vmatprep.subr.mxu0 %v9692_v17  ;;  %2189 = vmatprep.subr.mxu1 %v9693_v28  ;;  %v9742_v17 = vld [vmem:[#allocation125_spill] sm:$0xff]  ;;  %v9743_v28 = vld [vmem:[#allocation126_spill] sm:$0xff]  ;;  %v9765_v44 = vld [vmem:[#allocation148_spill] sm:$0xff] }
 0x4a7   :  { %2119 = vmatpush2.msra.mxu0 %v9694_v58  ;;  %2190 = vmatpush2.msra.mxu1 %v9695_v51  ;;  %v9744_v58 = vld [vmem:[#allocation127_spill] sm:$0xff]  ;;  %v9745_v51 = vld [vmem:[#allocation128_spill] sm:$0xff]  ;;  %v9754_v36 = vld [vmem:[#allocation137_spill] sm:$0xff] }
 0x4a8   :  { %2120 = vmatprep.subr.mxu0 %v9696_v26  ;;  %2191 = vmatprep.subr.mxu1 %v9697_v21  ;;  %v9746_v26 = vld [vmem:[#allocation129_spill] sm:$0xff] }
 0x4a9   :  { %2121 = vmatpush2.msra.mxu0 %v9698_v37  ;;  %2192 = vmatpush2.msra.mxu1 %v9699_v29  ;;  %v9747_v37 = vld [vmem:[#allocation130_spill] sm:$0xff]  ;;  %v9748_v29 = vld [vmem:[#allocation131_spill] sm:$0xff] }
 0x4aa   :  { %2122 = vmatprep.subr.mxu0 %v9700_v6  ;;  %2193 = vmatprep.subr.mxu1 %v9701_v48  ;;  %v9749_v48 = vld [vmem:[#allocation133_spill] sm:$0xff] }
 0x4ab   :  { %2123 = vmatpush2.msra.mxu0 %v9702_v55  ;;  %2194 = vmatpush2.msra.mxu1 %v9703_v16  ;;  %v9750_v55 = vld [vmem:[#allocation134_spill] sm:$0xff] }
 0x4ac   :  { %2124 = vmatprep.subr.mxu0 %v9704_v50  ;;  %2195 = vmatprep.subr.mxu1 %v9705_v32  ;;  %v9752_v50 = vld [vmem:[#allocation135_spill] sm:$0xff]  ;;  %v9753_v32 = vld [vmem:[#allocation136_spill] sm:$0xff] }
 0x4ad   :  { %2125 = vmatpush2.msra.mxu0 %v9706_v15  ;;  %2196 = vmatpush2.msra.mxu1 %v9707_v46  ;;  %v9755_v15 = vld [vmem:[#allocation138_spill] sm:$0xff]  ;;  %v9756_v46 = vld [vmem:[#allocation139_spill] sm:$0xff] }
 0x4ae   :  { %v3985_v59 = vpop.eup %3984  ;;  %2126 = vmatprep.subr.mxu0 %v9708_v57  ;;  %2197 = vmatprep.subr.mxu1 %v9709_v47  ;;  %v9758_v57 = vld [vmem:[#allocation141_spill] sm:$0xff]  ;;  %v9759_v47 = vld [vmem:[#allocation142_spill] sm:$0xff] }
 0x4af   :  { %v3987_v40 = vpop.eup %3986  ;;  %2127 = vmatpush2.msra.mxu0 %v9710_v41  ;;  %2198 = vmatpush2.msra.mxu1 %v9711_v22  ;;  %v9761_v41 = vld [vmem:[#allocation144_spill] sm:$0xff]  ;;  %v9763_v22 = vld [vmem:[#allocation146_spill] sm:$0xff] }
 0x4b0   :  { %v3989_v12 = vpop.eup %3988  ;;  %2128 = vmatprep.subr.mxu0 %v9712_v56  ;;  %2199 = vmatprep.subr.mxu1 %v9713_v61  ;;  %v1908_v62 = vmul.f32 %v3987_v40, %v3985_v59  ;;  %v9757_v59 = vld [vmem:[#allocation140_spill] sm:$0xff]  ;;  %v9760_v40 = vld [vmem:[#allocation143_spill] sm:$0xff]  ;;  %v9766_v56 = vld [vmem:[#allocation149_spill] sm:$0xff] }
 0x4b1   :  { %v1907_v3 = vmul.f32 %v3989_v12, %v9714_v2  ;;  %2129 = vmatpush2.msra.mxu0 %v9715_v8  ;;  %2200 = vmatpush2.msra.mxu1 %v9716_v43  ;;  %v3991_v21 = vpop.eup %3990  ;;  %v9764_v12 = vld [vmem:[#allocation147_spill] sm:$0xff]  ;;  %v9767_v61 = vld [vmem:[#allocation150_spill] sm:$0xff]  ;;  %v9769_v2 = vld [vmem:[#allocation152_spill] sm:$0xff] }
 0x4b2   :  { %2130 = vmatprep.subr.mxu0 %v9717_v34  ;;  %2201 = vmatprep.subr.mxu1 %v9718_v27  ;;  %v9771_v8 = vld [vmem:[#allocation154_spill] sm:$0xff]  ;;  %v9772_v43 = vld [vmem:[#allocation155_spill] sm:$0xff]  ;;  %v9773_v34 = vld [vmem:[#allocation156_spill] sm:$0xff] }
 0x4b3   :  { %v6932_v45 = vadd.f32 %v1908_v62, %v1907_v3  ;;  %2131 = vmatpush2.msra.mxu0 %v9719_v49  ;;  %2202 = vmatpush2.msra.mxu1 %v9720_v5  ;;  %v9768_v62 = vld [vmem:[#allocation151_spill] sm:$0xff]  ;;  %v9770_v3 = vld [vmem:[#allocation153_spill] sm:$0xff]  ;;  %v9775_v49 = vld [vmem:[#allocation158_spill] sm:$0xff] }
 0x4b4   :  { %2132 = vmatprep.subr.mxu0 %v9721_v52  ;;  %2203 = vmatprep.subr.mxu1 %v9722_v19  ;;  %v9774_v27 = vld [vmem:[#allocation157_spill] sm:$0xff]  ;;  %v9776_v5 = vld [vmem:[#allocation159_spill] sm:$0xff]  ;;  %v9777_v52 = vld [vmem:[#allocation160_spill] sm:$0xff] }
 0x4b5   :  { %2133 = vmatpush2.msra.mxu0 %v9723_v30  ;;  %2204 = vmatpush2.msra.mxu1 %v9724_v54  ;;  %3992 = vtanh.f32 %v6932_v45  ;;  %v9778_v19 = vld [vmem:[#allocation161_spill] sm:$0xff]  ;;  %v9779_v30 = vld [vmem:[#allocation162_spill] sm:$0xff]  ;;  %v9780_v54 = vld [vmem:[#allocation163_spill] sm:$0xff] }
 0x4b6   :  { %2134 = vmatprep.subr.mxu0 %v9725_v24  ;;  %2205 = vmatprep.subr.mxu1 %v9726_v10  ;;  %v9781_v24 = vld [vmem:[#allocation164_spill] sm:$0xff]  ;;  %v9782_v10 = vld [vmem:[#allocation165_spill] sm:$0xff] }
 0x4b7   :  { %2135 = vmatpush2.msra.mxu0 %v9727_v11  ;;  %2206 = vmatpush2.msra.mxu1 %v9728_v25  ;;  %v9783_v11 = vld [vmem:[#allocation166_spill] sm:$0xff]  ;;  %v9784_v25 = vld [vmem:[#allocation167_spill] sm:$0xff] }
 0x4b8   :  { %2136 = vmatprep.subr.mxu0 %v9729_v38  ;;  %2207 = vmatprep.subr.mxu1 %v9730_v23  ;;  %v9785_v38 = vld [vmem:[#allocation168_spill] sm:$0xff]  ;;  %v9786_v23 = vld [vmem:[#allocation169_spill] sm:$0xff] }
 0x4b9   :  { %2137 = vmatpush2.msra.mxu0 %v9731_v35  ;;  %2208 = vmatpush2.msra.mxu1 %v9732_v20  ;;  %v9787_v35 = vld [vmem:[#allocation170_spill] sm:$0xff]  ;;  %v9788_v20 = vld [vmem:[#allocation171_spill] sm:$0xff] }
 0x4ba   :  { %2138 = vmatprep.subr.mxu0 %v9733_v31  ;;  %2209 = vmatprep.subr.mxu1 %v9734_v53  ;;  %v9789_v31 = vld [vmem:[#allocation172_spill] sm:$0xff]  ;;  %v9790_v53 = vld [vmem:[#allocation173_spill] sm:$0xff] }
 0x4bb   :  { %2139 = vmatpush2.msra.mxu0 %v9735_v13  ;;  %2210 = vmatpush2.msra.mxu1 %v9736_v14  ;;  %v9791_v13 = vld [vmem:[#allocation174_spill] sm:$0xff]  ;;  %v9792_v14 = vld [vmem:[#allocation175_spill] sm:$0xff] }
 0x4bc   :  { %2140 = vmatprep.subr.mxu0 %v9737_v39  ;;  %2211 = vmatprep.subr.mxu1 %v9738_v4  ;;  %v9793_v39 = vld [vmem:[#allocation176_spill] sm:$0xff]  ;;  %v9794_v4 = vld [vmem:[#allocation177_spill] sm:$0xff] }
 0x4bd   :  { %2141 = vmatpush2.msra.mxu0 %v9739_v1  ;;  %2212 = vmatpush2.msra.mxu1 %v9740_v9  ;;  %v9795_v1 = vld [vmem:[#allocation178_spill] sm:$0xff]  ;;  %v9796_v9 = vld [vmem:[#allocation179_spill] sm:$0xff] }
 0x4be   :  { %2142 = vmatprep.subr.mxu0 %v9741_v42  ;;  %2213 = vmatprep.subr.mxu1 %v9742_v17  ;;  %v9797_v42 = vld [vmem:[#allocation180_spill] sm:$0xff]  ;;  %v9798_v17 = vld [vmem:[#allocation181_spill] sm:$0xff] }
 0x4bf   :  { %2143 = vmatpush2.msra.mxu0 %v9743_v28  ;;  %2214 = vmatpush2.msra.mxu1 %v9744_v58  ;;  %v9799_v28 = vld [vmem:[#allocation182_spill] sm:$0xff]  ;;  %v9800_v58 = vld [vmem:[#allocation183_spill] sm:$0xff] }
 0x4c0   :  { %2144 = vmatprep.subr.mxu0 %v9745_v51  ;;  %2215 = vmatprep.subr.mxu1 %v9746_v26  ;;  %v9801_v51 = vld [vmem:[#allocation184_spill] sm:$0xff]  ;;  %v9802_v26 = vld [vmem:[#allocation185_spill] sm:$0xff] }
 0x4c1   :  { %2145 = vmatpush2.msra.mxu0 %v9747_v37  ;;  %2216 = vmatpush2.msra.mxu1 %v9748_v29  ;;  %v9804_v37 = vld [vmem:[#allocation187_spill] sm:$0xff]  ;;  %v9805_v29 = vld [vmem:[#allocation188_spill] sm:$0xff] }
 0x4c2   :  { %v3993_v6 = vpop.eup %3992  ;;  %2248 = vmatprep.subr.mxu0 %v9749_v48  ;;  %2319 = vmatprep.subr.mxu1 %v9750_v55  ;;  %v9807_v48 = vld [vmem:[#allocation190_spill] sm:$0xff]  ;;  %v9808_v55 = vld [vmem:[#allocation191_spill] sm:$0xff] }
 0x4c3   :  { %v6967_v16 = vmul.f32 %v3993_v6, %v3991_v21  ;;  %v9803_v21 = vld [vmem:[#allocation186_spill] sm:$0xff]  ;;  %v9806_v6 = vld [vmem:[#allocation189_spill] sm:$0xff] }
 0x4c5   :  { %9751 = vst [vmem:[#allocation25_spill] sm:$0xff] %v6967_v16  ;;  %2146 = vmatprep.mubr.f32.mxu0 %v6967_v16  ;;  %2217 = vmatprep.mubr.f32.mxu1 %v6967_v16  ;;  %v7211_v16 = vld [vmem:[#allocation10 + $0x58] sm:$0xff] }
 0x4c6   :  { %2147 = vmatmul.mubr.f32.vlgmr.msra.gmra.mxu0 %v6827_v63  ;;  %2218 = vmatmul.mubr.f32.vlgmr.msra.gmra.mxu1 %v6827_v63  ;;  %v9762_v63 = vld [vmem:[#allocation145_spill] sm:$0xff]  ;;  %9827 = vst [vmem:[#allocation52_spill] sm:$0xff] %v7211_v16 }
 0x4c7   :  { %2249 = vmatpush1.msra.mxu0 %v9752_v50  ;;  %2320 = vmatpush1.msra.mxu1 %v9753_v32  ;;  %v9809_v50 = vld [vmem:[#allocation192_spill] sm:$0xff]  ;;  %v9810_v32 = vld [vmem:[#allocation21_spill] sm:$0xff] }
 0x4c8   :  { %2250 = vmatprep.subr.mxu0 %v9754_v36  ;;  %2321 = vmatprep.subr.mxu1 %v9755_v15  ;;  %v9811_v36 = vld [vmem:[#allocation23_spill] sm:$0xff]  ;;  %v9812_v15 = vld [vmem:[#allocation24_spill] sm:$0xff] }
 0x4c9   :  { %2251 = vmatpush1.msra.mxu0 %v9756_v46  ;;  %2322 = vmatpush1.msra.mxu1 %v9757_v59  ;;  %v9813_v46 = vmov 0.0   ;;  %v9814_v59 = vld [vmem:[#allocation22_spill] sm:$0xff] }
 0x4ca   :  { %2252 = vmatprep.subr.mxu0 %v9758_v57  ;;  %2323 = vmatprep.subr.mxu1 %v9759_v47  ;;  %v7037_v57 = vld [vmem:[#allocation10 + $0x1e8] sm:$0xff]  ;;  %v7040_v47 = vld [vmem:[#allocation10 + $0x1f8] sm:$0xff] }
 0x4cb   :  { %2253 = vmatpush1.msra.mxu0 %v9760_v40  ;;  %2324 = vmatpush1.msra.mxu1 %v9761_v41  ;;  %v9815_v41 = vld [vmem:[#allocation29_spill] sm:$0xff] }
 0x4cc   :  { %2254 = vmatprep.subr.mxu0 %v9762_v63  ;;  %2325 = vmatprep.subr.mxu1 %v9763_v22 }
 0x4cd   :  { %2255 = vmatpush1.msra.mxu0 %v9764_v12  ;;  %2326 = vmatpush1.msra.mxu1 %v9765_v44  ;;  %v9816_v44 = vld [vmem:[#allocation31_spill] sm:$0xff] }
 0x4ce   :  { %2256 = vmatprep.subr.mxu0 %v9766_v56  ;;  %2327 = vmatprep.subr.mxu1 %v9767_v61 }
 0x4cf   :  { %2257 = vmatpush1.msra.mxu0 %v9768_v62  ;;  %2328 = vmatpush1.msra.mxu1 %v9769_v2 }
 0x4d0   :  { %2258 = vmatprep.subr.mxu0 %v9770_v3  ;;  %2329 = vmatprep.subr.mxu1 %v9771_v8  ;;  %v9817_v3 = vld [vmem:[#allocation32_spill] sm:$0xff] }
 0x4d1   :  { %2259 = vmatpush1.msra.mxu0 %v9772_v43  ;;  %2330 = vmatpush1.msra.mxu1 %v9773_v34  ;;  %v9818_v43 = vld [vmem:[#allocation30_spill] sm:$0xff] }
 0x4d2   :  { %2260 = vmatprep.subr.mxu0 %v9774_v27  ;;  %2331 = vmatprep.subr.mxu1 %v9775_v49 }
 0x4d3   :  { %2261 = vmatpush1.msra.mxu0 %v9776_v5  ;;  %2332 = vmatpush1.msra.mxu1 %v9777_v52 }
 0x4d4   :  { %2262 = vmatprep.subr.mxu0 %v9778_v19  ;;  %2333 = vmatprep.subr.mxu1 %v9779_v30 }
 0x4d5   :  { %2263 = vmatpush1.msra.mxu0 %v9780_v54  ;;  %2334 = vmatpush1.msra.mxu1 %v9781_v24 }
 0x4d6   :  { %2264 = vmatprep.subr.mxu0 %v9782_v10  ;;  %2335 = vmatprep.subr.mxu1 %v9783_v11 }
 0x4d7   :  { %2265 = vmatpush1.msra.mxu0 %v9784_v25  ;;  %2336 = vmatpush1.msra.mxu1 %v9785_v38 }
 0x4d8   :  { %2266 = vmatprep.subr.mxu0 %v9786_v23  ;;  %2337 = vmatprep.subr.mxu1 %v9787_v35 }
 0x4d9   :  { %2267 = vmatpush1.msra.mxu0 %v9788_v20  ;;  %2338 = vmatpush1.msra.mxu1 %v9789_v31 }
 0x4da   :  { %2268 = vmatprep.subr.mxu0 %v9790_v53  ;;  %2339 = vmatprep.subr.mxu1 %v9791_v13  ;;  %v7055_v53 = vld [vmem:[#allocation10 + $0x1e0] sm:$0xff]  ;;  %v7058_v13 = vld [vmem:[#allocation10 + $0x1f0] sm:$0xff] }
 0x4db   :  { %2269 = vmatpush1.msra.mxu0 %v9792_v14  ;;  %2340 = vmatpush1.msra.mxu1 %v9793_v39  ;;  %v7064_v14 = vld [vmem:[#allocation10 + $0x1d8] sm:$0xff]  ;;  %v7067_v39 = vld [vmem:[#allocation10 + $0x1c0] sm:$0xff] }
 0x4dc   :  { %2270 = vmatprep.subr.mxu0 %v9794_v4  ;;  %2341 = vmatprep.subr.mxu1 %v9795_v1  ;;  %v7070_v4 = vld [vmem:[#allocation10 + $0x1d0] sm:$0xff]  ;;  %v7073_v1 = vld [vmem:[#allocation10 + $0x1a8] sm:$0xff] }
 0x4dd   :  { %2271 = vmatpush1.msra.mxu0 %v9796_v9  ;;  %2342 = vmatpush1.msra.mxu1 %v9797_v42  ;;  %v7076_v9 = vld [vmem:[#allocation10 + $0x1b8] sm:$0xff]  ;;  %v7079_v42 = vld [vmem:[#allocation10 + $0x1a0] sm:$0xff] }
 0x4de   :  { %2272 = vmatprep.subr.mxu0 %v9798_v17  ;;  %2343 = vmatprep.subr.mxu1 %v9799_v28  ;;  %v7082_v17 = vld [vmem:[#allocation10 + $0x1b0] sm:$0xff]  ;;  %v7085_v28 = vld [vmem:[#allocation10 + $0x188] sm:$0xff] }
 0x4df   :  { %2273 = vmatpush1.msra.mxu0 %v9800_v58  ;;  %2344 = vmatpush1.msra.mxu1 %v9801_v51  ;;  %v7088_v58 = vld [vmem:[#allocation10 + $0x198] sm:$0xff]  ;;  %v7091_v51 = vld [vmem:[#allocation10 + $0x180] sm:$0xff] }
 0x4e0   :  { %2274 = vmatprep.subr.mxu0 %v9802_v26  ;;  %2345 = vmatprep.subr.mxu1 %v9803_v21  ;;  %v7094_v26 = vld [vmem:[#allocation10 + $0x190] sm:$0xff]  ;;  %v7097_v21 = vld [vmem:[#allocation10 + $0x168] sm:$0xff] }
 0x4e1   :  { %2275 = vmatpush1.msra.mxu0 %v9804_v37  ;;  %2346 = vmatpush1.msra.mxu1 %v9805_v29  ;;  %v7100_v37 = vld [vmem:[#allocation10 + $0x178] sm:$0xff]  ;;  %v7103_v29 = vld [vmem:[#allocation10 + $0x160] sm:$0xff] }
 0x4e2   :  { %2276 = vmatprep.subr.mxu0 %v9806_v6  ;;  %2347 = vmatprep.subr.mxu1 %v9807_v48  ;;  %v7106_v6 = vld [vmem:[#allocation10 + $0x170] sm:$0xff]  ;;  %v7109_v48 = vld [vmem:[#allocation10 + $0x148] sm:$0xff] }
 0x4e3   :  { %2277 = vmatpush1.msra.mxu0 %v9808_v55  ;;  %2348 = vmatpush1.msra.mxu1 %v9809_v50  ;;  %v7112_v55 = vld [vmem:[#allocation10 + $0x158] sm:$0xff] }
 0x4e4   :  { %2278 = vmatprep.subr.mxu0 %v9810_v32  ;;  %2349 = vmatprep.subr.mxu1 %v9811_v36  ;;  %v7115_v32 = vld [vmem:[#allocation10 + $0x140] sm:$0xff]  ;;  %v7118_v36 = vld [vmem:[#allocation10 + $0x150] sm:$0xff] }
 0x4e5   :  { %2279 = vmatpush1.msra.mxu0 %v9812_v15  ;;  %2312 = vmatprep.mubr.f32.mxu0 %v9813_v46 }
 0x4e6   :  { %2350 = vmatpush1.msra.mxu1 %v9814_v59  ;;  %2383 = vmatprep.mubr.f32.mxu1 %v9813_v46  ;;  %v7122_v59 = vld [vmem:[#allocation10 + $0x128] sm:$0xff] }
 0x4e7   :  { %2418 = vmatprep.subr.mxu0 %v7037_v57  ;;  %2489 = vmatprep.subr.mxu1 %v7040_v47 }
 0x542   :  { %v1978_v40 = vpop.f32.mrf.mxu0  ;;  %v2049_v61 = vpop.f32.mrf.mxu1 }
 0x543   :  { %v2054_v63 = vadd.f32 %v1978_v40, %v9815_v41  ;;  %v2056_v34 = vadd.f32 %v2049_v61, %v9818_v43  ;;  %v7125_v40 = vld [vmem:[#allocation10 + $0x138] sm:$0xff]  ;;  %v7147_v43 = vld [vmem:[#allocation10 + $0xe8] sm:$0xff] }
 0x544   :  { %v1980_v22 = vpop.f32.mrf.mxu0  ;;  %v2051_v2 = vpop.f32.mrf.mxu1  ;;  %v7138_v61 = vld [vmem:[#allocation10 + $0x118] sm:$0xff] }
 0x545   :  { %v3842_v12 = vmul.f32 -1.442695, %v2054_v63  ;;  %v2055_v56 = vadd.f32 %v1980_v22, %v9816_v44  ;;  %v2057_v8 = vadd.f32 %v2051_v2, %v9817_v3  ;;  %v7128_v63 = vld [vmem:[#allocation10 + $0x120] sm:$0xff]  ;;  %v7131_v22 = vld [vmem:[#allocation10 + $0x130] sm:$0xff] }
 0x546   :  { %v7144_v2 = vld [vmem:[#allocation10 + $0x110] sm:$0xff] }
 0x547   :  { %3994 = vpow2.f32 %v3842_v12  ;;  %v3843_v62 = vmul.f32 -1.442695, %v2055_v56  ;;  %v3844_v27 = vmul.f32 -1.442695, %v2057_v8  ;;  %v7135_v56 = vld [vmem:[#allocation10 + $0x108] sm:$0xff] }
 0x549   :  { %3996 = vpow2.f32 %v3843_v62  ;;  %v7141_v62 = vld [vmem:[#allocation10 + $0x100] sm:$0xff] }
 0x54a   :  { %3998 = vtanh.f32 %v2056_v34  ;;  %v7150_v34 = vld [vmem:[#allocation10 + $0xf8] sm:$0xff] }
 0x54b   :  { %4000 = vpow2.f32 %v3844_v27  ;;  %v7153_v27 = vld [vmem:[#allocation10 + $0xe0] sm:$0xff] }
 0x554   :  { %v3995_v49 = vpop.eup %3994 }
 0x555   :  { %v2064_v5 = vadd.f32 1.0, %v3995_v49  ;;  %v7156_v49 = vld [vmem:[#allocation10 + $0xf0] sm:$0xff] }
 0x556   :  { %v3997_v52 = vpop.eup %3996 }
 0x557   :  { %4002 = vrcp.f32 %v2064_v5  ;;  %v2065_v19 = vadd.f32 1.0, %v3997_v52  ;;  %v3999_v30 = vpop.eup %3998  ;;  %v7159_v5 = vld [vmem:[#allocation10 + $0xc8] sm:$0xff]  ;;  %v7162_v52 = vld [vmem:[#allocation10 + $0xd8] sm:$0xff] }
 0x558   :  { %v4001_v54 = vpop.eup %4000 }
 0x559   :  { %4004 = vrcp.f32 %v2065_v19  ;;  %v2074_v25 = vadd.f32 1.0, %v4001_v54  ;;  %v7165_v19 = vld [vmem:[#allocation10 + $0xc0] sm:$0xff] }
 0x55b   :  { %4006 = vrcp.f32 %v2074_v25  ;;  %v7180_v25 = vld [vmem:[#allocation10 + $0xb0] sm:$0xff] }
 0x564   :  { %v4003_v24 = vpop.eup %4002 }
 0x565   :  { %v2078_v10 = vmul.f32 %v4003_v24, %v3999_v30  ;;  %v7168_v30 = vld [vmem:[#allocation10 + $0xd0] sm:$0xff]  ;;  %v7171_v24 = vld [vmem:[#allocation10 + $0xa8] sm:$0xff] }
 0x566   :  { %v4005_v11 = vpop.eup %4004 }
 0x567   :  { %v2077_v38 = vmul.f32 %v4005_v11, %v6824_v33  ;;  %v7061_v33 = vld [vmem:[#allocation10 + $0x1c8] sm:$0xff]  ;;  %v7177_v11 = vld [vmem:[#allocation10 + $0xa0] sm:$0xff] }
 0x568   :  { %v4007_v35 = vpop.eup %4006 }
 0x569   :  { %v7048_v23 = vadd.f32 %v2078_v10, %v2077_v38  ;;  %v7174_v10 = vld [vmem:[#allocation10 + $0xb8] sm:$0xff]  ;;  %v7183_v38 = vld [vmem:[#allocation10 + $0x88] sm:$0xff] }
 0x56b   :  { %4008 = vtanh.f32 %v7048_v23 }
 0x578   :  { %v4009_v20 = vpop.eup %4008 }
 0x579   :  { %v7051_v31 = vmul.f32 %v4009_v20, %v4007_v35  ;;  %v7186_v35 = vld [vmem:[#allocation10 + $0x98] sm:$0xff] }
 0x57a   :  { %9819 = vst [vmem:[#allocation27_spill] sm:$0xff] %v7186_v35 }
 0x57b   :  { %2313 = vmatmul.mubr.f32.vlgmr.msra.gmra.mxu0 %v7051_v31  ;;  %2384 = vmatmul.mubr.f32.vlgmr.msra.gmra.mxu1 %v7051_v31 }
 0x57c   :  { %2419 = vmatpush1.msra.mxu0 %v7055_v53  ;;  %2490 = vmatpush1.msra.mxu1 %v7058_v13 }
 0x57d   :  { %2420 = vmatprep.subr.mxu0 %v7061_v33  ;;  %2491 = vmatprep.subr.mxu1 %v7064_v14 }
 0x57e   :  { %2421 = vmatpush1.msra.mxu0 %v7067_v39  ;;  %2492 = vmatpush1.msra.mxu1 %v7070_v4 }
 0x57f   :  { %2422 = vmatprep.subr.mxu0 %v7073_v1  ;;  %2493 = vmatprep.subr.mxu1 %v7076_v9 }
 0x580   :  { %2423 = vmatpush1.msra.mxu0 %v7079_v42  ;;  %2494 = vmatpush1.msra.mxu1 %v7082_v17 }
 0x581   :  { %2424 = vmatprep.subr.mxu0 %v7085_v28  ;;  %2495 = vmatprep.subr.mxu1 %v7088_v58 }
 0x582   :  { %2425 = vmatpush1.msra.mxu0 %v7091_v51  ;;  %2496 = vmatpush1.msra.mxu1 %v7094_v26 }
 0x583   :  { %2426 = vmatprep.subr.mxu0 %v7097_v21  ;;  %2497 = vmatprep.subr.mxu1 %v7100_v37 }
 0x584   :  { %2427 = vmatpush1.msra.mxu0 %v7103_v29  ;;  %2498 = vmatpush1.msra.mxu1 %v7106_v6 }
 0x585   :  { %2428 = vmatprep.subr.mxu0 %v7109_v48  ;;  %2499 = vmatprep.subr.mxu1 %v7112_v55 }
 0x586   :  { %v2148_v50 = vpop.f32.mrf.mxu0  ;;  %2429 = vmatpush1.msra.mxu0 %v7115_v32  ;;  %2500 = vmatpush1.msra.mxu1 %v7118_v36  ;;  %v2219_v3 = vpop.f32.mrf.mxu1 }
 0x587   :  { %v2149_v15 = vadd.f32 %v2148_v50, %v6004_v60  ;;  %2430 = vmatprep.subr.mxu0 %v7122_v59  ;;  %2501 = vmatprep.subr.mxu1 %v7125_v40  ;;  %v7190_v50 = vld [vmem:[#allocation10 + $0x80] sm:$0xff] }
 0x588   :  { %v2150_v41 = vpop.f32.mrf.mxu0  ;;  %2431 = vmatpush1.msra.mxu0 %v7128_v63  ;;  %2502 = vmatpush1.msra.mxu1 %v7131_v22  ;;  %v2221_v54 = vpop.f32.mrf.mxu1  ;;  %9820 = vst [vmem:[#allocation28_spill] sm:$0xff] %v7190_v50 }
 0x589   :  { %v3845_v12 = vmul.f32 -1.442695, %v2149_v15  ;;  %v2151_v44 = vadd.f32 %v2150_v41, %v6011_v0  ;;  %2432 = vmatprep.subr.mxu0 %v7135_v56  ;;  %2503 = vmatprep.subr.mxu1 %v7138_v61  ;;  %v2222_v20 = vadd.f32 %v2221_v54, %v6032_v7  ;;  %v7193_v15 = vld [vmem:[#allocation10 + $0x90] sm:$0xff]  ;;  %v7196_v41 = vld [vmem:[#allocation10 + $0x68] sm:$0xff]  ;;  %v7214_v7 = vld [vmem:[#allocation10 + $0x40] sm:$0xff] }
 0x58a   :  { %2433 = vmatpush1.msra.mxu0 %v7141_v62  ;;  %2504 = vmatpush1.msra.mxu1 %v7144_v2  ;;  %9821 = vst [vmem:[#allocation26_spill] sm:$0xff] %v7193_v15  ;;  %9822 = vst [vmem:[#allocation47_spill] sm:$0xff] %v7196_v41  ;;  %v7208_v54 = vld [vmem:[#allocation10 + $0x48] sm:$0xff] }
 0x58b   :  { %4010 = vpow2.f32 %v3845_v12  ;;  %v3846_v8 = vmul.f32 -1.442695, %v2151_v44  ;;  %2434 = vmatprep.subr.mxu0 %v7147_v43  ;;  %2505 = vmatprep.subr.mxu1 %v7150_v34  ;;  %v7199_v12 = vld [vmem:[#allocation10 + $0x78] sm:$0xff]  ;;  %v7202_v44 = vld [vmem:[#allocation10 + $0x60] sm:$0xff]  ;;  %9826 = vst [vmem:[#allocation51_spill] sm:$0xff] %v7208_v54  ;;  %9828 = vst [vmem:[#allocation53_spill] sm:$0xff] %v7214_v7 }
 0x58c   :  { %2435 = vmatpush1.msra.mxu0 %v7153_v27  ;;  %2506 = vmatpush1.msra.mxu1 %v7156_v49  ;;  %9823 = vst [vmem:[#allocation48_spill] sm:$0xff] %v7199_v12  ;;  %9824 = vst [vmem:[#allocation49_spill] sm:$0xff] %v7202_v44 }
 0x58d   :  { %4012 = vpow2.f32 %v3846_v8  ;;  %2436 = vmatprep.subr.mxu0 %v7159_v5  ;;  %2507 = vmatprep.subr.mxu1 %v7162_v52  ;;  %v7205_v8 = vld [vmem:[#allocation10 + $0x70] sm:$0xff] }
 0x58e   :  { %2437 = vmatpush1.msra.mxu0 %v7165_v19  ;;  %2508 = vmatpush1.msra.mxu1 %v7168_v30  ;;  %9825 = vst [vmem:[#allocation50_spill] sm:$0xff] %v7205_v8 }
 0x58f   :  { %2438 = vmatprep.subr.mxu0 %v7171_v24  ;;  %2509 = vmatprep.subr.mxu1 %v7174_v10 }
 0x590   :  { %2439 = vmatpush1.msra.mxu0 %v7177_v11  ;;  %2510 = vmatpush1.msra.mxu1 %v7180_v25 }
 0x591   :  { %2440 = vmatprep.subr.mxu0 %v7183_v38  ;;  %2511 = vmatprep.subr.mxu1 %v7186_v35 }
 0x592   :  { %2441 = vmatpush1.msra.mxu0 %v7190_v50  ;;  %2512 = vmatpush1.msra.mxu1 %v7193_v15  ;;  %v7233_v15 = vld [vmem:[#allocation10 + $0x8] sm:$0xff] }
 0x593   :  { %2442 = vmatprep.subr.mxu0 %v7196_v41  ;;  %2513 = vmatprep.subr.mxu1 %v7199_v12  ;;  %v3847_v41 = vmul.f32 -1.442695, %v2222_v20  ;;  %v7217_v12 = vld [vmem:[#allocation10 + $0x50] sm:$0xff]  ;;  %v7227_v20 = vld [vmem:[#allocation10 + $0x20] sm:$0xff]  ;;  %9834 = vst [vmem:[#allocation59_spill] sm:$0xff] %v7233_v15  ;;  %v7342_v50 = vld [vmem:[#allocation10 + $0x2e8] sm:$0xff] }
 0x594   :  { %2443 = vmatpush1.msra.mxu0 %v7202_v44  ;;  %2514 = vmatpush1.msra.mxu1 %v7205_v8  ;;  %9829 = vst [vmem:[#allocation54_spill] sm:$0xff] %v7217_v12  ;;  %v7220_v44 = vld [vmem:[#allocation10 + $0x28] sm:$0xff]  ;;  %v7223_v8 = vld [vmem:[#allocation10 + $0x38] sm:$0xff]  ;;  %9832 = vst [vmem:[#allocation57_spill] sm:$0xff] %v7227_v20 }
 0x595   :  { %2444 = vmatprep.subr.mxu0 %v7208_v54  ;;  %2515 = vmatprep.subr.mxu1 %v7211_v16  ;;  %9830 = vst [vmem:[#allocation55_spill] sm:$0xff] %v7220_v44  ;;  %9831 = vst [vmem:[#allocation56_spill] sm:$0xff] %v7223_v8  ;;  %v2220_v16 = vadd.f32 %v2219_v3, %v9675_v18  ;;  %4014 = vpow2.f32 %v3847_v41  ;;  %v7239_v3 = vld [vmem:[#allocation10] sm:$0xff]  ;;  %v7242_v18 = vld [vmem:[#allocation10 + $0x10] sm:$0xff] }
 0x596   :  { %2445 = vmatpush1.msra.mxu0 %v7214_v7  ;;  %2516 = vmatpush1.msra.mxu1 %v7217_v12  ;;  %v7230_v7 = vld [vmem:[#allocation10 + $0x30] sm:$0xff]  ;;  %9836 = vst [vmem:[#allocation61_spill] sm:$0xff] %v7239_v3  ;;  %9837 = vst [vmem:[#allocation62_spill] sm:$0xff] %v7242_v18  ;;  %v7251_v41 = vld [vmem:[#allocation10 + $0x3e0] sm:$0xff] }
 0x597   :  { %2446 = vmatprep.subr.mxu0 %v7220_v44  ;;  %2517 = vmatprep.subr.mxu1 %v7223_v8  ;;  %9833 = vst [vmem:[#allocation58_spill] sm:$0xff] %v7230_v7  ;;  %v7236_v44 = vld [vmem:[#allocation10 + $0x18] sm:$0xff]  ;;  %9840 = vst [vmem:[#allocation65_spill] sm:$0xff] %v7251_v41 }
 0x598   :  { %v4011_v54 = vpop.eup %4010  ;;  %2447 = vmatpush1.msra.mxu0 %v7227_v20  ;;  %2518 = vmatpush1.msra.mxu1 %v7230_v7  ;;  %9835 = vst [vmem:[#allocation60_spill] sm:$0xff] %v7236_v44  ;;  %v7245_v7 = vld [vmem:[#allocation10 + $0x3e8] sm:$0xff]  ;;  %9870 = vst [vmem:[#allocation95_spill] sm:$0xff] %v7342_v50 }
 0x599   :  { %v2230_v12 = vadd.f32 1.0, %v4011_v54  ;;  %2448 = vmatprep.subr.mxu0 %v7233_v15  ;;  %2519 = vmatprep.subr.mxu1 %v7236_v44  ;;  %9838 = vst [vmem:[#allocation63_spill] sm:$0xff] %v7245_v7  ;;  %v7248_v15 = vld [vmem:[#allocation10 + $0x3f8] sm:$0xff]  ;;  %v7335_v44 = vld [vmem:[#allocation10 + $0x300] sm:$0xff] }
 0x59a   :  { %v4013_v8 = vpop.eup %4012  ;;  %2449 = vmatpush1.msra.mxu0 %v7239_v3  ;;  %2520 = vmatpush1.msra.mxu1 %v7242_v18  ;;  %9839 = vst [vmem:[#allocation64_spill] sm:$0xff] %v7248_v15  ;;  %v7254_v3 = vld [vmem:[#allocation10 + $0x3f0] sm:$0xff]  ;;  %v7332_v18 = vld [vmem:[#allocation10 + $0x318] sm:$0xff]  ;;  %9868 = vst [vmem:[#allocation93_spill] sm:$0xff] %v7335_v44 }
 0x59b   :  { %4016 = vrcp.f32 %v2230_v12  ;;  %v2231_v54 = vadd.f32 1.0, %v4013_v8  ;;  %2450 = vmatprep.subr.mxu0 %v7245_v7  ;;  %2521 = vmatprep.subr.mxu1 %v7248_v15  ;;  %9841 = vst [vmem:[#allocation66_spill] sm:$0xff] %v7254_v3  ;;  %v7257_v12 = vld [vmem:[#allocation10 + $0x3c8] sm:$0xff]  ;;  %v7260_v8 = vld [vmem:[#allocation10 + $0x3d8] sm:$0xff]  ;;  %v7263_v7 = vld [vmem:[#allocation10 + $0x3c0] sm:$0xff] }
 0x59c   :  { %4018 = vtanh.f32 %v2220_v16  ;;  %2451 = vmatpush2.msra.mxu0 %v7251_v41  ;;  %2522 = vmatpush2.msra.mxu1 %v7254_v3  ;;  %9842 = vst [vmem:[#allocation67_spill] sm:$0xff] %v7257_v12  ;;  %9843 = vst [vmem:[#allocation68_spill] sm:$0xff] %v7260_v8  ;;  %v7266_v16 = vld [vmem:[#allocation10 + $0x3d0] sm:$0xff]  ;;  %v7269_v41 = vld [vmem:[#allocation10 + $0x3a8] sm:$0xff] }
 0x59d   :  { %4020 = vrcp.f32 %v2231_v54  ;;  %2452 = vmatprep.subr.mxu0 %v7257_v12  ;;  %2523 = vmatprep.subr.mxu1 %v7260_v8  ;;  %9844 = vst [vmem:[#allocation69_spill] sm:$0xff] %v7263_v7  ;;  %9845 = vst [vmem:[#allocation70_spill] sm:$0xff] %v7266_v16  ;;  %v7272_v54 = vld [vmem:[#allocation10 + $0x3b8] sm:$0xff]  ;;  %v7275_v12 = vld [vmem:[#allocation10 + $0x3a0] sm:$0xff] }
 0x59e   :  { %2453 = vmatpush2.msra.mxu0 %v7263_v7  ;;  %2524 = vmatpush2.msra.mxu1 %v7266_v16  ;;  %9846 = vst [vmem:[#allocation71_spill] sm:$0xff] %v7269_v41  ;;  %9847 = vst [vmem:[#allocation72_spill] sm:$0xff] %v7272_v54  ;;  %v7278_v8 = vld [vmem:[#allocation10 + $0x3b0] sm:$0xff]  ;;  %v7281_v7 = vld [vmem:[#allocation10 + $0x388] sm:$0xff] }
 0x59f   :  { %2454 = vmatprep.subr.mxu0 %v7269_v41  ;;  %2525 = vmatprep.subr.mxu1 %v7272_v54  ;;  %9848 = vst [vmem:[#allocation73_spill] sm:$0xff] %v7275_v12  ;;  %9849 = vst [vmem:[#allocation74_spill] sm:$0xff] %v7278_v8  ;;  %v7284_v16 = vld [vmem:[#allocation10 + $0x398] sm:$0xff]  ;;  %v7287_v41 = vld [vmem:[#allocation10 + $0x380] sm:$0xff] }
 0x5a0   :  { %2455 = vmatpush2.msra.mxu0 %v7275_v12  ;;  %2526 = vmatpush2.msra.mxu1 %v7278_v8  ;;  %9850 = vst [vmem:[#allocation75_spill] sm:$0xff] %v7281_v7  ;;  %9851 = vst [vmem:[#allocation76_spill] sm:$0xff] %v7284_v16  ;;  %v7290_v54 = vld [vmem:[#allocation10 + $0x390] sm:$0xff]  ;;  %v7293_v12 = vld [vmem:[#allocation10 + $0x368] sm:$0xff] }
 0x5a1   :  { %2456 = vmatprep.subr.mxu0 %v7281_v7  ;;  %2527 = vmatprep.subr.mxu1 %v7284_v16  ;;  %9852 = vst [vmem:[#allocation77_spill] sm:$0xff] %v7287_v41  ;;  %9853 = vst [vmem:[#allocation78_spill] sm:$0xff] %v7290_v54  ;;  %v7296_v8 = vld [vmem:[#allocation10 + $0x378] sm:$0xff]  ;;  %v7299_v7 = vld [vmem:[#allocation10 + $0x360] sm:$0xff] }
 0x5a2   :  { %2457 = vmatpush2.msra.mxu0 %v7287_v41  ;;  %2528 = vmatpush2.msra.mxu1 %v7290_v54  ;;  %9854 = vst [vmem:[#allocation79_spill] sm:$0xff] %v7293_v12  ;;  %9855 = vst [vmem:[#allocation80_spill] sm:$0xff] %v7296_v8  ;;  %v7302_v16 = vld [vmem:[#allocation10 + $0x370] sm:$0xff]  ;;  %v7305_v41 = vld [vmem:[#allocation10 + $0x348] sm:$0xff] }
 0x5a3   :  { %2458 = vmatprep.subr.mxu0 %v7293_v12  ;;  %2529 = vmatprep.subr.mxu1 %v7296_v8  ;;  %9856 = vst [vmem:[#allocation81_spill] sm:$0xff] %v7299_v7  ;;  %9857 = vst [vmem:[#allocation82_spill] sm:$0xff] %v7302_v16  ;;  %v7308_v54 = vld [vmem:[#allocation10 + $0x358] sm:$0xff]  ;;  %v7311_v12 = vld [vmem:[#allocation10 + $0x340] sm:$0xff] }
 0x5a4   :  { %2459 = vmatpush2.msra.mxu0 %v7299_v7  ;;  %2530 = vmatpush2.msra.mxu1 %v7302_v16  ;;  %9858 = vst [vmem:[#allocation83_spill] sm:$0xff] %v7305_v41  ;;  %9859 = vst [vmem:[#allocation84_spill] sm:$0xff] %v7308_v54  ;;  %v7314_v8 = vld [vmem:[#allocation10 + $0x350] sm:$0xff]  ;;  %v4015_v7 = vpop.eup %4014  ;;  %v7317_v3 = vld [vmem:[#allocation10 + $0x328] sm:$0xff] }
 0x5a5   :  { %2460 = vmatprep.subr.mxu0 %v7305_v41  ;;  %2531 = vmatprep.subr.mxu1 %v7308_v54  ;;  %9860 = vst [vmem:[#allocation85_spill] sm:$0xff] %v7311_v12  ;;  %9861 = vst [vmem:[#allocation86_spill] sm:$0xff] %v7314_v8  ;;  %v7320_v16 = vld [vmem:[#allocation10 + $0x338] sm:$0xff]  ;;  %v7323_v15 = vld [vmem:[#allocation10 + $0x320] sm:$0xff] }
 0x5a6   :  { %2461 = vmatpush2.msra.mxu0 %v7311_v12  ;;  %2532 = vmatpush2.msra.mxu1 %v7314_v8  ;;  %9862 = vst [vmem:[#allocation87_spill] sm:$0xff] %v7317_v3  ;;  %9863 = vst [vmem:[#allocation88_spill] sm:$0xff] %v7320_v16  ;;  %v7326_v54 = vld [vmem:[#allocation10 + $0x330] sm:$0xff]  ;;  %v7329_v8 = vld [vmem:[#allocation10 + $0x308] sm:$0xff] }
 0x5a7   :  { %2462 = vmatprep.subr.mxu0 %v7317_v3  ;;  %2533 = vmatprep.subr.mxu1 %v7320_v16  ;;  %9864 = vst [vmem:[#allocation89_spill] sm:$0xff] %v7323_v15  ;;  %9865 = vst [vmem:[#allocation90_spill] sm:$0xff] %v7326_v54  ;;  %v2240_v16 = vadd.f32 1.0, %v4015_v7  ;;  %v7348_v7 = vld [vmem:[#allocation10 + $0x2e0] sm:$0xff] }
 0x5a8   :  { %v4017_v41 = vpop.eup %4016  ;;  %2463 = vmatpush2.msra.mxu0 %v7323_v15  ;;  %2534 = vmatpush2.msra.mxu1 %v7326_v54  ;;  %9866 = vst [vmem:[#allocation91_spill] sm:$0xff] %v7329_v8  ;;  %9867 = vst [vmem:[#allocation92_spill] sm:$0xff] %v7332_v18  ;;  %v7338_v15 = vld [vmem:[#allocation10 + $0x310] sm:$0xff] }
 0x5a9   :  { %v4019_v12 = vpop.eup %4018  ;;  %2464 = vmatprep.subr.mxu0 %v7329_v8  ;;  %2535 = vmatprep.subr.mxu1 %v7332_v18  ;;  %9869 = vst [vmem:[#allocation94_spill] sm:$0xff] %v7338_v15  ;;  %v7345_v8 = vld [vmem:[#allocation10 + $0x2f8] sm:$0xff]  ;;  %9872 = vst [vmem:[#allocation99_spill] sm:$0xff] %v7348_v7  ;;  %4022 = vrcp.f32 %v2240_v16  ;;  %v7378_v16 = vld [vmem:[#allocation10 + $0x2b0] sm:$0xff] }
 0x5aa   :  { %v4021_v3 = vpop.eup %4020  ;;  %2465 = vmatpush2.msra.mxu0 %v7335_v44  ;;  %2536 = vmatpush2.msra.mxu1 %v7338_v15  ;;  %v2244_v54 = vmul.f32 %v4019_v12, %v4017_v41  ;;  %9871 = vst [vmem:[#allocation96_spill] sm:$0xff] %v7345_v8  ;;  %v7351_v44 = vld [vmem:[#allocation10 + $0x2f0] sm:$0xff]  ;;  %v7356_v41 = vld [vmem:[#allocation10 + $0x2c8] sm:$0xff]  ;;  %9882 = vst [vmem:[#allocation107_spill] sm:$0xff] %v7378_v16 }
 0x5ab   :  { %v2243_v20 = vmul.f32 %v4021_v3, %v6932_v45  ;;  %2466 = vmatprep.subr.mxu0 %v7342_v50  ;;  %2537 = vmatprep.subr.mxu1 %v7345_v8  ;;  %9873 = vst [vmem:[#allocation97_spill] sm:$0xff] %v7351_v44  ;;  %9875 = vst [vmem:[#allocation100_spill] sm:$0xff] %v7356_v41  ;;  %v7359_v45 = vld [vmem:[#allocation10 + $0x2d8] sm:$0xff]  ;;  %v7362_v3 = vld [vmem:[#allocation10 + $0x2c0] sm:$0xff] }
 0x5ac   :  { %2467 = vmatpush2.msra.mxu0 %v7348_v7  ;;  %2538 = vmatpush2.msra.mxu1 %v7351_v44  ;;  %9876 = vst [vmem:[#allocation101_spill] sm:$0xff] %v7359_v45  ;;  %9877 = vst [vmem:[#allocation102_spill] sm:$0xff] %v7362_v3  ;;  %v7365_v12 = vld [vmem:[#allocation10 + $0x2d0] sm:$0xff]  ;;  %v7368_v44 = vld [vmem:[#allocation10 + $0x2a8] sm:$0xff] }
 0x5ad   :  { %v7354_v15 = vadd.f32 %v2244_v54, %v2243_v20  ;;  %2468 = vmatprep.subr.mxu0 %v7356_v41  ;;  %2539 = vmatprep.subr.mxu1 %v7359_v45  ;;  %9878 = vst [vmem:[#allocation103_spill] sm:$0xff] %v7365_v12  ;;  %9879 = vst [vmem:[#allocation104_spill] sm:$0xff] %v7368_v44  ;;  %v7371_v20 = vld [vmem:[#allocation10 + $0x2b8] sm:$0xff]  ;;  %v7375_v54 = vld [vmem:[#allocation10 + $0x2a0] sm:$0xff] }
 0x5ae   :  { %2469 = vmatpush2.msra.mxu0 %v7362_v3  ;;  %2540 = vmatpush2.msra.mxu1 %v7365_v12  ;;  %9880 = vst [vmem:[#allocation105_spill] sm:$0xff] %v7371_v20  ;;  %9881 = vst [vmem:[#allocation106_spill] sm:$0xff] %v7375_v54  ;;  %v7381_v3 = vld [vmem:[#allocation10 + $0x288] sm:$0xff]  ;;  %v7384_v12 = vld [vmem:[#allocation10 + $0x298] sm:$0xff] }
 0x5af   :  { %9874 = vst [vmem:[#allocation98_spill] sm:$0xff] %v7354_v15  ;;  %2470 = vmatprep.subr.mxu0 %v7368_v44  ;;  %2541 = vmatprep.subr.mxu1 %v7371_v20  ;;  %4024 = vtanh.f32 %v7354_v15  ;;  %9883 = vst [vmem:[#allocation108_spill] sm:$0xff] %v7381_v3  ;;  %v7387_v44 = vld [vmem:[#allocation10 + $0x280] sm:$0xff]  ;;  %v7390_v20 = vld [vmem:[#allocation10 + $0x290] sm:$0xff] }
 0x5b0   :  { %2471 = vmatpush2.msra.mxu0 %v7375_v54  ;;  %2542 = vmatpush2.msra.mxu1 %v7378_v16  ;;  %9884 = vst [vmem:[#allocation109_spill] sm:$0xff] %v7384_v12  ;;  %9885 = vst [vmem:[#allocation110_spill] sm:$0xff] %v7387_v44  ;;  %v7393_v54 = vld [vmem:[#allocation10 + $0x268] sm:$0xff]  ;;  %v7396_v16 = vld [vmem:[#allocation10 + $0x278] sm:$0xff] }
 0x5b1   :  { %2472 = vmatprep.subr.mxu0 %v7381_v3  ;;  %2543 = vmatprep.subr.mxu1 %v7384_v12  ;;  %9886 = vst [vmem:[#allocation111_spill] sm:$0xff] %v7390_v20  ;;  %9887 = vst [vmem:[#allocation112_spill] sm:$0xff] %v7393_v54  ;;  %v7399_v3 = vld [vmem:[#allocation10 + $0x260] sm:$0xff]  ;;  %v7402_v12 = vld [vmem:[#allocation10 + $0x270] sm:$0xff] }
 0x5b2   :  { %2473 = vmatpush2.msra.mxu0 %v7387_v44  ;;  %2544 = vmatpush2.msra.mxu1 %v7390_v20  ;;  %9888 = vst [vmem:[#allocation113_spill] sm:$0xff] %v7396_v16  ;;  %9889 = vst [vmem:[#allocation114_spill] sm:$0xff] %v7399_v3  ;;  %v7405_v44 = vld [vmem:[#allocation10 + $0x248] sm:$0xff]  ;;  %v7408_v20 = vld [vmem:[#allocation10 + $0x258] sm:$0xff] }
 0x5b3   :  { %2474 = vmatprep.subr.mxu0 %v7393_v54  ;;  %2545 = vmatprep.subr.mxu1 %v7396_v16  ;;  %9890 = vst [vmem:[#allocation115_spill] sm:$0xff] %v7402_v12  ;;  %9891 = vst [vmem:[#allocation116_spill] sm:$0xff] %v7405_v44  ;;  %v7411_v54 = vld [vmem:[#allocation10 + $0x240] sm:$0xff]  ;;  %v7414_v16 = vld [vmem:[#allocation10 + $0x250] sm:$0xff] }
 0x5b4   :  { %2475 = vmatpush2.msra.mxu0 %v7399_v3  ;;  %2546 = vmatpush2.msra.mxu1 %v7402_v12  ;;  %9892 = vst [vmem:[#allocation117_spill] sm:$0xff] %v7408_v20  ;;  %9893 = vst [vmem:[#allocation118_spill] sm:$0xff] %v7411_v54  ;;  %v7417_v3 = vld [vmem:[#allocation10 + $0x228] sm:$0xff]  ;;  %v7420_v12 = vld [vmem:[#allocation10 + $0x238] sm:$0xff] }
 0x5b5   :  { %2476 = vmatprep.subr.mxu0 %v7405_v44  ;;  %2547 = vmatprep.subr.mxu1 %v7408_v20  ;;  %9894 = vst [vmem:[#allocation119_spill] sm:$0xff] %v7414_v16  ;;  %9895 = vst [vmem:[#allocation120_spill] sm:$0xff] %v7417_v3  ;;  %v7423_v44 = vld [vmem:[#allocation10 + $0x220] sm:$0xff]  ;;  %v7426_v20 = vld [vmem:[#allocation10 + $0x230] sm:$0xff] }
 0x5b6   :  { %2477 = vmatpush2.msra.mxu0 %v7411_v54  ;;  %2548 = vmatpush2.msra.mxu1 %v7414_v16  ;;  %9896 = vst [vmem:[#allocation121_spill] sm:$0xff] %v7420_v12  ;;  %9897 = vst [vmem:[#allocation122_spill] sm:$0xff] %v7423_v44  ;;  %v7429_v54 = vld [vmem:[#allocation10 + $0x208] sm:$0xff]  ;;  %v7432_v16 = vld [vmem:[#allocation10 + $0x218] sm:$0xff] }
 0x5b7   :  { %2478 = vmatprep.subr.mxu0 %v7417_v3  ;;  %2549 = vmatprep.subr.mxu1 %v7420_v12  ;;  %9898 = vst [vmem:[#allocation123_spill] sm:$0xff] %v7426_v20  ;;  %9899 = vst [vmem:[#allocation124_spill] sm:$0xff] %v7429_v54  ;;  %v7435_v3 = vld [vmem:[#allocation10 + $0x200] sm:$0xff]  ;;  %v7438_v12 = vld [vmem:[#allocation10 + $0x210] sm:$0xff] }
 0x5b8   :  { %2479 = vmatpush2.msra.mxu0 %v7423_v44  ;;  %2550 = vmatpush2.msra.mxu1 %v7426_v20  ;;  %9900 = vst [vmem:[#allocation125_spill] sm:$0xff] %v7432_v16  ;;  %9901 = vst [vmem:[#allocation126_spill] sm:$0xff] %v7435_v3  ;;  %v4023_v44 = vpop.eup %4022  ;;  %v7441_v45 = vld [vmem:[#allocation9 + $0x1e8] sm:$0xff]  ;;  %v7444_v20 = vld [vmem:[#allocation9 + $0x1f8] sm:$0xff] }
 0x5b9   :  { %2480 = vmatprep.subr.mxu0 %v7429_v54  ;;  %2551 = vmatprep.subr.mxu1 %v7432_v16  ;;  %9902 = vst [vmem:[#allocation127_spill] sm:$0xff] %v7438_v12  ;;  %9903 = vst [vmem:[#allocation128_spill] sm:$0xff] %v7441_v45  ;;  %v9970_v8 = vld [vmem:[#allocation36_spill] sm:$0xff]  ;;  %v9971_v50 = vld [vmem:[#allocation34_spill] sm:$0xff] }
 0x5ba   :  { %2481 = vmatpush2.msra.mxu0 %v7435_v3  ;;  %2552 = vmatpush2.msra.mxu1 %v7438_v12  ;;  %9904 = vst [vmem:[#allocation129_spill] sm:$0xff] %v7444_v20  ;;  %v7453_v12 = vld [vmem:[#allocation9 + $0x1e0] sm:$0xff]  ;;  %v9969_v3 = vld [vmem:[#allocation35_spill] sm:$0xff] }
 0x5bb   :  { %2584 = vmatprep.subr.mxu0 %v7441_v45  ;;  %2655 = vmatprep.subr.mxu1 %v7444_v20  ;;  %9906 = vst [vmem:[#allocation131_spill] sm:$0xff] %v7453_v12  ;;  %v7456_v45 = vld [vmem:[#allocation9 + $0x1f0] sm:$0xff]  ;;  %v7459_v20 = vld [vmem:[#allocation9 + $0x1c8] sm:$0xff] }
 0x5bc   :  { %v4025_v54 = vpop.eup %4024  ;;  %9907 = vst [vmem:[#allocation133_spill] sm:$0xff] %v7456_v45  ;;  %9908 = vst [vmem:[#allocation134_spill] sm:$0xff] %v7459_v20 }
 0x5bd   :  { %v7447_v41 = vmul.f32 %v4025_v54, %v4023_v44  ;;  %v7462_v44 = vld [vmem:[#allocation9 + $0x1d8] sm:$0xff]  ;;  %v7465_v54 = vld [vmem:[#allocation9 + $0x1c0] sm:$0xff] }
 0x5be   :  { %9909 = vst [vmem:[#allocation135_spill] sm:$0xff] %v7462_v44  ;;  %9910 = vst [vmem:[#allocation136_spill] sm:$0xff] %v7465_v54 }
 0x5bf   :  { %9905 = vst [vmem:[#allocation130_spill] sm:$0xff] %v7447_v41  ;;  %2482 = vmatprep.mubr.f32.mxu0 %v7447_v41  ;;  %2553 = vmatprep.mubr.f32.mxu1 %v7447_v41  ;;  %v7471_v41 = vld [vmem:[#allocation9 + $0x1a8] sm:$0xff] }
 0x5c0   :  { %2483 = vmatmul.mubr.f32.vlgmr.msra.gmra.mxu0 %v7051_v31  ;;  %2554 = vmatmul.mubr.f32.vlgmr.msra.gmra.mxu1 %v7051_v31  ;;  %v7468_v31 = vld [vmem:[#allocation9 + $0x1d0] sm:$0xff]  ;;  %9912 = vst [vmem:[#allocation138_spill] sm:$0xff] %v7471_v41 }
 0x5c1   :  { %2585 = vmatpush1.msra.mxu0 %v7453_v12  ;;  %2656 = vmatpush1.msra.mxu1 %v7456_v45  ;;  %9911 = vst [vmem:[#allocation137_spill] sm:$0xff] %v7468_v31  ;;  %v7474_v45 = vld [vmem:[#allocation9 + $0x1b8] sm:$0xff] }
 0x5c2   :  { %2586 = vmatprep.subr.mxu0 %v7459_v20  ;;  %2657 = vmatprep.subr.mxu1 %v7462_v44  ;;  %9913 = vst [vmem:[#allocation139_spill] sm:$0xff] %v7474_v45  ;;  %v7477_v20 = vld [vmem:[#allocation9 + $0x1a0] sm:$0xff]  ;;  %v7480_v44 = vld [vmem:[#allocation9 + $0x1b0] sm:$0xff] }
 0x5c3   :  { %2587 = vmatpush1.msra.mxu0 %v7465_v54  ;;  %2658 = vmatpush1.msra.mxu1 %v7468_v31  ;;  %9914 = vst [vmem:[#allocation140_spill] sm:$0xff] %v7477_v20  ;;  %9915 = vst [vmem:[#allocation141_spill] sm:$0xff] %v7480_v44  ;;  %v7483_v54 = vld [vmem:[#allocation9 + $0x188] sm:$0xff]  ;;  %v7486_v31 = vld [vmem:[#allocation9 + $0x198] sm:$0xff] }
 0x5c4   :  { %2588 = vmatprep.subr.mxu0 %v7471_v41  ;;  %2659 = vmatprep.subr.mxu1 %v7474_v45  ;;  %9916 = vst [vmem:[#allocation142_spill] sm:$0xff] %v7483_v54  ;;  %9917 = vst [vmem:[#allocation143_spill] sm:$0xff] %v7486_v31  ;;  %v7489_v41 = vld [vmem:[#allocation9 + $0x180] sm:$0xff]  ;;  %v7492_v45 = vld [vmem:[#allocation9 + $0x190] sm:$0xff] }
 0x5c5   :  { %2589 = vmatpush1.msra.mxu0 %v7477_v20  ;;  %2660 = vmatpush1.msra.mxu1 %v7480_v44  ;;  %9918 = vst [vmem:[#allocation144_spill] sm:$0xff] %v7489_v41  ;;  %9919 = vst [vmem:[#allocation145_spill] sm:$0xff] %v7492_v45  ;;  %v7495_v20 = vld [vmem:[#allocation9 + $0x168] sm:$0xff]  ;;  %v7498_v44 = vld [vmem:[#allocation9 + $0x178] sm:$0xff] }
 0x5c6   :  { %2590 = vmatprep.subr.mxu0 %v7483_v54  ;;  %2661 = vmatprep.subr.mxu1 %v7486_v31  ;;  %9920 = vst [vmem:[#allocation146_spill] sm:$0xff] %v7495_v20  ;;  %9921 = vst [vmem:[#allocation147_spill] sm:$0xff] %v7498_v44  ;;  %v7501_v54 = vld [vmem:[#allocation9 + $0x160] sm:$0xff]  ;;  %v7504_v31 = vld [vmem:[#allocation9 + $0x170] sm:$0xff] }
 0x5c7   :  { %2591 = vmatpush1.msra.mxu0 %v7489_v41  ;;  %2662 = vmatpush1.msra.mxu1 %v7492_v45  ;;  %9922 = vst [vmem:[#allocation148_spill] sm:$0xff] %v7501_v54  ;;  %9923 = vst [vmem:[#allocation149_spill] sm:$0xff] %v7504_v31  ;;  %v7507_v41 = vld [vmem:[#allocation9 + $0x148] sm:$0xff]  ;;  %v7510_v45 = vld [vmem:[#allocation9 + $0x158] sm:$0xff] }
 0x5c8   :  { %2592 = vmatprep.subr.mxu0 %v7495_v20  ;;  %2663 = vmatprep.subr.mxu1 %v7498_v44  ;;  %9924 = vst [vmem:[#allocation150_spill] sm:$0xff] %v7507_v41  ;;  %9925 = vst [vmem:[#allocation151_spill] sm:$0xff] %v7510_v45  ;;  %v7513_v20 = vld [vmem:[#allocation9 + $0x140] sm:$0xff]  ;;  %v7516_v44 = vld [vmem:[#allocation9 + $0x150] sm:$0xff] }
 0x5c9   :  { %2593 = vmatpush1.msra.mxu0 %v7501_v54  ;;  %2664 = vmatpush1.msra.mxu1 %v7504_v31  ;;  %9926 = vst [vmem:[#allocation152_spill] sm:$0xff] %v7513_v20  ;;  %9927 = vst [vmem:[#allocation153_spill] sm:$0xff] %v7516_v44  ;;  %v7519_v54 = vld [vmem:[#allocation9 + $0x128] sm:$0xff]  ;;  %v7522_v31 = vld [vmem:[#allocation9 + $0x138] sm:$0xff] }
 0x5ca   :  { %2594 = vmatprep.subr.mxu0 %v7507_v41  ;;  %2665 = vmatprep.subr.mxu1 %v7510_v45  ;;  %9928 = vst [vmem:[#allocation154_spill] sm:$0xff] %v7519_v54  ;;  %9929 = vst [vmem:[#allocation155_spill] sm:$0xff] %v7522_v31  ;;  %v7525_v41 = vld [vmem:[#allocation9 + $0x120] sm:$0xff]  ;;  %v7528_v45 = vld [vmem:[#allocation9 + $0x130] sm:$0xff] }
 0x5cb   :  { %2595 = vmatpush1.msra.mxu0 %v7513_v20  ;;  %2666 = vmatpush1.msra.mxu1 %v7516_v44  ;;  %9930 = vst [vmem:[#allocation156_spill] sm:$0xff] %v7525_v41  ;;  %9931 = vst [vmem:[#allocation157_spill] sm:$0xff] %v7528_v45  ;;  %v7531_v20 = vld [vmem:[#allocation9 + $0x108] sm:$0xff]  ;;  %v7534_v44 = vld [vmem:[#allocation9 + $0x118] sm:$0xff] }
 0x5cc   :  { %2596 = vmatprep.subr.mxu0 %v7519_v54  ;;  %2667 = vmatprep.subr.mxu1 %v7522_v31  ;;  %9932 = vst [vmem:[#allocation158_spill] sm:$0xff] %v7531_v20  ;;  %9933 = vst [vmem:[#allocation159_spill] sm:$0xff] %v7534_v44  ;;  %v7537_v54 = vld [vmem:[#allocation9 + $0x100] sm:$0xff]  ;;  %v7540_v31 = vld [vmem:[#allocation9 + $0x110] sm:$0xff] }
 0x5cd   :  { %2597 = vmatpush1.msra.mxu0 %v7525_v41  ;;  %2668 = vmatpush1.msra.mxu1 %v7528_v45  ;;  %9934 = vst [vmem:[#allocation160_spill] sm:$0xff] %v7537_v54  ;;  %9935 = vst [vmem:[#allocation161_spill] sm:$0xff] %v7540_v31  ;;  %v7543_v41 = vld [vmem:[#allocation9 + $0xe8] sm:$0xff]  ;;  %v7546_v45 = vld [vmem:[#allocation9 + $0xf8] sm:$0xff] }
 0x5ce   :  { %2598 = vmatprep.subr.mxu0 %v7531_v20  ;;  %2669 = vmatprep.subr.mxu1 %v7534_v44  ;;  %9936 = vst [vmem:[#allocation162_spill] sm:$0xff] %v7543_v41  ;;  %9937 = vst [vmem:[#allocation163_spill] sm:$0xff] %v7546_v45  ;;  %v7549_v20 = vld [vmem:[#allocation9 + $0xe0] sm:$0xff]  ;;  %v7552_v44 = vld [vmem:[#allocation9 + $0xf0] sm:$0xff] }
 0x5cf   :  { %2599 = vmatpush1.msra.mxu0 %v7537_v54  ;;  %2670 = vmatpush1.msra.mxu1 %v7540_v31  ;;  %9938 = vst [vmem:[#allocation164_spill] sm:$0xff] %v7549_v20  ;;  %9939 = vst [vmem:[#allocation165_spill] sm:$0xff] %v7552_v44  ;;  %v7555_v54 = vld [vmem:[#allocation9 + $0xc8] sm:$0xff]  ;;  %v7558_v31 = vld [vmem:[#allocation9 + $0xd8] sm:$0xff] }
 0x5d0   :  { %2600 = vmatprep.subr.mxu0 %v7543_v41  ;;  %2671 = vmatprep.subr.mxu1 %v7546_v45  ;;  %9940 = vst [vmem:[#allocation166_spill] sm:$0xff] %v7555_v54  ;;  %9941 = vst [vmem:[#allocation167_spill] sm:$0xff] %v7558_v31  ;;  %v7561_v41 = vld [vmem:[#allocation9 + $0xc0] sm:$0xff]  ;;  %v7564_v45 = vld [vmem:[#allocation9 + $0xd0] sm:$0xff] }
 0x5d1   :  { %2601 = vmatpush1.msra.mxu0 %v7549_v20  ;;  %2672 = vmatpush1.msra.mxu1 %v7552_v44  ;;  %9942 = vst [vmem:[#allocation168_spill] sm:$0xff] %v7561_v41  ;;  %9943 = vst [vmem:[#allocation169_spill] sm:$0xff] %v7564_v45  ;;  %v7567_v20 = vld [vmem:[#allocation9 + $0xa8] sm:$0xff]  ;;  %v7570_v44 = vld [vmem:[#allocation9 + $0xb8] sm:$0xff] }
 0x5d2   :  { %2602 = vmatprep.subr.mxu0 %v7555_v54  ;;  %2673 = vmatprep.subr.mxu1 %v7558_v31  ;;  %9944 = vst [vmem:[#allocation170_spill] sm:$0xff] %v7567_v20  ;;  %9945 = vst [vmem:[#allocation171_spill] sm:$0xff] %v7570_v44  ;;  %v7573_v54 = vld [vmem:[#allocation9 + $0xa0] sm:$0xff]  ;;  %v7576_v31 = vld [vmem:[#allocation9 + $0xb0] sm:$0xff] }
 0x5d3   :  { %2603 = vmatpush1.msra.mxu0 %v7561_v41  ;;  %2674 = vmatpush1.msra.mxu1 %v7564_v45  ;;  %9946 = vst [vmem:[#allocation172_spill] sm:$0xff] %v7573_v54  ;;  %9947 = vst [vmem:[#allocation173_spill] sm:$0xff] %v7576_v31  ;;  %v7579_v41 = vld [vmem:[#allocation9 + $0x88] sm:$0xff]  ;;  %v7582_v45 = vld [vmem:[#allocation9 + $0x98] sm:$0xff] }
 0x5d4   :  { %2604 = vmatprep.subr.mxu0 %v7567_v20  ;;  %2675 = vmatprep.subr.mxu1 %v7570_v44  ;;  %9948 = vst [vmem:[#allocation174_spill] sm:$0xff] %v7579_v41  ;;  %9949 = vst [vmem:[#allocation175_spill] sm:$0xff] %v7582_v45  ;;  %v7585_v20 = vld [vmem:[#allocation9 + $0x80] sm:$0xff]  ;;  %v7588_v44 = vld [vmem:[#allocation9 + $0x90] sm:$0xff] }
 0x5d5   :  { %2605 = vmatpush1.msra.mxu0 %v7573_v54  ;;  %2676 = vmatpush1.msra.mxu1 %v7576_v31  ;;  %9950 = vst [vmem:[#allocation176_spill] sm:$0xff] %v7585_v20  ;;  %9951 = vst [vmem:[#allocation177_spill] sm:$0xff] %v7588_v44  ;;  %v7591_v54 = vld [vmem:[#allocation9 + $0x68] sm:$0xff]  ;;  %v7594_v31 = vld [vmem:[#allocation9 + $0x78] sm:$0xff] }
 0x5d6   :  { %2606 = vmatprep.subr.mxu0 %v7579_v41  ;;  %2677 = vmatprep.subr.mxu1 %v7582_v45  ;;  %9952 = vst [vmem:[#allocation178_spill] sm:$0xff] %v7591_v54  ;;  %9953 = vst [vmem:[#allocation179_spill] sm:$0xff] %v7594_v31  ;;  %v7597_v41 = vld [vmem:[#allocation9 + $0x60] sm:$0xff]  ;;  %v7600_v45 = vld [vmem:[#allocation9 + $0x70] sm:$0xff] }
 0x5d7   :  { %2607 = vmatpush1.msra.mxu0 %v7585_v20  ;;  %2678 = vmatpush1.msra.mxu1 %v7588_v44  ;;  %9954 = vst [vmem:[#allocation180_spill] sm:$0xff] %v7597_v41  ;;  %9955 = vst [vmem:[#allocation181_spill] sm:$0xff] %v7600_v45  ;;  %v7603_v20 = vld [vmem:[#allocation9 + $0x48] sm:$0xff]  ;;  %v7606_v44 = vld [vmem:[#allocation9 + $0x58] sm:$0xff] }
 0x5d8   :  { %2608 = vmatprep.subr.mxu0 %v7591_v54  ;;  %2679 = vmatprep.subr.mxu1 %v7594_v31  ;;  %9956 = vst [vmem:[#allocation182_spill] sm:$0xff] %v7603_v20  ;;  %9957 = vst [vmem:[#allocation183_spill] sm:$0xff] %v7606_v44  ;;  %v7609_v54 = vld [vmem:[#allocation9 + $0x40] sm:$0xff]  ;;  %v7612_v31 = vld [vmem:[#allocation9 + $0x50] sm:$0xff] }
 0x5d9   :  { %2609 = vmatpush1.msra.mxu0 %v7597_v41  ;;  %2680 = vmatpush1.msra.mxu1 %v7600_v45  ;;  %9958 = vst [vmem:[#allocation184_spill] sm:$0xff] %v7609_v54  ;;  %9959 = vst [vmem:[#allocation185_spill] sm:$0xff] %v7612_v31  ;;  %v7615_v41 = vld [vmem:[#allocation9 + $0x28] sm:$0xff]  ;;  %v7618_v45 = vld [vmem:[#allocation9 + $0x38] sm:$0xff] }
 0x5da   :  { %2610 = vmatprep.subr.mxu0 %v7603_v20  ;;  %2681 = vmatprep.subr.mxu1 %v7606_v44  ;;  %9960 = vst [vmem:[#allocation186_spill] sm:$0xff] %v7615_v41  ;;  %9961 = vst [vmem:[#allocation187_spill] sm:$0xff] %v7618_v45  ;;  %v7621_v20 = vld [vmem:[#allocation9 + $0x20] sm:$0xff]  ;;  %v7624_v44 = vld [vmem:[#allocation9 + $0x30] sm:$0xff] }
 0x5db   :  { %2611 = vmatpush1.msra.mxu0 %v7609_v54  ;;  %2682 = vmatpush1.msra.mxu1 %v7612_v31  ;;  %9962 = vst [vmem:[#allocation188_spill] sm:$0xff] %v7621_v20  ;;  %9963 = vst [vmem:[#allocation189_spill] sm:$0xff] %v7624_v44  ;;  %v7627_v54 = vld [vmem:[#allocation9 + $0x8] sm:$0xff]  ;;  %v7630_v31 = vld [vmem:[#allocation9 + $0x18] sm:$0xff] }
 0x5dc   :  { %2612 = vmatprep.subr.mxu0 %v7615_v41  ;;  %2683 = vmatprep.subr.mxu1 %v7618_v45  ;;  %9964 = vst [vmem:[#allocation190_spill] sm:$0xff] %v7627_v54  ;;  %9965 = vst [vmem:[#allocation191_spill] sm:$0xff] %v7630_v31  ;;  %v7633_v41 = vld [vmem:[#allocation9] sm:$0xff]  ;;  %v7637_v45 = vld [vmem:[#allocation9 + $0x10] sm:$0xff] }
 0x5dd   :  { %2613 = vmatpush1.msra.mxu0 %v7621_v20  ;;  %2684 = vmatpush1.msra.mxu1 %v7624_v44  ;;  %9966 = vst [vmem:[#allocation192_spill] sm:$0xff] %v7633_v41  ;;  %9967 = vst [vmem:[#allocation21_spill] sm:$0xff] %v7637_v45  ;;  %v9968_v44 = vld [vmem:[#allocation33_spill] sm:$0xff] }
 0x5de   :  { %2614 = vmatprep.subr.mxu0 %v7627_v54  ;;  %2685 = vmatprep.subr.mxu1 %v7630_v31 }
 0x5df   :  { %2615 = vmatpush1.msra.mxu0 %v7633_v41  ;;  %2648 = vmatprep.mubr.f32.mxu0 %v9813_v46 }
 0x5e0   :  { %2686 = vmatpush1.msra.mxu1 %v7637_v45  ;;  %2719 = vmatprep.mubr.f32.mxu1 %v9813_v46 }
 0x5e1   :  { %2754 = vmatprep.subr.mxu0 %v7037_v57  ;;  %2825 = vmatprep.subr.mxu1 %v7040_v47 }
 0x63b   :  { %v2314_v54 = vpop.f32.mrf.mxu0  ;;  %v2385_v41 = vpop.f32.mrf.mxu1 }
 0x63c   :  { %v2390_v20 = vadd.f32 %v2314_v54, %v9968_v44  ;;  %v2392_v46 = vadd.f32 %v2385_v41, %v9971_v50  ;;  %v10003_v41 = vld [vmem:[#allocation73_spill] sm:$0xff] }
 0x63d   :  { %v2316_v31 = vpop.f32.mrf.mxu0  ;;  %v2387_v15 = vpop.f32.mrf.mxu1 }
 0x63e   :  { %v3848_v12 = vmul.f32 -1.442695, %v2390_v20  ;;  %v2391_v16 = vadd.f32 %v2316_v31, %v9969_v3  ;;  %v2393_v45 = vadd.f32 %v2387_v15, %v9970_v8 }
 0x640   :  { %4026 = vpow2.f32 %v3848_v12  ;;  %v3849_v7 = vmul.f32 -1.442695, %v2391_v16  ;;  %v3850_v18 = vmul.f32 -1.442695, %v2393_v45  ;;  %v10004_v45 = vld [vmem:[#allocation74_spill] sm:$0xff] }
 0x642   :  { %4028 = vpow2.f32 %v3849_v7 }
 0x643   :  { %4030 = vtanh.f32 %v2392_v46 }
 0x644   :  { %4032 = vpow2.f32 %v3850_v18 }
 0x64d   :  { %v4027_v57 = vpop.eup %4026 }
 0x64e   :  { %v2400_v35 = vadd.f32 1.0, %v4027_v57  ;;  %v10005_v57 = vld [vmem:[#allocation75_spill] sm:$0xff] }
 0x64f   :  { %v4029_v47 = vpop.eup %4028 }
 0x650   :  { %4034 = vrcp.f32 %v2400_v35  ;;  %v2401_v44 = vadd.f32 1.0, %v4029_v47  ;;  %v4031_v20 = vpop.eup %4030  ;;  %v10002_v35 = vld [vmem:[#allocation72_spill] sm:$0xff] }
 0x651   :  { %v4033_v3 = vpop.eup %4032  ;;  %v10006_v47 = vld [vmem:[#allocation76_spill] sm:$0xff] }
 0x652   :  { %4036 = vrcp.f32 %v2401_v44  ;;  %v2410_v7 = vadd.f32 1.0, %v4033_v3  ;;  %v10007_v44 = vld [vmem:[#allocation77_spill] sm:$0xff]  ;;  %v10009_v3 = vld [vmem:[#allocation79_spill] sm:$0xff] }
 0x654   :  { %4038 = vrcp.f32 %v2410_v7  ;;  %v10013_v7 = vld [vmem:[#allocation83_spill] sm:$0xff] }
 0x65d   :  { %v4035_v12 = vpop.eup %4034 }
 0x65e   :  { %v2414_v54 = vmul.f32 %v4035_v12, %v4031_v20  ;;  %v10008_v20 = vld [vmem:[#allocation78_spill] sm:$0xff]  ;;  %v10010_v12 = vld [vmem:[#allocation80_spill] sm:$0xff] }
 0x65f   :  { %v4037_v16 = vpop.eup %4036 }
 0x660   :  { %v2413_v31 = vmul.f32 %v4037_v16, %v7048_v23  ;;  %v10012_v16 = vld [vmem:[#allocation82_spill] sm:$0xff] }
 0x661   :  { %v4039_v50 = vpop.eup %4038 }
 0x662   :  { %v7648_v15 = vadd.f32 %v2414_v54, %v2413_v31  ;;  %v10011_v54 = vld [vmem:[#allocation81_spill] sm:$0xff]  ;;  %v10014_v31 = vld [vmem:[#allocation84_spill] sm:$0xff] }
 0x664   :  { %4040 = vtanh.f32 %v7648_v15 }
 0x671   :  { %v4041_v46 = vpop.eup %4040 }
 0x672   :  { %v7651_v8 = vmul.f32 %v4041_v46, %v4039_v50  ;;  %v10015_v50 = vld [vmem:[#allocation85_spill] sm:$0xff]  ;;  %v10016_v46 = vld [vmem:[#allocation86_spill] sm:$0xff] }
 0x674   :  { %2649 = vmatmul.mubr.f32.vlgmr.msra.gmra.mxu0 %v7651_v8  ;;  %2720 = vmatmul.mubr.f32.vlgmr.msra.gmra.mxu1 %v7651_v8 }
 0x675   :  { %2755 = vmatpush1.msra.mxu0 %v7055_v53  ;;  %2826 = vmatpush1.msra.mxu1 %v7058_v13 }
 0x676   :  { %2756 = vmatprep.subr.mxu0 %v7061_v33  ;;  %2827 = vmatprep.subr.mxu1 %v7064_v14 }
 0x677   :  { %2757 = vmatpush1.msra.mxu0 %v7067_v39  ;;  %2828 = vmatpush1.msra.mxu1 %v7070_v4 }
 0x678   :  { %2758 = vmatprep.subr.mxu0 %v7073_v1  ;;  %2829 = vmatprep.subr.mxu1 %v7076_v9  ;;  %v9972_v1 = vld [vmem:[#allocation27_spill] sm:$0xff]  ;;  %v9973_v9 = vld [vmem:[#allocation28_spill] sm:$0xff] }
 0x679   :  { %2759 = vmatpush1.msra.mxu0 %v7079_v42  ;;  %2830 = vmatpush1.msra.mxu1 %v7082_v17  ;;  %v9974_v42 = vld [vmem:[#allocation26_spill] sm:$0xff]  ;;  %v9975_v17 = vld [vmem:[#allocation195_spill] sm:$0xff] }
 0x67a   :  { %2760 = vmatprep.subr.mxu0 %v7085_v28  ;;  %2831 = vmatprep.subr.mxu1 %v7088_v58  ;;  %v9976_v58 = vld [vmem:[#allocation47_spill] sm:$0xff] }
 0x67b   :  { %2761 = vmatpush1.msra.mxu0 %v7091_v51  ;;  %2832 = vmatpush1.msra.mxu1 %v7094_v26  ;;  %v9977_v51 = vld [vmem:[#allocation48_spill] sm:$0xff]  ;;  %v9978_v26 = vld [vmem:[#allocation49_spill] sm:$0xff] }
 0x67c   :  { %2762 = vmatprep.subr.mxu0 %v7097_v21  ;;  %2833 = vmatprep.subr.mxu1 %v7100_v37  ;;  %v9979_v21 = vld [vmem:[#allocation50_spill] sm:$0xff]  ;;  %v9980_v37 = vld [vmem:[#allocation51_spill] sm:$0xff] }
 0x67d   :  { %2763 = vmatpush1.msra.mxu0 %v7103_v29  ;;  %2834 = vmatpush1.msra.mxu1 %v7106_v6  ;;  %v9981_v29 = vld [vmem:[#allocation52_spill] sm:$0xff]  ;;  %v9982_v6 = vld [vmem:[#allocation53_spill] sm:$0xff] }
 0x67e   :  { %2764 = vmatprep.subr.mxu0 %v7109_v48  ;;  %2835 = vmatprep.subr.mxu1 %v7112_v55  ;;  %v9983_v48 = vld [vmem:[#allocation54_spill] sm:$0xff] }
 0x67f   :  { %2765 = vmatpush1.msra.mxu0 %v7115_v32  ;;  %2836 = vmatpush1.msra.mxu1 %v7118_v36  ;;  %v9984_v32 = vld [vmem:[#allocation55_spill] sm:$0xff]  ;;  %v9985_v36 = vld [vmem:[#allocation56_spill] sm:$0xff] }
 0x680   :  { %v2484_v18 = vpop.f32.mrf.mxu0  ;;  %2766 = vmatprep.subr.mxu0 %v7122_v59  ;;  %2837 = vmatprep.subr.mxu1 %v7125_v40  ;;  %v2555_v14 = vpop.f32.mrf.mxu1  ;;  %v9986_v59 = vld [vmem:[#allocation57_spill] sm:$0xff]  ;;  %v9987_v40 = vld [vmem:[#allocation58_spill] sm:$0xff] }
 0x681   :  { %v2485_v23 = vadd.f32 %v2484_v18, %v6004_v60  ;;  %2767 = vmatpush1.msra.mxu0 %v7128_v63  ;;  %2838 = vmatpush1.msra.mxu1 %v7131_v22  ;;  %v9988_v22 = vld [vmem:[#allocation45_spill] sm:$0xff]  ;;  %v10017_v18 = vld [vmem:[#allocation87_spill] sm:$0xff] }
 0x682   :  { %v2486_v53 = vpop.f32.mrf.mxu0  ;;  %2768 = vmatprep.subr.mxu0 %v7135_v56  ;;  %2839 = vmatprep.subr.mxu1 %v7138_v61  ;;  %v2557_v4 = vpop.f32.mrf.mxu1  ;;  %v2556_v56 = vadd.f32 %v2555_v14, %v9988_v22  ;;  %v9989_v61 = vld [vmem:[#allocation59_spill] sm:$0xff] }
 0x683   :  { %v3851_v13 = vmul.f32 -1.442695, %v2485_v23  ;;  %v2487_v33 = vadd.f32 %v2486_v53, %v6011_v0  ;;  %2769 = vmatpush1.msra.mxu0 %v7141_v62  ;;  %2840 = vmatpush1.msra.mxu1 %v7144_v2  ;;  %v2558_v28 = vadd.f32 %v2557_v4, %v9975_v17  ;;  %v9990_v62 = vld [vmem:[#allocation60_spill] sm:$0xff] }
 0x684   :  { %2770 = vmatprep.subr.mxu0 %v7147_v43  ;;  %2841 = vmatprep.subr.mxu1 %v7150_v34  ;;  %v9991_v43 = vld [vmem:[#allocation61_spill] sm:$0xff]  ;;  %v9992_v34 = vld [vmem:[#allocation62_spill] sm:$0xff]  ;;  %v10018_v23 = vld [vmem:[#allocation88_spill] sm:$0xff] }
 0x685   :  { %4042 = vpow2.f32 %v3851_v13  ;;  %v3852_v39 = vmul.f32 -1.442695, %v2487_v33  ;;  %2771 = vmatpush1.msra.mxu0 %v7153_v27  ;;  %2842 = vmatpush1.msra.mxu1 %v7156_v49  ;;  %v3853_v55 = vmul.f32 -1.442695, %v2558_v28  ;;  %v9993_v49 = vld [vmem:[#allocation63_spill] sm:$0xff]  ;;  %v10019_v13 = vld [vmem:[#allocation89_spill] sm:$0xff] }
 0x686   :  { %2772 = vmatprep.subr.mxu0 %v7159_v5  ;;  %2843 = vmatprep.subr.mxu1 %v7162_v52  ;;  %v9994_v5 = vld [vmem:[#allocation64_spill] sm:$0xff]  ;;  %v10020_v33 = vld [vmem:[#allocation90_spill] sm:$0xff] }
 0x687   :  { %4044 = vpow2.f32 %v3852_v39  ;;  %2773 = vmatpush1.msra.mxu0 %v7165_v19  ;;  %2844 = vmatpush1.msra.mxu1 %v7168_v30  ;;  %v9995_v19 = vld [vmem:[#allocation65_spill] sm:$0xff]  ;;  %v9996_v30 = vld [vmem:[#allocation66_spill] sm:$0xff]  ;;  %v10021_v39 = vld [vmem:[#allocation91_spill] sm:$0xff] }
 0x688   :  { %2774 = vmatprep.subr.mxu0 %v7171_v24  ;;  %2845 = vmatprep.subr.mxu1 %v7174_v10  ;;  %4046 = vpow2.f32 %v3853_v55  ;;  %v9997_v24 = vld [vmem:[#allocation67_spill] sm:$0xff]  ;;  %v9998_v10 = vld [vmem:[#allocation68_spill] sm:$0xff] }
 0x689   :  { %2775 = vmatpush1.msra.mxu0 %v7177_v11  ;;  %2846 = vmatpush1.msra.mxu1 %v7180_v25  ;;  %v9999_v11 = vld [vmem:[#allocation69_spill] sm:$0xff]  ;;  %v10000_v25 = vld [vmem:[#allocation70_spill] sm:$0xff]  ;;  %v10022_v4 = vld [vmem:[#allocation92_spill] sm:$0xff] }
 0x68a   :  { %2776 = vmatprep.subr.mxu0 %v7183_v38  ;;  %2847 = vmatprep.subr.mxu1 %v9972_v1  ;;  %v10001_v38 = vld [vmem:[#allocation71_spill] sm:$0xff]  ;;  %v10030_v55 = vld [vmem:[#allocation100_spill] sm:$0xff] }
 0x68b   :  { %2777 = vmatpush1.msra.mxu0 %v9973_v9  ;;  %2848 = vmatpush1.msra.mxu1 %v9974_v42  ;;  %v10023_v9 = vld [vmem:[#allocation93_spill] sm:$0xff]  ;;  %v10024_v42 = vld [vmem:[#allocation94_spill] sm:$0xff] }
 0x68c   :  { %2778 = vmatprep.subr.mxu0 %v9976_v58  ;;  %2849 = vmatprep.subr.mxu1 %v9977_v51  ;;  %v10025_v51 = vld [vmem:[#allocation95_spill] sm:$0xff] }
 0x68d   :  { %2779 = vmatpush1.msra.mxu0 %v9978_v26  ;;  %2850 = vmatpush1.msra.mxu1 %v9979_v21  ;;  %v10026_v26 = vld [vmem:[#allocation96_spill] sm:$0xff] }
 0x68e   :  { %2780 = vmatprep.subr.mxu0 %v9980_v37  ;;  %2851 = vmatprep.subr.mxu1 %v9981_v29  ;;  %v10027_v37 = vld [vmem:[#allocation98_spill] sm:$0xff] }
 0x68f   :  { %2781 = vmatpush1.msra.mxu0 %v9982_v6  ;;  %2852 = vmatpush1.msra.mxu1 %v9983_v48  ;;  %v10028_v6 = vld [vmem:[#allocation99_spill] sm:$0xff]  ;;  %v10029_v48 = vld [vmem:[#allocation97_spill] sm:$0xff] }
 0x690   :  { %2782 = vmatprep.subr.mxu0 %v9984_v32  ;;  %2853 = vmatprep.subr.mxu1 %v9985_v36  ;;  %v10031_v32 = vld [vmem:[#allocation101_spill] sm:$0xff] }
 0x691   :  { %2783 = vmatpush1.msra.mxu0 %v9986_v59  ;;  %2854 = vmatpush1.msra.mxu1 %v9987_v40  ;;  %v10032_v59 = vld [vmem:[#allocation102_spill] sm:$0xff]  ;;  %v10033_v40 = vld [vmem:[#allocation103_spill] sm:$0xff] }
 0x692   :  { %v4043_v63 = vpop.eup %4042  ;;  %2784 = vmatprep.subr.mxu0 %v9989_v61  ;;  %2855 = vmatprep.subr.mxu1 %v9990_v62  ;;  %v10036_v61 = vld [vmem:[#allocation106_spill] sm:$0xff]  ;;  %v10037_v62 = vld [vmem:[#allocation107_spill] sm:$0xff] }
 0x693   :  { %v2566_v2 = vadd.f32 1.0, %v4043_v63  ;;  %2785 = vmatpush1.msra.mxu0 %v9991_v43  ;;  %2856 = vmatpush1.msra.mxu1 %v9992_v34  ;;  %v10034_v63 = vld [vmem:[#allocation104_spill] sm:$0xff]  ;;  %v10039_v43 = vld [vmem:[#allocation109_spill] sm:$0xff]  ;;  %v10040_v34 = vld [vmem:[#allocation110_spill] sm:$0xff] }
 0x694   :  { %v4045_v27 = vpop.eup %4044  ;;  %2786 = vmatprep.subr.mxu0 %v9993_v49  ;;  %2857 = vmatprep.subr.mxu1 %v9994_v5  ;;  %v10042_v49 = vld [vmem:[#allocation112_spill] sm:$0xff]  ;;  %v10043_v5 = vld [vmem:[#allocation113_spill] sm:$0xff] }
 0x695   :  { %4048 = vrcp.f32 %v2566_v2  ;;  %v2567_v52 = vadd.f32 1.0, %v4045_v27  ;;  %2787 = vmatpush2.msra.mxu0 %v9995_v19  ;;  %2858 = vmatpush2.msra.mxu1 %v9996_v30  ;;  %v4047_v53 = vpop.eup %4046  ;;  %v10038_v2 = vld [vmem:[#allocation108_spill] sm:$0xff]  ;;  %v10041_v27 = vld [vmem:[#allocation111_spill] sm:$0xff] }
 0x696   :  { %4050 = vtanh.f32 %v2556_v56  ;;  %2788 = vmatprep.subr.mxu0 %v9997_v24  ;;  %2859 = vmatprep.subr.mxu1 %v9998_v10  ;;  %v2576_v58 = vadd.f32 1.0, %v4047_v53  ;;  %v10035_v56 = vld [vmem:[#allocation105_spill] sm:$0xff]  ;;  %v10045_v19 = vld [vmem:[#allocation115_spill] sm:$0xff]  ;;  %v10046_v30 = vld [vmem:[#allocation116_spill] sm:$0xff] }
 0x697   :  { %4052 = vrcp.f32 %v2567_v52  ;;  %2789 = vmatpush2.msra.mxu0 %v9999_v11  ;;  %2860 = vmatpush2.msra.mxu1 %v10000_v25  ;;  %v10044_v52 = vld [vmem:[#allocation114_spill] sm:$0xff]  ;;  %v10047_v24 = vld [vmem:[#allocation117_spill] sm:$0xff]  ;;  %v10049_v11 = vld [vmem:[#allocation119_spill] sm:$0xff] }
 0x698   :  { %2790 = vmatprep.subr.mxu0 %v10001_v38  ;;  %2861 = vmatprep.subr.mxu1 %v10002_v35  ;;  %4054 = vrcp.f32 %v2576_v58  ;;  %v10048_v10 = vld [vmem:[#allocation118_spill] sm:$0xff]  ;;  %v10050_v25 = vld [vmem:[#allocation120_spill] sm:$0xff]  ;;  %v10051_v38 = vld [vmem:[#allocation121_spill] sm:$0xff] }
 0x699   :  { %2791 = vmatpush2.msra.mxu0 %v10003_v41  ;;  %2862 = vmatpush2.msra.mxu1 %v10004_v45  ;;  %v10052_v35 = vld [vmem:[#allocation122_spill] sm:$0xff]  ;;  %v10053_v41 = vld [vmem:[#allocation123_spill] sm:$0xff]  ;;  %v10054_v45 = vld [vmem:[#allocation124_spill] sm:$0xff] }
 0x69a   :  { %2792 = vmatprep.subr.mxu0 %v10005_v57  ;;  %2863 = vmatprep.subr.mxu1 %v10006_v47  ;;  %v10055_v57 = vld [vmem:[#allocation125_spill] sm:$0xff]  ;;  %v10056_v47 = vld [vmem:[#allocation126_spill] sm:$0xff] }
 0x69b   :  { %2793 = vmatpush2.msra.mxu0 %v10007_v44  ;;  %2864 = vmatpush2.msra.mxu1 %v10008_v20  ;;  %v10057_v44 = vld [vmem:[#allocation127_spill] sm:$0xff]  ;;  %v10058_v20 = vld [vmem:[#allocation128_spill] sm:$0xff]  ;;  %v10067_v53 = vld [vmem:[#allocation138_spill] sm:$0xff] }
 0x69c   :  { %2794 = vmatprep.subr.mxu0 %v10009_v3  ;;  %2865 = vmatprep.subr.mxu1 %v10010_v12  ;;  %v10059_v3 = vld [vmem:[#allocation129_spill] sm:$0xff] }
 0x69d   :  { %2795 = vmatpush2.msra.mxu0 %v10011_v54  ;;  %2866 = vmatpush2.msra.mxu1 %v10012_v16  ;;  %v10078_v58 = vld [vmem:[#allocation149_spill] sm:$0xff] }
 0x69e   :  { %2796 = vmatprep.subr.mxu0 %v10013_v7  ;;  %2867 = vmatprep.subr.mxu1 %v10014_v31  ;;  %v10061_v7 = vld [vmem:[#allocation131_spill] sm:$0xff]  ;;  %v10062_v31 = vld [vmem:[#allocation133_spill] sm:$0xff] }
 0x69f   :  { %2797 = vmatpush2.msra.mxu0 %v10015_v50  ;;  %2868 = vmatpush2.msra.mxu1 %v10016_v46  ;;  %v10063_v50 = vld [vmem:[#allocation134_spill] sm:$0xff]  ;;  %v10064_v46 = vld [vmem:[#allocation135_spill] sm:$0xff] }
 0x6a0   :  { %2798 = vmatprep.subr.mxu0 %v10017_v18  ;;  %2869 = vmatprep.subr.mxu1 %v10018_v23  ;;  %v10065_v18 = vld [vmem:[#allocation136_spill] sm:$0xff]  ;;  %v10066_v23 = vld [vmem:[#allocation137_spill] sm:$0xff] }
 0x6a1   :  { %2799 = vmatpush2.msra.mxu0 %v10019_v13  ;;  %2870 = vmatpush2.msra.mxu1 %v10020_v33  ;;  %v10068_v13 = vld [vmem:[#allocation139_spill] sm:$0xff]  ;;  %v10069_v33 = vld [vmem:[#allocation140_spill] sm:$0xff] }
 0x6a2   :  { %v4049_v14 = vpop.eup %4048  ;;  %2800 = vmatprep.subr.mxu0 %v10021_v39  ;;  %2871 = vmatprep.subr.mxu1 %v10022_v4  ;;  %v10072_v39 = vld [vmem:[#allocation143_spill] sm:$0xff]  ;;  %v10073_v4 = vld [vmem:[#allocation144_spill] sm:$0xff] }
 0x6a3   :  { %v4051_v1 = vpop.eup %4050  ;;  %2801 = vmatpush2.msra.mxu0 %v10023_v9  ;;  %2872 = vmatpush2.msra.mxu1 %v10024_v42  ;;  %v10075_v9 = vld [vmem:[#allocation146_spill] sm:$0xff]  ;;  %v10076_v42 = vld [vmem:[#allocation147_spill] sm:$0xff] }
 0x6a4   :  { %v4053_v28 = vpop.eup %4052  ;;  %2802 = vmatprep.subr.mxu0 %v10025_v51  ;;  %2873 = vmatprep.subr.mxu1 %v10026_v26  ;;  %v2580_v21 = vmul.f32 %v4051_v1, %v4049_v14  ;;  %v10070_v14 = vld [vmem:[#allocation141_spill] sm:$0xff]  ;;  %v10079_v51 = vld [vmem:[#allocation150_spill] sm:$0xff]  ;;  %v10080_v26 = vld [vmem:[#allocation151_spill] sm:$0xff] }
 0x6a5   :  { %v2579_v29 = vmul.f32 %v4053_v28, %v10027_v37  ;;  %2803 = vmatpush2.msra.mxu0 %v10028_v6  ;;  %2874 = vmatpush2.msra.mxu1 %v10029_v48  ;;  %v4055_v12 = vpop.eup %4054  ;;  %v10074_v1 = vld [vmem:[#allocation145_spill] sm:$0xff]  ;;  %v10077_v28 = vld [vmem:[#allocation148_spill] sm:$0xff]  ;;  %v10084_v6 = vld [vmem:[#allocation155_spill] sm:$0xff] }
 0x6a6   :  { %2804 = vmatprep.subr.mxu0 %v10030_v55  ;;  %2875 = vmatprep.subr.mxu1 %v10031_v32  ;;  %v10082_v37 = vld [vmem:[#allocation153_spill] sm:$0xff]  ;;  %v10085_v48 = vld [vmem:[#allocation156_spill] sm:$0xff]  ;;  %v10087_v32 = vld [vmem:[#allocation158_spill] sm:$0xff] }
 0x6a7   :  { %v7760_v36 = vadd.f32 %v2580_v21, %v2579_v29  ;;  %2805 = vmatpush2.msra.mxu0 %v10032_v59  ;;  %2876 = vmatpush2.msra.mxu1 %v10033_v40  ;;  %v10081_v21 = vld [vmem:[#allocation152_spill] sm:$0xff]  ;;  %v10083_v29 = vld [vmem:[#allocation154_spill] sm:$0xff]  ;;  %v10086_v55 = vld [vmem:[#allocation157_spill] sm:$0xff] }
 0x6a8   :  { %2806 = vmatprep.subr.mxu0 %v10034_v63  ;;  %2877 = vmatprep.subr.mxu1 %v10035_v56  ;;  %v10088_v59 = vld [vmem:[#allocation159_spill] sm:$0xff]  ;;  %v10089_v40 = vld [vmem:[#allocation160_spill] sm:$0xff]  ;;  %v10090_v63 = vld [vmem:[#allocation161_spill] sm:$0xff] }
 0x6a9   :  { %2807 = vmatpush2.msra.mxu0 %v10036_v61  ;;  %2878 = vmatpush2.msra.mxu1 %v10037_v62  ;;  %4056 = vtanh.f32 %v7760_v36  ;;  %v10091_v56 = vld [vmem:[#allocation162_spill] sm:$0xff]  ;;  %v10092_v61 = vld [vmem:[#allocation163_spill] sm:$0xff]  ;;  %v10093_v62 = vld [vmem:[#allocation164_spill] sm:$0xff] }
 0x6aa   :  { %2808 = vmatprep.subr.mxu0 %v10038_v2  ;;  %2879 = vmatprep.subr.mxu1 %v10039_v43  ;;  %v10094_v2 = vld [vmem:[#allocation165_spill] sm:$0xff]  ;;  %v10095_v43 = vld [vmem:[#allocation166_spill] sm:$0xff] }
 0x6ab   :  { %2809 = vmatpush2.msra.mxu0 %v10040_v34  ;;  %2880 = vmatpush2.msra.mxu1 %v10041_v27  ;;  %v10096_v34 = vld [vmem:[#allocation167_spill] sm:$0xff]  ;;  %v10097_v27 = vld [vmem:[#allocation168_spill] sm:$0xff] }
 0x6ac   :  { %2810 = vmatprep.subr.mxu0 %v10042_v49  ;;  %2881 = vmatprep.subr.mxu1 %v10043_v5  ;;  %v10098_v49 = vld [vmem:[#allocation169_spill] sm:$0xff]  ;;  %v10099_v5 = vld [vmem:[#allocation170_spill] sm:$0xff] }
 0x6ad   :  { %2811 = vmatpush2.msra.mxu0 %v10044_v52  ;;  %2882 = vmatpush2.msra.mxu1 %v10045_v19  ;;  %v10100_v52 = vld [vmem:[#allocation171_spill] sm:$0xff]  ;;  %v10101_v19 = vld [vmem:[#allocation172_spill] sm:$0xff] }
 0x6ae   :  { %2812 = vmatprep.subr.mxu0 %v10046_v30  ;;  %2883 = vmatprep.subr.mxu1 %v10047_v24  ;;  %v10102_v30 = vld [vmem:[#allocation173_spill] sm:$0xff]  ;;  %v10103_v24 = vld [vmem:[#allocation174_spill] sm:$0xff] }
 0x6af   :  { %2813 = vmatpush2.msra.mxu0 %v10048_v10  ;;  %2884 = vmatpush2.msra.mxu1 %v10049_v11  ;;  %v10104_v10 = vld [vmem:[#allocation175_spill] sm:$0xff]  ;;  %v10105_v11 = vld [vmem:[#allocation176_spill] sm:$0xff] }
 0x6b0   :  { %2814 = vmatprep.subr.mxu0 %v10050_v25  ;;  %2885 = vmatprep.subr.mxu1 %v10051_v38  ;;  %v10106_v25 = vld [vmem:[#allocation177_spill] sm:$0xff]  ;;  %v10107_v38 = vld [vmem:[#allocation178_spill] sm:$0xff] }
 0x6b1   :  { %2815 = vmatpush2.msra.mxu0 %v10052_v35  ;;  %2886 = vmatpush2.msra.mxu1 %v10053_v41  ;;  %v10108_v35 = vld [vmem:[#allocation179_spill] sm:$0xff]  ;;  %v10109_v41 = vld [vmem:[#allocation180_spill] sm:$0xff] }
 0x6b2   :  { %2816 = vmatprep.subr.mxu0 %v10054_v45  ;;  %2887 = vmatprep.subr.mxu1 %v10055_v57  ;;  %v10110_v45 = vld [vmem:[#allocation181_spill] sm:$0xff]  ;;  %v10111_v57 = vld [vmem:[#allocation182_spill] sm:$0xff] }
 0x6b3   :  { %2817 = vmatpush2.msra.mxu0 %v10056_v47  ;;  %2888 = vmatpush2.msra.mxu1 %v10057_v44  ;;  %v10112_v47 = vld [vmem:[#allocation183_spill] sm:$0xff]  ;;  %v10113_v44 = vld [vmem:[#allocation184_spill] sm:$0xff] }
 0x6b4   :  { %2920 = vmatprep.subr.mxu0 %v10058_v20  ;;  %2991 = vmatprep.subr.mxu1 %v10059_v3  ;;  %v10114_v20 = vld [vmem:[#allocation185_spill] sm:$0xff]  ;;  %v10115_v3 = vld [vmem:[#allocation186_spill] sm:$0xff] }
 0x6b6   :  { %v4057_v54 = vpop.eup %4056 }
 0x6b7   :  { %v7791_v16 = vmul.f32 %v4057_v54, %v4055_v12  ;;  %v10116_v12 = vld [vmem:[#allocation187_spill] sm:$0xff]  ;;  %v10117_v54 = vld [vmem:[#allocation188_spill] sm:$0xff] }
 0x6b9   :  { %10060 = vst [vmem:[#allocation23_spill] sm:$0xff] %v7791_v16  ;;  %2818 = vmatprep.mubr.f32.mxu0 %v7791_v16  ;;  %2889 = vmatprep.mubr.f32.mxu1 %v7791_v16  ;;  %v8032_v16 = vld [vmem:[#allocation10 + $0x48] sm:$0xff] }
 0x6ba   :  { %2819 = vmatmul.mubr.f32.vlgmr.msra.gmra.mxu0 %v7651_v8  ;;  %2890 = vmatmul.mubr.f32.vlgmr.msra.gmra.mxu1 %v7651_v8  ;;  %v10071_v8 = vld [vmem:[#allocation142_spill] sm:$0xff]  ;;  %10131 = vst [vmem:[#allocation31_spill] sm:$0xff] %v8032_v16 }
 0x6bb   :  { %2921 = vmatpush1.msra.mxu0 %v10061_v7  ;;  %2992 = vmatpush1.msra.mxu1 %v10062_v31  ;;  %v10118_v7 = vld [vmem:[#allocation189_spill] sm:$0xff]  ;;  %v10119_v31 = vld [vmem:[#allocation190_spill] sm:$0xff] }
 0x6bc   :  { %2922 = vmatprep.subr.mxu0 %v10063_v50  ;;  %2993 = vmatprep.subr.mxu1 %v10064_v46  ;;  %v10120_v50 = vld [vmem:[#allocation191_spill] sm:$0xff]  ;;  %v10121_v46 = vld [vmem:[#allocation192_spill] sm:$0xff] }
 0x6bd   :  { %2923 = vmatpush1.msra.mxu0 %v10065_v18  ;;  %2994 = vmatpush1.msra.mxu1 %v10066_v23  ;;  %v10122_v18 = vmov 0.0   ;;  %v10123_v23 = vld [vmem:[#allocation21_spill] sm:$0xff] }
 0x6be   :  { %2924 = vmatprep.subr.mxu0 %v10067_v53  ;;  %2995 = vmatprep.subr.mxu1 %v10068_v13  ;;  %v7861_v53 = vld [vmem:[#allocation10 + $0x1e8] sm:$0xff]  ;;  %v7864_v13 = vld [vmem:[#allocation10 + $0x1f8] sm:$0xff] }
 0x6bf   :  { %2925 = vmatpush1.msra.mxu0 %v10069_v33  ;;  %2996 = vmatpush1.msra.mxu1 %v10070_v14  ;;  %v10124_v14 = vld [vmem:[#allocation37_spill] sm:$0xff] }
 0x6c0   :  { %2926 = vmatprep.subr.mxu0 %v10071_v8  ;;  %2997 = vmatprep.subr.mxu1 %v10072_v39 }
 0x6c1   :  { %2927 = vmatpush1.msra.mxu0 %v10073_v4  ;;  %2998 = vmatpush1.msra.mxu1 %v10074_v1  ;;  %v10125_v1 = vld [vmem:[#allocation39_spill] sm:$0xff] }
 0x6c2   :  { %2928 = vmatprep.subr.mxu0 %v10075_v9  ;;  %2999 = vmatprep.subr.mxu1 %v10076_v42 }
 0x6c3   :  { %2929 = vmatpush1.msra.mxu0 %v10077_v28  ;;  %3000 = vmatpush1.msra.mxu1 %v10078_v58 }
 0x6c4   :  { %2930 = vmatprep.subr.mxu0 %v10079_v51  ;;  %3001 = vmatprep.subr.mxu1 %v10080_v26  ;;  %v10126_v51 = vld [vmem:[#allocation40_spill] sm:$0xff] }
 0x6c5   :  { %2931 = vmatpush1.msra.mxu0 %v10081_v21  ;;  %3002 = vmatpush1.msra.mxu1 %v10082_v37  ;;  %v10127_v21 = vld [vmem:[#allocation38_spill] sm:$0xff] }
 0x6c6   :  { %2932 = vmatprep.subr.mxu0 %v10083_v29  ;;  %3003 = vmatprep.subr.mxu1 %v10084_v6 }
 0x6c7   :  { %2933 = vmatpush1.msra.mxu0 %v10085_v48  ;;  %3004 = vmatpush1.msra.mxu1 %v10086_v55 }
 0x6c8   :  { %2934 = vmatprep.subr.mxu0 %v10087_v32  ;;  %3005 = vmatprep.subr.mxu1 %v10088_v59 }
 0x6c9   :  { %2935 = vmatpush1.msra.mxu0 %v10089_v40  ;;  %3006 = vmatpush1.msra.mxu1 %v10090_v63 }
 0x6ca   :  { %2936 = vmatprep.subr.mxu0 %v10091_v56  ;;  %3007 = vmatprep.subr.mxu1 %v10092_v61 }
 0x6cb   :  { %2937 = vmatpush1.msra.mxu0 %v10093_v62  ;;  %3008 = vmatpush1.msra.mxu1 %v10094_v2 }
 0x6cc   :  { %2938 = vmatprep.subr.mxu0 %v10095_v43  ;;  %3009 = vmatprep.subr.mxu1 %v10096_v34 }
 0x6cd   :  { %2939 = vmatpush1.msra.mxu0 %v10097_v27  ;;  %3010 = vmatpush1.msra.mxu1 %v10098_v49 }
 0x6ce   :  { %2940 = vmatprep.subr.mxu0 %v10099_v5  ;;  %3011 = vmatprep.subr.mxu1 %v10100_v52  ;;  %v7879_v5 = vld [vmem:[#allocation10 + $0x1e0] sm:$0xff]  ;;  %v7882_v52 = vld [vmem:[#allocation10 + $0x1f0] sm:$0xff] }
 0x6cf   :  { %2941 = vmatpush1.msra.mxu0 %v10101_v19  ;;  %3012 = vmatpush1.msra.mxu1 %v10102_v30  ;;  %v7888_v19 = vld [vmem:[#allocation10 + $0x1d8] sm:$0xff]  ;;  %v7891_v30 = vld [vmem:[#allocation10 + $0x1c0] sm:$0xff] }
 0x6d0   :  { %2942 = vmatprep.subr.mxu0 %v10103_v24  ;;  %3013 = vmatprep.subr.mxu1 %v10104_v10  ;;  %v7894_v24 = vld [vmem:[#allocation10 + $0x1d0] sm:$0xff]  ;;  %v7897_v10 = vld [vmem:[#allocation10 + $0x1a8] sm:$0xff] }
 0x6d1   :  { %2943 = vmatpush1.msra.mxu0 %v10105_v11  ;;  %3014 = vmatpush1.msra.mxu1 %v10106_v25  ;;  %v7900_v11 = vld [vmem:[#allocation10 + $0x1b8] sm:$0xff]  ;;  %v7903_v25 = vld [vmem:[#allocation10 + $0x1a0] sm:$0xff] }
 0x6d2   :  { %2944 = vmatprep.subr.mxu0 %v10107_v38  ;;  %3015 = vmatprep.subr.mxu1 %v10108_v35  ;;  %v7906_v38 = vld [vmem:[#allocation10 + $0x1b0] sm:$0xff]  ;;  %v7909_v35 = vld [vmem:[#allocation10 + $0x188] sm:$0xff] }
 0x6d3   :  { %2945 = vmatpush1.msra.mxu0 %v10109_v41  ;;  %3016 = vmatpush1.msra.mxu1 %v10110_v45  ;;  %v7912_v41 = vld [vmem:[#allocation10 + $0x198] sm:$0xff]  ;;  %v7915_v45 = vld [vmem:[#allocation10 + $0x180] sm:$0xff] }
 0x6d4   :  { %2946 = vmatprep.subr.mxu0 %v10111_v57  ;;  %3017 = vmatprep.subr.mxu1 %v10112_v47  ;;  %v7918_v57 = vld [vmem:[#allocation10 + $0x190] sm:$0xff]  ;;  %v7921_v47 = vld [vmem:[#allocation10 + $0x168] sm:$0xff] }
 0x6d5   :  { %2947 = vmatpush1.msra.mxu0 %v10113_v44  ;;  %3018 = vmatpush1.msra.mxu1 %v10114_v20  ;;  %v7924_v44 = vld [vmem:[#allocation10 + $0x178] sm:$0xff]  ;;  %v7927_v20 = vld [vmem:[#allocation10 + $0x160] sm:$0xff] }
 0x6d6   :  { %2948 = vmatprep.subr.mxu0 %v10115_v3  ;;  %3019 = vmatprep.subr.mxu1 %v10116_v12  ;;  %v7930_v3 = vld [vmem:[#allocation10 + $0x170] sm:$0xff]  ;;  %v7933_v12 = vld [vmem:[#allocation10 + $0x148] sm:$0xff] }
 0x6d7   :  { %2949 = vmatpush1.msra.mxu0 %v10117_v54  ;;  %3020 = vmatpush1.msra.mxu1 %v10118_v7  ;;  %v7936_v54 = vld [vmem:[#allocation10 + $0x158] sm:$0xff]  ;;  %v7939_v7 = vld [vmem:[#allocation10 + $0x140] sm:$0xff] }
 0x6d8   :  { %2950 = vmatprep.subr.mxu0 %v10119_v31  ;;  %3021 = vmatprep.subr.mxu1 %v10120_v50  ;;  %v7942_v31 = vld [vmem:[#allocation10 + $0x150] sm:$0xff]  ;;  %v7945_v50 = vld [vmem:[#allocation10 + $0x128] sm:$0xff] }
 0x6d9   :  { %2951 = vmatpush1.msra.mxu0 %v10121_v46  ;;  %2984 = vmatprep.mubr.f32.mxu0 %v10122_v18  ;;  %v7948_v46 = vld [vmem:[#allocation10 + $0x138] sm:$0xff] }
 0x6da   :  { %3022 = vmatpush1.msra.mxu1 %v10123_v23  ;;  %3055 = vmatprep.mubr.f32.mxu1 %v10122_v18  ;;  %v8035_v18 = vld [vmem:[#allocation10 + $0x58] sm:$0xff] }
 0x6db   :  { %3090 = vmatprep.subr.mxu0 %v7861_v53  ;;  %3161 = vmatprep.subr.mxu1 %v7864_v13  ;;  %10132 = vst [vmem:[#allocation32_spill] sm:$0xff] %v8035_v18 }
 0x734   :  { %v2650_v33 = vpop.f32.mrf.mxu0  ;;  %v2721_v42 = vpop.f32.mrf.mxu1 }
 0x735   :  { %v2726_v8 = vadd.f32 %v2650_v33, %v10124_v14  ;;  %v2728_v37 = vadd.f32 %v2721_v42, %v10127_v21  ;;  %v7951_v33 = vld [vmem:[#allocation10 + $0x120] sm:$0xff]  ;;  %v7954_v14 = vld [vmem:[#allocation10 + $0x130] sm:$0xff] }
 0x736   :  { %v2652_v39 = vpop.f32.mrf.mxu0  ;;  %v2723_v58 = vpop.f32.mrf.mxu1  ;;  %v7967_v42 = vld [vmem:[#allocation10 + $0x110] sm:$0xff]  ;;  %v7977_v21 = vld [vmem:[#allocation10 + $0xe0] sm:$0xff] }
 0x737   :  { %v3854_v4 = vmul.f32 -1.442695, %v2726_v8  ;;  %v2727_v9 = vadd.f32 %v2652_v39, %v10125_v1  ;;  %v2729_v26 = vadd.f32 %v2723_v58, %v10126_v51  ;;  %v7958_v39 = vld [vmem:[#allocation10 + $0x108] sm:$0xff] }
 0x738   :  { %v7971_v51 = vld [vmem:[#allocation10 + $0xe8] sm:$0xff] }
 0x739   :  { %4058 = vpow2.f32 %v3854_v4  ;;  %v3855_v28 = vmul.f32 -1.442695, %v2727_v9  ;;  %v3856_v29 = vmul.f32 -1.442695, %v2729_v26  ;;  %v7961_v4 = vld [vmem:[#allocation10 + $0x118] sm:$0xff]  ;;  %v7964_v9 = vld [vmem:[#allocation10 + $0x100] sm:$0xff] }
 0x73a   :  { %v7974_v26 = vld [vmem:[#allocation10 + $0xf8] sm:$0xff] }
 0x73b   :  { %4060 = vpow2.f32 %v3855_v28 }
 0x73c   :  { %4062 = vtanh.f32 %v2728_v37  ;;  %v7980_v37 = vld [vmem:[#allocation10 + $0xf0] sm:$0xff] }
 0x73d   :  { %4064 = vpow2.f32 %v3856_v29 }
 0x746   :  { %v4059_v6 = vpop.eup %4058 }
 0x747   :  { %v2736_v48 = vadd.f32 1.0, %v4059_v6 }
 0x748   :  { %v4061_v55 = vpop.eup %4060 }
 0x749   :  { %4066 = vrcp.f32 %v2736_v48  ;;  %v2737_v32 = vadd.f32 1.0, %v4061_v55  ;;  %v4063_v59 = vpop.eup %4062  ;;  %v7983_v48 = vld [vmem:[#allocation10 + $0xc8] sm:$0xff]  ;;  %v7986_v55 = vld [vmem:[#allocation10 + $0xd8] sm:$0xff] }
 0x74a   :  { %v4065_v40 = vpop.eup %4064 }
 0x74b   :  { %4068 = vrcp.f32 %v2737_v32  ;;  %v2746_v62 = vadd.f32 1.0, %v4065_v40  ;;  %v7989_v32 = vld [vmem:[#allocation10 + $0xc0] sm:$0xff]  ;;  %v7995_v40 = vld [vmem:[#allocation10 + $0xa8] sm:$0xff] }
 0x74d   :  { %4070 = vrcp.f32 %v2746_v62 }
 0x756   :  { %v4067_v63 = vpop.eup %4066 }
 0x757   :  { %v2750_v56 = vmul.f32 %v4067_v63, %v4063_v59  ;;  %v7992_v59 = vld [vmem:[#allocation10 + $0xd0] sm:$0xff]  ;;  %v7998_v63 = vld [vmem:[#allocation10 + $0xb8] sm:$0xff] }
 0x758   :  { %v4069_v61 = vpop.eup %4068 }
 0x759   :  { %v2749_v2 = vmul.f32 %v4069_v61, %v7648_v15  ;;  %v7885_v15 = vld [vmem:[#allocation10 + $0x1c8] sm:$0xff]  ;;  %v8004_v61 = vld [vmem:[#allocation10 + $0xb0] sm:$0xff] }
 0x75a   :  { %v4071_v34 = vpop.eup %4070 }
 0x75b   :  { %v7872_v43 = vadd.f32 %v2750_v56, %v2749_v2  ;;  %v8001_v56 = vld [vmem:[#allocation10 + $0xa0] sm:$0xff]  ;;  %v8007_v2 = vld [vmem:[#allocation10 + $0x88] sm:$0xff] }
 0x75d   :  { %10128 = vst [vmem:[#allocation24_spill] sm:$0xff] %v7872_v43  ;;  %4072 = vtanh.f32 %v7872_v43 }
 0x76a   :  { %v4073_v27 = vpop.eup %4072 }
 0x76b   :  { %v7875_v49 = vmul.f32 %v4073_v27, %v4071_v34  ;;  %v8010_v34 = vld [vmem:[#allocation10 + $0x98] sm:$0xff]  ;;  %v8013_v27 = vld [vmem:[#allocation10 + $0x80] sm:$0xff] }
 0x76d   :  { %2985 = vmatmul.mubr.f32.vlgmr.msra.gmra.mxu0 %v7875_v49  ;;  %3056 = vmatmul.mubr.f32.vlgmr.msra.gmra.mxu1 %v7875_v49 }
 0x76e   :  { %3091 = vmatpush1.msra.mxu0 %v7879_v5  ;;  %3162 = vmatpush1.msra.mxu1 %v7882_v52 }
 0x76f   :  { %3092 = vmatprep.subr.mxu0 %v7885_v15  ;;  %3163 = vmatprep.subr.mxu1 %v7888_v19 }
 0x770   :  { %3093 = vmatpush1.msra.mxu0 %v7891_v30  ;;  %3164 = vmatpush1.msra.mxu1 %v7894_v24 }
 0x771   :  { %3094 = vmatprep.subr.mxu0 %v7897_v10  ;;  %3165 = vmatprep.subr.mxu1 %v7900_v11 }
 0x772   :  { %3095 = vmatpush1.msra.mxu0 %v7903_v25  ;;  %3166 = vmatpush1.msra.mxu1 %v7906_v38 }
 0x773   :  { %3096 = vmatprep.subr.mxu0 %v7909_v35  ;;  %3167 = vmatprep.subr.mxu1 %v7912_v41 }
 0x774   :  { %3097 = vmatpush1.msra.mxu0 %v7915_v45  ;;  %3168 = vmatpush1.msra.mxu1 %v7918_v57 }
 0x775   :  { %3098 = vmatprep.subr.mxu0 %v7921_v47  ;;  %3169 = vmatprep.subr.mxu1 %v7924_v44 }
 0x776   :  { %3099 = vmatpush1.msra.mxu0 %v7927_v20  ;;  %3170 = vmatpush1.msra.mxu1 %v7930_v3 }
 0x777   :  { %3100 = vmatprep.subr.mxu0 %v7933_v12  ;;  %3171 = vmatprep.subr.mxu1 %v7936_v54 }
 0x778   :  { %3101 = vmatpush1.msra.mxu0 %v7939_v7  ;;  %3172 = vmatpush1.msra.mxu1 %v7942_v31 }
 0x779   :  { %3102 = vmatprep.subr.mxu0 %v7945_v50  ;;  %3173 = vmatprep.subr.mxu1 %v7948_v46 }
 0x77a   :  { %v2820_v23 = vpop.f32.mrf.mxu0  ;;  %3103 = vmatpush1.msra.mxu0 %v7951_v33  ;;  %3174 = vmatpush1.msra.mxu1 %v7954_v14  ;;  %v2891_v29 = vpop.f32.mrf.mxu1 }
 0x77b   :  { %v2821_v8 = vadd.f32 %v2820_v23, %v6004_v60  ;;  %3104 = vmatprep.subr.mxu0 %v7958_v39  ;;  %3175 = vmatprep.subr.mxu1 %v7961_v4  ;;  %v8016_v23 = vld [vmem:[#allocation10 + $0x90] sm:$0xff]  ;;  %v8047_v60 = vld [vmem:[#allocation10 + $0x38] sm:$0xff] }
 0x77c   :  { %v2822_v1 = vpop.f32.mrf.mxu0  ;;  %3105 = vmatpush1.msra.mxu0 %v7964_v9  ;;  %3176 = vmatpush1.msra.mxu1 %v7967_v42  ;;  %v2893_v62 = vpop.f32.mrf.mxu1  ;;  %10136 = vst [vmem:[#allocation36_spill] sm:$0xff] %v8047_v60 }
 0x77d   :  { %v3857_v28 = vmul.f32 -1.442695, %v2821_v8  ;;  %v2823_v58 = vadd.f32 %v2822_v1, %v6011_v0  ;;  %3106 = vmatprep.subr.mxu0 %v7971_v51  ;;  %3177 = vmatprep.subr.mxu1 %v7974_v26  ;;  %v8019_v8 = vld [vmem:[#allocation10 + $0x68] sm:$0xff]  ;;  %v8022_v1 = vld [vmem:[#allocation10 + $0x78] sm:$0xff]  ;;  %v8038_v0 = vld [vmem:[#allocation10 + $0x40] sm:$0xff] }
 0x77e   :  { %3107 = vmatpush1.msra.mxu0 %v7977_v21  ;;  %3178 = vmatpush1.msra.mxu1 %v7980_v37  ;;  %10133 = vst [vmem:[#allocation30_spill] sm:$0xff] %v8038_v0 }
 0x77f   :  { %4074 = vpow2.f32 %v3857_v28  ;;  %v3858_v6 = vmul.f32 -1.442695, %v2823_v58  ;;  %3108 = vmatprep.subr.mxu0 %v7983_v48  ;;  %3179 = vmatprep.subr.mxu1 %v7986_v55  ;;  %v2894_v28 = vadd.f32 %v2893_v62, %v9975_v17  ;;  %v8026_v58 = vld [vmem:[#allocation10 + $0x60] sm:$0xff]  ;;  %v8041_v62 = vld [vmem:[#allocation10 + $0x50] sm:$0xff]  ;;  %v8044_v17 = vld [vmem:[#allocation10 + $0x28] sm:$0xff] }
 0x780   :  { %3109 = vmatpush1.msra.mxu0 %v7989_v32  ;;  %3180 = vmatpush1.msra.mxu1 %v7992_v59  ;;  %10129 = vst [vmem:[#allocation22_spill] sm:$0xff] %v8026_v58  ;;  %10134 = vst [vmem:[#allocation33_spill] sm:$0xff] %v8041_v62 }
 0x781   :  { %4076 = vpow2.f32 %v3858_v6  ;;  %3110 = vmatprep.subr.mxu0 %v7995_v40  ;;  %3181 = vmatprep.subr.mxu1 %v7998_v63  ;;  %v8029_v6 = vld [vmem:[#allocation10 + $0x70] sm:$0xff]  ;;  %10135 = vst [vmem:[#allocation35_spill] sm:$0xff] %v8044_v17  ;;  %v3859_v43 = vmul.f32 -1.442695, %v2894_v28  ;;  %v8063_v28 = vld [vmem:[#allocation10] sm:$0xff] }
 0x782   :  { %3111 = vmatpush1.msra.mxu0 %v8001_v56  ;;  %3182 = vmatpush1.msra.mxu1 %v8004_v61  ;;  %10130 = vst [vmem:[#allocation29_spill] sm:$0xff] %v8029_v6  ;;  %10141 = vst [vmem:[#allocation47_spill] sm:$0xff] %v8063_v28 }
 0x783   :  { %3112 = vmatprep.subr.mxu0 %v8007_v2  ;;  %3183 = vmatprep.subr.mxu1 %v8010_v34  ;;  %4078 = vpow2.f32 %v3859_v43  ;;  %v8087_v43 = vld [vmem:[#allocation10 + $0x3c0] sm:$0xff] }
 0x784   :  { %3113 = vmatpush1.msra.mxu0 %v8013_v27  ;;  %3184 = vmatpush1.msra.mxu1 %v8016_v23  ;;  %10149 = vst [vmem:[#allocation55_spill] sm:$0xff] %v8087_v43 }
 0x785   :  { %3114 = vmatprep.subr.mxu0 %v8019_v8  ;;  %3185 = vmatprep.subr.mxu1 %v8022_v1 }
 0x786   :  { %3115 = vmatpush1.msra.mxu0 %v8026_v58  ;;  %3186 = vmatpush1.msra.mxu1 %v8029_v6  ;;  %v8069_v6 = vld [vmem:[#allocation10 + $0x3e8] sm:$0xff] }
 0x787   :  { %3116 = vmatprep.subr.mxu0 %v8032_v16  ;;  %3187 = vmatprep.subr.mxu1 %v8035_v18  ;;  %v8050_v16 = vld [vmem:[#allocation10 + $0x20] sm:$0xff]  ;;  %v8053_v18 = vld [vmem:[#allocation10 + $0x30] sm:$0xff]  ;;  %10143 = vst [vmem:[#allocation49_spill] sm:$0xff] %v8069_v6  ;;  %v8178_v58 = vld [vmem:[#allocation10 + $0x2c8] sm:$0xff] }
 0x788   :  { %3117 = vmatpush1.msra.mxu0 %v8038_v0  ;;  %3188 = vmatpush1.msra.mxu1 %v8041_v62  ;;  %10137 = vst [vmem:[#allocation34_spill] sm:$0xff] %v8050_v16  ;;  %10138 = vst [vmem:[#allocation27_spill] sm:$0xff] %v8053_v18  ;;  %v8056_v0 = vld [vmem:[#allocation10 + $0x8] sm:$0xff]  ;;  %v8059_v62 = vld [vmem:[#allocation10 + $0x18] sm:$0xff] }
 0x789   :  { %3118 = vmatprep.subr.mxu0 %v8044_v17  ;;  %3189 = vmatprep.subr.mxu1 %v8047_v60  ;;  %10139 = vst [vmem:[#allocation28_spill] sm:$0xff] %v8056_v0  ;;  %10140 = vst [vmem:[#allocation26_spill] sm:$0xff] %v8059_v62  ;;  %v2892_v60 = vadd.f32 %v2891_v29, %v9988_v22  ;;  %v8075_v29 = vld [vmem:[#allocation10 + $0x3e0] sm:$0xff]  ;;  %v8078_v22 = vld [vmem:[#allocation10 + $0x3f0] sm:$0xff] }
 0x78a   :  { %3119 = vmatpush1.msra.mxu0 %v8050_v16  ;;  %3190 = vmatpush1.msra.mxu1 %v8053_v18  ;;  %v8066_v16 = vld [vmem:[#allocation10 + $0x10] sm:$0xff]  ;;  %10145 = vst [vmem:[#allocation51_spill] sm:$0xff] %v8075_v29  ;;  %10146 = vst [vmem:[#allocation52_spill] sm:$0xff] %v8078_v22 }
 0x78b   :  { %3120 = vmatprep.subr.mxu0 %v8056_v0  ;;  %3191 = vmatprep.subr.mxu1 %v8059_v62  ;;  %10142 = vst [vmem:[#allocation48_spill] sm:$0xff] %v8066_v16  ;;  %v8072_v0 = vld [vmem:[#allocation10 + $0x3f8] sm:$0xff] }
 0x78c   :  { %v4075_v17 = vpop.eup %4074  ;;  %3121 = vmatpush1.msra.mxu0 %v8063_v28  ;;  %3192 = vmatpush1.msra.mxu1 %v8066_v16  ;;  %10144 = vst [vmem:[#allocation50_spill] sm:$0xff] %v8072_v0  ;;  %v8081_v16 = vld [vmem:[#allocation10 + $0x3c8] sm:$0xff] }
 0x78d   :  { %v2902_v18 = vadd.f32 1.0, %v4075_v17  ;;  %3122 = vmatprep.subr.mxu0 %v8069_v6  ;;  %3193 = vmatprep.subr.mxu1 %v8072_v0  ;;  %10147 = vst [vmem:[#allocation53_spill] sm:$0xff] %v8081_v16  ;;  %v8084_v6 = vld [vmem:[#allocation10 + $0x3d8] sm:$0xff]  ;;  %v8171_v0 = vld [vmem:[#allocation10 + $0x2e0] sm:$0xff] }
 0x78e   :  { %v4077_v62 = vpop.eup %4076  ;;  %3123 = vmatpush2.msra.mxu0 %v8075_v29  ;;  %3194 = vmatpush2.msra.mxu1 %v8078_v22  ;;  %10148 = vst [vmem:[#allocation54_spill] sm:$0xff] %v8084_v6  ;;  %v8090_v29 = vld [vmem:[#allocation10 + $0x3d0] sm:$0xff]  ;;  %v8168_v22 = vld [vmem:[#allocation10 + $0x2f8] sm:$0xff]  ;;  %10176 = vst [vmem:[#allocation82_spill] sm:$0xff] %v8171_v0 }
 0x78f   :  { %4080 = vrcp.f32 %v2902_v18  ;;  %v2903_v17 = vadd.f32 1.0, %v4077_v62  ;;  %3124 = vmatprep.subr.mxu0 %v8081_v16  ;;  %3195 = vmatprep.subr.mxu1 %v8084_v6  ;;  %10150 = vst [vmem:[#allocation56_spill] sm:$0xff] %v8090_v29  ;;  %v8093_v18 = vld [vmem:[#allocation10 + $0x3a8] sm:$0xff]  ;;  %v8096_v62 = vld [vmem:[#allocation10 + $0x3b8] sm:$0xff]  ;;  %v8099_v16 = vld [vmem:[#allocation10 + $0x3a0] sm:$0xff] }
 0x790   :  { %4082 = vtanh.f32 %v2892_v60  ;;  %3125 = vmatpush2.msra.mxu0 %v8087_v43  ;;  %3196 = vmatpush2.msra.mxu1 %v8090_v29  ;;  %10151 = vst [vmem:[#allocation57_spill] sm:$0xff] %v8093_v18  ;;  %10152 = vst [vmem:[#allocation58_spill] sm:$0xff] %v8096_v62  ;;  %v8102_v60 = vld [vmem:[#allocation10 + $0x3b0] sm:$0xff]  ;;  %v8105_v43 = vld [vmem:[#allocation10 + $0x388] sm:$0xff] }
 0x791   :  { %4084 = vrcp.f32 %v2903_v17  ;;  %3126 = vmatprep.subr.mxu0 %v8093_v18  ;;  %3197 = vmatprep.subr.mxu1 %v8096_v62  ;;  %10153 = vst [vmem:[#allocation59_spill] sm:$0xff] %v8099_v16  ;;  %10154 = vst [vmem:[#allocation60_spill] sm:$0xff] %v8102_v60  ;;  %v8108_v17 = vld [vmem:[#allocation10 + $0x398] sm:$0xff]  ;;  %v8111_v18 = vld [vmem:[#allocation10 + $0x380] sm:$0xff] }
 0x792   :  { %3127 = vmatpush2.msra.mxu0 %v8099_v16  ;;  %3198 = vmatpush2.msra.mxu1 %v8102_v60  ;;  %10155 = vst [vmem:[#allocation61_spill] sm:$0xff] %v8105_v43  ;;  %10156 = vst [vmem:[#allocation62_spill] sm:$0xff] %v8108_v17  ;;  %v8114_v62 = vld [vmem:[#allocation10 + $0x390] sm:$0xff]  ;;  %v8117_v16 = vld [vmem:[#allocation10 + $0x368] sm:$0xff] }
 0x793   :  { %3128 = vmatprep.subr.mxu0 %v8105_v43  ;;  %3199 = vmatprep.subr.mxu1 %v8108_v17  ;;  %10157 = vst [vmem:[#allocation63_spill] sm:$0xff] %v8111_v18  ;;  %10158 = vst [vmem:[#allocation64_spill] sm:$0xff] %v8114_v62  ;;  %v8120_v60 = vld [vmem:[#allocation10 + $0x378] sm:$0xff]  ;;  %v8123_v43 = vld [vmem:[#allocation10 + $0x360] sm:$0xff] }
 0x794   :  { %3129 = vmatpush2.msra.mxu0 %v8111_v18  ;;  %3200 = vmatpush2.msra.mxu1 %v8114_v62  ;;  %10159 = vst [vmem:[#allocation65_spill] sm:$0xff] %v8117_v16  ;;  %10160 = vst [vmem:[#allocation66_spill] sm:$0xff] %v8120_v60  ;;  %v8126_v17 = vld [vmem:[#allocation10 + $0x370] sm:$0xff]  ;;  %v8129_v18 = vld [vmem:[#allocation10 + $0x348] sm:$0xff] }
 0x795   :  { %3130 = vmatprep.subr.mxu0 %v8117_v16  ;;  %3201 = vmatprep.subr.mxu1 %v8120_v60  ;;  %10161 = vst [vmem:[#allocation67_spill] sm:$0xff] %v8123_v43  ;;  %10162 = vst [vmem:[#allocation68_spill] sm:$0xff] %v8126_v17  ;;  %v8132_v62 = vld [vmem:[#allocation10 + $0x358] sm:$0xff]  ;;  %v8135_v16 = vld [vmem:[#allocation10 + $0x340] sm:$0xff] }
 0x796   :  { %3131 = vmatpush2.msra.mxu0 %v8123_v43  ;;  %3202 = vmatpush2.msra.mxu1 %v8126_v17  ;;  %10163 = vst [vmem:[#allocation69_spill] sm:$0xff] %v8129_v18  ;;  %10164 = vst [vmem:[#allocation70_spill] sm:$0xff] %v8132_v62  ;;  %v8138_v60 = vld [vmem:[#allocation10 + $0x350] sm:$0xff]  ;;  %v8141_v43 = vld [vmem:[#allocation10 + $0x328] sm:$0xff] }
 0x797   :  { %3132 = vmatprep.subr.mxu0 %v8129_v18  ;;  %3203 = vmatprep.subr.mxu1 %v8132_v62  ;;  %10165 = vst [vmem:[#allocation71_spill] sm:$0xff] %v8135_v16  ;;  %10166 = vst [vmem:[#allocation72_spill] sm:$0xff] %v8138_v60  ;;  %v8144_v17 = vld [vmem:[#allocation10 + $0x338] sm:$0xff]  ;;  %v8147_v18 = vld [vmem:[#allocation10 + $0x320] sm:$0xff] }
 0x798   :  { %3133 = vmatpush2.msra.mxu0 %v8135_v16  ;;  %3204 = vmatpush2.msra.mxu1 %v8138_v60  ;;  %10167 = vst [vmem:[#allocation73_spill] sm:$0xff] %v8141_v43  ;;  %10168 = vst [vmem:[#allocation74_spill] sm:$0xff] %v8144_v17  ;;  %v8150_v62 = vld [vmem:[#allocation10 + $0x330] sm:$0xff]  ;;  %v4079_v16 = vpop.eup %4078  ;;  %v8153_v29 = vld [vmem:[#allocation10 + $0x308] sm:$0xff] }
 0x799   :  { %3134 = vmatprep.subr.mxu0 %v8141_v43  ;;  %3205 = vmatprep.subr.mxu1 %v8144_v17  ;;  %10169 = vst [vmem:[#allocation75_spill] sm:$0xff] %v8147_v18  ;;  %10170 = vst [vmem:[#allocation76_spill] sm:$0xff] %v8150_v62  ;;  %v8156_v60 = vld [vmem:[#allocation10 + $0x318] sm:$0xff]  ;;  %v8159_v6 = vld [vmem:[#allocation10 + $0x300] sm:$0xff] }
 0x79a   :  { %3135 = vmatpush2.msra.mxu0 %v8147_v18  ;;  %3206 = vmatpush2.msra.mxu1 %v8150_v62  ;;  %10171 = vst [vmem:[#allocation77_spill] sm:$0xff] %v8153_v29  ;;  %10172 = vst [vmem:[#allocation78_spill] sm:$0xff] %v8156_v60  ;;  %v8162_v17 = vld [vmem:[#allocation10 + $0x310] sm:$0xff]  ;;  %v8165_v62 = vld [vmem:[#allocation10 + $0x2e8] sm:$0xff] }
 0x79b   :  { %3136 = vmatprep.subr.mxu0 %v8153_v29  ;;  %3207 = vmatprep.subr.mxu1 %v8156_v60  ;;  %10173 = vst [vmem:[#allocation79_spill] sm:$0xff] %v8159_v6  ;;  %10174 = vst [vmem:[#allocation80_spill] sm:$0xff] %v8162_v17  ;;  %v2912_v60 = vadd.f32 1.0, %v4079_v16  ;;  %v8184_v16 = vld [vmem:[#allocation10 + $0x2c0] sm:$0xff] }
 0x79c   :  { %v4081_v43 = vpop.eup %4080  ;;  %3137 = vmatpush2.msra.mxu0 %v8159_v6  ;;  %3208 = vmatpush2.msra.mxu1 %v8162_v17  ;;  %10175 = vst [vmem:[#allocation81_spill] sm:$0xff] %v8165_v62  ;;  %v8174_v6 = vld [vmem:[#allocation10 + $0x2f0] sm:$0xff] }
 0x79d   :  { %v4083_v18 = vpop.eup %4082  ;;  %3138 = vmatprep.subr.mxu0 %v8165_v62  ;;  %3209 = vmatprep.subr.mxu1 %v8168_v22  ;;  %10177 = vst [vmem:[#allocation83_spill] sm:$0xff] %v8174_v6  ;;  %v8181_v62 = vld [vmem:[#allocation10 + $0x2d8] sm:$0xff]  ;;  %4086 = vrcp.f32 %v2912_v60  ;;  %v8214_v60 = vld [vmem:[#allocation10 + $0x290] sm:$0xff] }
 0x79e   :  { %v4085_v29 = vpop.eup %4084  ;;  %3139 = vmatpush2.msra.mxu0 %v8171_v0  ;;  %3210 = vmatpush2.msra.mxu1 %v8174_v6  ;;  %v2916_v17 = vmul.f32 %v4083_v18, %v4081_v43  ;;  %v8187_v0 = vld [vmem:[#allocation10 + $0x2d0] sm:$0xff]  ;;  %v8192_v43 = vld [vmem:[#allocation10 + $0x2a8] sm:$0xff]  ;;  %10185 = vst [vmem:[#allocation91_spill] sm:$0xff] %v8214_v60 }
 0x79f   :  { %v2915_v28 = vmul.f32 %v4085_v29, %v7760_v36  ;;  %3140 = vmatprep.subr.mxu0 %v8178_v58  ;;  %3211 = vmatprep.subr.mxu1 %v8181_v62  ;;  %10178 = vst [vmem:[#allocation84_spill] sm:$0xff] %v8187_v0  ;;  %v8195_v36 = vld [vmem:[#allocation10 + $0x2b8] sm:$0xff]  ;;  %v8198_v29 = vld [vmem:[#allocation10 + $0x2a0] sm:$0xff]  ;;  %v8201_v18 = vld [vmem:[#allocation10 + $0x2b0] sm:$0xff] }
 0x7a0   :  { %3141 = vmatpush2.msra.mxu0 %v8184_v16  ;;  %3212 = vmatpush2.msra.mxu1 %v8187_v0  ;;  %10180 = vst [vmem:[#allocation86_spill] sm:$0xff] %v8198_v29  ;;  %10181 = vst [vmem:[#allocation87_spill] sm:$0xff] %v8201_v18  ;;  %v8204_v0 = vld [vmem:[#allocation10 + $0x288] sm:$0xff] }
 0x7a1   :  { %v8190_v6 = vadd.f32 %v2916_v17, %v2915_v28  ;;  %3142 = vmatprep.subr.mxu0 %v8192_v43  ;;  %3213 = vmatprep.subr.mxu1 %v8195_v36  ;;  %10182 = vst [vmem:[#allocation88_spill] sm:$0xff] %v8204_v0  ;;  %v8207_v28 = vld [vmem:[#allocation10 + $0x298] sm:$0xff]  ;;  %v8211_v17 = vld [vmem:[#allocation10 + $0x280] sm:$0xff] }
 0x7a2   :  { %3143 = vmatpush2.msra.mxu0 %v8198_v29  ;;  %3214 = vmatpush2.msra.mxu1 %v8201_v18  ;;  %10183 = vst [vmem:[#allocation89_spill] sm:$0xff] %v8207_v28  ;;  %10184 = vst [vmem:[#allocation90_spill] sm:$0xff] %v8211_v17  ;;  %v8217_v29 = vld [vmem:[#allocation10 + $0x268] sm:$0xff]  ;;  %v8220_v18 = vld [vmem:[#allocation10 + $0x278] sm:$0xff] }
 0x7a3   :  { %10179 = vst [vmem:[#allocation85_spill] sm:$0xff] %v8190_v6  ;;  %3144 = vmatprep.subr.mxu0 %v8204_v0  ;;  %3215 = vmatprep.subr.mxu1 %v8207_v28  ;;  %4088 = vtanh.f32 %v8190_v6  ;;  %10186 = vst [vmem:[#allocation92_spill] sm:$0xff] %v8217_v29  ;;  %v8223_v0 = vld [vmem:[#allocation10 + $0x260] sm:$0xff]  ;;  %v8226_v6 = vld [vmem:[#allocation10 + $0x270] sm:$0xff] }
 0x7a4   :  { %3145 = vmatpush2.msra.mxu0 %v8211_v17  ;;  %3216 = vmatpush2.msra.mxu1 %v8214_v60  ;;  %10187 = vst [vmem:[#allocation93_spill] sm:$0xff] %v8220_v18  ;;  %10188 = vst [vmem:[#allocation94_spill] sm:$0xff] %v8223_v0  ;;  %v8229_v17 = vld [vmem:[#allocation10 + $0x248] sm:$0xff]  ;;  %v8232_v60 = vld [vmem:[#allocation10 + $0x258] sm:$0xff] }
 0x7a5   :  { %3146 = vmatprep.subr.mxu0 %v8217_v29  ;;  %3217 = vmatprep.subr.mxu1 %v8220_v18  ;;  %10189 = vst [vmem:[#allocation95_spill] sm:$0xff] %v8226_v6  ;;  %10190 = vst [vmem:[#allocation96_spill] sm:$0xff] %v8229_v17  ;;  %v8235_v29 = vld [vmem:[#allocation10 + $0x240] sm:$0xff]  ;;  %v8238_v18 = vld [vmem:[#allocation10 + $0x250] sm:$0xff] }
 0x7a6   :  { %3147 = vmatpush2.msra.mxu0 %v8223_v0  ;;  %3218 = vmatpush2.msra.mxu1 %v8226_v6  ;;  %10191 = vst [vmem:[#allocation98_spill] sm:$0xff] %v8232_v60  ;;  %10192 = vst [vmem:[#allocation99_spill] sm:$0xff] %v8235_v29  ;;  %v8241_v0 = vld [vmem:[#allocation10 + $0x228] sm:$0xff]  ;;  %v8244_v6 = vld [vmem:[#allocation10 + $0x238] sm:$0xff] }
 0x7a7   :  { %3148 = vmatprep.subr.mxu0 %v8229_v17  ;;  %3219 = vmatprep.subr.mxu1 %v8232_v60  ;;  %10193 = vst [vmem:[#allocation97_spill] sm:$0xff] %v8238_v18  ;;  %10194 = vst [vmem:[#allocation100_spill] sm:$0xff] %v8241_v0  ;;  %v8247_v17 = vld [vmem:[#allocation10 + $0x220] sm:$0xff]  ;;  %v8250_v60 = vld [vmem:[#allocation10 + $0x230] sm:$0xff] }
 0x7a8   :  { %3149 = vmatpush2.msra.mxu0 %v8235_v29  ;;  %3220 = vmatpush2.msra.mxu1 %v8238_v18  ;;  %10195 = vst [vmem:[#allocation101_spill] sm:$0xff] %v8244_v6  ;;  %10196 = vst [vmem:[#allocation102_spill] sm:$0xff] %v8247_v17  ;;  %v8253_v29 = vld [vmem:[#allocation10 + $0x208] sm:$0xff]  ;;  %v8256_v18 = vld [vmem:[#allocation10 + $0x218] sm:$0xff] }
 0x7a9   :  { %3150 = vmatprep.subr.mxu0 %v8241_v0  ;;  %3221 = vmatprep.subr.mxu1 %v8244_v6  ;;  %10197 = vst [vmem:[#allocation103_spill] sm:$0xff] %v8250_v60  ;;  %v8259_v0 = vld [vmem:[#allocation10 + $0x200] sm:$0xff]  ;;  %v8262_v6 = vld [vmem:[#allocation10 + $0x210] sm:$0xff] }
 0x7aa   :  { %3151 = vmatpush2.msra.mxu0 %v8247_v17  ;;  %3222 = vmatpush2.msra.mxu1 %v8250_v60  ;;  %v4087_v60 = vpop.eup %4086 }
 0x7ab   :  { %3152 = vmatprep.subr.mxu0 %v8253_v29  ;;  %3223 = vmatprep.subr.mxu1 %v8256_v18 }
 0x7ac   :  { %3153 = vmatpush2.msra.mxu0 %v8259_v0  ;;  %3224 = vmatpush2.msra.mxu1 %v8262_v6 }
 0x7ad   :  { %3256 = vmatprep.subr.mxu0 %v7861_v53  ;;  %3327 = vmatprep.subr.mxu1 %v7864_v13  ;;  %v10198_v53 = vld [vmem:[#allocation22_spill] sm:$0xff]  ;;  %v10199_v13 = vld [vmem:[#allocation29_spill] sm:$0xff] }
 0x7b0   :  { %v4089_v17 = vpop.eup %4088 }
 0x7b1   :  { %v8267_v28 = vmul.f32 %v4089_v17, %v4087_v60  ;;  %v10249_v17 = vld [vmem:[#allocation87_spill] sm:$0xff]  ;;  %v10251_v60 = vld [vmem:[#allocation89_spill] sm:$0xff] }
 0x7b3   :  { %3154 = vmatprep.mubr.f32.mxu0 %v8267_v28  ;;  %3225 = vmatprep.mubr.f32.mxu1 %v8267_v28 }
 0x7b4   :  { %3155 = vmatmul.mubr.f32.vlgmr.msra.gmra.mxu0 %v7875_v49  ;;  %3226 = vmatmul.mubr.f32.vlgmr.msra.gmra.mxu1 %v7875_v49  ;;  %v10200_v49 = vld [vmem:[#allocation31_spill] sm:$0xff] }
 0x7b5   :  { %3257 = vmatpush1.msra.mxu0 %v7879_v5  ;;  %3328 = vmatpush1.msra.mxu1 %v7882_v52  ;;  %v10201_v5 = vld [vmem:[#allocation32_spill] sm:$0xff]  ;;  %v10202_v52 = vld [vmem:[#allocation30_spill] sm:$0xff] }
 0x7b6   :  { %3258 = vmatprep.subr.mxu0 %v7885_v15  ;;  %3329 = vmatprep.subr.mxu1 %v7888_v19  ;;  %v10203_v15 = vld [vmem:[#allocation33_spill] sm:$0xff]  ;;  %v10204_v19 = vld [vmem:[#allocation35_spill] sm:$0xff] }
 0x7b7   :  { %3259 = vmatpush1.msra.mxu0 %v7891_v30  ;;  %3330 = vmatpush1.msra.mxu1 %v7894_v24  ;;  %v10205_v30 = vld [vmem:[#allocation36_spill] sm:$0xff]  ;;  %v10206_v24 = vld [vmem:[#allocation34_spill] sm:$0xff] }
 0x7b8   :  { %3260 = vmatprep.subr.mxu0 %v7897_v10  ;;  %3331 = vmatprep.subr.mxu1 %v7900_v11  ;;  %v10207_v10 = vld [vmem:[#allocation27_spill] sm:$0xff]  ;;  %v10208_v11 = vld [vmem:[#allocation28_spill] sm:$0xff] }
 0x7b9   :  { %3261 = vmatpush1.msra.mxu0 %v7903_v25  ;;  %3332 = vmatpush1.msra.mxu1 %v7906_v38  ;;  %v10209_v25 = vld [vmem:[#allocation26_spill] sm:$0xff]  ;;  %v10210_v38 = vld [vmem:[#allocation47_spill] sm:$0xff] }
 0x7ba   :  { %3262 = vmatprep.subr.mxu0 %v7909_v35  ;;  %3333 = vmatprep.subr.mxu1 %v7912_v41  ;;  %v10211_v35 = vld [vmem:[#allocation48_spill] sm:$0xff]  ;;  %v10212_v41 = vld [vmem:[#allocation49_spill] sm:$0xff] }
 0x7bb   :  { %3263 = vmatpush1.msra.mxu0 %v7915_v45  ;;  %3334 = vmatpush1.msra.mxu1 %v7918_v57  ;;  %v10213_v45 = vld [vmem:[#allocation50_spill] sm:$0xff]  ;;  %v10214_v57 = vld [vmem:[#allocation51_spill] sm:$0xff] }
 0x7bc   :  { %3264 = vmatprep.subr.mxu0 %v7921_v47  ;;  %3335 = vmatprep.subr.mxu1 %v7924_v44  ;;  %v10215_v47 = vld [vmem:[#allocation52_spill] sm:$0xff]  ;;  %v10216_v44 = vld [vmem:[#allocation53_spill] sm:$0xff] }
 0x7bd   :  { %3265 = vmatpush1.msra.mxu0 %v7927_v20  ;;  %3336 = vmatpush1.msra.mxu1 %v7930_v3  ;;  %v10217_v20 = vld [vmem:[#allocation54_spill] sm:$0xff]  ;;  %v10218_v3 = vld [vmem:[#allocation55_spill] sm:$0xff] }
 0x7be   :  { %3266 = vmatprep.subr.mxu0 %v7933_v12  ;;  %3337 = vmatprep.subr.mxu1 %v7936_v54  ;;  %v10219_v12 = vld [vmem:[#allocation56_spill] sm:$0xff]  ;;  %v10220_v54 = vld [vmem:[#allocation57_spill] sm:$0xff] }
 0x7bf   :  { %3267 = vmatpush1.msra.mxu0 %v7939_v7  ;;  %3338 = vmatpush1.msra.mxu1 %v7942_v31  ;;  %v10221_v7 = vld [vmem:[#allocation58_spill] sm:$0xff]  ;;  %v10222_v31 = vld [vmem:[#allocation59_spill] sm:$0xff] }
 0x7c0   :  { %3268 = vmatprep.subr.mxu0 %v7945_v50  ;;  %3339 = vmatprep.subr.mxu1 %v7948_v46  ;;  %v10223_v50 = vld [vmem:[#allocation60_spill] sm:$0xff]  ;;  %v10224_v46 = vld [vmem:[#allocation61_spill] sm:$0xff] }
 0x7c1   :  { %3269 = vmatpush1.msra.mxu0 %v7951_v33  ;;  %3340 = vmatpush1.msra.mxu1 %v7954_v14  ;;  %v10225_v33 = vld [vmem:[#allocation62_spill] sm:$0xff]  ;;  %v10226_v14 = vld [vmem:[#allocation63_spill] sm:$0xff] }
 0x7c2   :  { %3270 = vmatprep.subr.mxu0 %v7958_v39  ;;  %3341 = vmatprep.subr.mxu1 %v7961_v4  ;;  %v10227_v39 = vld [vmem:[#allocation64_spill] sm:$0xff]  ;;  %v10228_v4 = vld [vmem:[#allocation65_spill] sm:$0xff] }
 0x7c3   :  { %3271 = vmatpush1.msra.mxu0 %v7964_v9  ;;  %3342 = vmatpush1.msra.mxu1 %v7967_v42  ;;  %v10229_v9 = vld [vmem:[#allocation66_spill] sm:$0xff]  ;;  %v10230_v42 = vld [vmem:[#allocation67_spill] sm:$0xff] }
 0x7c4   :  { %3272 = vmatprep.subr.mxu0 %v7971_v51  ;;  %3343 = vmatprep.subr.mxu1 %v7974_v26  ;;  %v10231_v51 = vld [vmem:[#allocation68_spill] sm:$0xff]  ;;  %v10232_v26 = vld [vmem:[#allocation69_spill] sm:$0xff] }
 0x7c5   :  { %3273 = vmatpush1.msra.mxu0 %v7977_v21  ;;  %3344 = vmatpush1.msra.mxu1 %v7980_v37  ;;  %v10233_v21 = vld [vmem:[#allocation70_spill] sm:$0xff]  ;;  %v10234_v37 = vld [vmem:[#allocation71_spill] sm:$0xff] }
 0x7c6   :  { %3274 = vmatprep.subr.mxu0 %v7983_v48  ;;  %3345 = vmatprep.subr.mxu1 %v7986_v55  ;;  %v10235_v48 = vld [vmem:[#allocation72_spill] sm:$0xff]  ;;  %v10236_v55 = vld [vmem:[#allocation73_spill] sm:$0xff] }
 0x7c7   :  { %3275 = vmatpush1.msra.mxu0 %v7989_v32  ;;  %3346 = vmatpush1.msra.mxu1 %v7992_v59  ;;  %v10237_v32 = vld [vmem:[#allocation74_spill] sm:$0xff]  ;;  %v10238_v59 = vld [vmem:[#allocation75_spill] sm:$0xff] }
 0x7c8   :  { %3276 = vmatprep.subr.mxu0 %v7995_v40  ;;  %3347 = vmatprep.subr.mxu1 %v7998_v63  ;;  %v10239_v40 = vld [vmem:[#allocation76_spill] sm:$0xff]  ;;  %v10240_v63 = vld [vmem:[#allocation77_spill] sm:$0xff] }
 0x7c9   :  { %3277 = vmatpush1.msra.mxu0 %v8001_v56  ;;  %3348 = vmatpush1.msra.mxu1 %v8004_v61  ;;  %v10241_v56 = vld [vmem:[#allocation78_spill] sm:$0xff]  ;;  %v10242_v61 = vld [vmem:[#allocation79_spill] sm:$0xff] }
 0x7ca   :  { %3278 = vmatprep.subr.mxu0 %v8007_v2  ;;  %3349 = vmatprep.subr.mxu1 %v8010_v34  ;;  %v10243_v2 = vld [vmem:[#allocation80_spill] sm:$0xff]  ;;  %v10244_v34 = vld [vmem:[#allocation81_spill] sm:$0xff] }
 0x7cb   :  { %3279 = vmatpush1.msra.mxu0 %v8013_v27  ;;  %3350 = vmatpush1.msra.mxu1 %v8016_v23  ;;  %v10245_v27 = vld [vmem:[#allocation82_spill] sm:$0xff]  ;;  %v10246_v23 = vld [vmem:[#allocation83_spill] sm:$0xff] }
 0x7cc   :  { %3280 = vmatprep.subr.mxu0 %v8019_v8  ;;  %3351 = vmatprep.subr.mxu1 %v8022_v1  ;;  %v10247_v8 = vld [vmem:[#allocation84_spill] sm:$0xff]  ;;  %v10248_v1 = vld [vmem:[#allocation86_spill] sm:$0xff] }
 0x7cd   :  { %3281 = vmatpush1.msra.mxu0 %v10198_v53  ;;  %3352 = vmatpush1.msra.mxu1 %v10199_v13  ;;  %v10252_v53 = vld [vmem:[#allocation90_spill] sm:$0xff] }
 0x7ce   :  { %3282 = vmatprep.subr.mxu0 %v10200_v49  ;;  %3353 = vmatprep.subr.mxu1 %v10201_v5  ;;  %v10256_v13 = vld [vmem:[#allocation94_spill] sm:$0xff]  ;;  %v10260_v5 = vld [vmem:[#allocation99_spill] sm:$0xff] }
 0x7cf   :  { %3283 = vmatpush1.msra.mxu0 %v10202_v52  ;;  %3354 = vmatpush1.msra.mxu1 %v10203_v15  ;;  %v10259_v49 = vld [vmem:[#allocation98_spill] sm:$0xff]  ;;  %v10261_v52 = vld [vmem:[#allocation97_spill] sm:$0xff]  ;;  %v10262_v15 = vld [vmem:[#allocation100_spill] sm:$0xff] }
 0x7d0   :  { %3284 = vmatprep.subr.mxu0 %v10204_v19  ;;  %3355 = vmatprep.subr.mxu1 %v10205_v30  ;;  %v10263_v19 = vld [vmem:[#allocation101_spill] sm:$0xff]  ;;  %v10264_v30 = vld [vmem:[#allocation102_spill] sm:$0xff] }
 0x7d1   :  { %3285 = vmatpush1.msra.mxu0 %v10206_v24  ;;  %3356 = vmatpush1.msra.mxu1 %v10207_v10  ;;  %v10265_v24 = vld [vmem:[#allocation103_spill] sm:$0xff] }
 0x7d2   :  { %3286 = vmatprep.subr.mxu0 %v10208_v11  ;;  %3357 = vmatprep.subr.mxu1 %v10209_v25  ;;  %v3489_v11 = vld [vmem:[#allocation12 + $0x1e8] sm:$0xff]  ;;  %v3491_v25 = vld [vmem:[#allocation12 + $0x1f8] sm:$0xff] }
 0x7d3   :  { %3287 = vmatpush1.msra.mxu0 %v10210_v38  ;;  %3358 = vmatpush1.msra.mxu1 %v10211_v35  ;;  %v10266_v38 = vld [vmem:[#allocation41_spill] sm:$0xff] }
 0x7d4   :  { %3288 = vmatprep.subr.mxu0 %v10212_v41  ;;  %3359 = vmatprep.subr.mxu1 %v10213_v45 }
 0x7d5   :  { %3289 = vmatpush2.msra.mxu0 %v10214_v57  ;;  %3360 = vmatpush2.msra.mxu1 %v10215_v47  ;;  %v10267_v57 = vld [vmem:[#allocation43_spill] sm:$0xff] }
 0x7d6   :  { %3290 = vmatprep.subr.mxu0 %v10216_v44  ;;  %3361 = vmatprep.subr.mxu1 %v10217_v20  ;;  %v10268_v20 = vld [vmem:[#allocation44_spill] sm:$0xff] }
 0x7d7   :  { %3291 = vmatpush2.msra.mxu0 %v10218_v3  ;;  %3362 = vmatpush2.msra.mxu1 %v10219_v12  ;;  %v10269_v3 = vld [vmem:[#allocation42_spill] sm:$0xff] }
 0x7d8   :  { %3292 = vmatprep.subr.mxu0 %v10220_v54  ;;  %3363 = vmatprep.subr.mxu1 %v10221_v7 }
 0x7d9   :  { %3293 = vmatpush2.msra.mxu0 %v10222_v31  ;;  %3364 = vmatpush2.msra.mxu1 %v10223_v50 }
 0x7da   :  { %3294 = vmatprep.subr.mxu0 %v10224_v46  ;;  %3365 = vmatprep.subr.mxu1 %v10225_v33 }
 0x7db   :  { %3295 = vmatpush2.msra.mxu0 %v10226_v14  ;;  %3366 = vmatpush2.msra.mxu1 %v10227_v39 }
 0x7dc   :  { %3296 = vmatprep.subr.mxu0 %v10228_v4  ;;  %3367 = vmatprep.subr.mxu1 %v10229_v9 }
 0x7dd   :  { %3297 = vmatpush2.msra.mxu0 %v10230_v42  ;;  %3368 = vmatpush2.msra.mxu1 %v10231_v51  ;;  %v10270_v42 = vld [vmem:[#allocation24_spill] sm:$0xff] }
 0x7de   :  { %3298 = vmatprep.subr.mxu0 %v10232_v26  ;;  %3369 = vmatprep.subr.mxu1 %v10233_v21 }
 0x7df   :  { %3299 = vmatpush2.msra.mxu0 %v10234_v37  ;;  %3370 = vmatpush2.msra.mxu1 %v10235_v48 }
 0x7e0   :  { %3300 = vmatprep.subr.mxu0 %v10236_v55  ;;  %3371 = vmatprep.subr.mxu1 %v10237_v32  ;;  %v10271_v32 = vld [vmem:[#allocation193_spill] sm:$0xff] }
 0x7e1   :  { %3301 = vmatpush2.msra.mxu0 %v10238_v59  ;;  %3372 = vmatpush2.msra.mxu1 %v10239_v40 }
 0x7e2   :  { %3302 = vmatprep.subr.mxu0 %v10240_v63  ;;  %3373 = vmatprep.subr.mxu1 %v10241_v56  ;;  %v10272_v56 = vld [vmem:[#allocation194_spill] sm:$0xff] }
 0x7e3   :  { %3303 = vmatpush2.msra.mxu0 %v10242_v61  ;;  %3374 = vmatpush2.msra.mxu1 %v10243_v2 }
 0x7e4   :  { %3304 = vmatprep.subr.mxu0 %v10244_v34  ;;  %3375 = vmatprep.subr.mxu1 %v8168_v22  ;;  %v10250_v22 = vld [vmem:[#allocation88_spill] sm:$0xff] }
 0x7e5   :  { %3305 = vmatpush2.msra.mxu0 %v10245_v27  ;;  %3376 = vmatpush2.msra.mxu1 %v10246_v23  ;;  %v10273_v23 = vld [vmem:[#allocation195_spill] sm:$0xff] }
 0x7e6   :  { %3306 = vmatprep.subr.mxu0 %v8178_v58  ;;  %3377 = vmatprep.subr.mxu1 %v8181_v62  ;;  %v10253_v58 = vld [vmem:[#allocation91_spill] sm:$0xff]  ;;  %v10254_v62 = vld [vmem:[#allocation92_spill] sm:$0xff] }
 0x7e7   :  { %3307 = vmatpush2.msra.mxu0 %v8184_v16  ;;  %3378 = vmatpush2.msra.mxu1 %v10247_v8  ;;  %v10255_v16 = vld [vmem:[#allocation93_spill] sm:$0xff] }
 0x7e8   :  { %3308 = vmatprep.subr.mxu0 %v8192_v43  ;;  %3379 = vmatprep.subr.mxu1 %v8195_v36  ;;  %v10257_v43 = vld [vmem:[#allocation95_spill] sm:$0xff]  ;;  %v10258_v36 = vld [vmem:[#allocation96_spill] sm:$0xff] }
 0x7e9   :  { %3309 = vmatpush2.msra.mxu0 %v10248_v1  ;;  %3380 = vmatpush2.msra.mxu1 %v10249_v17 }
 0x7ea   :  { %3310 = vmatprep.subr.mxu0 %v10250_v22  ;;  %3381 = vmatprep.subr.mxu1 %v10251_v60  ;;  %v10274_v22 = vld [vmem:[#allocation45_spill] sm:$0xff] }
 0x7eb   :  { %3311 = vmatpush2.msra.mxu0 %v10252_v53  ;;  %3382 = vmatpush2.msra.mxu1 %v10253_v58 }
 0x7ec   :  { %3312 = vmatprep.subr.mxu0 %v10254_v62  ;;  %3383 = vmatprep.subr.mxu1 %v10255_v16 }
 0x7ed   :  { %3313 = vmatpush2.msra.mxu0 %v10256_v13  ;;  %3384 = vmatpush2.msra.mxu1 %v10257_v43 }
 0x7ee   :  { %3314 = vmatprep.subr.mxu0 %v10258_v36  ;;  %3385 = vmatprep.subr.mxu1 %v10259_v49 }
 0x7ef   :  { %3315 = vmatpush2.msra.mxu0 %v10260_v5  ;;  %3386 = vmatpush2.msra.mxu1 %v10261_v52  ;;  %v10275_v52 = vld [vmem:[#allocation85_spill] sm:$0xff] }
 0x7f0   :  { %3316 = vmatprep.subr.mxu0 %v10262_v15  ;;  %3387 = vmatprep.subr.mxu1 %v10263_v19 }
 0x7f1   :  { %3317 = vmatpush2.msra.mxu0 %v10264_v30  ;;  %3388 = vmatpush2.msra.mxu1 %v10265_v24 }
 0x7f2   :  { %3318 = vmatprep.subr.mxu0 %v8253_v29  ;;  %3389 = vmatprep.subr.mxu1 %v8256_v18 }
 0x7f3   :  { %3319 = vmatpush2.msra.mxu0 %v8259_v0  ;;  %3390 = vmatpush2.msra.mxu1 %v8262_v6 }
 0x7f4   :  { %3514 = vmatprep.subr.mxu0 %v3489_v11  ;;  %3627 = vmatprep.subr.mxu1 %v3491_v25  ;;  %v3488_v11 = vld [vmem:[#allocation12 + $0x1e0] sm:$0xff]  ;;  %v3490_v25 = vld [vmem:[#allocation12 + $0x1f0] sm:$0xff] }
 0x82d   :  { %v2986_v10 = vpop.f32.mrf.mxu0  ;;  %v3057_v44 = vpop.f32.mrf.mxu1 }
 0x82e   :  { %v3062_v35 = vadd.f32 %v2986_v10, %v10266_v38  ;;  %v3064_v6 = vadd.f32 %v3057_v44, %v10269_v3  ;;  %v3485_v38 = vld [vmem:[#allocation12 + $0x1c8] sm:$0xff]  ;;  %v3480_v44 = vld [vmem:[#allocation12 + $0x1a0] sm:$0xff]  ;;  %v3478_v3 = vld [vmem:[#allocation12 + $0x190] sm:$0xff] }
 0x82f   :  { %v2988_v41 = vpop.f32.mrf.mxu0  ;;  %v3059_v18 = vpop.f32.mrf.mxu1 }
 0x830   :  { %v3860_v45 = vmul.f32 -1.442695, %v3062_v35  ;;  %v3063_v47 = vadd.f32 %v2988_v41, %v10267_v57  ;;  %v3065_v0 = vadd.f32 %v3059_v18, %v10268_v20  ;;  %v3487_v35 = vld [vmem:[#allocation12 + $0x1d8] sm:$0xff]  ;;  %v3484_v41 = vld [vmem:[#allocation12 + $0x1c0] sm:$0xff]  ;;  %v3481_v57 = vld [vmem:[#allocation12 + $0x1a8] sm:$0xff] }
 0x831   :  { %v3477_v18 = vld [vmem:[#allocation12 + $0x188] sm:$0xff]  ;;  %v3479_v20 = vld [vmem:[#allocation12 + $0x198] sm:$0xff] }
 0x832   :  { %4090 = vpow2.f32 %v3860_v45  ;;  %v3861_v29 = vmul.f32 -1.442695, %v3063_v47  ;;  %v3862_v12 = vmul.f32 -1.442695, %v3065_v0  ;;  %v3486_v45 = vld [vmem:[#allocation12 + $0x1d0] sm:$0xff]  ;;  %v3483_v47 = vld [vmem:[#allocation12 + $0x1b8] sm:$0xff] }
 0x833   :  { %v3476_v0 = vld [vmem:[#allocation12 + $0x180] sm:$0xff] }
 0x834   :  { %4092 = vpow2.f32 %v3861_v29  ;;  %v3482_v29 = vld [vmem:[#allocation12 + $0x1b0] sm:$0xff] }
 0x835   :  { %4094 = vtanh.f32 %v3064_v6  ;;  %v3473_v6 = vld [vmem:[#allocation12 + $0x168] sm:$0xff] }
 0x836   :  { %4096 = vpow2.f32 %v3862_v12  ;;  %v3475_v12 = vld [vmem:[#allocation12 + $0x178] sm:$0xff] }
 0x83f   :  { %v4091_v54 = vpop.eup %4090 }
 0x840   :  { %v3072_v7 = vadd.f32 1.0, %v4091_v54  ;;  %v3472_v54 = vld [vmem:[#allocation12 + $0x160] sm:$0xff] }
 0x841   :  { %v4093_v31 = vpop.eup %4092 }
 0x842   :  { %4098 = vrcp.f32 %v3072_v7  ;;  %v3073_v50 = vadd.f32 1.0, %v4093_v31  ;;  %v4095_v46 = vpop.eup %4094  ;;  %v3474_v7 = vld [vmem:[#allocation12 + $0x170] sm:$0xff]  ;;  %v3469_v31 = vld [vmem:[#allocation12 + $0x148] sm:$0xff] }
 0x843   :  { %v4097_v33 = vpop.eup %4096 }
 0x844   :  { %4100 = vrcp.f32 %v3073_v50  ;;  %v3082_v9 = vadd.f32 1.0, %v4097_v33  ;;  %v3471_v50 = vld [vmem:[#allocation12 + $0x158] sm:$0xff]  ;;  %v3470_v33 = vld [vmem:[#allocation12 + $0x150] sm:$0xff] }
 0x846   :  { %4102 = vrcp.f32 %v3082_v9  ;;  %v3466_v9 = vld [vmem:[#allocation12 + $0x130] sm:$0xff] }
 0x84f   :  { %v4099_v14 = vpop.eup %4098 }
 0x850   :  { %v3086_v39 = vmul.f32 %v4099_v14, %v4095_v46  ;;  %v3468_v46 = vld [vmem:[#allocation12 + $0x140] sm:$0xff]  ;;  %v3465_v14 = vld [vmem:[#allocation12 + $0x128] sm:$0xff] }
 0x851   :  { %v4101_v4 = vpop.eup %4100 }
 0x852   :  { %v3085_v51 = vmul.f32 %v4101_v4, %v10270_v42  ;;  %v3464_v4 = vld [vmem:[#allocation12 + $0x120] sm:$0xff]  ;;  %v3461_v42 = vld [vmem:[#allocation12 + $0x108] sm:$0xff] }
 0x853   :  { %v4103_v21 = vpop.eup %4102 }
 0x854   :  { %v3087_v26 = vadd.f32 %v3086_v39, %v3085_v51  ;;  %v3467_v39 = vld [vmem:[#allocation12 + $0x138] sm:$0xff] }
 0x855   :  { %v3463_v51 = vld [vmem:[#allocation12 + $0x118] sm:$0xff] }
 0x856   :  { %3425 = vst [vmem:[%s8619_s13] sm:$0xff] %v3087_v26  ;;  %4104 = vtanh.f32 %v3087_v26  ;;  %v3460_v26 = vld [vmem:[#allocation12 + $0x100] sm:$0xff] }
 0x863   :  { %v4105_v37 = vpop.eup %4104 }
 0x864   :  { %v3089_v48 = vmul.f32 %v4105_v37, %v4103_v21  ;;  %v3462_v21 = vld [vmem:[#allocation12 + $0x110] sm:$0xff]  ;;  %v3457_v37 = vld [vmem:[#allocation12 + $0xe8] sm:$0xff] }
 0x866   :  { %3422 = vst [vmem:[%s8618_s12] sm:$0xff] %v3089_v48 }
 0x874   :  { %v3156_v55 = vpop.f32.mrf.mxu0  ;;  %v3227_v2 = vpop.f32.mrf.mxu1 }
 0x875   :  { %v3157_v59 = vadd.f32 %v3156_v55, %v10271_v32  ;;  %v3228_v60 = vadd.f32 %v3227_v2, %v10274_v22  ;;  %v3456_v55 = vld [vmem:[#allocation12 + $0xe0] sm:$0xff]  ;;  %v3454_v2 = vld [vmem:[#allocation12 + $0xd0] sm:$0xff] }
 0x876   :  { %v3158_v40 = vpop.f32.mrf.mxu0  ;;  %v3229_v27 = vpop.f32.mrf.mxu1 }
 0x877   :  { %v3863_v63 = vmul.f32 -1.442695, %v3157_v59  ;;  %v3159_v61 = vadd.f32 %v3158_v40, %v10272_v56  ;;  %v3230_v8 = vadd.f32 %v3229_v27, %v10273_v23  ;;  %v3458_v59 = vld [vmem:[#allocation12 + $0xf0] sm:$0xff]  ;;  %v3453_v40 = vld [vmem:[#allocation12 + $0xc8] sm:$0xff]  ;;  %v3451_v27 = vld [vmem:[#allocation12 + $0xb8] sm:$0xff] }
 0x879   :  { %4106 = vpow2.f32 %v3863_v63  ;;  %v3864_v34 = vmul.f32 -1.442695, %v3159_v61  ;;  %v3865_v1 = vmul.f32 -1.442695, %v3230_v8  ;;  %v3455_v63 = vld [vmem:[#allocation12 + $0xd8] sm:$0xff]  ;;  %v3452_v61 = vld [vmem:[#allocation12 + $0xc0] sm:$0xff] }
 0x87a   :  { %v3448_v8 = vld [vmem:[#allocation12 + $0xa0] sm:$0xff] }
 0x87b   :  { %4108 = vpow2.f32 %v3864_v34  ;;  %v3449_v34 = vld [vmem:[#allocation12 + $0xa8] sm:$0xff] }
 0x87c   :  { %4110 = vpow2.f32 %v3865_v1  ;;  %v3450_v1 = vld [vmem:[#allocation12 + $0xb0] sm:$0xff] }
 0x886   :  { %v4107_v17 = vpop.eup %4106 }
 0x887   :  { %v3238_v53 = vadd.f32 1.0, %v4107_v17  ;;  %v3445_v17 = vld [vmem:[#allocation12 + $0x88] sm:$0xff] }
 0x888   :  { %v4109_v58 = vpop.eup %4108 }
 0x889   :  { %4112 = vrcp.f32 %v3238_v53  ;;  %v3239_v62 = vadd.f32 1.0, %v4109_v58  ;;  %v4111_v16 = vpop.eup %4110  ;;  %v3444_v53 = vld [vmem:[#allocation12 + $0x80] sm:$0xff]  ;;  %v3446_v58 = vld [vmem:[#allocation12 + $0x90] sm:$0xff] }
 0x88a   :  { %4114 = vtanh.f32 %v3228_v60  ;;  %v3248_v49 = vadd.f32 1.0, %v4111_v16  ;;  %v3447_v60 = vld [vmem:[#allocation12 + $0x98] sm:$0xff] }
 0x88b   :  { %4116 = vrcp.f32 %v3239_v62  ;;  %v3441_v62 = vld [vmem:[#allocation12 + $0x68] sm:$0xff]  ;;  %v3443_v16 = vld [vmem:[#allocation12 + $0x78] sm:$0xff] }
 0x88c   :  { %4118 = vrcp.f32 %v3248_v49  ;;  %v3439_v49 = vld [vmem:[#allocation12 + $0x58] sm:$0xff] }
 0x896   :  { %v4113_v13 = vpop.eup %4112 }
 0x897   :  { %v4115_v43 = vpop.eup %4114 }
 0x898   :  { %v4117_v36 = vpop.eup %4116  ;;  %v3252_v5 = vmul.f32 %v4115_v43, %v4113_v13  ;;  %v3440_v13 = vld [vmem:[#allocation12 + $0x60] sm:$0xff]  ;;  %v3442_v43 = vld [vmem:[#allocation12 + $0x70] sm:$0xff] }
 0x899   :  { %v3251_v15 = vmul.f32 %v4117_v36, %v10275_v52  ;;  %v4119_v30 = vpop.eup %4118  ;;  %v3437_v36 = vld [vmem:[#allocation12 + $0x48] sm:$0xff]  ;;  %v3438_v52 = vld [vmem:[#allocation12 + $0x50] sm:$0xff] }
 0x89b   :  { %v8415_v19 = vadd.f32 %v3252_v5, %v3251_v15  ;;  %v3436_v5 = vld [vmem:[#allocation12 + $0x40] sm:$0xff]  ;;  %v3433_v15 = vld [vmem:[#allocation12 + $0x28] sm:$0xff] }
 0x89d   :  { %4120 = vtanh.f32 %v8415_v19 }
 0x8aa   :  { %v4121_v24 = vpop.eup %4120 }
 0x8ab   :  { %v8418_v10 = vmul.f32 %v4121_v24, %v4119_v30  ;;  %v3435_v30 = vld [vmem:[#allocation12 + $0x38] sm:$0xff]  ;;  %v3432_v24 = vld [vmem:[#allocation12 + $0x20] sm:$0xff] }
 0x8ad   :  { %3320 = vmatprep.mubr.f32.mxu0 %v8418_v10  ;;  %3391 = vmatprep.mubr.f32.mxu1 %v8418_v10 }
 0x8ae   :  { %3321 = vmatmul.mubr.f32.vlgmr.msra.gmra.mxu0 %v3089_v48  ;;  %3392 = vmatmul.mubr.f32.vlgmr.msra.gmra.mxu1 %v3089_v48  ;;  %v3459_v48 = vld [vmem:[#allocation12 + $0xf8] sm:$0xff] }
 0x8af   :  { %3515 = vmatpush1.msra.mxu0 %v3488_v11  ;;  %3628 = vmatpush1.msra.mxu1 %v3490_v25  ;;  %v3434_v11 = vld [vmem:[#allocation12 + $0x30] sm:$0xff]  ;;  %v3429_v25 = vld [vmem:[#allocation12 + $0x8] sm:$0xff] }
 0x8b0   :  { %3516 = vmatprep.subr.mxu0 %v3485_v38  ;;  %3629 = vmatprep.subr.mxu1 %v3487_v35  ;;  %v3431_v38 = vld [vmem:[#allocation12 + $0x18] sm:$0xff]  ;;  %v3428_v35 = vld [vmem:[#allocation12] sm:$0xff] }
 0x8b1   :  { %3517 = vmatpush1.msra.mxu0 %v3484_v41  ;;  %3630 = vmatpush1.msra.mxu1 %v3486_v45  ;;  %v3430_v41 = vld [vmem:[#allocation12 + $0x10] sm:$0xff]  ;;  %v10276_v45 = vmov 0.0  }
 0x8b2   :  { %3518 = vmatprep.subr.mxu0 %v3481_v57  ;;  %3631 = vmatprep.subr.mxu1 %v3483_v47  ;;  %v10277_v57 = vld [vmem:[#allocation46_spill] sm:$0xff]  ;;  %v10278_v47 = vld [vmem:[#allocation132_spill] sm:$0xff] }
 0x8b3   :  { %3519 = vmatpush1.msra.mxu0 %v3480_v44  ;;  %3632 = vmatpush1.msra.mxu1 %v3482_v29  ;;  %v10279_v44 = vld [vmem:[#allocation25_spill] sm:$0xff]  ;;  %v10280_v29 = vld [vmem:[#allocation130_spill] sm:$0xff] }
 0x8b4   :  { %3520 = vmatprep.subr.mxu0 %v3477_v18  ;;  %3633 = vmatprep.subr.mxu1 %v3479_v20  ;;  %v10281_v18 = vld [vmem:[#allocation23_spill] sm:$0xff] }
 0x8b5   :  { %3521 = vmatpush1.msra.mxu0 %v3476_v0  ;;  %3634 = vmatpush1.msra.mxu1 %v3478_v3 }
 0x8b6   :  { %3522 = vmatprep.subr.mxu0 %v3473_v6  ;;  %3635 = vmatprep.subr.mxu1 %v3475_v12 }
 0x8b7   :  { %3523 = vmatpush1.msra.mxu0 %v3472_v54  ;;  %3636 = vmatpush1.msra.mxu1 %v3474_v7 }
 0x8b8   :  { %3524 = vmatprep.subr.mxu0 %v3469_v31  ;;  %3637 = vmatprep.subr.mxu1 %v3471_v50 }
 0x8b9   :  { %3525 = vmatpush1.msra.mxu0 %v3468_v46  ;;  %3638 = vmatpush1.msra.mxu1 %v3470_v33 }
 0x8ba   :  { %3526 = vmatprep.subr.mxu0 %v3465_v14  ;;  %3639 = vmatprep.subr.mxu1 %v3467_v39  ;;  %v10282_v39 = vld [vmem:[#allocation17_spill] sm:$0xff] }
 0x8bb   :  { %3527 = vmatpush1.msra.mxu0 %v3464_v4  ;;  %3640 = vmatpush1.msra.mxu1 %v3466_v9  ;;  %v10283_v9 = vld [vmem:[#allocation18_spill] sm:$0xff] }
 0x8bc   :  { %3528 = vmatprep.subr.mxu0 %v3461_v42  ;;  %3641 = vmatprep.subr.mxu1 %v3463_v51  ;;  %v10284_v42 = vld [vmem:[#allocation19_spill] sm:$0xff] }
 0x8bd   :  { %3529 = vmatpush1.msra.mxu0 %v3460_v26  ;;  %3642 = vmatpush1.msra.mxu1 %v3462_v21 }
 0x8be   :  { %3530 = vmatprep.subr.mxu0 %v3457_v37  ;;  %3643 = vmatprep.subr.mxu1 %v3459_v48 }
 0x8bf   :  { %3531 = vmatpush1.msra.mxu0 %v3456_v55  ;;  %3644 = vmatpush1.msra.mxu1 %v3458_v59 }
 0x8c0   :  { %3532 = vmatprep.subr.mxu0 %v3453_v40  ;;  %3645 = vmatprep.subr.mxu1 %v3455_v63 }
 0x8c1   :  { %3533 = vmatpush1.msra.mxu0 %v3452_v61  ;;  %3646 = vmatpush1.msra.mxu1 %v3454_v2 }
 0x8c2   :  { %3534 = vmatprep.subr.mxu0 %v3449_v34  ;;  %3647 = vmatprep.subr.mxu1 %v3451_v27 }
 0x8c3   :  { %3535 = vmatpush1.msra.mxu0 %v3448_v8  ;;  %3648 = vmatpush1.msra.mxu1 %v3450_v1 }
 0x8c4   :  { %3536 = vmatprep.subr.mxu0 %v3445_v17  ;;  %3649 = vmatprep.subr.mxu1 %v3447_v60 }
 0x8c5   :  { %3537 = vmatpush1.msra.mxu0 %v3444_v53  ;;  %3650 = vmatpush1.msra.mxu1 %v3446_v58 }
 0x8c6   :  { %3538 = vmatprep.subr.mxu0 %v3441_v62  ;;  %3651 = vmatprep.subr.mxu1 %v3443_v16 }
 0x8c7   :  { %3539 = vmatpush1.msra.mxu0 %v3440_v13  ;;  %3652 = vmatpush1.msra.mxu1 %v3442_v43 }
 0x8c8   :  { %3540 = vmatprep.subr.mxu0 %v3437_v36  ;;  %3653 = vmatprep.subr.mxu1 %v3439_v49 }
 0x8c9   :  { %3541 = vmatpush1.msra.mxu0 %v3436_v5  ;;  %3654 = vmatpush1.msra.mxu1 %v3438_v52 }
 0x8ca   :  { %3542 = vmatprep.subr.mxu0 %v3433_v15  ;;  %3655 = vmatprep.subr.mxu1 %v3435_v30 }
 0x8cb   :  { %3543 = vmatpush1.msra.mxu0 %v3432_v24  ;;  %3656 = vmatpush1.msra.mxu1 %v3434_v11 }
 0x8cc   :  { %3544 = vmatprep.subr.mxu0 %v3429_v25  ;;  %3657 = vmatprep.subr.mxu1 %v3431_v38 }
 0x8cd   :  { %3545 = vmatpush1.msra.mxu0 %v3428_v35  ;;  %3578 = vmatprep.mubr.f32.mxu0 %v10276_v45 }
 0x8ce   :  { %3658 = vmatpush1.msra.mxu1 %v3430_v41  ;;  %3691 = vmatprep.mubr.f32.mxu1 %v10276_v45 }
 0x8cf   :  { %3579 = vmatmul.mubr.f32.vlgmr.msra.gmra.mxu0 %v10277_v57  ;;  %3692 = vmatmul.mubr.f32.vlgmr.msra.gmra.mxu1 %v10277_v57 }
 0x8d0   :  { %3584 = vmatprep.mubr.f32.mxu0 %v10276_v45  ;;  %3697 = vmatprep.mubr.f32.mxu1 %v10276_v45 }
 0x8d3   :  { %3585 = vmatmul.mubr.f32.gmra.mxu0 %v10278_v47  ;;  %3698 = vmatmul.mubr.f32.gmra.mxu1 %v10278_v47 }
 0x8d4   :  { %3590 = vmatprep.mubr.f32.mxu0 %v10276_v45  ;;  %3703 = vmatprep.mubr.f32.mxu1 %v10276_v45 }
 0x8d7   :  { %3591 = vmatmul.mubr.f32.gmra.mxu0 %v10279_v44  ;;  %3704 = vmatmul.mubr.f32.gmra.mxu1 %v10279_v44 }
 0x8d8   :  { %3596 = vmatprep.mubr.f32.mxu0 %v10276_v45  ;;  %3709 = vmatprep.mubr.f32.mxu1 %v10276_v45 }
 0x8db   :  { %3597 = vmatmul.mubr.f32.gmra.mxu0 %v10280_v29  ;;  %3710 = vmatmul.mubr.f32.gmra.mxu1 %v10280_v29 }
 0x8dc   :  { %3602 = vmatprep.mubr.f32.mxu0 %v10276_v45  ;;  %3715 = vmatprep.mubr.f32.mxu1 %v10276_v45 }
 0x8df   :  { %3603 = vmatmul.mubr.f32.gmra.mxu0 %v10281_v18  ;;  %3716 = vmatmul.mubr.f32.gmra.mxu1 %v10281_v18 }
 0x8e0   :  { %3608 = vmatprep.mubr.f32.mxu0 %v10276_v45  ;;  %3721 = vmatprep.mubr.f32.mxu1 %v10276_v45 }
 0x8e3   :  { %3609 = vmatmul.mubr.f32.gmra.mxu0 %v8267_v28  ;;  %3722 = vmatmul.mubr.f32.gmra.mxu1 %v8267_v28 }
 0x8e4   :  { %3614 = vmatprep.mubr.f32.mxu0 %v10276_v45  ;;  %3727 = vmatprep.mubr.f32.mxu1 %v10276_v45 }
 0x8e7   :  { %3615 = vmatmul.mubr.f32.gmra.mxu0 %v8418_v10  ;;  %3728 = vmatmul.mubr.f32.gmra.mxu1 %v8418_v10 }
 0x8e8   :  { %3620 = vmatprep.mubr.f32.mxu0 %v10276_v45  ;;  %3733 = vmatprep.mubr.f32.mxu1 %v10276_v45 }
 0x96e   :  { %v3322_v20 = vpop.f32.mrf.mxu0  ;;  %v3393_v28 = vpop.f32.mrf.mxu1 }
 0x96f   :  { %v3323_v0 = vadd.f32 %v3322_v20, %v10271_v32  ;;  %v3394_v46 = vadd.f32 %v3393_v28, %v10274_v22  ;;  %v10285_v22 = vld [vmem:[#allocation20_spill] sm:$0xff] }
 0x970   :  { %v3324_v3 = vpop.f32.mrf.mxu0  ;;  %v3395_v7 = vpop.f32.mrf.mxu1 }
 0x971   :  { %v3866_v6 = vmul.f32 -1.442695, %v3323_v0  ;;  %v3325_v12 = vadd.f32 %v3324_v3, %v10272_v56  ;;  %v3396_v31 = vadd.f32 %v3395_v7, %v10273_v23  ;;  %v3492_v56 = vld [vmem:[%s8616_s10] sm:$0xf] }
 0x972   :  { %v8460_v4 = vrot.slane %v3492_v56, %v10282_v39  ;;  %v8463_v23 = vrot.slane %v3492_v56, %v10283_v9  ;;  %v8466_v51 = vrot.slane %v3492_v56, %v10284_v42  ;;  %v8469_v26 = vrot.slane %v3492_v56, %v10285_v22 }
 0x973   :  { %4122 = vpow2.f32 %v3866_v6  ;;  %v3867_v54 = vmul.f32 -1.442695, %v3325_v12  ;;  %v3868_v50 = vmul.f32 -1.442695, %v3396_v31 }
 0x975   :  { %4124 = vpow2.f32 %v3867_v54 }
 0x976   :  { %4126 = vpow2.f32 %v3868_v50 }
 0x980   :  { %v4123_v10 = vpop.eup %4122 }
 0x981   :  { %v3404_v33 = vadd.f32 1.0, %v4123_v10 }
 0x982   :  { %v4125_v14 = vpop.eup %4124 }
 0x983   :  { %4128 = vrcp.f32 %v3404_v33  ;;  %v3405_v32 = vadd.f32 1.0, %v4125_v14  ;;  %v4127_v21 = vpop.eup %4126 }
 0x984   :  { %4130 = vtanh.f32 %v3394_v46  ;;  %v3414_v27 = vadd.f32 1.0, %v4127_v21 }
 0x985   :  { %4132 = vrcp.f32 %v3405_v32 }
 0x986   :  { %4134 = vrcp.f32 %v3414_v27 }
 0x98f   :  { %v3580_v37 = vpop.f32.mrf.mxu0  ;;  %v3693_v48 = vpop.f32.mrf.mxu1 }
 0x990   :  { %v4129_v55 = vpop.eup %4128  ;;  %v3581_v59 = vadd.f32 %v3580_v37, %v8460_v4  ;;  %v3694_v40 = vadd.f32 %v3693_v48, %v8463_v23 }
 0x991   :  { %v4131_v63 = vpop.eup %4130  ;;  %v3582_v61 = vpop.f32.mrf.mxu0 }
 0x992   :  { %v3695_v2 = vpop.f32.mrf.mxu1  ;;  %v4133_v34 = vpop.eup %4132  ;;  %3740 = vst [vmem:[%s8617_s11] sm:$0xff] %v3581_v59  ;;  %3742 = vst [vmem:[%s8617_s11 + $0x10] sm:$0xff] %v3694_v40  ;;  %v3583_v8 = vadd.f32 %v3582_v61, %v8466_v51  ;;  %v3418_v17 = vmul.f32 %v4131_v63, %v4129_v55 }
 0x993   :  { %v3696_v1 = vadd.f32 %v3695_v2, %v8469_v26  ;;  %v3417_v60 = vmul.f32 %v4133_v34, %v8415_v19  ;;  %v3586_v53 = vpop.f32.mrf.mxu0  ;;  %v4135_v31 = vpop.eup %4134 }
 0x994   :  { %v3699_v58 = vpop.f32.mrf.mxu1  ;;  %3741 = vst [vmem:[%s8617_s11 + $0x8] sm:$0xff] %v3583_v8  ;;  %v3587_v62 = vadd.f32 %v3586_v53, %v8460_v4 }
 0x995   :  { %3743 = vst [vmem:[%s8617_s11 + $0x18] sm:$0xff] %v3696_v1  ;;  %v3700_v16 = vadd.f32 %v3699_v58, %v8463_v23  ;;  %v3588_v13 = vpop.f32.mrf.mxu0  ;;  %v3419_v36 = vadd.f32 %v3418_v17, %v3417_v60 }
 0x996   :  { %v3701_v43 = vpop.f32.mrf.mxu1  ;;  %3744 = vst [vmem:[%s8617_s11 + $0x20] sm:$0xff] %v3587_v62  ;;  %v3589_v19 = vadd.f32 %v3588_v13, %v8466_v51 }
 0x997   :  { %3746 = vst [vmem:[%s8617_s11 + $0x30] sm:$0xff] %v3700_v16  ;;  %v3702_v49 = vadd.f32 %v3701_v43, %v8469_v26  ;;  %v3592_v5 = vpop.f32.mrf.mxu0  ;;  %4136 = vtanh.f32 %v3419_v36  ;;  %3870 = vst [vmem:[%s8619_s13 + $0x8] sm:$0xff] %v3419_v36 }
 0x998   :  { %v3705_v52 = vpop.f32.mrf.mxu1  ;;  %3745 = vst [vmem:[%s8617_s11 + $0x28] sm:$0xff] %v3589_v19  ;;  %v3593_v15 = vadd.f32 %v3592_v5, %v8460_v4 }
 0x999   :  { %3747 = vst [vmem:[%s8617_s11 + $0x38] sm:$0xff] %v3702_v49  ;;  %v3706_v30 = vadd.f32 %v3705_v52, %v8463_v23  ;;  %v3594_v24 = vpop.f32.mrf.mxu0 }
 0x99a   :  { %v3707_v11 = vpop.f32.mrf.mxu1  ;;  %3748 = vst [vmem:[%s8617_s11 + $0x40] sm:$0xff] %v3593_v15  ;;  %v3595_v25 = vadd.f32 %v3594_v24, %v8466_v51 }
 0x99b   :  { %3750 = vst [vmem:[%s8617_s11 + $0x50] sm:$0xff] %v3706_v30  ;;  %v3708_v38 = vadd.f32 %v3707_v11, %v8469_v26  ;;  %v3598_v35 = vpop.f32.mrf.mxu0 }
 0x99c   :  { %v3711_v41 = vpop.f32.mrf.mxu1  ;;  %3749 = vst [vmem:[%s8617_s11 + $0x48] sm:$0xff] %v3595_v25  ;;  %v3599_v45 = vadd.f32 %v3598_v35, %v8460_v4 }
 0x99d   :  { %3751 = vst [vmem:[%s8617_s11 + $0x58] sm:$0xff] %v3708_v38  ;;  %v3712_v57 = vadd.f32 %v3711_v41, %v8463_v23  ;;  %v3600_v47 = vpop.f32.mrf.mxu0 }
 0x99e   :  { %v3713_v44 = vpop.f32.mrf.mxu1  ;;  %3752 = vst [vmem:[%s8617_s11 + $0x60] sm:$0xff] %v3599_v45  ;;  %v3601_v29 = vadd.f32 %v3600_v47, %v8466_v51 }
 0x99f   :  { %3754 = vst [vmem:[%s8617_s11 + $0x70] sm:$0xff] %v3712_v57  ;;  %v3714_v18 = vadd.f32 %v3713_v44, %v8469_v26  ;;  %v3604_v20 = vpop.f32.mrf.mxu0 }
 0x9a0   :  { %v3717_v0 = vpop.f32.mrf.mxu1  ;;  %3753 = vst [vmem:[%s8617_s11 + $0x68] sm:$0xff] %v3601_v29  ;;  %v3605_v3 = vadd.f32 %v3604_v20, %v8460_v4 }
 0x9a1   :  { %3755 = vst [vmem:[%s8617_s11 + $0x78] sm:$0xff] %v3714_v18  ;;  %v3718_v6 = vadd.f32 %v3717_v0, %v8463_v23  ;;  %v3606_v12 = vpop.f32.mrf.mxu0 }
 0x9a2   :  { %v3719_v28 = vpop.f32.mrf.mxu1  ;;  %3756 = vst [vmem:[%s8617_s11 + $0x80] sm:$0xff] %v3605_v3  ;;  %v3607_v54 = vadd.f32 %v3606_v12, %v8466_v51 }
 0x9a3   :  { %3758 = vst [vmem:[%s8617_s11 + $0x90] sm:$0xff] %v3718_v6  ;;  %v3720_v7 = vadd.f32 %v3719_v28, %v8469_v26  ;;  %v3610_v50 = vpop.f32.mrf.mxu0 }
 0x9a4   :  { %v3723_v10 = vpop.f32.mrf.mxu1  ;;  %v4137_v46 = vpop.eup %4136  ;;  %3757 = vst [vmem:[%s8617_s11 + $0x88] sm:$0xff] %v3607_v54  ;;  %v3611_v33 = vadd.f32 %v3610_v50, %v8460_v4 }
 0x9a5   :  { %3759 = vst [vmem:[%s8617_s11 + $0x98] sm:$0xff] %v3720_v7  ;;  %v3724_v14 = vadd.f32 %v3723_v10, %v8463_v23  ;;  %v3612_v32 = vpop.f32.mrf.mxu0  ;;  %v3421_v39 = vmul.f32 %v4137_v46, %v4135_v31 }
 0x9a6   :  { %v3725_v56 = vpop.f32.mrf.mxu1  ;;  %3760 = vst [vmem:[%s8617_s11 + $0xa0] sm:$0xff] %v3611_v33  ;;  %v3613_v9 = vadd.f32 %v3612_v32, %v8466_v51 }
 0x9a7   :  { %3762 = vst [vmem:[%s8617_s11 + $0xb0] sm:$0xff] %v3724_v14  ;;  %v3726_v42 = vadd.f32 %v3725_v56, %v8469_v26  ;;  %v3616_v22 = vpop.f32.mrf.mxu0  ;;  %3869 = vst [vmem:[%s8618_s12 + $0x8] sm:$0xff] %v3421_v39  ;;  %3621 = vmatmul.mubr.f32.gmra.mxu0 %v3421_v39  ;;  %3734 = vmatmul.mubr.f32.gmra.mxu1 %v3421_v39 }
 0x9a8   :  { %v3729_v21 = vpop.f32.mrf.mxu1  ;;  %3761 = vst [vmem:[%s8617_s11 + $0xa8] sm:$0xff] %v3613_v9  ;;  %v3617_v37 = vadd.f32 %v3616_v22, %v8460_v4 }
 0x9a9   :  { %3763 = vst [vmem:[%s8617_s11 + $0xb8] sm:$0xff] %v3726_v42  ;;  %v3730_v48 = vadd.f32 %v3729_v21, %v8463_v23  ;;  %v3618_v55 = vpop.f32.mrf.mxu0 }
 0x9aa   :  { %v3731_v59 = vpop.f32.mrf.mxu1  ;;  %3764 = vst [vmem:[%s8617_s11 + $0xc0] sm:$0xff] %v3617_v37  ;;  %v3619_v40 = vadd.f32 %v3618_v55, %v8466_v51 }
 0x9ab   :  { %3766 = vst [vmem:[%s8617_s11 + $0xd0] sm:$0xff] %v3730_v48  ;;  %v3732_v63 = vadd.f32 %v3731_v59, %v8469_v26 }
 0x9ac   :  { %3765 = vst [vmem:[%s8617_s11 + $0xc8] sm:$0xff] %v3619_v40 }
 0x9ad   :  { %3767 = vst [vmem:[%s8617_s11 + $0xd8] sm:$0xff] %v3732_v63 }
 0xa67   :  { %v3622_v61 = vpop.f32.mrf.mxu0  ;;  %v3735_v2 = vpop.f32.mrf.mxu1 }
 0xa68   :  { %v3623_v34 = vadd.f32 %v3622_v61, %v8460_v4  ;;  %v3736_v27 = vadd.f32 %v3735_v2, %v8463_v23 }
 0xa69   :  { %v3624_v8 = vpop.f32.mrf.mxu0  ;;  %v3737_v1 = vpop.f32.mrf.mxu1 }
 0xa6a   :  { %3768 = vst [vmem:[%s8617_s11 + $0xe0] sm:$0xff] %v3623_v34  ;;  %3770 = vst [vmem:[%s8617_s11 + $0xf0] sm:$0xff] %v3736_v27  ;;  %v3625_v17 = vadd.f32 %v3624_v8, %v8466_v51  ;;  %v3738_v60 = vadd.f32 %v3737_v1, %v8469_v26 }
 0xa6c   :  { %3769 = vst [vmem:[%s8617_s11 + $0xe8] sm:$0xff] %v3625_v17  ;;  %3771 = vst [vmem:[%s8617_s11 + $0xf8] sm:$0xff] %v3738_v60 }
 0xa6d   :  { %3784 = vsyncpa [#allocation4], 1 }
 0xa6e   :  { %3785 = vsyncpa [#allocation8], 1 }
 0xa6f   :  { %3786 = vsyncpa [#allocation11], 1 }
 0xa70   :  { %3787 = vsyncpa [#allocation5], 1 }

</bundles_post_ra>
